<compile_context>
chip_gen: v5e
topology: v5e:2x2
jax: 0.10.0
libtpu: 0.0.40
codegen_flags: <defaults>
</compile_context>

<pallas_src>
import math

import jax
import jax.numpy as jnp
from jax.experimental import pallas as pl
from jax.experimental.pallas import tpu as pltpu

# ----------------------------- config (small) -------------------------------
B = 2            # batch
S = 8            # max_seq_length (src & tgt)
D_MODEL = 32     # dim_model
N_HEADS = 4      # num_heads
D_HEAD = D_MODEL // N_HEADS
D_FFN = 64       # dim_ffn
N_LAYERS = 2     # num_layers_per_stack (reduced from 6 for a small example)
SRC_VOCAB = 72
TGT_VOCAB = 64
V_PAD = 128      # final projection padded to a lane-dense 128 columns
EPS = 1e-5
NEG_INF = -1e9
MM_DTYPE = jnp.bfloat16   # matmul operand dtype (f32 accumulation); native on v6e/v7x


# --------------------------- in-kernel building blocks -----------------------
def _mm(a, b):
    """Matmul with bf16 operands and f32 accumulation (MXU-native on v6e/v7x)."""
    return jnp.dot(a.astype(MM_DTYPE), b.astype(MM_DTYPE),
                   preferred_element_type=jnp.float32)


def _ln_apply(x, p):
    mean = jnp.mean(x, axis=-1, keepdims=True)
    var = jnp.mean((x - mean) ** 2, axis=-1, keepdims=True)
    return (x - mean) * jax.lax.rsqrt(var + EPS) * p["g"] + p["b"]


def _attend(q, k, v, mask):
    """Scaled dot-product attention.  q/k/v: (S, D) with heads packed on lanes.
    mask: (S, S).  Softmax math stays in f32.
    Note: a fully-masked key row would silently softmax to uniform (no PAD tokens
    in this example, so it never triggers)."""
    scale = 1.0 / math.sqrt(D_HEAD)
    heads = []
    for h in range(N_HEADS):
        lo, hi = h * D_HEAD, (h + 1) * D_HEAD
        qh, kh, vh = q[:, lo:hi], k[:, lo:hi], v[:, lo:hi]
        # (S, Dh) x (S, Dh) contracting on Dh -> (S, S)  (no explicit transpose)
        s = jax.lax.dot_general(qh, kh, (((1,), (1,)), ((), ())),
                                preferred_element_type=jnp.float32) * scale
        s = jnp.where(mask > 0.0, s, jnp.float32(NEG_INF))
        mx = jnp.max(s, axis=-1, keepdims=True)
        p = jnp.exp(s - mx)
        p = p / jnp.sum(p, axis=-1, keepdims=True)
        heads.append(jnp.dot(p, vh, preferred_element_type=jnp.float32))
    return jnp.concatenate(heads, axis=-1)          # (S, D) — heads re-packed on lanes


def _self_attention(h, p, mask):
    qkv = _mm(h, p["wqkv"]) + p["bqkv"]              # fused QKV: (S, 3D)
    q = qkv[:, :D_MODEL]
    k = qkv[:, D_MODEL:2 * D_MODEL]
    v = qkv[:, 2 * D_MODEL:]
    return _mm(_attend(q, k, v, mask), p["wo"]) + p["bo"]


def _cross_attention(h, memory, p, mask):
    q = _mm(h, p["wq"]) + p["bq"]                    # (S, D)   from decoder state
    kv = _mm(memory, p["wkv"]) + p["bkv"]            # fused KV: (S, 2D) from memory
    k = kv[:, :D_MODEL]
    v = kv[:, D_MODEL:]
    return _mm(_attend(q, k, v, mask), p["wo"]) + p["bo"]


def _ffn_apply(x, p):
    hidden = jnp.maximum(_mm(x, p["w1"]) + p["b1"], 0.0)
    return _mm(hidden, p["w2"]) + p["b2"]


# ------------------------------ fused forward --------------------------------
def transformer_forward(kp, src, src_mask, tgt, tgt_mask, pe):
    """Full encoder-decoder forward.  Embedding gather + PE stay in plain JAX;
    everything else is one fused Pallas kernel over a batch-parallel grid."""
    scale = math.sqrt(D_MODEL)
    x_src = (kp["src_emb"][src] * scale + pe[None, :S, :]).reshape(B * S, D_MODEL)
    x_tgt = (kp["tgt_emb"][tgt] * scale + pe[None, :S, :]).reshape(B * S, D_MODEL)

    leaves, treedef = jax.tree_util.tree_flatten(kp["stack"])
    n_leaves = len(leaves)

    def kernel(*refs):
        xs_ref, xt_ref, sm_ref, tm_ref = refs[:4]
        w_vals = [r[...] for r in refs[4:4 + n_leaves]]
        o_ref = refs[4 + n_leaves]
        wp = jax.tree_util.tree_unflatten(treedef, w_vals)

        src_m = sm_ref[0]                            # (S, S)
        tgt_m = tm_ref[0]                            # (S, S)

        # ---------------- encoder stack (pre-LN blocks + final LN) ------------
        x = xs_ref[...]                              # (S, D)
        for lp in wp["enc_layers"]:
            h = _ln_apply(x, lp["ln1"])
            x = x + _self_attention(h, lp["self_attn"], src_m)
            h = _ln_apply(x, lp["ln2"])
            x = x + _ffn_apply(h, lp["ffn"])
        memory = _ln_apply(x, wp["enc_final_ln"])

        # ---------------- decoder stack ---------------------------------------
        y = xt_ref[...]                              # (S, D)
        for lp in wp["dec_layers"]:
            h = _ln_apply(y, lp["ln1"])
            y = y + _self_attention(h, lp["self_attn"], tgt_m)
            h = _ln_apply(y, lp["ln2"])
            y = y + _cross_attention(h, memory, lp["src_attn"], src_m)
            h = _ln_apply(y, lp["ln3"])
            y = y + _ffn_apply(h, lp["ffn"])
        dec = _ln_apply(y, wp["dec_final_ln"])

        # ------------- final linear + log-softmax (lane-dense 128-wide) -------
        logits = _mm(dec, wp["final"]["w"]) + wp["final"]["b"]   # pad cols -> -1e9
        mx = jnp.max(logits, axis=-1, keepdims=True)
        z = logits - mx
        lse = jnp.log(jnp.sum(jnp.exp(z), axis=-1, keepdims=True))
        o_ref[...] = z - lse

    weight_specs = [pl.BlockSpec(leaf.shape, lambda b: (0, 0)) for leaf in leaves]

    out = pl.pallas_call(
        kernel,
        out_shape=jax.ShapeDtypeStruct((B * S, V_PAD), jnp.float32),
        grid=(B,),
        in_specs=[
            pl.BlockSpec((S, D_MODEL), lambda b: (b, 0)),     # src activations
            pl.BlockSpec((S, D_MODEL), lambda b: (b, 0)),     # tgt activations
            pl.BlockSpec((1, S, S), lambda b: (b, 0, 0)),     # src mask
            pl.BlockSpec((1, S, S), lambda b: (b, 0, 0)),     # tgt mask
        ] + weight_specs,
        out_specs=pl.BlockSpec((S, V_PAD), lambda b: (b, 0)),
        compiler_params=pltpu.CompilerParams(
            dimension_semantics=("parallel",)),               # 2-TC shard on v7x
    )(x_src, x_tgt, src_mask, tgt_mask, *leaves)

    return out.reshape(B, S, V_PAD)[:, :, :TGT_VOCAB]


# -------------------------------- parameters --------------------------------
def xavier_uniform(key, shape):
    fan_in, fan_out = shape
    limit = math.sqrt(6.0 / (fan_in + fan_out))
    return jax.random.uniform(key, shape, jnp.float32, -limit, limit)


def init_params(key):
    """Same parameterization as the reference module (separate q/k/v/o linears,
    Xavier-uniform weights, zero biases)."""
    keys = iter(jax.random.split(key, 128))
    nk = lambda: next(keys)

    def linear_p(din, dout):
        return {"w": xavier_uniform(nk(), (din, dout)),
                "b": jnp.zeros((dout,), jnp.float32)}

    def ln_p():
        return {"g": jnp.ones((D_MODEL,), jnp.float32),
                "b": jnp.zeros((D_MODEL,), jnp.float32)}

    def attn_p():
        return {"q": linear_p(D_MODEL, D_MODEL),
                "k": linear_p(D_MODEL, D_MODEL),
                "v": linear_p(D_MODEL, D_MODEL),
                "o": linear_p(D_MODEL, D_MODEL)}

    def ffn_p():
        return {"w1": xavier_uniform(nk(), (D_MODEL, D_FFN)),
                "b1": jnp.zeros((D_FFN,), jnp.float32),
                "w2": xavier_uniform(nk(), (D_FFN, D_MODEL)),
                "b2": jnp.zeros((D_MODEL,), jnp.float32)}

    return {
        "src_emb": xavier_uniform(nk(), (SRC_VOCAB, D_MODEL)),
        "tgt_emb": xavier_uniform(nk(), (TGT_VOCAB, D_MODEL)),
        "enc_layers": [
            {"ln1": ln_p(), "self_attn": attn_p(), "ln2": ln_p(), "ffn": ffn_p()}
            for _ in range(N_LAYERS)
        ],
        "enc_final_ln": ln_p(),
        "dec_layers": [
            {"ln1": ln_p(), "self_attn": attn_p(),
             "ln2": ln_p(), "src_attn": attn_p(),
             "ln3": ln_p(), "ffn": ffn_p()}
            for _ in range(N_LAYERS)
        ],
        "dec_final_ln": ln_p(),
        "final_w": xavier_uniform(nk(), (D_MODEL, TGT_VOCAB)),
        "final_b": jnp.zeros((TGT_VOCAB,), jnp.float32),
    }


def prepare_params(params):
    """Repack parameters for the fused kernel: concat QKV (KV for cross-attn),
    make every leaf 2-D, and pad the final head to a lane-dense 128 columns
    (pad bias -1e9 so padded logits drop out of the log-softmax)."""
    vec = lambda b: b.reshape(1, -1)

    def ln(p):
        return {"g": vec(p["g"]), "b": vec(p["b"])}

    def self_attn(p):
        return {"wqkv": jnp.concatenate([p["q"]["w"], p["k"]["w"], p["v"]["w"]], axis=1),
                "bqkv": vec(jnp.concatenate([p["q"]["b"], p["k"]["b"], p["v"]["b"]])),
                "wo": p["o"]["w"], "bo": vec(p["o"]["b"])}

    def cross_attn(p):
        return {"wq": p["q"]["w"], "bq": vec(p["q"]["b"]),
                "wkv": jnp.concatenate([p["k"]["w"], p["v"]["w"]], axis=1),
                "bkv": vec(jnp.concatenate([p["k"]["b"], p["v"]["b"]])),
                "wo": p["o"]["w"], "bo": vec(p["o"]["b"])}

    def ffn(p):
        return {"w1": p["w1"], "b1": vec(p["b1"]), "w2": p["w2"], "b2": vec(p["b2"])}

    w_final = jnp.zeros((D_MODEL, V_PAD), jnp.float32).at[:, :TGT_VOCAB].set(params["final_w"])
    b_final = jnp.full((1, V_PAD), NEG_INF, jnp.float32).at[0, :TGT_VOCAB].set(params["final_b"])

    stack = {
        "enc_layers": [
            {"ln1": ln(lp["ln1"]), "self_attn": self_attn(lp["self_attn"]),
             "ln2": ln(lp["ln2"]), "ffn": ffn(lp["ffn"])}
            for lp in params["enc_layers"]
        ],
        "enc_final_ln": ln(params["enc_final_ln"]),
        "dec_layers": [
            {"ln1": ln(lp["ln1"]), "self_attn": self_attn(lp["self_attn"]),
             "ln2": ln(lp["ln2"]), "src_attn": cross_attn(lp["src_attn"]),
             "ln3": ln(lp["ln3"]), "ffn": ffn(lp["ffn"])}
            for lp in params["dec_layers"]
        ],
        "dec_final_ln": ln(params["dec_final_ln"]),
        "final": {"w": w_final, "b": b_final},
    }
    return {"src_emb": params["src_emb"], "tgt_emb": params["tgt_emb"], "stack": stack}


def positional_encoding(max_len, d_model):
    pos = jnp.arange(max_len, dtype=jnp.float32)[:, None]
    div = jnp.exp(
        jnp.arange(0, d_model, 2, dtype=jnp.float32) * (-math.log(10000.0) / d_model)
    )
    pe = jnp.zeros((max_len, d_model), jnp.float32)
    pe = pe.at[:, 0::2].set(jnp.sin(pos * div))
    pe = pe.at[:, 1::2].set(jnp.cos(pos * div))
    return pe


# ----------------------------------- main ------------------------------------
if __name__ == "__main__":
    key = jax.random.PRNGKey(0)
    kp_key, ks, kt = jax.random.split(key, 3)

    params = prepare_params(init_params(kp_key))
    pe = positional_encoding(1000, D_MODEL)   # max_length table, sliced to S

    # deterministic example inputs (token ids in [1, vocab) => no padding here)
    src = jax.random.randint(ks, (B, S), 1, SRC_VOCAB, dtype=jnp.int32)
    tgt = jax.random.randint(kt, (B, S), 1, TGT_VOCAB, dtype=jnp.int32)

    PAD = 0
    src_pad = (src != PAD).astype(jnp.float32)                    # (B, S)
    tgt_pad = (tgt != PAD).astype(jnp.float32)                    # (B, S)
    src_mask = jnp.broadcast_to(src_pad[:, None, :], (B, S, S))   # (B, Sq, Sk)
    causal = jnp.tril(jnp.ones((S, S), jnp.float32))
    tgt_mask = tgt_pad[:, None, :] * causal[None, :, :]           # (B, Sq, Sk)

    fwd = jax.jit(transformer_forward)
    y_hat = fwd(params, src, src_mask, tgt, tgt_mask, pe)
    y_hat = jax.block_until_ready(y_hat)

    assert y_hat.shape == (B, S, TGT_VOCAB)
    assert bool(jnp.all(jnp.isfinite(y_hat)))
    # log-softmax rows must sum (in prob space) to ~1
    row_sums = jnp.sum(jnp.exp(y_hat), axis=-1)
    assert bool(jnp.all(jnp.abs(row_sums - 1.0) < 1e-4))

    print("KERNEL_OK")
</pallas_src>

<mosaic_0001>
module attributes {stable_mosaic.version = 11 : i64} {
  func.func @kernel(%arg0: i32, %arg1: memref<8x32xf32, #tpu.memory_space<vmem>>, %arg2: memref<8x32xf32, #tpu.memory_space<vmem>>, %arg3: memref<1x8x8xf32, #tpu.memory_space<vmem>>, %arg4: memref<1x8x8xf32, #tpu.memory_space<vmem>>, %arg5: memref<1x32xf32, #tpu.memory_space<vmem>>, %arg6: memref<1x32xf32, #tpu.memory_space<vmem>>, %arg7: memref<1x64xf32, #tpu.memory_space<vmem>>, %arg8: memref<1x32xf32, #tpu.memory_space<vmem>>, %arg9: memref<32x64xf32, #tpu.memory_space<vmem>>, %arg10: memref<64x32xf32, #tpu.memory_space<vmem>>, %arg11: memref<1x32xf32, #tpu.memory_space<vmem>>, %arg12: memref<1x32xf32, #tpu.memory_space<vmem>>, %arg13: memref<1x32xf32, #tpu.memory_space<vmem>>, %arg14: memref<1x32xf32, #tpu.memory_space<vmem>>, %arg15: memref<1x32xf32, #tpu.memory_space<vmem>>, %arg16: memref<1x32xf32, #tpu.memory_space<vmem>>, %arg17: memref<1x32xf32, #tpu.memory_space<vmem>>, %arg18: memref<1x96xf32, #tpu.memory_space<vmem>>, %arg19: memref<32x32xf32, #tpu.memory_space<vmem>>, %arg20: memref<32x96xf32, #tpu.memory_space<vmem>>, %arg21: memref<1x64xf32, #tpu.memory_space<vmem>>, %arg22: memref<1x32xf32, #tpu.memory_space<vmem>>, %arg23: memref<1x32xf32, #tpu.memory_space<vmem>>, %arg24: memref<32x64xf32, #tpu.memory_space<vmem>>, %arg25: memref<32x32xf32, #tpu.memory_space<vmem>>, %arg26: memref<32x32xf32, #tpu.memory_space<vmem>>, %arg27: memref<1x64xf32, #tpu.memory_space<vmem>>, %arg28: memref<1x32xf32, #tpu.memory_space<vmem>>, %arg29: memref<32x64xf32, #tpu.memory_space<vmem>>, %arg30: memref<64x32xf32, #tpu.memory_space<vmem>>, %arg31: memref<1x32xf32, #tpu.memory_space<vmem>>, %arg32: memref<1x32xf32, #tpu.memory_space<vmem>>, %arg33: memref<1x32xf32, #tpu.memory_space<vmem>>, %arg34: memref<1x32xf32, #tpu.memory_space<vmem>>, %arg35: memref<1x32xf32, #tpu.memory_space<vmem>>, %arg36: memref<1x32xf32, #tpu.memory_space<vmem>>, %arg37: memref<1x32xf32, #tpu.memory_space<vmem>>, %arg38: memref<1x96xf32, #tpu.memory_space<vmem>>, %arg39: memref<32x32xf32, #tpu.memory_space<vmem>>, %arg40: memref<32x96xf32, #tpu.memory_space<vmem>>, %arg41: memref<1x64xf32, #tpu.memory_space<vmem>>, %arg42: memref<1x32xf32, #tpu.memory_space<vmem>>, %arg43: memref<1x32xf32, #tpu.memory_space<vmem>>, %arg44: memref<32x64xf32, #tpu.memory_space<vmem>>, %arg45: memref<32x32xf32, #tpu.memory_space<vmem>>, %arg46: memref<32x32xf32, #tpu.memory_space<vmem>>, %arg47: memref<1x32xf32, #tpu.memory_space<vmem>>, %arg48: memref<1x32xf32, #tpu.memory_space<vmem>>, %arg49: memref<1x64xf32, #tpu.memory_space<vmem>>, %arg50: memref<1x32xf32, #tpu.memory_space<vmem>>, %arg51: memref<32x64xf32, #tpu.memory_space<vmem>>, %arg52: memref<64x32xf32, #tpu.memory_space<vmem>>, %arg53: memref<1x32xf32, #tpu.memory_space<vmem>>, %arg54: memref<1x32xf32, #tpu.memory_space<vmem>>, %arg55: memref<1x32xf32, #tpu.memory_space<vmem>>, %arg56: memref<1x32xf32, #tpu.memory_space<vmem>>, %arg57: memref<1x32xf32, #tpu.memory_space<vmem>>, %arg58: memref<1x96xf32, #tpu.memory_space<vmem>>, %arg59: memref<32x32xf32, #tpu.memory_space<vmem>>, %arg60: memref<32x96xf32, #tpu.memory_space<vmem>>, %arg61: memref<1x64xf32, #tpu.memory_space<vmem>>, %arg62: memref<1x32xf32, #tpu.memory_space<vmem>>, %arg63: memref<32x64xf32, #tpu.memory_space<vmem>>, %arg64: memref<64x32xf32, #tpu.memory_space<vmem>>, %arg65: memref<1x32xf32, #tpu.memory_space<vmem>>, %arg66: memref<1x32xf32, #tpu.memory_space<vmem>>, %arg67: memref<1x32xf32, #tpu.memory_space<vmem>>, %arg68: memref<1x32xf32, #tpu.memory_space<vmem>>, %arg69: memref<1x32xf32, #tpu.memory_space<vmem>>, %arg70: memref<1x96xf32, #tpu.memory_space<vmem>>, %arg71: memref<32x32xf32, #tpu.memory_space<vmem>>, %arg72: memref<32x96xf32, #tpu.memory_space<vmem>>, %arg73: memref<1x128xf32, #tpu.memory_space<vmem>>, %arg74: memref<32x128xf32, #tpu.memory_space<vmem>>, %arg75: memref<8x128xf32, #tpu.memory_space<vmem>>) attributes {dimension_semantics = [#tpu.dimension_semantics<parallel>], iteration_bounds = array<i64: 2>, scalar_prefetch = 0 : i64, scratch_operands = 0 : i64, tpu.core_type = #tpu.core_type<tc>, window_params = [{transform_indices = @transform_0, window_bounds = array<i64: 8, 32>}, {transform_indices = @transform_1, window_bounds = array<i64: 8, 32>}, {transform_indices = @transform_2, window_bounds = array<i64: 1, 8, 8>}, {transform_indices = @transform_3, window_bounds = array<i64: 1, 8, 8>}, {pipeline_mode = #tpu.pipeline_mode<synchronous>, transform_indices = @transform_4, window_bounds = array<i64: 1, 32>}, {pipeline_mode = #tpu.pipeline_mode<synchronous>, transform_indices = @transform_5, window_bounds = array<i64: 1, 32>}, {pipeline_mode = #tpu.pipeline_mode<synchronous>, transform_indices = @transform_6, window_bounds = array<i64: 1, 64>}, {pipeline_mode = #tpu.pipeline_mode<synchronous>, transform_indices = @transform_7, window_bounds = array<i64: 1, 32>}, {pipeline_mode = #tpu.pipeline_mode<synchronous>, transform_indices = @transform_8, window_bounds = array<i64: 32, 64>}, {pipeline_mode = #tpu.pipeline_mode<synchronous>, transform_indices = @transform_9, window_bounds = array<i64: 64, 32>}, {pipeline_mode = #tpu.pipeline_mode<synchronous>, transform_indices = @transform_10, window_bounds = array<i64: 1, 32>}, {pipeline_mode = #tpu.pipeline_mode<synchronous>, transform_indices = @transform_11, window_bounds = array<i64: 1, 32>}, {pipeline_mode = #tpu.pipeline_mode<synchronous>, transform_indices = @transform_12, window_bounds = array<i64: 1, 32>}, {pipeline_mode = #tpu.pipeline_mode<synchronous>, transform_indices = @transform_13, window_bounds = array<i64: 1, 32>}, {pipeline_mode = #tpu.pipeline_mode<synchronous>, transform_indices = @transform_14, window_bounds = array<i64: 1, 32>}, {pipeline_mode = #tpu.pipeline_mode<synchronous>, transform_indices = @transform_15, window_bounds = array<i64: 1, 32>}, {pipeline_mode = #tpu.pipeline_mode<synchronous>, transform_indices = @transform_16, window_bounds = array<i64: 1, 32>}, {pipeline_mode = #tpu.pipeline_mode<synchronous>, transform_indices = @transform_17, window_bounds = array<i64: 1, 96>}, {pipeline_mode = #tpu.pipeline_mode<synchronous>, transform_indices = @transform_18, window_bounds = array<i64: 32, 32>}, {pipeline_mode = #tpu.pipeline_mode<synchronous>, transform_indices = @transform_19, window_bounds = array<i64: 32, 96>}, {pipeline_mode = #tpu.pipeline_mode<synchronous>, transform_indices = @transform_20, window_bounds = array<i64: 1, 64>}, {pipeline_mode = #tpu.pipeline_mode<synchronous>, transform_indices = @transform_21, window_bounds = array<i64: 1, 32>}, {pipeline_mode = #tpu.pipeline_mode<synchronous>, transform_indices = @transform_22, window_bounds = array<i64: 1, 32>}, {pipeline_mode = #tpu.pipeline_mode<synchronous>, transform_indices = @transform_23, window_bounds = array<i64: 32, 64>}, {pipeline_mode = #tpu.pipeline_mode<synchronous>, transform_indices = @transform_24, window_bounds = array<i64: 32, 32>}, {pipeline_mode = #tpu.pipeline_mode<synchronous>, transform_indices = @transform_25, window_bounds = array<i64: 32, 32>}, {pipeline_mode = #tpu.pipeline_mode<synchronous>, transform_indices = @transform_26, window_bounds = array<i64: 1, 64>}, {pipeline_mode = #tpu.pipeline_mode<synchronous>, transform_indices = @transform_27, window_bounds = array<i64: 1, 32>}, {pipeline_mode = #tpu.pipeline_mode<synchronous>, transform_indices = @transform_28, window_bounds = array<i64: 32, 64>}, {pipeline_mode = #tpu.pipeline_mode<synchronous>, transform_indices = @transform_29, window_bounds = array<i64: 64, 32>}, {pipeline_mode = #tpu.pipeline_mode<synchronous>, transform_indices = @transform_30, window_bounds = array<i64: 1, 32>}, {pipeline_mode = #tpu.pipeline_mode<synchronous>, transform_indices = @transform_31, window_bounds = array<i64: 1, 32>}, {pipeline_mode = #tpu.pipeline_mode<synchronous>, transform_indices = @transform_32, window_bounds = array<i64: 1, 32>}, {pipeline_mode = #tpu.pipeline_mode<synchronous>, transform_indices = @transform_33, window_bounds = array<i64: 1, 32>}, {pipeline_mode = #tpu.pipeline_mode<synchronous>, transform_indices = @transform_34, window_bounds = array<i64: 1, 32>}, {pipeline_mode = #tpu.pipeline_mode<synchronous>, transform_indices = @transform_35, window_bounds = array<i64: 1, 32>}, {pipeline_mode = #tpu.pipeline_mode<synchronous>, transform_indices = @transform_36, window_bounds = array<i64: 1, 32>}, {pipeline_mode = #tpu.pipeline_mode<synchronous>, transform_indices = @transform_37, window_bounds = array<i64: 1, 96>}, {pipeline_mode = #tpu.pipeline_mode<synchronous>, transform_indices = @transform_38, window_bounds = array<i64: 32, 32>}, {pipeline_mode = #tpu.pipeline_mode<synchronous>, transform_indices = @transform_39, window_bounds = array<i64: 32, 96>}, {pipeline_mode = #tpu.pipeline_mode<synchronous>, transform_indices = @transform_40, window_bounds = array<i64: 1, 64>}, {pipeline_mode = #tpu.pipeline_mode<synchronous>, transform_indices = @transform_41, window_bounds = array<i64: 1, 32>}, {pipeline_mode = #tpu.pipeline_mode<synchronous>, transform_indices = @transform_42, window_bounds = array<i64: 1, 32>}, {pipeline_mode = #tpu.pipeline_mode<synchronous>, transform_indices = @transform_43, window_bounds = array<i64: 32, 64>}, {pipeline_mode = #tpu.pipeline_mode<synchronous>, transform_indices = @transform_44, window_bounds = array<i64: 32, 32>}, {pipeline_mode = #tpu.pipeline_mode<synchronous>, transform_indices = @transform_45, window_bounds = array<i64: 32, 32>}, {pipeline_mode = #tpu.pipeline_mode<synchronous>, transform_indices = @transform_46, window_bounds = array<i64: 1, 32>}, {pipeline_mode = #tpu.pipeline_mode<synchronous>, transform_indices = @transform_47, window_bounds = array<i64: 1, 32>}, {pipeline_mode = #tpu.pipeline_mode<synchronous>, transform_indices = @transform_48, window_bounds = array<i64: 1, 64>}, {pipeline_mode = #tpu.pipeline_mode<synchronous>, transform_indices = @transform_49, window_bounds = array<i64: 1, 32>}, {pipeline_mode = #tpu.pipeline_mode<synchronous>, transform_indices = @transform_50, window_bounds = array<i64: 32, 64>}, {pipeline_mode = #tpu.pipeline_mode<synchronous>, transform_indices = @transform_51, window_bounds = array<i64: 64, 32>}, {pipeline_mode = #tpu.pipeline_mode<synchronous>, transform_indices = @transform_52, window_bounds = array<i64: 1, 32>}, {pipeline_mode = #tpu.pipeline_mode<synchronous>, transform_indices = @transform_53, window_bounds = array<i64: 1, 32>}, {pipeline_mode = #tpu.pipeline_mode<synchronous>, transform_indices = @transform_54, window_bounds = array<i64: 1, 32>}, {pipeline_mode = #tpu.pipeline_mode<synchronous>, transform_indices = @transform_55, window_bounds = array<i64: 1, 32>}, {pipeline_mode = #tpu.pipeline_mode<synchronous>, transform_indices = @transform_56, window_bounds = array<i64: 1, 32>}, {pipeline_mode = #tpu.pipeline_mode<synchronous>, transform_indices = @transform_57, window_bounds = array<i64: 1, 96>}, {pipeline_mode = #tpu.pipeline_mode<synchronous>, transform_indices = @transform_58, window_bounds = array<i64: 32, 32>}, {pipeline_mode = #tpu.pipeline_mode<synchronous>, transform_indices = @transform_59, window_bounds = array<i64: 32, 96>}, {pipeline_mode = #tpu.pipeline_mode<synchronous>, transform_indices = @transform_60, window_bounds = array<i64: 1, 64>}, {pipeline_mode = #tpu.pipeline_mode<synchronous>, transform_indices = @transform_61, window_bounds = array<i64: 1, 32>}, {pipeline_mode = #tpu.pipeline_mode<synchronous>, transform_indices = @transform_62, window_bounds = array<i64: 32, 64>}, {pipeline_mode = #tpu.pipeline_mode<synchronous>, transform_indices = @transform_63, window_bounds = array<i64: 64, 32>}, {pipeline_mode = #tpu.pipeline_mode<synchronous>, transform_indices = @transform_64, window_bounds = array<i64: 1, 32>}, {pipeline_mode = #tpu.pipeline_mode<synchronous>, transform_indices = @transform_65, window_bounds = array<i64: 1, 32>}, {pipeline_mode = #tpu.pipeline_mode<synchronous>, transform_indices = @transform_66, window_bounds = array<i64: 1, 32>}, {pipeline_mode = #tpu.pipeline_mode<synchronous>, transform_indices = @transform_67, window_bounds = array<i64: 1, 32>}, {pipeline_mode = #tpu.pipeline_mode<synchronous>, transform_indices = @transform_68, window_bounds = array<i64: 1, 32>}, {pipeline_mode = #tpu.pipeline_mode<synchronous>, transform_indices = @transform_69, window_bounds = array<i64: 1, 96>}, {pipeline_mode = #tpu.pipeline_mode<synchronous>, transform_indices = @transform_70, window_bounds = array<i64: 32, 32>}, {pipeline_mode = #tpu.pipeline_mode<synchronous>, transform_indices = @transform_71, window_bounds = array<i64: 32, 96>}, {pipeline_mode = #tpu.pipeline_mode<synchronous>, transform_indices = @transform_72, window_bounds = array<i64: 1, 128>}, {pipeline_mode = #tpu.pipeline_mode<synchronous>, transform_indices = @transform_73, window_bounds = array<i64: 32, 128>}, {transform_indices = @transform_74, window_bounds = array<i64: 8, 128>}]} {
    %c0 = arith.constant 0 : index
    %c0_0 = arith.constant 0 : index
    %0 = vector.load %arg5[%c0, %c0_0] : memref<1x32xf32, #tpu.memory_space<vmem>>, vector<1x32xf32>
    %c0_1 = arith.constant 0 : index
    %c0_2 = arith.constant 0 : index
    %1 = vector.load %arg6[%c0_1, %c0_2] : memref<1x32xf32, #tpu.memory_space<vmem>>, vector<1x32xf32>
    %c0_3 = arith.constant 0 : index
    %c0_4 = arith.constant 0 : index
    %2 = vector.load %arg7[%c0_3, %c0_4] : memref<1x64xf32, #tpu.memory_space<vmem>>, vector<1x64xf32>
    %c0_5 = arith.constant 0 : index
    %c0_6 = arith.constant 0 : index
    %3 = vector.load %arg8[%c0_5, %c0_6] : memref<1x32xf32, #tpu.memory_space<vmem>>, vector<1x32xf32>
    %c0_7 = arith.constant 0 : index
    %c0_8 = arith.constant 0 : index
    %4 = vector.load %arg9[%c0_7, %c0_8] : memref<32x64xf32, #tpu.memory_space<vmem>>, vector<32x64xf32>
    %c0_9 = arith.constant 0 : index
    %c0_10 = arith.constant 0 : index
    %5 = vector.load %arg10[%c0_9, %c0_10] : memref<64x32xf32, #tpu.memory_space<vmem>>, vector<64x32xf32>
    %c0_11 = arith.constant 0 : index
    %c0_12 = arith.constant 0 : index
    %6 = vector.load %arg11[%c0_11, %c0_12] : memref<1x32xf32, #tpu.memory_space<vmem>>, vector<1x32xf32>
    %c0_13 = arith.constant 0 : index
    %c0_14 = arith.constant 0 : index
    %7 = vector.load %arg12[%c0_13, %c0_14] : memref<1x32xf32, #tpu.memory_space<vmem>>, vector<1x32xf32>
    %c0_15 = arith.constant 0 : index
    %c0_16 = arith.constant 0 : index
    %8 = vector.load %arg13[%c0_15, %c0_16] : memref<1x32xf32, #tpu.memory_space<vmem>>, vector<1x32xf32>
    %c0_17 = arith.constant 0 : index
    %c0_18 = arith.constant 0 : index
    %9 = vector.load %arg14[%c0_17, %c0_18] : memref<1x32xf32, #tpu.memory_space<vmem>>, vector<1x32xf32>
    %c0_19 = arith.constant 0 : index
    %c0_20 = arith.constant 0 : index
    %10 = vector.load %arg15[%c0_19, %c0_20] : memref<1x32xf32, #tpu.memory_space<vmem>>, vector<1x32xf32>
    %c0_21 = arith.constant 0 : index
    %c0_22 = arith.constant 0 : index
    %11 = vector.load %arg16[%c0_21, %c0_22] : memref<1x32xf32, #tpu.memory_space<vmem>>, vector<1x32xf32>
    %c0_23 = arith.constant 0 : index
    %c0_24 = arith.constant 0 : index
    %12 = vector.load %arg17[%c0_23, %c0_24] : memref<1x32xf32, #tpu.memory_space<vmem>>, vector<1x32xf32>
    %c0_25 = arith.constant 0 : index
    %c0_26 = arith.constant 0 : index
    %13 = vector.load %arg18[%c0_25, %c0_26] : memref<1x96xf32, #tpu.memory_space<vmem>>, vector<1x96xf32>
    %c0_27 = arith.constant 0 : index
    %c0_28 = arith.constant 0 : index
    %14 = vector.load %arg19[%c0_27, %c0_28] : memref<32x32xf32, #tpu.memory_space<vmem>>, vector<32x32xf32>
    %c0_29 = arith.constant 0 : index
    %c0_30 = arith.constant 0 : index
    %15 = vector.load %arg20[%c0_29, %c0_30] : memref<32x96xf32, #tpu.memory_space<vmem>>, vector<32x96xf32>
    %c0_31 = arith.constant 0 : index
    %c0_32 = arith.constant 0 : index
    %16 = vector.load %arg21[%c0_31, %c0_32] : memref<1x64xf32, #tpu.memory_space<vmem>>, vector<1x64xf32>
    %c0_33 = arith.constant 0 : index
    %c0_34 = arith.constant 0 : index
    %17 = vector.load %arg22[%c0_33, %c0_34] : memref<1x32xf32, #tpu.memory_space<vmem>>, vector<1x32xf32>
    %c0_35 = arith.constant 0 : index
    %c0_36 = arith.constant 0 : index
    %18 = vector.load %arg23[%c0_35, %c0_36] : memref<1x32xf32, #tpu.memory_space<vmem>>, vector<1x32xf32>
    %c0_37 = arith.constant 0 : index
    %c0_38 = arith.constant 0 : index
    %19 = vector.load %arg24[%c0_37, %c0_38] : memref<32x64xf32, #tpu.memory_space<vmem>>, vector<32x64xf32>
    %c0_39 = arith.constant 0 : index
    %c0_40 = arith.constant 0 : index
    %20 = vector.load %arg25[%c0_39, %c0_40] : memref<32x32xf32, #tpu.memory_space<vmem>>, vector<32x32xf32>
    %c0_41 = arith.constant 0 : index
    %c0_42 = arith.constant 0 : index
    %21 = vector.load %arg26[%c0_41, %c0_42] : memref<32x32xf32, #tpu.memory_space<vmem>>, vector<32x32xf32>
    %c0_43 = arith.constant 0 : index
    %c0_44 = arith.constant 0 : index
    %22 = vector.load %arg27[%c0_43, %c0_44] : memref<1x64xf32, #tpu.memory_space<vmem>>, vector<1x64xf32>
    %c0_45 = arith.constant 0 : index
    %c0_46 = arith.constant 0 : index
    %23 = vector.load %arg28[%c0_45, %c0_46] : memref<1x32xf32, #tpu.memory_space<vmem>>, vector<1x32xf32>
    %c0_47 = arith.constant 0 : index
    %c0_48 = arith.constant 0 : index
    %24 = vector.load %arg29[%c0_47, %c0_48] : memref<32x64xf32, #tpu.memory_space<vmem>>, vector<32x64xf32>
    %c0_49 = arith.constant 0 : index
    %c0_50 = arith.constant 0 : index
    %25 = vector.load %arg30[%c0_49, %c0_50] : memref<64x32xf32, #tpu.memory_space<vmem>>, vector<64x32xf32>
    %c0_51 = arith.constant 0 : index
    %c0_52 = arith.constant 0 : index
    %26 = vector.load %arg31[%c0_51, %c0_52] : memref<1x32xf32, #tpu.memory_space<vmem>>, vector<1x32xf32>
    %c0_53 = arith.constant 0 : index
    %c0_54 = arith.constant 0 : index
    %27 = vector.load %arg32[%c0_53, %c0_54] : memref<1x32xf32, #tpu.memory_space<vmem>>, vector<1x32xf32>
    %c0_55 = arith.constant 0 : index
    %c0_56 = arith.constant 0 : index
    %28 = vector.load %arg33[%c0_55, %c0_56] : memref<1x32xf32, #tpu.memory_space<vmem>>, vector<1x32xf32>
    %c0_57 = arith.constant 0 : index
    %c0_58 = arith.constant 0 : index
    %29 = vector.load %arg34[%c0_57, %c0_58] : memref<1x32xf32, #tpu.memory_space<vmem>>, vector<1x32xf32>
    %c0_59 = arith.constant 0 : index
    %c0_60 = arith.constant 0 : index
    %30 = vector.load %arg35[%c0_59, %c0_60] : memref<1x32xf32, #tpu.memory_space<vmem>>, vector<1x32xf32>
    %c0_61 = arith.constant 0 : index
    %c0_62 = arith.constant 0 : index
    %31 = vector.load %arg36[%c0_61, %c0_62] : memref<1x32xf32, #tpu.memory_space<vmem>>, vector<1x32xf32>
    %c0_63 = arith.constant 0 : index
    %c0_64 = arith.constant 0 : index
    %32 = vector.load %arg37[%c0_63, %c0_64] : memref<1x32xf32, #tpu.memory_space<vmem>>, vector<1x32xf32>
    %c0_65 = arith.constant 0 : index
    %c0_66 = arith.constant 0 : index
    %33 = vector.load %arg38[%c0_65, %c0_66] : memref<1x96xf32, #tpu.memory_space<vmem>>, vector<1x96xf32>
    %c0_67 = arith.constant 0 : index
    %c0_68 = arith.constant 0 : index
    %34 = vector.load %arg39[%c0_67, %c0_68] : memref<32x32xf32, #tpu.memory_space<vmem>>, vector<32x32xf32>
    %c0_69 = arith.constant 0 : index
    %c0_70 = arith.constant 0 : index
    %35 = vector.load %arg40[%c0_69, %c0_70] : memref<32x96xf32, #tpu.memory_space<vmem>>, vector<32x96xf32>
    %c0_71 = arith.constant 0 : index
    %c0_72 = arith.constant 0 : index
    %36 = vector.load %arg41[%c0_71, %c0_72] : memref<1x64xf32, #tpu.memory_space<vmem>>, vector<1x64xf32>
    %c0_73 = arith.constant 0 : index
    %c0_74 = arith.constant 0 : index
    %37 = vector.load %arg42[%c0_73, %c0_74] : memref<1x32xf32, #tpu.memory_space<vmem>>, vector<1x32xf32>
    %c0_75 = arith.constant 0 : index
    %c0_76 = arith.constant 0 : index
    %38 = vector.load %arg43[%c0_75, %c0_76] : memref<1x32xf32, #tpu.memory_space<vmem>>, vector<1x32xf32>
    %c0_77 = arith.constant 0 : index
    %c0_78 = arith.constant 0 : index
    %39 = vector.load %arg44[%c0_77, %c0_78] : memref<32x64xf32, #tpu.memory_space<vmem>>, vector<32x64xf32>
    %c0_79 = arith.constant 0 : index
    %c0_80 = arith.constant 0 : index
    %40 = vector.load %arg45[%c0_79, %c0_80] : memref<32x32xf32, #tpu.memory_space<vmem>>, vector<32x32xf32>
    %c0_81 = arith.constant 0 : index
    %c0_82 = arith.constant 0 : index
    %41 = vector.load %arg46[%c0_81, %c0_82] : memref<32x32xf32, #tpu.memory_space<vmem>>, vector<32x32xf32>
    %c0_83 = arith.constant 0 : index
    %c0_84 = arith.constant 0 : index
    %42 = vector.load %arg47[%c0_83, %c0_84] : memref<1x32xf32, #tpu.memory_space<vmem>>, vector<1x32xf32>
    %c0_85 = arith.constant 0 : index
    %c0_86 = arith.constant 0 : index
    %43 = vector.load %arg48[%c0_85, %c0_86] : memref<1x32xf32, #tpu.memory_space<vmem>>, vector<1x32xf32>
    %c0_87 = arith.constant 0 : index
    %c0_88 = arith.constant 0 : index
    %44 = vector.load %arg49[%c0_87, %c0_88] : memref<1x64xf32, #tpu.memory_space<vmem>>, vector<1x64xf32>
    %c0_89 = arith.constant 0 : index
    %c0_90 = arith.constant 0 : index
    %45 = vector.load %arg50[%c0_89, %c0_90] : memref<1x32xf32, #tpu.memory_space<vmem>>, vector<1x32xf32>
    %c0_91 = arith.constant 0 : index
    %c0_92 = arith.constant 0 : index
    %46 = vector.load %arg51[%c0_91, %c0_92] : memref<32x64xf32, #tpu.memory_space<vmem>>, vector<32x64xf32>
    %c0_93 = arith.constant 0 : index
    %c0_94 = arith.constant 0 : index
    %47 = vector.load %arg52[%c0_93, %c0_94] : memref<64x32xf32, #tpu.memory_space<vmem>>, vector<64x32xf32>
    %c0_95 = arith.constant 0 : index
    %c0_96 = arith.constant 0 : index
    %48 = vector.load %arg53[%c0_95, %c0_96] : memref<1x32xf32, #tpu.memory_space<vmem>>, vector<1x32xf32>
    %c0_97 = arith.constant 0 : index
    %c0_98 = arith.constant 0 : index
    %49 = vector.load %arg54[%c0_97, %c0_98] : memref<1x32xf32, #tpu.memory_space<vmem>>, vector<1x32xf32>
    %c0_99 = arith.constant 0 : index
    %c0_100 = arith.constant 0 : index
    %50 = vector.load %arg55[%c0_99, %c0_100] : memref<1x32xf32, #tpu.memory_space<vmem>>, vector<1x32xf32>
    %c0_101 = arith.constant 0 : index
    %c0_102 = arith.constant 0 : index
    %51 = vector.load %arg56[%c0_101, %c0_102] : memref<1x32xf32, #tpu.memory_space<vmem>>, vector<1x32xf32>
    %c0_103 = arith.constant 0 : index
    %c0_104 = arith.constant 0 : index
    %52 = vector.load %arg57[%c0_103, %c0_104] : memref<1x32xf32, #tpu.memory_space<vmem>>, vector<1x32xf32>
    %c0_105 = arith.constant 0 : index
    %c0_106 = arith.constant 0 : index
    %53 = vector.load %arg58[%c0_105, %c0_106] : memref<1x96xf32, #tpu.memory_space<vmem>>, vector<1x96xf32>
    %c0_107 = arith.constant 0 : index
    %c0_108 = arith.constant 0 : index
    %54 = vector.load %arg59[%c0_107, %c0_108] : memref<32x32xf32, #tpu.memory_space<vmem>>, vector<32x32xf32>
    %c0_109 = arith.constant 0 : index
    %c0_110 = arith.constant 0 : index
    %55 = vector.load %arg60[%c0_109, %c0_110] : memref<32x96xf32, #tpu.memory_space<vmem>>, vector<32x96xf32>
    %c0_111 = arith.constant 0 : index
    %c0_112 = arith.constant 0 : index
    %56 = vector.load %arg61[%c0_111, %c0_112] : memref<1x64xf32, #tpu.memory_space<vmem>>, vector<1x64xf32>
    %c0_113 = arith.constant 0 : index
    %c0_114 = arith.constant 0 : index
    %57 = vector.load %arg62[%c0_113, %c0_114] : memref<1x32xf32, #tpu.memory_space<vmem>>, vector<1x32xf32>
    %c0_115 = arith.constant 0 : index
    %c0_116 = arith.constant 0 : index
    %58 = vector.load %arg63[%c0_115, %c0_116] : memref<32x64xf32, #tpu.memory_space<vmem>>, vector<32x64xf32>
    %c0_117 = arith.constant 0 : index
    %c0_118 = arith.constant 0 : index
    %59 = vector.load %arg64[%c0_117, %c0_118] : memref<64x32xf32, #tpu.memory_space<vmem>>, vector<64x32xf32>
    %c0_119 = arith.constant 0 : index
    %c0_120 = arith.constant 0 : index
    %60 = vector.load %arg65[%c0_119, %c0_120] : memref<1x32xf32, #tpu.memory_space<vmem>>, vector<1x32xf32>
    %c0_121 = arith.constant 0 : index
    %c0_122 = arith.constant 0 : index
    %61 = vector.load %arg66[%c0_121, %c0_122] : memref<1x32xf32, #tpu.memory_space<vmem>>, vector<1x32xf32>
    %c0_123 = arith.constant 0 : index
    %c0_124 = arith.constant 0 : index
    %62 = vector.load %arg67[%c0_123, %c0_124] : memref<1x32xf32, #tpu.memory_space<vmem>>, vector<1x32xf32>
    %c0_125 = arith.constant 0 : index
    %c0_126 = arith.constant 0 : index
    %63 = vector.load %arg68[%c0_125, %c0_126] : memref<1x32xf32, #tpu.memory_space<vmem>>, vector<1x32xf32>
    %c0_127 = arith.constant 0 : index
    %c0_128 = arith.constant 0 : index
    %64 = vector.load %arg69[%c0_127, %c0_128] : memref<1x32xf32, #tpu.memory_space<vmem>>, vector<1x32xf32>
    %c0_129 = arith.constant 0 : index
    %c0_130 = arith.constant 0 : index
    %65 = vector.load %arg70[%c0_129, %c0_130] : memref<1x96xf32, #tpu.memory_space<vmem>>, vector<1x96xf32>
    %c0_131 = arith.constant 0 : index
    %c0_132 = arith.constant 0 : index
    %66 = vector.load %arg71[%c0_131, %c0_132] : memref<32x32xf32, #tpu.memory_space<vmem>>, vector<32x32xf32>
    %c0_133 = arith.constant 0 : index
    %c0_134 = arith.constant 0 : index
    %67 = vector.load %arg72[%c0_133, %c0_134] : memref<32x96xf32, #tpu.memory_space<vmem>>, vector<32x96xf32>
    %c0_135 = arith.constant 0 : index
    %c0_136 = arith.constant 0 : index
    %68 = vector.load %arg73[%c0_135, %c0_136] : memref<1x128xf32, #tpu.memory_space<vmem>>, vector<1x128xf32>
    %c0_137 = arith.constant 0 : index
    %c0_138 = arith.constant 0 : index
    %69 = vector.load %arg74[%c0_137, %c0_138] : memref<32x128xf32, #tpu.memory_space<vmem>>, vector<32x128xf32>
    %c0_139 = arith.constant 0 : index
    %c0_140 = arith.constant 0 : index
    %c0_141 = arith.constant 0 : index
    %70 = vector.load %arg3[%c0_139, %c0_140, %c0_141] : memref<1x8x8xf32, #tpu.memory_space<vmem>>, vector<1x8x8xf32>
    %71 = vector.shape_cast %70 : vector<1x8x8xf32> to vector<8x8xf32>
    %c0_142 = arith.constant 0 : index
    %c0_143 = arith.constant 0 : index
    %c0_144 = arith.constant 0 : index
    %72 = vector.load %arg4[%c0_142, %c0_143, %c0_144] : memref<1x8x8xf32, #tpu.memory_space<vmem>>, vector<1x8x8xf32>
    %73 = vector.shape_cast %72 : vector<1x8x8xf32> to vector<8x8xf32>
    %c0_145 = arith.constant 0 : index
    %c0_146 = arith.constant 0 : index
    %74 = vector.load %arg1[%c0_145, %c0_146] : memref<8x32xf32, #tpu.memory_space<vmem>>, vector<8x32xf32>
    %cst = arith.constant dense<0.000000e+00> : vector<8xf32>
    %75 = vector.multi_reduction <add>, %74, %cst [1] : vector<8x32xf32> to vector<8xf32>
    %76 = vector.shape_cast %75 : vector<8xf32> to vector<8x1xf32>
    %cst_147 = arith.constant 3.200000e+01 : f32
    %77 = vector.broadcast %cst_147 : f32 to vector<8x1xf32>
    %78 = arith.divf %76, %77 : vector<8x1xf32>
    %79 = vector.broadcast %78 : vector<8x1xf32> to vector<8x32xf32>
    %80 = arith.subf %74, %79 : vector<8x32xf32>
    %81 = arith.mulf %80, %80 : vector<8x32xf32>
    %cst_148 = arith.constant dense<0.000000e+00> : vector<8xf32>
    %82 = vector.multi_reduction <add>, %81, %cst_148 [1] : vector<8x32xf32> to vector<8xf32>
    %83 = vector.shape_cast %82 : vector<8xf32> to vector<8x1xf32>
    %cst_149 = arith.constant 3.200000e+01 : f32
    %84 = vector.broadcast %cst_149 : f32 to vector<8x1xf32>
    %85 = arith.divf %83, %84 : vector<8x1xf32>
    %86 = vector.broadcast %78 : vector<8x1xf32> to vector<8x32xf32>
    %87 = arith.subf %74, %86 : vector<8x32xf32>
    %cst_150 = arith.constant 9.99999974E-6 : f32
    %88 = vector.broadcast %cst_150 : f32 to vector<8x1xf32>
    %89 = arith.addf %85, %88 : vector<8x1xf32>
    %90 = math.rsqrt %89 : vector<8x1xf32>
    %91 = vector.broadcast %90 : vector<8x1xf32> to vector<8x32xf32>
    %92 = arith.mulf %87, %91 : vector<8x32xf32>
    %93 = vector.broadcast %49 : vector<1x32xf32> to vector<8x32xf32>
    %94 = arith.mulf %92, %93 : vector<8x32xf32>
    %95 = vector.broadcast %48 : vector<1x32xf32> to vector<8x32xf32>
    %96 = arith.addf %94, %95 : vector<8x32xf32>
    %97 = arith.truncf %96 : vector<8x32xf32> to vector<8x32xbf16>
    %98 = arith.truncf %55 : vector<32x96xf32> to vector<32x96xbf16>
    %cst_151 = arith.constant dense<0.000000e+00> : vector<8x96xf32>
    %99 = tpu.matmul %97, %98, %cst_151 {dimension_numbers = #tpu.dot_dimension_numbers<[1], [0], [0], [1], [0, 0, 1, 1], [], []>} : vector<8x32xbf16>, vector<32x96xbf16>, vector<8x96xf32> -> vector<8x96xf32>
    %100 = vector.broadcast %53 : vector<1x96xf32> to vector<8x96xf32>
    %101 = arith.addf %99, %100 : vector<8x96xf32>
    %102 = vector.extract_strided_slice %101 {offsets = [0, 0], sizes = [8, 32], strides = [1, 1]} : vector<8x96xf32> to vector<8x32xf32>
    %103 = vector.extract_strided_slice %101 {offsets = [0, 32], sizes = [8, 32], strides = [1, 1]} : vector<8x96xf32> to vector<8x32xf32>
    %104 = vector.extract_strided_slice %101 {offsets = [0, 64], sizes = [8, 32], strides = [1, 1]} : vector<8x96xf32> to vector<8x32xf32>
    %105 = vector.extract_strided_slice %102 {offsets = [0, 0], sizes = [8, 8], strides = [1, 1]} : vector<8x32xf32> to vector<8x8xf32>
    %106 = vector.extract_strided_slice %103 {offsets = [0, 0], sizes = [8, 8], strides = [1, 1]} : vector<8x32xf32> to vector<8x8xf32>
    %107 = vector.extract_strided_slice %104 {offsets = [0, 0], sizes = [8, 8], strides = [1, 1]} : vector<8x32xf32> to vector<8x8xf32>
    %cst_152 = arith.constant dense<0.000000e+00> : vector<8x8xf32>
    %108 = tpu.matmul %105, %106, %cst_152 {dimension_numbers = #tpu.dot_dimension_numbers<[1], [1], [0], [0], [0, 0, 1, 0], [], []>} : vector<8x8xf32>, vector<8x8xf32>, vector<8x8xf32> -> vector<8x8xf32>
    %cst_153 = arith.constant 0.353553385 : f32
    %109 = vector.broadcast %cst_153 : f32 to vector<8x8xf32>
    %110 = arith.mulf %108, %109 : vector<8x8xf32>
    %cst_154 = arith.constant 0.000000e+00 : f32
    %111 = vector.broadcast %cst_154 : f32 to vector<8x8xf32>
    %112 = arith.cmpf ogt, %71, %111 : vector<8x8xf32>
    %cst_155 = arith.constant -1.000000e+09 : f32
    %113 = vector.broadcast %cst_155 : f32 to vector<8x8xf32>
    %114 = arith.select %112, %110, %113 : vector<8x8xi1>, vector<8x8xf32>
    %cst_156 = arith.constant dense<0xFF800000> : vector<8xf32>
    %115 = vector.multi_reduction <maximumf>, %114, %cst_156 [1] : vector<8x8xf32> to vector<8xf32>
    %116 = vector.shape_cast %115 : vector<8xf32> to vector<8x1xf32>
    %117 = vector.broadcast %116 : vector<8x1xf32> to vector<8x8xf32>
    %118 = arith.subf %114, %117 : vector<8x8xf32>
    %119 = math.exp %118 : vector<8x8xf32>
    %cst_157 = arith.constant dense<0.000000e+00> : vector<8xf32>
    %120 = vector.multi_reduction <add>, %119, %cst_157 [1] : vector<8x8xf32> to vector<8xf32>
    %121 = vector.shape_cast %120 : vector<8xf32> to vector<8x1xf32>
    %122 = vector.broadcast %121 : vector<8x1xf32> to vector<8x8xf32>
    %123 = arith.divf %119, %122 : vector<8x8xf32>
    %cst_158 = arith.constant dense<0.000000e+00> : vector<8x8xf32>
    %124 = tpu.matmul %123, %107, %cst_158 {dimension_numbers = #tpu.dot_dimension_numbers<[1], [0], [0], [1], [0, 0, 1, 1], [], []>} : vector<8x8xf32>, vector<8x8xf32>, vector<8x8xf32> -> vector<8x8xf32>
    %125 = vector.extract_strided_slice %102 {offsets = [0, 8], sizes = [8, 8], strides = [1, 1]} : vector<8x32xf32> to vector<8x8xf32>
    %126 = vector.extract_strided_slice %103 {offsets = [0, 8], sizes = [8, 8], strides = [1, 1]} : vector<8x32xf32> to vector<8x8xf32>
    %127 = vector.extract_strided_slice %104 {offsets = [0, 8], sizes = [8, 8], strides = [1, 1]} : vector<8x32xf32> to vector<8x8xf32>
    %cst_159 = arith.constant dense<0.000000e+00> : vector<8x8xf32>
    %128 = tpu.matmul %125, %126, %cst_159 {dimension_numbers = #tpu.dot_dimension_numbers<[1], [1], [0], [0], [0, 0, 1, 0], [], []>} : vector<8x8xf32>, vector<8x8xf32>, vector<8x8xf32> -> vector<8x8xf32>
    %cst_160 = arith.constant 0.353553385 : f32
    %129 = vector.broadcast %cst_160 : f32 to vector<8x8xf32>
    %130 = arith.mulf %128, %129 : vector<8x8xf32>
    %cst_161 = arith.constant 0.000000e+00 : f32
    %131 = vector.broadcast %cst_161 : f32 to vector<8x8xf32>
    %132 = arith.cmpf ogt, %71, %131 : vector<8x8xf32>
    %cst_162 = arith.constant -1.000000e+09 : f32
    %133 = vector.broadcast %cst_162 : f32 to vector<8x8xf32>
    %134 = arith.select %132, %130, %133 : vector<8x8xi1>, vector<8x8xf32>
    %cst_163 = arith.constant dense<0xFF800000> : vector<8xf32>
    %135 = vector.multi_reduction <maximumf>, %134, %cst_163 [1] : vector<8x8xf32> to vector<8xf32>
    %136 = vector.shape_cast %135 : vector<8xf32> to vector<8x1xf32>
    %137 = vector.broadcast %136 : vector<8x1xf32> to vector<8x8xf32>
    %138 = arith.subf %134, %137 : vector<8x8xf32>
    %139 = math.exp %138 : vector<8x8xf32>
    %cst_164 = arith.constant dense<0.000000e+00> : vector<8xf32>
    %140 = vector.multi_reduction <add>, %139, %cst_164 [1] : vector<8x8xf32> to vector<8xf32>
    %141 = vector.shape_cast %140 : vector<8xf32> to vector<8x1xf32>
    %142 = vector.broadcast %141 : vector<8x1xf32> to vector<8x8xf32>
    %143 = arith.divf %139, %142 : vector<8x8xf32>
    %cst_165 = arith.constant dense<0.000000e+00> : vector<8x8xf32>
    %144 = tpu.matmul %143, %127, %cst_165 {dimension_numbers = #tpu.dot_dimension_numbers<[1], [0], [0], [1], [0, 0, 1, 1], [], []>} : vector<8x8xf32>, vector<8x8xf32>, vector<8x8xf32> -> vector<8x8xf32>
    %145 = vector.extract_strided_slice %102 {offsets = [0, 16], sizes = [8, 8], strides = [1, 1]} : vector<8x32xf32> to vector<8x8xf32>
    %146 = vector.extract_strided_slice %103 {offsets = [0, 16], sizes = [8, 8], strides = [1, 1]} : vector<8x32xf32> to vector<8x8xf32>
    %147 = vector.extract_strided_slice %104 {offsets = [0, 16], sizes = [8, 8], strides = [1, 1]} : vector<8x32xf32> to vector<8x8xf32>
    %cst_166 = arith.constant dense<0.000000e+00> : vector<8x8xf32>
    %148 = tpu.matmul %145, %146, %cst_166 {dimension_numbers = #tpu.dot_dimension_numbers<[1], [1], [0], [0], [0, 0, 1, 0], [], []>} : vector<8x8xf32>, vector<8x8xf32>, vector<8x8xf32> -> vector<8x8xf32>
    %cst_167 = arith.constant 0.353553385 : f32
    %149 = vector.broadcast %cst_167 : f32 to vector<8x8xf32>
    %150 = arith.mulf %148, %149 : vector<8x8xf32>
    %cst_168 = arith.constant 0.000000e+00 : f32
    %151 = vector.broadcast %cst_168 : f32 to vector<8x8xf32>
    %152 = arith.cmpf ogt, %71, %151 : vector<8x8xf32>
    %cst_169 = arith.constant -1.000000e+09 : f32
    %153 = vector.broadcast %cst_169 : f32 to vector<8x8xf32>
    %154 = arith.select %152, %150, %153 : vector<8x8xi1>, vector<8x8xf32>
    %cst_170 = arith.constant dense<0xFF800000> : vector<8xf32>
    %155 = vector.multi_reduction <maximumf>, %154, %cst_170 [1] : vector<8x8xf32> to vector<8xf32>
    %156 = vector.shape_cast %155 : vector<8xf32> to vector<8x1xf32>
    %157 = vector.broadcast %156 : vector<8x1xf32> to vector<8x8xf32>
    %158 = arith.subf %154, %157 : vector<8x8xf32>
    %159 = math.exp %158 : vector<8x8xf32>
    %cst_171 = arith.constant dense<0.000000e+00> : vector<8xf32>
    %160 = vector.multi_reduction <add>, %159, %cst_171 [1] : vector<8x8xf32> to vector<8xf32>
    %161 = vector.shape_cast %160 : vector<8xf32> to vector<8x1xf32>
    %162 = vector.broadcast %161 : vector<8x1xf32> to vector<8x8xf32>
    %163 = arith.divf %159, %162 : vector<8x8xf32>
    %cst_172 = arith.constant dense<0.000000e+00> : vector<8x8xf32>
    %164 = tpu.matmul %163, %147, %cst_172 {dimension_numbers = #tpu.dot_dimension_numbers<[1], [0], [0], [1], [0, 0, 1, 1], [], []>} : vector<8x8xf32>, vector<8x8xf32>, vector<8x8xf32> -> vector<8x8xf32>
    %165 = vector.extract_strided_slice %102 {offsets = [0, 24], sizes = [8, 8], strides = [1, 1]} : vector<8x32xf32> to vector<8x8xf32>
    %166 = vector.extract_strided_slice %103 {offsets = [0, 24], sizes = [8, 8], strides = [1, 1]} : vector<8x32xf32> to vector<8x8xf32>
    %167 = vector.extract_strided_slice %104 {offsets = [0, 24], sizes = [8, 8], strides = [1, 1]} : vector<8x32xf32> to vector<8x8xf32>
    %cst_173 = arith.constant dense<0.000000e+00> : vector<8x8xf32>
    %168 = tpu.matmul %165, %166, %cst_173 {dimension_numbers = #tpu.dot_dimension_numbers<[1], [1], [0], [0], [0, 0, 1, 0], [], []>} : vector<8x8xf32>, vector<8x8xf32>, vector<8x8xf32> -> vector<8x8xf32>
    %cst_174 = arith.constant 0.353553385 : f32
    %169 = vector.broadcast %cst_174 : f32 to vector<8x8xf32>
    %170 = arith.mulf %168, %169 : vector<8x8xf32>
    %cst_175 = arith.constant 0.000000e+00 : f32
    %171 = vector.broadcast %cst_175 : f32 to vector<8x8xf32>
    %172 = arith.cmpf ogt, %71, %171 : vector<8x8xf32>
    %cst_176 = arith.constant -1.000000e+09 : f32
    %173 = vector.broadcast %cst_176 : f32 to vector<8x8xf32>
    %174 = arith.select %172, %170, %173 : vector<8x8xi1>, vector<8x8xf32>
    %cst_177 = arith.constant dense<0xFF800000> : vector<8xf32>
    %175 = vector.multi_reduction <maximumf>, %174, %cst_177 [1] : vector<8x8xf32> to vector<8xf32>
    %176 = vector.shape_cast %175 : vector<8xf32> to vector<8x1xf32>
    %177 = vector.broadcast %176 : vector<8x1xf32> to vector<8x8xf32>
    %178 = arith.subf %174, %177 : vector<8x8xf32>
    %179 = math.exp %178 : vector<8x8xf32>
    %cst_178 = arith.constant dense<0.000000e+00> : vector<8xf32>
    %180 = vector.multi_reduction <add>, %179, %cst_178 [1] : vector<8x8xf32> to vector<8xf32>
    %181 = vector.shape_cast %180 : vector<8xf32> to vector<8x1xf32>
    %182 = vector.broadcast %181 : vector<8x1xf32> to vector<8x8xf32>
    %183 = arith.divf %179, %182 : vector<8x8xf32>
    %cst_179 = arith.constant dense<0.000000e+00> : vector<8x8xf32>
    %184 = tpu.matmul %183, %167, %cst_179 {dimension_numbers = #tpu.dot_dimension_numbers<[1], [0], [0], [1], [0, 0, 1, 1], [], []>} : vector<8x8xf32>, vector<8x8xf32>, vector<8x8xf32> -> vector<8x8xf32>
    %185 = tpu.concatenate %124, %144, %164, %184 in 1 : vector<8x8xf32>, vector<8x8xf32>, vector<8x8xf32>, vector<8x8xf32> -> vector<8x32xf32>
    %186 = arith.truncf %185 : vector<8x32xf32> to vector<8x32xbf16>
    %187 = arith.truncf %54 : vector<32x32xf32> to vector<32x32xbf16>
    %cst_180 = arith.constant dense<0.000000e+00> : vector<8x32xf32>
    %188 = tpu.matmul %186, %187, %cst_180 {dimension_numbers = #tpu.dot_dimension_numbers<[1], [0], [0], [1], [0, 0, 1, 1], [], []>} : vector<8x32xbf16>, vector<32x32xbf16>, vector<8x32xf32> -> vector<8x32xf32>
    %189 = vector.broadcast %52 : vector<1x32xf32> to vector<8x32xf32>
    %190 = arith.addf %188, %189 : vector<8x32xf32>
    %191 = arith.addf %74, %190 : vector<8x32xf32>
    %cst_181 = arith.constant dense<0.000000e+00> : vector<8xf32>
    %192 = vector.multi_reduction <add>, %191, %cst_181 [1] : vector<8x32xf32> to vector<8xf32>
    %193 = vector.shape_cast %192 : vector<8xf32> to vector<8x1xf32>
    %cst_182 = arith.constant 3.200000e+01 : f32
    %194 = vector.broadcast %cst_182 : f32 to vector<8x1xf32>
    %195 = arith.divf %193, %194 : vector<8x1xf32>
    %196 = vector.broadcast %195 : vector<8x1xf32> to vector<8x32xf32>
    %197 = arith.subf %191, %196 : vector<8x32xf32>
    %198 = arith.mulf %197, %197 : vector<8x32xf32>
    %cst_183 = arith.constant dense<0.000000e+00> : vector<8xf32>
    %199 = vector.multi_reduction <add>, %198, %cst_183 [1] : vector<8x32xf32> to vector<8xf32>
    %200 = vector.shape_cast %199 : vector<8xf32> to vector<8x1xf32>
    %cst_184 = arith.constant 3.200000e+01 : f32
    %201 = vector.broadcast %cst_184 : f32 to vector<8x1xf32>
    %202 = arith.divf %200, %201 : vector<8x1xf32>
    %203 = vector.broadcast %195 : vector<8x1xf32> to vector<8x32xf32>
    %204 = arith.subf %191, %203 : vector<8x32xf32>
    %cst_185 = arith.constant 9.99999974E-6 : f32
    %205 = vector.broadcast %cst_185 : f32 to vector<8x1xf32>
    %206 = arith.addf %202, %205 : vector<8x1xf32>
    %207 = math.rsqrt %206 : vector<8x1xf32>
    %208 = vector.broadcast %207 : vector<8x1xf32> to vector<8x32xf32>
    %209 = arith.mulf %204, %208 : vector<8x32xf32>
    %210 = vector.broadcast %51 : vector<1x32xf32> to vector<8x32xf32>
    %211 = arith.mulf %209, %210 : vector<8x32xf32>
    %212 = vector.broadcast %50 : vector<1x32xf32> to vector<8x32xf32>
    %213 = arith.addf %211, %212 : vector<8x32xf32>
    %214 = arith.truncf %213 : vector<8x32xf32> to vector<8x32xbf16>
    %215 = arith.truncf %46 : vector<32x64xf32> to vector<32x64xbf16>
    %cst_186 = arith.constant dense<0.000000e+00> : vector<8x64xf32>
    %216 = tpu.matmul %214, %215, %cst_186 {dimension_numbers = #tpu.dot_dimension_numbers<[1], [0], [0], [1], [0, 0, 1, 1], [], []>} : vector<8x32xbf16>, vector<32x64xbf16>, vector<8x64xf32> -> vector<8x64xf32>
    %217 = vector.broadcast %44 : vector<1x64xf32> to vector<8x64xf32>
    %218 = arith.addf %216, %217 : vector<8x64xf32>
    %cst_187 = arith.constant 0.000000e+00 : f32
    %219 = vector.broadcast %cst_187 : f32 to vector<8x64xf32>
    %220 = arith.maximumf %218, %219 : vector<8x64xf32>
    %221 = arith.truncf %220 : vector<8x64xf32> to vector<8x64xbf16>
    %222 = arith.truncf %47 : vector<64x32xf32> to vector<64x32xbf16>
    %cst_188 = arith.constant dense<0.000000e+00> : vector<8x32xf32>
    %223 = tpu.matmul %221, %222, %cst_188 {dimension_numbers = #tpu.dot_dimension_numbers<[1], [0], [0], [1], [0, 0, 1, 1], [], []>} : vector<8x64xbf16>, vector<64x32xbf16>, vector<8x32xf32> -> vector<8x32xf32>
    %224 = vector.broadcast %45 : vector<1x32xf32> to vector<8x32xf32>
    %225 = arith.addf %223, %224 : vector<8x32xf32>
    %226 = arith.addf %191, %225 : vector<8x32xf32>
    %cst_189 = arith.constant dense<0.000000e+00> : vector<8xf32>
    %227 = vector.multi_reduction <add>, %226, %cst_189 [1] : vector<8x32xf32> to vector<8xf32>
    %228 = vector.shape_cast %227 : vector<8xf32> to vector<8x1xf32>
    %cst_190 = arith.constant 3.200000e+01 : f32
    %229 = vector.broadcast %cst_190 : f32 to vector<8x1xf32>
    %230 = arith.divf %228, %229 : vector<8x1xf32>
    %231 = vector.broadcast %230 : vector<8x1xf32> to vector<8x32xf32>
    %232 = arith.subf %226, %231 : vector<8x32xf32>
    %233 = arith.mulf %232, %232 : vector<8x32xf32>
    %cst_191 = arith.constant dense<0.000000e+00> : vector<8xf32>
    %234 = vector.multi_reduction <add>, %233, %cst_191 [1] : vector<8x32xf32> to vector<8xf32>
    %235 = vector.shape_cast %234 : vector<8xf32> to vector<8x1xf32>
    %cst_192 = arith.constant 3.200000e+01 : f32
    %236 = vector.broadcast %cst_192 : f32 to vector<8x1xf32>
    %237 = arith.divf %235, %236 : vector<8x1xf32>
    %238 = vector.broadcast %230 : vector<8x1xf32> to vector<8x32xf32>
    %239 = arith.subf %226, %238 : vector<8x32xf32>
    %cst_193 = arith.constant 9.99999974E-6 : f32
    %240 = vector.broadcast %cst_193 : f32 to vector<8x1xf32>
    %241 = arith.addf %237, %240 : vector<8x1xf32>
    %242 = math.rsqrt %241 : vector<8x1xf32>
    %243 = vector.broadcast %242 : vector<8x1xf32> to vector<8x32xf32>
    %244 = arith.mulf %239, %243 : vector<8x32xf32>
    %245 = vector.broadcast %61 : vector<1x32xf32> to vector<8x32xf32>
    %246 = arith.mulf %244, %245 : vector<8x32xf32>
    %247 = vector.broadcast %60 : vector<1x32xf32> to vector<8x32xf32>
    %248 = arith.addf %246, %247 : vector<8x32xf32>
    %249 = arith.truncf %248 : vector<8x32xf32> to vector<8x32xbf16>
    %250 = arith.truncf %67 : vector<32x96xf32> to vector<32x96xbf16>
    %cst_194 = arith.constant dense<0.000000e+00> : vector<8x96xf32>
    %251 = tpu.matmul %249, %250, %cst_194 {dimension_numbers = #tpu.dot_dimension_numbers<[1], [0], [0], [1], [0, 0, 1, 1], [], []>} : vector<8x32xbf16>, vector<32x96xbf16>, vector<8x96xf32> -> vector<8x96xf32>
    %252 = vector.broadcast %65 : vector<1x96xf32> to vector<8x96xf32>
    %253 = arith.addf %251, %252 : vector<8x96xf32>
    %254 = vector.extract_strided_slice %253 {offsets = [0, 0], sizes = [8, 32], strides = [1, 1]} : vector<8x96xf32> to vector<8x32xf32>
    %255 = vector.extract_strided_slice %253 {offsets = [0, 32], sizes = [8, 32], strides = [1, 1]} : vector<8x96xf32> to vector<8x32xf32>
    %256 = vector.extract_strided_slice %253 {offsets = [0, 64], sizes = [8, 32], strides = [1, 1]} : vector<8x96xf32> to vector<8x32xf32>
    %257 = vector.extract_strided_slice %254 {offsets = [0, 0], sizes = [8, 8], strides = [1, 1]} : vector<8x32xf32> to vector<8x8xf32>
    %258 = vector.extract_strided_slice %255 {offsets = [0, 0], sizes = [8, 8], strides = [1, 1]} : vector<8x32xf32> to vector<8x8xf32>
    %259 = vector.extract_strided_slice %256 {offsets = [0, 0], sizes = [8, 8], strides = [1, 1]} : vector<8x32xf32> to vector<8x8xf32>
    %cst_195 = arith.constant dense<0.000000e+00> : vector<8x8xf32>
    %260 = tpu.matmul %257, %258, %cst_195 {dimension_numbers = #tpu.dot_dimension_numbers<[1], [1], [0], [0], [0, 0, 1, 0], [], []>} : vector<8x8xf32>, vector<8x8xf32>, vector<8x8xf32> -> vector<8x8xf32>
    %cst_196 = arith.constant 0.353553385 : f32
    %261 = vector.broadcast %cst_196 : f32 to vector<8x8xf32>
    %262 = arith.mulf %260, %261 : vector<8x8xf32>
    %cst_197 = arith.constant 0.000000e+00 : f32
    %263 = vector.broadcast %cst_197 : f32 to vector<8x8xf32>
    %264 = arith.cmpf ogt, %71, %263 : vector<8x8xf32>
    %cst_198 = arith.constant -1.000000e+09 : f32
    %265 = vector.broadcast %cst_198 : f32 to vector<8x8xf32>
    %266 = arith.select %264, %262, %265 : vector<8x8xi1>, vector<8x8xf32>
    %cst_199 = arith.constant dense<0xFF800000> : vector<8xf32>
    %267 = vector.multi_reduction <maximumf>, %266, %cst_199 [1] : vector<8x8xf32> to vector<8xf32>
    %268 = vector.shape_cast %267 : vector<8xf32> to vector<8x1xf32>
    %269 = vector.broadcast %268 : vector<8x1xf32> to vector<8x8xf32>
    %270 = arith.subf %266, %269 : vector<8x8xf32>
    %271 = math.exp %270 : vector<8x8xf32>
    %cst_200 = arith.constant dense<0.000000e+00> : vector<8xf32>
    %272 = vector.multi_reduction <add>, %271, %cst_200 [1] : vector<8x8xf32> to vector<8xf32>
    %273 = vector.shape_cast %272 : vector<8xf32> to vector<8x1xf32>
    %274 = vector.broadcast %273 : vector<8x1xf32> to vector<8x8xf32>
    %275 = arith.divf %271, %274 : vector<8x8xf32>
    %cst_201 = arith.constant dense<0.000000e+00> : vector<8x8xf32>
    %276 = tpu.matmul %275, %259, %cst_201 {dimension_numbers = #tpu.dot_dimension_numbers<[1], [0], [0], [1], [0, 0, 1, 1], [], []>} : vector<8x8xf32>, vector<8x8xf32>, vector<8x8xf32> -> vector<8x8xf32>
    %277 = vector.extract_strided_slice %254 {offsets = [0, 8], sizes = [8, 8], strides = [1, 1]} : vector<8x32xf32> to vector<8x8xf32>
    %278 = vector.extract_strided_slice %255 {offsets = [0, 8], sizes = [8, 8], strides = [1, 1]} : vector<8x32xf32> to vector<8x8xf32>
    %279 = vector.extract_strided_slice %256 {offsets = [0, 8], sizes = [8, 8], strides = [1, 1]} : vector<8x32xf32> to vector<8x8xf32>
    %cst_202 = arith.constant dense<0.000000e+00> : vector<8x8xf32>
    %280 = tpu.matmul %277, %278, %cst_202 {dimension_numbers = #tpu.dot_dimension_numbers<[1], [1], [0], [0], [0, 0, 1, 0], [], []>} : vector<8x8xf32>, vector<8x8xf32>, vector<8x8xf32> -> vector<8x8xf32>
    %cst_203 = arith.constant 0.353553385 : f32
    %281 = vector.broadcast %cst_203 : f32 to vector<8x8xf32>
    %282 = arith.mulf %280, %281 : vector<8x8xf32>
    %cst_204 = arith.constant 0.000000e+00 : f32
    %283 = vector.broadcast %cst_204 : f32 to vector<8x8xf32>
    %284 = arith.cmpf ogt, %71, %283 : vector<8x8xf32>
    %cst_205 = arith.constant -1.000000e+09 : f32
    %285 = vector.broadcast %cst_205 : f32 to vector<8x8xf32>
    %286 = arith.select %284, %282, %285 : vector<8x8xi1>, vector<8x8xf32>
    %cst_206 = arith.constant dense<0xFF800000> : vector<8xf32>
    %287 = vector.multi_reduction <maximumf>, %286, %cst_206 [1] : vector<8x8xf32> to vector<8xf32>
    %288 = vector.shape_cast %287 : vector<8xf32> to vector<8x1xf32>
    %289 = vector.broadcast %288 : vector<8x1xf32> to vector<8x8xf32>
    %290 = arith.subf %286, %289 : vector<8x8xf32>
    %291 = math.exp %290 : vector<8x8xf32>
    %cst_207 = arith.constant dense<0.000000e+00> : vector<8xf32>
    %292 = vector.multi_reduction <add>, %291, %cst_207 [1] : vector<8x8xf32> to vector<8xf32>
    %293 = vector.shape_cast %292 : vector<8xf32> to vector<8x1xf32>
    %294 = vector.broadcast %293 : vector<8x1xf32> to vector<8x8xf32>
    %295 = arith.divf %291, %294 : vector<8x8xf32>
    %cst_208 = arith.constant dense<0.000000e+00> : vector<8x8xf32>
    %296 = tpu.matmul %295, %279, %cst_208 {dimension_numbers = #tpu.dot_dimension_numbers<[1], [0], [0], [1], [0, 0, 1, 1], [], []>} : vector<8x8xf32>, vector<8x8xf32>, vector<8x8xf32> -> vector<8x8xf32>
    %297 = vector.extract_strided_slice %254 {offsets = [0, 16], sizes = [8, 8], strides = [1, 1]} : vector<8x32xf32> to vector<8x8xf32>
    %298 = vector.extract_strided_slice %255 {offsets = [0, 16], sizes = [8, 8], strides = [1, 1]} : vector<8x32xf32> to vector<8x8xf32>
    %299 = vector.extract_strided_slice %256 {offsets = [0, 16], sizes = [8, 8], strides = [1, 1]} : vector<8x32xf32> to vector<8x8xf32>
    %cst_209 = arith.constant dense<0.000000e+00> : vector<8x8xf32>
    %300 = tpu.matmul %297, %298, %cst_209 {dimension_numbers = #tpu.dot_dimension_numbers<[1], [1], [0], [0], [0, 0, 1, 0], [], []>} : vector<8x8xf32>, vector<8x8xf32>, vector<8x8xf32> -> vector<8x8xf32>
    %cst_210 = arith.constant 0.353553385 : f32
    %301 = vector.broadcast %cst_210 : f32 to vector<8x8xf32>
    %302 = arith.mulf %300, %301 : vector<8x8xf32>
    %cst_211 = arith.constant 0.000000e+00 : f32
    %303 = vector.broadcast %cst_211 : f32 to vector<8x8xf32>
    %304 = arith.cmpf ogt, %71, %303 : vector<8x8xf32>
    %cst_212 = arith.constant -1.000000e+09 : f32
    %305 = vector.broadcast %cst_212 : f32 to vector<8x8xf32>
    %306 = arith.select %304, %302, %305 : vector<8x8xi1>, vector<8x8xf32>
    %cst_213 = arith.constant dense<0xFF800000> : vector<8xf32>
    %307 = vector.multi_reduction <maximumf>, %306, %cst_213 [1] : vector<8x8xf32> to vector<8xf32>
    %308 = vector.shape_cast %307 : vector<8xf32> to vector<8x1xf32>
    %309 = vector.broadcast %308 : vector<8x1xf32> to vector<8x8xf32>
    %310 = arith.subf %306, %309 : vector<8x8xf32>
    %311 = math.exp %310 : vector<8x8xf32>
    %cst_214 = arith.constant dense<0.000000e+00> : vector<8xf32>
    %312 = vector.multi_reduction <add>, %311, %cst_214 [1] : vector<8x8xf32> to vector<8xf32>
    %313 = vector.shape_cast %312 : vector<8xf32> to vector<8x1xf32>
    %314 = vector.broadcast %313 : vector<8x1xf32> to vector<8x8xf32>
    %315 = arith.divf %311, %314 : vector<8x8xf32>
    %cst_215 = arith.constant dense<0.000000e+00> : vector<8x8xf32>
    %316 = tpu.matmul %315, %299, %cst_215 {dimension_numbers = #tpu.dot_dimension_numbers<[1], [0], [0], [1], [0, 0, 1, 1], [], []>} : vector<8x8xf32>, vector<8x8xf32>, vector<8x8xf32> -> vector<8x8xf32>
    %317 = vector.extract_strided_slice %254 {offsets = [0, 24], sizes = [8, 8], strides = [1, 1]} : vector<8x32xf32> to vector<8x8xf32>
    %318 = vector.extract_strided_slice %255 {offsets = [0, 24], sizes = [8, 8], strides = [1, 1]} : vector<8x32xf32> to vector<8x8xf32>
    %319 = vector.extract_strided_slice %256 {offsets = [0, 24], sizes = [8, 8], strides = [1, 1]} : vector<8x32xf32> to vector<8x8xf32>
    %cst_216 = arith.constant dense<0.000000e+00> : vector<8x8xf32>
    %320 = tpu.matmul %317, %318, %cst_216 {dimension_numbers = #tpu.dot_dimension_numbers<[1], [1], [0], [0], [0, 0, 1, 0], [], []>} : vector<8x8xf32>, vector<8x8xf32>, vector<8x8xf32> -> vector<8x8xf32>
    %cst_217 = arith.constant 0.353553385 : f32
    %321 = vector.broadcast %cst_217 : f32 to vector<8x8xf32>
    %322 = arith.mulf %320, %321 : vector<8x8xf32>
    %cst_218 = arith.constant 0.000000e+00 : f32
    %323 = vector.broadcast %cst_218 : f32 to vector<8x8xf32>
    %324 = arith.cmpf ogt, %71, %323 : vector<8x8xf32>
    %cst_219 = arith.constant -1.000000e+09 : f32
    %325 = vector.broadcast %cst_219 : f32 to vector<8x8xf32>
    %326 = arith.select %324, %322, %325 : vector<8x8xi1>, vector<8x8xf32>
    %cst_220 = arith.constant dense<0xFF800000> : vector<8xf32>
    %327 = vector.multi_reduction <maximumf>, %326, %cst_220 [1] : vector<8x8xf32> to vector<8xf32>
    %328 = vector.shape_cast %327 : vector<8xf32> to vector<8x1xf32>
    %329 = vector.broadcast %328 : vector<8x1xf32> to vector<8x8xf32>
    %330 = arith.subf %326, %329 : vector<8x8xf32>
    %331 = math.exp %330 : vector<8x8xf32>
    %cst_221 = arith.constant dense<0.000000e+00> : vector<8xf32>
    %332 = vector.multi_reduction <add>, %331, %cst_221 [1] : vector<8x8xf32> to vector<8xf32>
    %333 = vector.shape_cast %332 : vector<8xf32> to vector<8x1xf32>
    %334 = vector.broadcast %333 : vector<8x1xf32> to vector<8x8xf32>
    %335 = arith.divf %331, %334 : vector<8x8xf32>
    %cst_222 = arith.constant dense<0.000000e+00> : vector<8x8xf32>
    %336 = tpu.matmul %335, %319, %cst_222 {dimension_numbers = #tpu.dot_dimension_numbers<[1], [0], [0], [1], [0, 0, 1, 1], [], []>} : vector<8x8xf32>, vector<8x8xf32>, vector<8x8xf32> -> vector<8x8xf32>
    %337 = tpu.concatenate %276, %296, %316, %336 in 1 : vector<8x8xf32>, vector<8x8xf32>, vector<8x8xf32>, vector<8x8xf32> -> vector<8x32xf32>
    %338 = arith.truncf %337 : vector<8x32xf32> to vector<8x32xbf16>
    %339 = arith.truncf %66 : vector<32x32xf32> to vector<32x32xbf16>
    %cst_223 = arith.constant dense<0.000000e+00> : vector<8x32xf32>
    %340 = tpu.matmul %338, %339, %cst_223 {dimension_numbers = #tpu.dot_dimension_numbers<[1], [0], [0], [1], [0, 0, 1, 1], [], []>} : vector<8x32xbf16>, vector<32x32xbf16>, vector<8x32xf32> -> vector<8x32xf32>
    %341 = vector.broadcast %64 : vector<1x32xf32> to vector<8x32xf32>
    %342 = arith.addf %340, %341 : vector<8x32xf32>
    %343 = arith.addf %226, %342 : vector<8x32xf32>
    %cst_224 = arith.constant dense<0.000000e+00> : vector<8xf32>
    %344 = vector.multi_reduction <add>, %343, %cst_224 [1] : vector<8x32xf32> to vector<8xf32>
    %345 = vector.shape_cast %344 : vector<8xf32> to vector<8x1xf32>
    %cst_225 = arith.constant 3.200000e+01 : f32
    %346 = vector.broadcast %cst_225 : f32 to vector<8x1xf32>
    %347 = arith.divf %345, %346 : vector<8x1xf32>
    %348 = vector.broadcast %347 : vector<8x1xf32> to vector<8x32xf32>
    %349 = arith.subf %343, %348 : vector<8x32xf32>
    %350 = arith.mulf %349, %349 : vector<8x32xf32>
    %cst_226 = arith.constant dense<0.000000e+00> : vector<8xf32>
    %351 = vector.multi_reduction <add>, %350, %cst_226 [1] : vector<8x32xf32> to vector<8xf32>
    %352 = vector.shape_cast %351 : vector<8xf32> to vector<8x1xf32>
    %cst_227 = arith.constant 3.200000e+01 : f32
    %353 = vector.broadcast %cst_227 : f32 to vector<8x1xf32>
    %354 = arith.divf %352, %353 : vector<8x1xf32>
    %355 = vector.broadcast %347 : vector<8x1xf32> to vector<8x32xf32>
    %356 = arith.subf %343, %355 : vector<8x32xf32>
    %cst_228 = arith.constant 9.99999974E-6 : f32
    %357 = vector.broadcast %cst_228 : f32 to vector<8x1xf32>
    %358 = arith.addf %354, %357 : vector<8x1xf32>
    %359 = math.rsqrt %358 : vector<8x1xf32>
    %360 = vector.broadcast %359 : vector<8x1xf32> to vector<8x32xf32>
    %361 = arith.mulf %356, %360 : vector<8x32xf32>
    %362 = vector.broadcast %63 : vector<1x32xf32> to vector<8x32xf32>
    %363 = arith.mulf %361, %362 : vector<8x32xf32>
    %364 = vector.broadcast %62 : vector<1x32xf32> to vector<8x32xf32>
    %365 = arith.addf %363, %364 : vector<8x32xf32>
    %366 = arith.truncf %365 : vector<8x32xf32> to vector<8x32xbf16>
    %367 = arith.truncf %58 : vector<32x64xf32> to vector<32x64xbf16>
    %cst_229 = arith.constant dense<0.000000e+00> : vector<8x64xf32>
    %368 = tpu.matmul %366, %367, %cst_229 {dimension_numbers = #tpu.dot_dimension_numbers<[1], [0], [0], [1], [0, 0, 1, 1], [], []>} : vector<8x32xbf16>, vector<32x64xbf16>, vector<8x64xf32> -> vector<8x64xf32>
    %369 = vector.broadcast %56 : vector<1x64xf32> to vector<8x64xf32>
    %370 = arith.addf %368, %369 : vector<8x64xf32>
    %cst_230 = arith.constant 0.000000e+00 : f32
    %371 = vector.broadcast %cst_230 : f32 to vector<8x64xf32>
    %372 = arith.maximumf %370, %371 : vector<8x64xf32>
    %373 = arith.truncf %372 : vector<8x64xf32> to vector<8x64xbf16>
    %374 = arith.truncf %59 : vector<64x32xf32> to vector<64x32xbf16>
    %cst_231 = arith.constant dense<0.000000e+00> : vector<8x32xf32>
    %375 = tpu.matmul %373, %374, %cst_231 {dimension_numbers = #tpu.dot_dimension_numbers<[1], [0], [0], [1], [0, 0, 1, 1], [], []>} : vector<8x64xbf16>, vector<64x32xbf16>, vector<8x32xf32> -> vector<8x32xf32>
    %376 = vector.broadcast %57 : vector<1x32xf32> to vector<8x32xf32>
    %377 = arith.addf %375, %376 : vector<8x32xf32>
    %378 = arith.addf %343, %377 : vector<8x32xf32>
    %cst_232 = arith.constant dense<0.000000e+00> : vector<8xf32>
    %379 = vector.multi_reduction <add>, %378, %cst_232 [1] : vector<8x32xf32> to vector<8xf32>
    %380 = vector.shape_cast %379 : vector<8xf32> to vector<8x1xf32>
    %cst_233 = arith.constant 3.200000e+01 : f32
    %381 = vector.broadcast %cst_233 : f32 to vector<8x1xf32>
    %382 = arith.divf %380, %381 : vector<8x1xf32>
    %383 = vector.broadcast %382 : vector<8x1xf32> to vector<8x32xf32>
    %384 = arith.subf %378, %383 : vector<8x32xf32>
    %385 = arith.mulf %384, %384 : vector<8x32xf32>
    %cst_234 = arith.constant dense<0.000000e+00> : vector<8xf32>
    %386 = vector.multi_reduction <add>, %385, %cst_234 [1] : vector<8x32xf32> to vector<8xf32>
    %387 = vector.shape_cast %386 : vector<8xf32> to vector<8x1xf32>
    %cst_235 = arith.constant 3.200000e+01 : f32
    %388 = vector.broadcast %cst_235 : f32 to vector<8x1xf32>
    %389 = arith.divf %387, %388 : vector<8x1xf32>
    %390 = vector.broadcast %382 : vector<8x1xf32> to vector<8x32xf32>
    %391 = arith.subf %378, %390 : vector<8x32xf32>
    %cst_236 = arith.constant 9.99999974E-6 : f32
    %392 = vector.broadcast %cst_236 : f32 to vector<8x1xf32>
    %393 = arith.addf %389, %392 : vector<8x1xf32>
    %394 = math.rsqrt %393 : vector<8x1xf32>
    %395 = vector.broadcast %394 : vector<8x1xf32> to vector<8x32xf32>
    %396 = arith.mulf %391, %395 : vector<8x32xf32>
    %397 = vector.broadcast %43 : vector<1x32xf32> to vector<8x32xf32>
    %398 = arith.mulf %396, %397 : vector<8x32xf32>
    %399 = vector.broadcast %42 : vector<1x32xf32> to vector<8x32xf32>
    %400 = arith.addf %398, %399 : vector<8x32xf32>
    %c0_237 = arith.constant 0 : index
    %c0_238 = arith.constant 0 : index
    %401 = vector.load %arg2[%c0_237, %c0_238] : memref<8x32xf32, #tpu.memory_space<vmem>>, vector<8x32xf32>
    %cst_239 = arith.constant dense<0.000000e+00> : vector<8xf32>
    %402 = vector.multi_reduction <add>, %401, %cst_239 [1] : vector<8x32xf32> to vector<8xf32>
    %403 = vector.shape_cast %402 : vector<8xf32> to vector<8x1xf32>
    %cst_240 = arith.constant 3.200000e+01 : f32
    %404 = vector.broadcast %cst_240 : f32 to vector<8x1xf32>
    %405 = arith.divf %403, %404 : vector<8x1xf32>
    %406 = vector.broadcast %405 : vector<8x1xf32> to vector<8x32xf32>
    %407 = arith.subf %401, %406 : vector<8x32xf32>
    %408 = arith.mulf %407, %407 : vector<8x32xf32>
    %cst_241 = arith.constant dense<0.000000e+00> : vector<8xf32>
    %409 = vector.multi_reduction <add>, %408, %cst_241 [1] : vector<8x32xf32> to vector<8xf32>
    %410 = vector.shape_cast %409 : vector<8xf32> to vector<8x1xf32>
    %cst_242 = arith.constant 3.200000e+01 : f32
    %411 = vector.broadcast %cst_242 : f32 to vector<8x1xf32>
    %412 = arith.divf %410, %411 : vector<8x1xf32>
    %413 = vector.broadcast %405 : vector<8x1xf32> to vector<8x32xf32>
    %414 = arith.subf %401, %413 : vector<8x32xf32>
    %cst_243 = arith.constant 9.99999974E-6 : f32
    %415 = vector.broadcast %cst_243 : f32 to vector<8x1xf32>
    %416 = arith.addf %412, %415 : vector<8x1xf32>
    %417 = math.rsqrt %416 : vector<8x1xf32>
    %418 = vector.broadcast %417 : vector<8x1xf32> to vector<8x32xf32>
    %419 = arith.mulf %414, %418 : vector<8x32xf32>
    %420 = vector.broadcast %7 : vector<1x32xf32> to vector<8x32xf32>
    %421 = arith.mulf %419, %420 : vector<8x32xf32>
    %422 = vector.broadcast %6 : vector<1x32xf32> to vector<8x32xf32>
    %423 = arith.addf %421, %422 : vector<8x32xf32>
    %424 = arith.truncf %423 : vector<8x32xf32> to vector<8x32xbf16>
    %425 = arith.truncf %15 : vector<32x96xf32> to vector<32x96xbf16>
    %cst_244 = arith.constant dense<0.000000e+00> : vector<8x96xf32>
    %426 = tpu.matmul %424, %425, %cst_244 {dimension_numbers = #tpu.dot_dimension_numbers<[1], [0], [0], [1], [0, 0, 1, 1], [], []>} : vector<8x32xbf16>, vector<32x96xbf16>, vector<8x96xf32> -> vector<8x96xf32>
    %427 = vector.broadcast %13 : vector<1x96xf32> to vector<8x96xf32>
    %428 = arith.addf %426, %427 : vector<8x96xf32>
    %429 = vector.extract_strided_slice %428 {offsets = [0, 0], sizes = [8, 32], strides = [1, 1]} : vector<8x96xf32> to vector<8x32xf32>
    %430 = vector.extract_strided_slice %428 {offsets = [0, 32], sizes = [8, 32], strides = [1, 1]} : vector<8x96xf32> to vector<8x32xf32>
    %431 = vector.extract_strided_slice %428 {offsets = [0, 64], sizes = [8, 32], strides = [1, 1]} : vector<8x96xf32> to vector<8x32xf32>
    %432 = vector.extract_strided_slice %429 {offsets = [0, 0], sizes = [8, 8], strides = [1, 1]} : vector<8x32xf32> to vector<8x8xf32>
    %433 = vector.extract_strided_slice %430 {offsets = [0, 0], sizes = [8, 8], strides = [1, 1]} : vector<8x32xf32> to vector<8x8xf32>
    %434 = vector.extract_strided_slice %431 {offsets = [0, 0], sizes = [8, 8], strides = [1, 1]} : vector<8x32xf32> to vector<8x8xf32>
    %cst_245 = arith.constant dense<0.000000e+00> : vector<8x8xf32>
    %435 = tpu.matmul %432, %433, %cst_245 {dimension_numbers = #tpu.dot_dimension_numbers<[1], [1], [0], [0], [0, 0, 1, 0], [], []>} : vector<8x8xf32>, vector<8x8xf32>, vector<8x8xf32> -> vector<8x8xf32>
    %cst_246 = arith.constant 0.353553385 : f32
    %436 = vector.broadcast %cst_246 : f32 to vector<8x8xf32>
    %437 = arith.mulf %435, %436 : vector<8x8xf32>
    %cst_247 = arith.constant 0.000000e+00 : f32
    %438 = vector.broadcast %cst_247 : f32 to vector<8x8xf32>
    %439 = arith.cmpf ogt, %73, %438 : vector<8x8xf32>
    %cst_248 = arith.constant -1.000000e+09 : f32
    %440 = vector.broadcast %cst_248 : f32 to vector<8x8xf32>
    %441 = arith.select %439, %437, %440 : vector<8x8xi1>, vector<8x8xf32>
    %cst_249 = arith.constant dense<0xFF800000> : vector<8xf32>
    %442 = vector.multi_reduction <maximumf>, %441, %cst_249 [1] : vector<8x8xf32> to vector<8xf32>
    %443 = vector.shape_cast %442 : vector<8xf32> to vector<8x1xf32>
    %444 = vector.broadcast %443 : vector<8x1xf32> to vector<8x8xf32>
    %445 = arith.subf %441, %444 : vector<8x8xf32>
    %446 = math.exp %445 : vector<8x8xf32>
    %cst_250 = arith.constant dense<0.000000e+00> : vector<8xf32>
    %447 = vector.multi_reduction <add>, %446, %cst_250 [1] : vector<8x8xf32> to vector<8xf32>
    %448 = vector.shape_cast %447 : vector<8xf32> to vector<8x1xf32>
    %449 = vector.broadcast %448 : vector<8x1xf32> to vector<8x8xf32>
    %450 = arith.divf %446, %449 : vector<8x8xf32>
    %cst_251 = arith.constant dense<0.000000e+00> : vector<8x8xf32>
    %451 = tpu.matmul %450, %434, %cst_251 {dimension_numbers = #tpu.dot_dimension_numbers<[1], [0], [0], [1], [0, 0, 1, 1], [], []>} : vector<8x8xf32>, vector<8x8xf32>, vector<8x8xf32> -> vector<8x8xf32>
    %452 = vector.extract_strided_slice %429 {offsets = [0, 8], sizes = [8, 8], strides = [1, 1]} : vector<8x32xf32> to vector<8x8xf32>
    %453 = vector.extract_strided_slice %430 {offsets = [0, 8], sizes = [8, 8], strides = [1, 1]} : vector<8x32xf32> to vector<8x8xf32>
    %454 = vector.extract_strided_slice %431 {offsets = [0, 8], sizes = [8, 8], strides = [1, 1]} : vector<8x32xf32> to vector<8x8xf32>
    %cst_252 = arith.constant dense<0.000000e+00> : vector<8x8xf32>
    %455 = tpu.matmul %452, %453, %cst_252 {dimension_numbers = #tpu.dot_dimension_numbers<[1], [1], [0], [0], [0, 0, 1, 0], [], []>} : vector<8x8xf32>, vector<8x8xf32>, vector<8x8xf32> -> vector<8x8xf32>
    %cst_253 = arith.constant 0.353553385 : f32
    %456 = vector.broadcast %cst_253 : f32 to vector<8x8xf32>
    %457 = arith.mulf %455, %456 : vector<8x8xf32>
    %cst_254 = arith.constant 0.000000e+00 : f32
    %458 = vector.broadcast %cst_254 : f32 to vector<8x8xf32>
    %459 = arith.cmpf ogt, %73, %458 : vector<8x8xf32>
    %cst_255 = arith.constant -1.000000e+09 : f32
    %460 = vector.broadcast %cst_255 : f32 to vector<8x8xf32>
    %461 = arith.select %459, %457, %460 : vector<8x8xi1>, vector<8x8xf32>
    %cst_256 = arith.constant dense<0xFF800000> : vector<8xf32>
    %462 = vector.multi_reduction <maximumf>, %461, %cst_256 [1] : vector<8x8xf32> to vector<8xf32>
    %463 = vector.shape_cast %462 : vector<8xf32> to vector<8x1xf32>
    %464 = vector.broadcast %463 : vector<8x1xf32> to vector<8x8xf32>
    %465 = arith.subf %461, %464 : vector<8x8xf32>
    %466 = math.exp %465 : vector<8x8xf32>
    %cst_257 = arith.constant dense<0.000000e+00> : vector<8xf32>
    %467 = vector.multi_reduction <add>, %466, %cst_257 [1] : vector<8x8xf32> to vector<8xf32>
    %468 = vector.shape_cast %467 : vector<8xf32> to vector<8x1xf32>
    %469 = vector.broadcast %468 : vector<8x1xf32> to vector<8x8xf32>
    %470 = arith.divf %466, %469 : vector<8x8xf32>
    %cst_258 = arith.constant dense<0.000000e+00> : vector<8x8xf32>
    %471 = tpu.matmul %470, %454, %cst_258 {dimension_numbers = #tpu.dot_dimension_numbers<[1], [0], [0], [1], [0, 0, 1, 1], [], []>} : vector<8x8xf32>, vector<8x8xf32>, vector<8x8xf32> -> vector<8x8xf32>
    %472 = vector.extract_strided_slice %429 {offsets = [0, 16], sizes = [8, 8], strides = [1, 1]} : vector<8x32xf32> to vector<8x8xf32>
    %473 = vector.extract_strided_slice %430 {offsets = [0, 16], sizes = [8, 8], strides = [1, 1]} : vector<8x32xf32> to vector<8x8xf32>
    %474 = vector.extract_strided_slice %431 {offsets = [0, 16], sizes = [8, 8], strides = [1, 1]} : vector<8x32xf32> to vector<8x8xf32>
    %cst_259 = arith.constant dense<0.000000e+00> : vector<8x8xf32>
    %475 = tpu.matmul %472, %473, %cst_259 {dimension_numbers = #tpu.dot_dimension_numbers<[1], [1], [0], [0], [0, 0, 1, 0], [], []>} : vector<8x8xf32>, vector<8x8xf32>, vector<8x8xf32> -> vector<8x8xf32>
    %cst_260 = arith.constant 0.353553385 : f32
    %476 = vector.broadcast %cst_260 : f32 to vector<8x8xf32>
    %477 = arith.mulf %475, %476 : vector<8x8xf32>
    %cst_261 = arith.constant 0.000000e+00 : f32
    %478 = vector.broadcast %cst_261 : f32 to vector<8x8xf32>
    %479 = arith.cmpf ogt, %73, %478 : vector<8x8xf32>
    %cst_262 = arith.constant -1.000000e+09 : f32
    %480 = vector.broadcast %cst_262 : f32 to vector<8x8xf32>
    %481 = arith.select %479, %477, %480 : vector<8x8xi1>, vector<8x8xf32>
    %cst_263 = arith.constant dense<0xFF800000> : vector<8xf32>
    %482 = vector.multi_reduction <maximumf>, %481, %cst_263 [1] : vector<8x8xf32> to vector<8xf32>
    %483 = vector.shape_cast %482 : vector<8xf32> to vector<8x1xf32>
    %484 = vector.broadcast %483 : vector<8x1xf32> to vector<8x8xf32>
    %485 = arith.subf %481, %484 : vector<8x8xf32>
    %486 = math.exp %485 : vector<8x8xf32>
    %cst_264 = arith.constant dense<0.000000e+00> : vector<8xf32>
    %487 = vector.multi_reduction <add>, %486, %cst_264 [1] : vector<8x8xf32> to vector<8xf32>
    %488 = vector.shape_cast %487 : vector<8xf32> to vector<8x1xf32>
    %489 = vector.broadcast %488 : vector<8x1xf32> to vector<8x8xf32>
    %490 = arith.divf %486, %489 : vector<8x8xf32>
    %cst_265 = arith.constant dense<0.000000e+00> : vector<8x8xf32>
    %491 = tpu.matmul %490, %474, %cst_265 {dimension_numbers = #tpu.dot_dimension_numbers<[1], [0], [0], [1], [0, 0, 1, 1], [], []>} : vector<8x8xf32>, vector<8x8xf32>, vector<8x8xf32> -> vector<8x8xf32>
    %492 = vector.extract_strided_slice %429 {offsets = [0, 24], sizes = [8, 8], strides = [1, 1]} : vector<8x32xf32> to vector<8x8xf32>
    %493 = vector.extract_strided_slice %430 {offsets = [0, 24], sizes = [8, 8], strides = [1, 1]} : vector<8x32xf32> to vector<8x8xf32>
    %494 = vector.extract_strided_slice %431 {offsets = [0, 24], sizes = [8, 8], strides = [1, 1]} : vector<8x32xf32> to vector<8x8xf32>
    %cst_266 = arith.constant dense<0.000000e+00> : vector<8x8xf32>
    %495 = tpu.matmul %492, %493, %cst_266 {dimension_numbers = #tpu.dot_dimension_numbers<[1], [1], [0], [0], [0, 0, 1, 0], [], []>} : vector<8x8xf32>, vector<8x8xf32>, vector<8x8xf32> -> vector<8x8xf32>
    %cst_267 = arith.constant 0.353553385 : f32
    %496 = vector.broadcast %cst_267 : f32 to vector<8x8xf32>
    %497 = arith.mulf %495, %496 : vector<8x8xf32>
    %cst_268 = arith.constant 0.000000e+00 : f32
    %498 = vector.broadcast %cst_268 : f32 to vector<8x8xf32>
    %499 = arith.cmpf ogt, %73, %498 : vector<8x8xf32>
    %cst_269 = arith.constant -1.000000e+09 : f32
    %500 = vector.broadcast %cst_269 : f32 to vector<8x8xf32>
    %501 = arith.select %499, %497, %500 : vector<8x8xi1>, vector<8x8xf32>
    %cst_270 = arith.constant dense<0xFF800000> : vector<8xf32>
    %502 = vector.multi_reduction <maximumf>, %501, %cst_270 [1] : vector<8x8xf32> to vector<8xf32>
    %503 = vector.shape_cast %502 : vector<8xf32> to vector<8x1xf32>
    %504 = vector.broadcast %503 : vector<8x1xf32> to vector<8x8xf32>
    %505 = arith.subf %501, %504 : vector<8x8xf32>
    %506 = math.exp %505 : vector<8x8xf32>
    %cst_271 = arith.constant dense<0.000000e+00> : vector<8xf32>
    %507 = vector.multi_reduction <add>, %506, %cst_271 [1] : vector<8x8xf32> to vector<8xf32>
    %508 = vector.shape_cast %507 : vector<8xf32> to vector<8x1xf32>
    %509 = vector.broadcast %508 : vector<8x1xf32> to vector<8x8xf32>
    %510 = arith.divf %506, %509 : vector<8x8xf32>
    %cst_272 = arith.constant dense<0.000000e+00> : vector<8x8xf32>
    %511 = tpu.matmul %510, %494, %cst_272 {dimension_numbers = #tpu.dot_dimension_numbers<[1], [0], [0], [1], [0, 0, 1, 1], [], []>} : vector<8x8xf32>, vector<8x8xf32>, vector<8x8xf32> -> vector<8x8xf32>
    %512 = tpu.concatenate %451, %471, %491, %511 in 1 : vector<8x8xf32>, vector<8x8xf32>, vector<8x8xf32>, vector<8x8xf32> -> vector<8x32xf32>
    %513 = arith.truncf %512 : vector<8x32xf32> to vector<8x32xbf16>
    %514 = arith.truncf %14 : vector<32x32xf32> to vector<32x32xbf16>
    %cst_273 = arith.constant dense<0.000000e+00> : vector<8x32xf32>
    %515 = tpu.matmul %513, %514, %cst_273 {dimension_numbers = #tpu.dot_dimension_numbers<[1], [0], [0], [1], [0, 0, 1, 1], [], []>} : vector<8x32xbf16>, vector<32x32xbf16>, vector<8x32xf32> -> vector<8x32xf32>
    %516 = vector.broadcast %12 : vector<1x32xf32> to vector<8x32xf32>
    %517 = arith.addf %515, %516 : vector<8x32xf32>
    %518 = arith.addf %401, %517 : vector<8x32xf32>
    %cst_274 = arith.constant dense<0.000000e+00> : vector<8xf32>
    %519 = vector.multi_reduction <add>, %518, %cst_274 [1] : vector<8x32xf32> to vector<8xf32>
    %520 = vector.shape_cast %519 : vector<8xf32> to vector<8x1xf32>
    %cst_275 = arith.constant 3.200000e+01 : f32
    %521 = vector.broadcast %cst_275 : f32 to vector<8x1xf32>
    %522 = arith.divf %520, %521 : vector<8x1xf32>
    %523 = vector.broadcast %522 : vector<8x1xf32> to vector<8x32xf32>
    %524 = arith.subf %518, %523 : vector<8x32xf32>
    %525 = arith.mulf %524, %524 : vector<8x32xf32>
    %cst_276 = arith.constant dense<0.000000e+00> : vector<8xf32>
    %526 = vector.multi_reduction <add>, %525, %cst_276 [1] : vector<8x32xf32> to vector<8xf32>
    %527 = vector.shape_cast %526 : vector<8xf32> to vector<8x1xf32>
    %cst_277 = arith.constant 3.200000e+01 : f32
    %528 = vector.broadcast %cst_277 : f32 to vector<8x1xf32>
    %529 = arith.divf %527, %528 : vector<8x1xf32>
    %530 = vector.broadcast %522 : vector<8x1xf32> to vector<8x32xf32>
    %531 = arith.subf %518, %530 : vector<8x32xf32>
    %cst_278 = arith.constant 9.99999974E-6 : f32
    %532 = vector.broadcast %cst_278 : f32 to vector<8x1xf32>
    %533 = arith.addf %529, %532 : vector<8x1xf32>
    %534 = math.rsqrt %533 : vector<8x1xf32>
    %535 = vector.broadcast %534 : vector<8x1xf32> to vector<8x32xf32>
    %536 = arith.mulf %531, %535 : vector<8x32xf32>
    %537 = vector.broadcast %9 : vector<1x32xf32> to vector<8x32xf32>
    %538 = arith.mulf %536, %537 : vector<8x32xf32>
    %539 = vector.broadcast %8 : vector<1x32xf32> to vector<8x32xf32>
    %540 = arith.addf %538, %539 : vector<8x32xf32>
    %541 = arith.truncf %540 : vector<8x32xf32> to vector<8x32xbf16>
    %542 = arith.truncf %21 : vector<32x32xf32> to vector<32x32xbf16>
    %cst_279 = arith.constant dense<0.000000e+00> : vector<8x32xf32>
    %543 = tpu.matmul %541, %542, %cst_279 {dimension_numbers = #tpu.dot_dimension_numbers<[1], [0], [0], [1], [0, 0, 1, 1], [], []>} : vector<8x32xbf16>, vector<32x32xbf16>, vector<8x32xf32> -> vector<8x32xf32>
    %544 = vector.broadcast %18 : vector<1x32xf32> to vector<8x32xf32>
    %545 = arith.addf %543, %544 : vector<8x32xf32>
    %546 = arith.truncf %400 : vector<8x32xf32> to vector<8x32xbf16>
    %547 = arith.truncf %19 : vector<32x64xf32> to vector<32x64xbf16>
    %cst_280 = arith.constant dense<0.000000e+00> : vector<8x64xf32>
    %548 = tpu.matmul %546, %547, %cst_280 {dimension_numbers = #tpu.dot_dimension_numbers<[1], [0], [0], [1], [0, 0, 1, 1], [], []>} : vector<8x32xbf16>, vector<32x64xbf16>, vector<8x64xf32> -> vector<8x64xf32>
    %549 = vector.broadcast %16 : vector<1x64xf32> to vector<8x64xf32>
    %550 = arith.addf %548, %549 : vector<8x64xf32>
    %551 = vector.extract_strided_slice %550 {offsets = [0, 0], sizes = [8, 32], strides = [1, 1]} : vector<8x64xf32> to vector<8x32xf32>
    %552 = vector.extract_strided_slice %550 {offsets = [0, 32], sizes = [8, 32], strides = [1, 1]} : vector<8x64xf32> to vector<8x32xf32>
    %553 = vector.extract_strided_slice %545 {offsets = [0, 0], sizes = [8, 8], strides = [1, 1]} : vector<8x32xf32> to vector<8x8xf32>
    %554 = vector.extract_strided_slice %551 {offsets = [0, 0], sizes = [8, 8], strides = [1, 1]} : vector<8x32xf32> to vector<8x8xf32>
    %555 = vector.extract_strided_slice %552 {offsets = [0, 0], sizes = [8, 8], strides = [1, 1]} : vector<8x32xf32> to vector<8x8xf32>
    %cst_281 = arith.constant dense<0.000000e+00> : vector<8x8xf32>
    %556 = tpu.matmul %553, %554, %cst_281 {dimension_numbers = #tpu.dot_dimension_numbers<[1], [1], [0], [0], [0, 0, 1, 0], [], []>} : vector<8x8xf32>, vector<8x8xf32>, vector<8x8xf32> -> vector<8x8xf32>
    %cst_282 = arith.constant 0.353553385 : f32
    %557 = vector.broadcast %cst_282 : f32 to vector<8x8xf32>
    %558 = arith.mulf %556, %557 : vector<8x8xf32>
    %cst_283 = arith.constant 0.000000e+00 : f32
    %559 = vector.broadcast %cst_283 : f32 to vector<8x8xf32>
    %560 = arith.cmpf ogt, %71, %559 : vector<8x8xf32>
    %cst_284 = arith.constant -1.000000e+09 : f32
    %561 = vector.broadcast %cst_284 : f32 to vector<8x8xf32>
    %562 = arith.select %560, %558, %561 : vector<8x8xi1>, vector<8x8xf32>
    %cst_285 = arith.constant dense<0xFF800000> : vector<8xf32>
    %563 = vector.multi_reduction <maximumf>, %562, %cst_285 [1] : vector<8x8xf32> to vector<8xf32>
    %564 = vector.shape_cast %563 : vector<8xf32> to vector<8x1xf32>
    %565 = vector.broadcast %564 : vector<8x1xf32> to vector<8x8xf32>
    %566 = arith.subf %562, %565 : vector<8x8xf32>
    %567 = math.exp %566 : vector<8x8xf32>
    %cst_286 = arith.constant dense<0.000000e+00> : vector<8xf32>
    %568 = vector.multi_reduction <add>, %567, %cst_286 [1] : vector<8x8xf32> to vector<8xf32>
    %569 = vector.shape_cast %568 : vector<8xf32> to vector<8x1xf32>
    %570 = vector.broadcast %569 : vector<8x1xf32> to vector<8x8xf32>
    %571 = arith.divf %567, %570 : vector<8x8xf32>
    %cst_287 = arith.constant dense<0.000000e+00> : vector<8x8xf32>
    %572 = tpu.matmul %571, %555, %cst_287 {dimension_numbers = #tpu.dot_dimension_numbers<[1], [0], [0], [1], [0, 0, 1, 1], [], []>} : vector<8x8xf32>, vector<8x8xf32>, vector<8x8xf32> -> vector<8x8xf32>
    %573 = vector.extract_strided_slice %545 {offsets = [0, 8], sizes = [8, 8], strides = [1, 1]} : vector<8x32xf32> to vector<8x8xf32>
    %574 = vector.extract_strided_slice %551 {offsets = [0, 8], sizes = [8, 8], strides = [1, 1]} : vector<8x32xf32> to vector<8x8xf32>
    %575 = vector.extract_strided_slice %552 {offsets = [0, 8], sizes = [8, 8], strides = [1, 1]} : vector<8x32xf32> to vector<8x8xf32>
    %cst_288 = arith.constant dense<0.000000e+00> : vector<8x8xf32>
    %576 = tpu.matmul %573, %574, %cst_288 {dimension_numbers = #tpu.dot_dimension_numbers<[1], [1], [0], [0], [0, 0, 1, 0], [], []>} : vector<8x8xf32>, vector<8x8xf32>, vector<8x8xf32> -> vector<8x8xf32>
    %cst_289 = arith.constant 0.353553385 : f32
    %577 = vector.broadcast %cst_289 : f32 to vector<8x8xf32>
    %578 = arith.mulf %576, %577 : vector<8x8xf32>
    %cst_290 = arith.constant 0.000000e+00 : f32
    %579 = vector.broadcast %cst_290 : f32 to vector<8x8xf32>
    %580 = arith.cmpf ogt, %71, %579 : vector<8x8xf32>
    %cst_291 = arith.constant -1.000000e+09 : f32
    %581 = vector.broadcast %cst_291 : f32 to vector<8x8xf32>
    %582 = arith.select %580, %578, %581 : vector<8x8xi1>, vector<8x8xf32>
    %cst_292 = arith.constant dense<0xFF800000> : vector<8xf32>
    %583 = vector.multi_reduction <maximumf>, %582, %cst_292 [1] : vector<8x8xf32> to vector<8xf32>
    %584 = vector.shape_cast %583 : vector<8xf32> to vector<8x1xf32>
    %585 = vector.broadcast %584 : vector<8x1xf32> to vector<8x8xf32>
    %586 = arith.subf %582, %585 : vector<8x8xf32>
    %587 = math.exp %586 : vector<8x8xf32>
    %cst_293 = arith.constant dense<0.000000e+00> : vector<8xf32>
    %588 = vector.multi_reduction <add>, %587, %cst_293 [1] : vector<8x8xf32> to vector<8xf32>
    %589 = vector.shape_cast %588 : vector<8xf32> to vector<8x1xf32>
    %590 = vector.broadcast %589 : vector<8x1xf32> to vector<8x8xf32>
    %591 = arith.divf %587, %590 : vector<8x8xf32>
    %cst_294 = arith.constant dense<0.000000e+00> : vector<8x8xf32>
    %592 = tpu.matmul %591, %575, %cst_294 {dimension_numbers = #tpu.dot_dimension_numbers<[1], [0], [0], [1], [0, 0, 1, 1], [], []>} : vector<8x8xf32>, vector<8x8xf32>, vector<8x8xf32> -> vector<8x8xf32>
    %593 = vector.extract_strided_slice %545 {offsets = [0, 16], sizes = [8, 8], strides = [1, 1]} : vector<8x32xf32> to vector<8x8xf32>
    %594 = vector.extract_strided_slice %551 {offsets = [0, 16], sizes = [8, 8], strides = [1, 1]} : vector<8x32xf32> to vector<8x8xf32>
    %595 = vector.extract_strided_slice %552 {offsets = [0, 16], sizes = [8, 8], strides = [1, 1]} : vector<8x32xf32> to vector<8x8xf32>
    %cst_295 = arith.constant dense<0.000000e+00> : vector<8x8xf32>
    %596 = tpu.matmul %593, %594, %cst_295 {dimension_numbers = #tpu.dot_dimension_numbers<[1], [1], [0], [0], [0, 0, 1, 0], [], []>} : vector<8x8xf32>, vector<8x8xf32>, vector<8x8xf32> -> vector<8x8xf32>
    %cst_296 = arith.constant 0.353553385 : f32
    %597 = vector.broadcast %cst_296 : f32 to vector<8x8xf32>
    %598 = arith.mulf %596, %597 : vector<8x8xf32>
    %cst_297 = arith.constant 0.000000e+00 : f32
    %599 = vector.broadcast %cst_297 : f32 to vector<8x8xf32>
    %600 = arith.cmpf ogt, %71, %599 : vector<8x8xf32>
    %cst_298 = arith.constant -1.000000e+09 : f32
    %601 = vector.broadcast %cst_298 : f32 to vector<8x8xf32>
    %602 = arith.select %600, %598, %601 : vector<8x8xi1>, vector<8x8xf32>
    %cst_299 = arith.constant dense<0xFF800000> : vector<8xf32>
    %603 = vector.multi_reduction <maximumf>, %602, %cst_299 [1] : vector<8x8xf32> to vector<8xf32>
    %604 = vector.shape_cast %603 : vector<8xf32> to vector<8x1xf32>
    %605 = vector.broadcast %604 : vector<8x1xf32> to vector<8x8xf32>
    %606 = arith.subf %602, %605 : vector<8x8xf32>
    %607 = math.exp %606 : vector<8x8xf32>
    %cst_300 = arith.constant dense<0.000000e+00> : vector<8xf32>
    %608 = vector.multi_reduction <add>, %607, %cst_300 [1] : vector<8x8xf32> to vector<8xf32>
    %609 = vector.shape_cast %608 : vector<8xf32> to vector<8x1xf32>
    %610 = vector.broadcast %609 : vector<8x1xf32> to vector<8x8xf32>
    %611 = arith.divf %607, %610 : vector<8x8xf32>
    %cst_301 = arith.constant dense<0.000000e+00> : vector<8x8xf32>
    %612 = tpu.matmul %611, %595, %cst_301 {dimension_numbers = #tpu.dot_dimension_numbers<[1], [0], [0], [1], [0, 0, 1, 1], [], []>} : vector<8x8xf32>, vector<8x8xf32>, vector<8x8xf32> -> vector<8x8xf32>
    %613 = vector.extract_strided_slice %545 {offsets = [0, 24], sizes = [8, 8], strides = [1, 1]} : vector<8x32xf32> to vector<8x8xf32>
    %614 = vector.extract_strided_slice %551 {offsets = [0, 24], sizes = [8, 8], strides = [1, 1]} : vector<8x32xf32> to vector<8x8xf32>
    %615 = vector.extract_strided_slice %552 {offsets = [0, 24], sizes = [8, 8], strides = [1, 1]} : vector<8x32xf32> to vector<8x8xf32>
    %cst_302 = arith.constant dense<0.000000e+00> : vector<8x8xf32>
    %616 = tpu.matmul %613, %614, %cst_302 {dimension_numbers = #tpu.dot_dimension_numbers<[1], [1], [0], [0], [0, 0, 1, 0], [], []>} : vector<8x8xf32>, vector<8x8xf32>, vector<8x8xf32> -> vector<8x8xf32>
    %cst_303 = arith.constant 0.353553385 : f32
    %617 = vector.broadcast %cst_303 : f32 to vector<8x8xf32>
    %618 = arith.mulf %616, %617 : vector<8x8xf32>
    %cst_304 = arith.constant 0.000000e+00 : f32
    %619 = vector.broadcast %cst_304 : f32 to vector<8x8xf32>
    %620 = arith.cmpf ogt, %71, %619 : vector<8x8xf32>
    %cst_305 = arith.constant -1.000000e+09 : f32
    %621 = vector.broadcast %cst_305 : f32 to vector<8x8xf32>
    %622 = arith.select %620, %618, %621 : vector<8x8xi1>, vector<8x8xf32>
    %cst_306 = arith.constant dense<0xFF800000> : vector<8xf32>
    %623 = vector.multi_reduction <maximumf>, %622, %cst_306 [1] : vector<8x8xf32> to vector<8xf32>
    %624 = vector.shape_cast %623 : vector<8xf32> to vector<8x1xf32>
    %625 = vector.broadcast %624 : vector<8x1xf32> to vector<8x8xf32>
    %626 = arith.subf %622, %625 : vector<8x8xf32>
    %627 = math.exp %626 : vector<8x8xf32>
    %cst_307 = arith.constant dense<0.000000e+00> : vector<8xf32>
    %628 = vector.multi_reduction <add>, %627, %cst_307 [1] : vector<8x8xf32> to vector<8xf32>
    %629 = vector.shape_cast %628 : vector<8xf32> to vector<8x1xf32>
    %630 = vector.broadcast %629 : vector<8x1xf32> to vector<8x8xf32>
    %631 = arith.divf %627, %630 : vector<8x8xf32>
    %cst_308 = arith.constant dense<0.000000e+00> : vector<8x8xf32>
    %632 = tpu.matmul %631, %615, %cst_308 {dimension_numbers = #tpu.dot_dimension_numbers<[1], [0], [0], [1], [0, 0, 1, 1], [], []>} : vector<8x8xf32>, vector<8x8xf32>, vector<8x8xf32> -> vector<8x8xf32>
    %633 = tpu.concatenate %572, %592, %612, %632 in 1 : vector<8x8xf32>, vector<8x8xf32>, vector<8x8xf32>, vector<8x8xf32> -> vector<8x32xf32>
    %634 = arith.truncf %633 : vector<8x32xf32> to vector<8x32xbf16>
    %635 = arith.truncf %20 : vector<32x32xf32> to vector<32x32xbf16>
    %cst_309 = arith.constant dense<0.000000e+00> : vector<8x32xf32>
    %636 = tpu.matmul %634, %635, %cst_309 {dimension_numbers = #tpu.dot_dimension_numbers<[1], [0], [0], [1], [0, 0, 1, 1], [], []>} : vector<8x32xbf16>, vector<32x32xbf16>, vector<8x32xf32> -> vector<8x32xf32>
    %637 = vector.broadcast %17 : vector<1x32xf32> to vector<8x32xf32>
    %638 = arith.addf %636, %637 : vector<8x32xf32>
    %639 = arith.addf %518, %638 : vector<8x32xf32>
    %cst_310 = arith.constant dense<0.000000e+00> : vector<8xf32>
    %640 = vector.multi_reduction <add>, %639, %cst_310 [1] : vector<8x32xf32> to vector<8xf32>
    %641 = vector.shape_cast %640 : vector<8xf32> to vector<8x1xf32>
    %cst_311 = arith.constant 3.200000e+01 : f32
    %642 = vector.broadcast %cst_311 : f32 to vector<8x1xf32>
    %643 = arith.divf %641, %642 : vector<8x1xf32>
    %644 = vector.broadcast %643 : vector<8x1xf32> to vector<8x32xf32>
    %645 = arith.subf %639, %644 : vector<8x32xf32>
    %646 = arith.mulf %645, %645 : vector<8x32xf32>
    %cst_312 = arith.constant dense<0.000000e+00> : vector<8xf32>
    %647 = vector.multi_reduction <add>, %646, %cst_312 [1] : vector<8x32xf32> to vector<8xf32>
    %648 = vector.shape_cast %647 : vector<8xf32> to vector<8x1xf32>
    %cst_313 = arith.constant 3.200000e+01 : f32
    %649 = vector.broadcast %cst_313 : f32 to vector<8x1xf32>
    %650 = arith.divf %648, %649 : vector<8x1xf32>
    %651 = vector.broadcast %643 : vector<8x1xf32> to vector<8x32xf32>
    %652 = arith.subf %639, %651 : vector<8x32xf32>
    %cst_314 = arith.constant 9.99999974E-6 : f32
    %653 = vector.broadcast %cst_314 : f32 to vector<8x1xf32>
    %654 = arith.addf %650, %653 : vector<8x1xf32>
    %655 = math.rsqrt %654 : vector<8x1xf32>
    %656 = vector.broadcast %655 : vector<8x1xf32> to vector<8x32xf32>
    %657 = arith.mulf %652, %656 : vector<8x32xf32>
    %658 = vector.broadcast %11 : vector<1x32xf32> to vector<8x32xf32>
    %659 = arith.mulf %657, %658 : vector<8x32xf32>
    %660 = vector.broadcast %10 : vector<1x32xf32> to vector<8x32xf32>
    %661 = arith.addf %659, %660 : vector<8x32xf32>
    %662 = arith.truncf %661 : vector<8x32xf32> to vector<8x32xbf16>
    %663 = arith.truncf %4 : vector<32x64xf32> to vector<32x64xbf16>
    %cst_315 = arith.constant dense<0.000000e+00> : vector<8x64xf32>
    %664 = tpu.matmul %662, %663, %cst_315 {dimension_numbers = #tpu.dot_dimension_numbers<[1], [0], [0], [1], [0, 0, 1, 1], [], []>} : vector<8x32xbf16>, vector<32x64xbf16>, vector<8x64xf32> -> vector<8x64xf32>
    %665 = vector.broadcast %2 : vector<1x64xf32> to vector<8x64xf32>
    %666 = arith.addf %664, %665 : vector<8x64xf32>
    %cst_316 = arith.constant 0.000000e+00 : f32
    %667 = vector.broadcast %cst_316 : f32 to vector<8x64xf32>
    %668 = arith.maximumf %666, %667 : vector<8x64xf32>
    %669 = arith.truncf %668 : vector<8x64xf32> to vector<8x64xbf16>
    %670 = arith.truncf %5 : vector<64x32xf32> to vector<64x32xbf16>
    %cst_317 = arith.constant dense<0.000000e+00> : vector<8x32xf32>
    %671 = tpu.matmul %669, %670, %cst_317 {dimension_numbers = #tpu.dot_dimension_numbers<[1], [0], [0], [1], [0, 0, 1, 1], [], []>} : vector<8x64xbf16>, vector<64x32xbf16>, vector<8x32xf32> -> vector<8x32xf32>
    %672 = vector.broadcast %3 : vector<1x32xf32> to vector<8x32xf32>
    %673 = arith.addf %671, %672 : vector<8x32xf32>
    %674 = arith.addf %639, %673 : vector<8x32xf32>
    %cst_318 = arith.constant dense<0.000000e+00> : vector<8xf32>
    %675 = vector.multi_reduction <add>, %674, %cst_318 [1] : vector<8x32xf32> to vector<8xf32>
    %676 = vector.shape_cast %675 : vector<8xf32> to vector<8x1xf32>
    %cst_319 = arith.constant 3.200000e+01 : f32
    %677 = vector.broadcast %cst_319 : f32 to vector<8x1xf32>
    %678 = arith.divf %676, %677 : vector<8x1xf32>
    %679 = vector.broadcast %678 : vector<8x1xf32> to vector<8x32xf32>
    %680 = arith.subf %674, %679 : vector<8x32xf32>
    %681 = arith.mulf %680, %680 : vector<8x32xf32>
    %cst_320 = arith.constant dense<0.000000e+00> : vector<8xf32>
    %682 = vector.multi_reduction <add>, %681, %cst_320 [1] : vector<8x32xf32> to vector<8xf32>
    %683 = vector.shape_cast %682 : vector<8xf32> to vector<8x1xf32>
    %cst_321 = arith.constant 3.200000e+01 : f32
    %684 = vector.broadcast %cst_321 : f32 to vector<8x1xf32>
    %685 = arith.divf %683, %684 : vector<8x1xf32>
    %686 = vector.broadcast %678 : vector<8x1xf32> to vector<8x32xf32>
    %687 = arith.subf %674, %686 : vector<8x32xf32>
    %cst_322 = arith.constant 9.99999974E-6 : f32
    %688 = vector.broadcast %cst_322 : f32 to vector<8x1xf32>
    %689 = arith.addf %685, %688 : vector<8x1xf32>
    %690 = math.rsqrt %689 : vector<8x1xf32>
    %691 = vector.broadcast %690 : vector<8x1xf32> to vector<8x32xf32>
    %692 = arith.mulf %687, %691 : vector<8x32xf32>
    %693 = vector.broadcast %27 : vector<1x32xf32> to vector<8x32xf32>
    %694 = arith.mulf %692, %693 : vector<8x32xf32>
    %695 = vector.broadcast %26 : vector<1x32xf32> to vector<8x32xf32>
    %696 = arith.addf %694, %695 : vector<8x32xf32>
    %697 = arith.truncf %696 : vector<8x32xf32> to vector<8x32xbf16>
    %698 = arith.truncf %35 : vector<32x96xf32> to vector<32x96xbf16>
    %cst_323 = arith.constant dense<0.000000e+00> : vector<8x96xf32>
    %699 = tpu.matmul %697, %698, %cst_323 {dimension_numbers = #tpu.dot_dimension_numbers<[1], [0], [0], [1], [0, 0, 1, 1], [], []>} : vector<8x32xbf16>, vector<32x96xbf16>, vector<8x96xf32> -> vector<8x96xf32>
    %700 = vector.broadcast %33 : vector<1x96xf32> to vector<8x96xf32>
    %701 = arith.addf %699, %700 : vector<8x96xf32>
    %702 = vector.extract_strided_slice %701 {offsets = [0, 0], sizes = [8, 32], strides = [1, 1]} : vector<8x96xf32> to vector<8x32xf32>
    %703 = vector.extract_strided_slice %701 {offsets = [0, 32], sizes = [8, 32], strides = [1, 1]} : vector<8x96xf32> to vector<8x32xf32>
    %704 = vector.extract_strided_slice %701 {offsets = [0, 64], sizes = [8, 32], strides = [1, 1]} : vector<8x96xf32> to vector<8x32xf32>
    %705 = vector.extract_strided_slice %702 {offsets = [0, 0], sizes = [8, 8], strides = [1, 1]} : vector<8x32xf32> to vector<8x8xf32>
    %706 = vector.extract_strided_slice %703 {offsets = [0, 0], sizes = [8, 8], strides = [1, 1]} : vector<8x32xf32> to vector<8x8xf32>
    %707 = vector.extract_strided_slice %704 {offsets = [0, 0], sizes = [8, 8], strides = [1, 1]} : vector<8x32xf32> to vector<8x8xf32>
    %cst_324 = arith.constant dense<0.000000e+00> : vector<8x8xf32>
    %708 = tpu.matmul %705, %706, %cst_324 {dimension_numbers = #tpu.dot_dimension_numbers<[1], [1], [0], [0], [0, 0, 1, 0], [], []>} : vector<8x8xf32>, vector<8x8xf32>, vector<8x8xf32> -> vector<8x8xf32>
    %cst_325 = arith.constant 0.353553385 : f32
    %709 = vector.broadcast %cst_325 : f32 to vector<8x8xf32>
    %710 = arith.mulf %708, %709 : vector<8x8xf32>
    %cst_326 = arith.constant 0.000000e+00 : f32
    %711 = vector.broadcast %cst_326 : f32 to vector<8x8xf32>
    %712 = arith.cmpf ogt, %73, %711 : vector<8x8xf32>
    %cst_327 = arith.constant -1.000000e+09 : f32
    %713 = vector.broadcast %cst_327 : f32 to vector<8x8xf32>
    %714 = arith.select %712, %710, %713 : vector<8x8xi1>, vector<8x8xf32>
    %cst_328 = arith.constant dense<0xFF800000> : vector<8xf32>
    %715 = vector.multi_reduction <maximumf>, %714, %cst_328 [1] : vector<8x8xf32> to vector<8xf32>
    %716 = vector.shape_cast %715 : vector<8xf32> to vector<8x1xf32>
    %717 = vector.broadcast %716 : vector<8x1xf32> to vector<8x8xf32>
    %718 = arith.subf %714, %717 : vector<8x8xf32>
    %719 = math.exp %718 : vector<8x8xf32>
    %cst_329 = arith.constant dense<0.000000e+00> : vector<8xf32>
    %720 = vector.multi_reduction <add>, %719, %cst_329 [1] : vector<8x8xf32> to vector<8xf32>
    %721 = vector.shape_cast %720 : vector<8xf32> to vector<8x1xf32>
    %722 = vector.broadcast %721 : vector<8x1xf32> to vector<8x8xf32>
    %723 = arith.divf %719, %722 : vector<8x8xf32>
    %cst_330 = arith.constant dense<0.000000e+00> : vector<8x8xf32>
    %724 = tpu.matmul %723, %707, %cst_330 {dimension_numbers = #tpu.dot_dimension_numbers<[1], [0], [0], [1], [0, 0, 1, 1], [], []>} : vector<8x8xf32>, vector<8x8xf32>, vector<8x8xf32> -> vector<8x8xf32>
    %725 = vector.extract_strided_slice %702 {offsets = [0, 8], sizes = [8, 8], strides = [1, 1]} : vector<8x32xf32> to vector<8x8xf32>
    %726 = vector.extract_strided_slice %703 {offsets = [0, 8], sizes = [8, 8], strides = [1, 1]} : vector<8x32xf32> to vector<8x8xf32>
    %727 = vector.extract_strided_slice %704 {offsets = [0, 8], sizes = [8, 8], strides = [1, 1]} : vector<8x32xf32> to vector<8x8xf32>
    %cst_331 = arith.constant dense<0.000000e+00> : vector<8x8xf32>
    %728 = tpu.matmul %725, %726, %cst_331 {dimension_numbers = #tpu.dot_dimension_numbers<[1], [1], [0], [0], [0, 0, 1, 0], [], []>} : vector<8x8xf32>, vector<8x8xf32>, vector<8x8xf32> -> vector<8x8xf32>
    %cst_332 = arith.constant 0.353553385 : f32
    %729 = vector.broadcast %cst_332 : f32 to vector<8x8xf32>
    %730 = arith.mulf %728, %729 : vector<8x8xf32>
    %cst_333 = arith.constant 0.000000e+00 : f32
    %731 = vector.broadcast %cst_333 : f32 to vector<8x8xf32>
    %732 = arith.cmpf ogt, %73, %731 : vector<8x8xf32>
    %cst_334 = arith.constant -1.000000e+09 : f32
    %733 = vector.broadcast %cst_334 : f32 to vector<8x8xf32>
    %734 = arith.select %732, %730, %733 : vector<8x8xi1>, vector<8x8xf32>
    %cst_335 = arith.constant dense<0xFF800000> : vector<8xf32>
    %735 = vector.multi_reduction <maximumf>, %734, %cst_335 [1] : vector<8x8xf32> to vector<8xf32>
    %736 = vector.shape_cast %735 : vector<8xf32> to vector<8x1xf32>
    %737 = vector.broadcast %736 : vector<8x1xf32> to vector<8x8xf32>
    %738 = arith.subf %734, %737 : vector<8x8xf32>
    %739 = math.exp %738 : vector<8x8xf32>
    %cst_336 = arith.constant dense<0.000000e+00> : vector<8xf32>
    %740 = vector.multi_reduction <add>, %739, %cst_336 [1] : vector<8x8xf32> to vector<8xf32>
    %741 = vector.shape_cast %740 : vector<8xf32> to vector<8x1xf32>
    %742 = vector.broadcast %741 : vector<8x1xf32> to vector<8x8xf32>
    %743 = arith.divf %739, %742 : vector<8x8xf32>
    %cst_337 = arith.constant dense<0.000000e+00> : vector<8x8xf32>
    %744 = tpu.matmul %743, %727, %cst_337 {dimension_numbers = #tpu.dot_dimension_numbers<[1], [0], [0], [1], [0, 0, 1, 1], [], []>} : vector<8x8xf32>, vector<8x8xf32>, vector<8x8xf32> -> vector<8x8xf32>
    %745 = vector.extract_strided_slice %702 {offsets = [0, 16], sizes = [8, 8], strides = [1, 1]} : vector<8x32xf32> to vector<8x8xf32>
    %746 = vector.extract_strided_slice %703 {offsets = [0, 16], sizes = [8, 8], strides = [1, 1]} : vector<8x32xf32> to vector<8x8xf32>
    %747 = vector.extract_strided_slice %704 {offsets = [0, 16], sizes = [8, 8], strides = [1, 1]} : vector<8x32xf32> to vector<8x8xf32>
    %cst_338 = arith.constant dense<0.000000e+00> : vector<8x8xf32>
    %748 = tpu.matmul %745, %746, %cst_338 {dimension_numbers = #tpu.dot_dimension_numbers<[1], [1], [0], [0], [0, 0, 1, 0], [], []>} : vector<8x8xf32>, vector<8x8xf32>, vector<8x8xf32> -> vector<8x8xf32>
    %cst_339 = arith.constant 0.353553385 : f32
    %749 = vector.broadcast %cst_339 : f32 to vector<8x8xf32>
    %750 = arith.mulf %748, %749 : vector<8x8xf32>
    %cst_340 = arith.constant 0.000000e+00 : f32
    %751 = vector.broadcast %cst_340 : f32 to vector<8x8xf32>
    %752 = arith.cmpf ogt, %73, %751 : vector<8x8xf32>
    %cst_341 = arith.constant -1.000000e+09 : f32
    %753 = vector.broadcast %cst_341 : f32 to vector<8x8xf32>
    %754 = arith.select %752, %750, %753 : vector<8x8xi1>, vector<8x8xf32>
    %cst_342 = arith.constant dense<0xFF800000> : vector<8xf32>
    %755 = vector.multi_reduction <maximumf>, %754, %cst_342 [1] : vector<8x8xf32> to vector<8xf32>
    %756 = vector.shape_cast %755 : vector<8xf32> to vector<8x1xf32>
    %757 = vector.broadcast %756 : vector<8x1xf32> to vector<8x8xf32>
    %758 = arith.subf %754, %757 : vector<8x8xf32>
    %759 = math.exp %758 : vector<8x8xf32>
    %cst_343 = arith.constant dense<0.000000e+00> : vector<8xf32>
    %760 = vector.multi_reduction <add>, %759, %cst_343 [1] : vector<8x8xf32> to vector<8xf32>
    %761 = vector.shape_cast %760 : vector<8xf32> to vector<8x1xf32>
    %762 = vector.broadcast %761 : vector<8x1xf32> to vector<8x8xf32>
    %763 = arith.divf %759, %762 : vector<8x8xf32>
    %cst_344 = arith.constant dense<0.000000e+00> : vector<8x8xf32>
    %764 = tpu.matmul %763, %747, %cst_344 {dimension_numbers = #tpu.dot_dimension_numbers<[1], [0], [0], [1], [0, 0, 1, 1], [], []>} : vector<8x8xf32>, vector<8x8xf32>, vector<8x8xf32> -> vector<8x8xf32>
    %765 = vector.extract_strided_slice %702 {offsets = [0, 24], sizes = [8, 8], strides = [1, 1]} : vector<8x32xf32> to vector<8x8xf32>
    %766 = vector.extract_strided_slice %703 {offsets = [0, 24], sizes = [8, 8], strides = [1, 1]} : vector<8x32xf32> to vector<8x8xf32>
    %767 = vector.extract_strided_slice %704 {offsets = [0, 24], sizes = [8, 8], strides = [1, 1]} : vector<8x32xf32> to vector<8x8xf32>
    %cst_345 = arith.constant dense<0.000000e+00> : vector<8x8xf32>
    %768 = tpu.matmul %765, %766, %cst_345 {dimension_numbers = #tpu.dot_dimension_numbers<[1], [1], [0], [0], [0, 0, 1, 0], [], []>} : vector<8x8xf32>, vector<8x8xf32>, vector<8x8xf32> -> vector<8x8xf32>
    %cst_346 = arith.constant 0.353553385 : f32
    %769 = vector.broadcast %cst_346 : f32 to vector<8x8xf32>
    %770 = arith.mulf %768, %769 : vector<8x8xf32>
    %cst_347 = arith.constant 0.000000e+00 : f32
    %771 = vector.broadcast %cst_347 : f32 to vector<8x8xf32>
    %772 = arith.cmpf ogt, %73, %771 : vector<8x8xf32>
    %cst_348 = arith.constant -1.000000e+09 : f32
    %773 = vector.broadcast %cst_348 : f32 to vector<8x8xf32>
    %774 = arith.select %772, %770, %773 : vector<8x8xi1>, vector<8x8xf32>
    %cst_349 = arith.constant dense<0xFF800000> : vector<8xf32>
    %775 = vector.multi_reduction <maximumf>, %774, %cst_349 [1] : vector<8x8xf32> to vector<8xf32>
    %776 = vector.shape_cast %775 : vector<8xf32> to vector<8x1xf32>
    %777 = vector.broadcast %776 : vector<8x1xf32> to vector<8x8xf32>
    %778 = arith.subf %774, %777 : vector<8x8xf32>
    %779 = math.exp %778 : vector<8x8xf32>
    %cst_350 = arith.constant dense<0.000000e+00> : vector<8xf32>
    %780 = vector.multi_reduction <add>, %779, %cst_350 [1] : vector<8x8xf32> to vector<8xf32>
    %781 = vector.shape_cast %780 : vector<8xf32> to vector<8x1xf32>
    %782 = vector.broadcast %781 : vector<8x1xf32> to vector<8x8xf32>
    %783 = arith.divf %779, %782 : vector<8x8xf32>
    %cst_351 = arith.constant dense<0.000000e+00> : vector<8x8xf32>
    %784 = tpu.matmul %783, %767, %cst_351 {dimension_numbers = #tpu.dot_dimension_numbers<[1], [0], [0], [1], [0, 0, 1, 1], [], []>} : vector<8x8xf32>, vector<8x8xf32>, vector<8x8xf32> -> vector<8x8xf32>
    %785 = tpu.concatenate %724, %744, %764, %784 in 1 : vector<8x8xf32>, vector<8x8xf32>, vector<8x8xf32>, vector<8x8xf32> -> vector<8x32xf32>
    %786 = arith.truncf %785 : vector<8x32xf32> to vector<8x32xbf16>
    %787 = arith.truncf %34 : vector<32x32xf32> to vector<32x32xbf16>
    %cst_352 = arith.constant dense<0.000000e+00> : vector<8x32xf32>
    %788 = tpu.matmul %786, %787, %cst_352 {dimension_numbers = #tpu.dot_dimension_numbers<[1], [0], [0], [1], [0, 0, 1, 1], [], []>} : vector<8x32xbf16>, vector<32x32xbf16>, vector<8x32xf32> -> vector<8x32xf32>
    %789 = vector.broadcast %32 : vector<1x32xf32> to vector<8x32xf32>
    %790 = arith.addf %788, %789 : vector<8x32xf32>
    %791 = arith.addf %674, %790 : vector<8x32xf32>
    %cst_353 = arith.constant dense<0.000000e+00> : vector<8xf32>
    %792 = vector.multi_reduction <add>, %791, %cst_353 [1] : vector<8x32xf32> to vector<8xf32>
    %793 = vector.shape_cast %792 : vector<8xf32> to vector<8x1xf32>
    %cst_354 = arith.constant 3.200000e+01 : f32
    %794 = vector.broadcast %cst_354 : f32 to vector<8x1xf32>
    %795 = arith.divf %793, %794 : vector<8x1xf32>
    %796 = vector.broadcast %795 : vector<8x1xf32> to vector<8x32xf32>
    %797 = arith.subf %791, %796 : vector<8x32xf32>
    %798 = arith.mulf %797, %797 : vector<8x32xf32>
    %cst_355 = arith.constant dense<0.000000e+00> : vector<8xf32>
    %799 = vector.multi_reduction <add>, %798, %cst_355 [1] : vector<8x32xf32> to vector<8xf32>
    %800 = vector.shape_cast %799 : vector<8xf32> to vector<8x1xf32>
    %cst_356 = arith.constant 3.200000e+01 : f32
    %801 = vector.broadcast %cst_356 : f32 to vector<8x1xf32>
    %802 = arith.divf %800, %801 : vector<8x1xf32>
    %803 = vector.broadcast %795 : vector<8x1xf32> to vector<8x32xf32>
    %804 = arith.subf %791, %803 : vector<8x32xf32>
    %cst_357 = arith.constant 9.99999974E-6 : f32
    %805 = vector.broadcast %cst_357 : f32 to vector<8x1xf32>
    %806 = arith.addf %802, %805 : vector<8x1xf32>
    %807 = math.rsqrt %806 : vector<8x1xf32>
    %808 = vector.broadcast %807 : vector<8x1xf32> to vector<8x32xf32>
    %809 = arith.mulf %804, %808 : vector<8x32xf32>
    %810 = vector.broadcast %29 : vector<1x32xf32> to vector<8x32xf32>
    %811 = arith.mulf %809, %810 : vector<8x32xf32>
    %812 = vector.broadcast %28 : vector<1x32xf32> to vector<8x32xf32>
    %813 = arith.addf %811, %812 : vector<8x32xf32>
    %814 = arith.truncf %813 : vector<8x32xf32> to vector<8x32xbf16>
    %815 = arith.truncf %41 : vector<32x32xf32> to vector<32x32xbf16>
    %cst_358 = arith.constant dense<0.000000e+00> : vector<8x32xf32>
    %816 = tpu.matmul %814, %815, %cst_358 {dimension_numbers = #tpu.dot_dimension_numbers<[1], [0], [0], [1], [0, 0, 1, 1], [], []>} : vector<8x32xbf16>, vector<32x32xbf16>, vector<8x32xf32> -> vector<8x32xf32>
    %817 = vector.broadcast %38 : vector<1x32xf32> to vector<8x32xf32>
    %818 = arith.addf %816, %817 : vector<8x32xf32>
    %819 = arith.truncf %400 : vector<8x32xf32> to vector<8x32xbf16>
    %820 = arith.truncf %39 : vector<32x64xf32> to vector<32x64xbf16>
    %cst_359 = arith.constant dense<0.000000e+00> : vector<8x64xf32>
    %821 = tpu.matmul %819, %820, %cst_359 {dimension_numbers = #tpu.dot_dimension_numbers<[1], [0], [0], [1], [0, 0, 1, 1], [], []>} : vector<8x32xbf16>, vector<32x64xbf16>, vector<8x64xf32> -> vector<8x64xf32>
    %822 = vector.broadcast %36 : vector<1x64xf32> to vector<8x64xf32>
    %823 = arith.addf %821, %822 : vector<8x64xf32>
    %824 = vector.extract_strided_slice %823 {offsets = [0, 0], sizes = [8, 32], strides = [1, 1]} : vector<8x64xf32> to vector<8x32xf32>
    %825 = vector.extract_strided_slice %823 {offsets = [0, 32], sizes = [8, 32], strides = [1, 1]} : vector<8x64xf32> to vector<8x32xf32>
    %826 = vector.extract_strided_slice %818 {offsets = [0, 0], sizes = [8, 8], strides = [1, 1]} : vector<8x32xf32> to vector<8x8xf32>
    %827 = vector.extract_strided_slice %824 {offsets = [0, 0], sizes = [8, 8], strides = [1, 1]} : vector<8x32xf32> to vector<8x8xf32>
    %828 = vector.extract_strided_slice %825 {offsets = [0, 0], sizes = [8, 8], strides = [1, 1]} : vector<8x32xf32> to vector<8x8xf32>
    %cst_360 = arith.constant dense<0.000000e+00> : vector<8x8xf32>
    %829 = tpu.matmul %826, %827, %cst_360 {dimension_numbers = #tpu.dot_dimension_numbers<[1], [1], [0], [0], [0, 0, 1, 0], [], []>} : vector<8x8xf32>, vector<8x8xf32>, vector<8x8xf32> -> vector<8x8xf32>
    %cst_361 = arith.constant 0.353553385 : f32
    %830 = vector.broadcast %cst_361 : f32 to vector<8x8xf32>
    %831 = arith.mulf %829, %830 : vector<8x8xf32>
    %cst_362 = arith.constant 0.000000e+00 : f32
    %832 = vector.broadcast %cst_362 : f32 to vector<8x8xf32>
    %833 = arith.cmpf ogt, %71, %832 : vector<8x8xf32>
    %cst_363 = arith.constant -1.000000e+09 : f32
    %834 = vector.broadcast %cst_363 : f32 to vector<8x8xf32>
    %835 = arith.select %833, %831, %834 : vector<8x8xi1>, vector<8x8xf32>
    %cst_364 = arith.constant dense<0xFF800000> : vector<8xf32>
    %836 = vector.multi_reduction <maximumf>, %835, %cst_364 [1] : vector<8x8xf32> to vector<8xf32>
    %837 = vector.shape_cast %836 : vector<8xf32> to vector<8x1xf32>
    %838 = vector.broadcast %837 : vector<8x1xf32> to vector<8x8xf32>
    %839 = arith.subf %835, %838 : vector<8x8xf32>
    %840 = math.exp %839 : vector<8x8xf32>
    %cst_365 = arith.constant dense<0.000000e+00> : vector<8xf32>
    %841 = vector.multi_reduction <add>, %840, %cst_365 [1] : vector<8x8xf32> to vector<8xf32>
    %842 = vector.shape_cast %841 : vector<8xf32> to vector<8x1xf32>
    %843 = vector.broadcast %842 : vector<8x1xf32> to vector<8x8xf32>
    %844 = arith.divf %840, %843 : vector<8x8xf32>
    %cst_366 = arith.constant dense<0.000000e+00> : vector<8x8xf32>
    %845 = tpu.matmul %844, %828, %cst_366 {dimension_numbers = #tpu.dot_dimension_numbers<[1], [0], [0], [1], [0, 0, 1, 1], [], []>} : vector<8x8xf32>, vector<8x8xf32>, vector<8x8xf32> -> vector<8x8xf32>
    %846 = vector.extract_strided_slice %818 {offsets = [0, 8], sizes = [8, 8], strides = [1, 1]} : vector<8x32xf32> to vector<8x8xf32>
    %847 = vector.extract_strided_slice %824 {offsets = [0, 8], sizes = [8, 8], strides = [1, 1]} : vector<8x32xf32> to vector<8x8xf32>
    %848 = vector.extract_strided_slice %825 {offsets = [0, 8], sizes = [8, 8], strides = [1, 1]} : vector<8x32xf32> to vector<8x8xf32>
    %cst_367 = arith.constant dense<0.000000e+00> : vector<8x8xf32>
    %849 = tpu.matmul %846, %847, %cst_367 {dimension_numbers = #tpu.dot_dimension_numbers<[1], [1], [0], [0], [0, 0, 1, 0], [], []>} : vector<8x8xf32>, vector<8x8xf32>, vector<8x8xf32> -> vector<8x8xf32>
    %cst_368 = arith.constant 0.353553385 : f32
    %850 = vector.broadcast %cst_368 : f32 to vector<8x8xf32>
    %851 = arith.mulf %849, %850 : vector<8x8xf32>
    %cst_369 = arith.constant 0.000000e+00 : f32
    %852 = vector.broadcast %cst_369 : f32 to vector<8x8xf32>
    %853 = arith.cmpf ogt, %71, %852 : vector<8x8xf32>
    %cst_370 = arith.constant -1.000000e+09 : f32
    %854 = vector.broadcast %cst_370 : f32 to vector<8x8xf32>
    %855 = arith.select %853, %851, %854 : vector<8x8xi1>, vector<8x8xf32>
    %cst_371 = arith.constant dense<0xFF800000> : vector<8xf32>
    %856 = vector.multi_reduction <maximumf>, %855, %cst_371 [1] : vector<8x8xf32> to vector<8xf32>
    %857 = vector.shape_cast %856 : vector<8xf32> to vector<8x1xf32>
    %858 = vector.broadcast %857 : vector<8x1xf32> to vector<8x8xf32>
    %859 = arith.subf %855, %858 : vector<8x8xf32>
    %860 = math.exp %859 : vector<8x8xf32>
    %cst_372 = arith.constant dense<0.000000e+00> : vector<8xf32>
    %861 = vector.multi_reduction <add>, %860, %cst_372 [1] : vector<8x8xf32> to vector<8xf32>
    %862 = vector.shape_cast %861 : vector<8xf32> to vector<8x1xf32>
    %863 = vector.broadcast %862 : vector<8x1xf32> to vector<8x8xf32>
    %864 = arith.divf %860, %863 : vector<8x8xf32>
    %cst_373 = arith.constant dense<0.000000e+00> : vector<8x8xf32>
    %865 = tpu.matmul %864, %848, %cst_373 {dimension_numbers = #tpu.dot_dimension_numbers<[1], [0], [0], [1], [0, 0, 1, 1], [], []>} : vector<8x8xf32>, vector<8x8xf32>, vector<8x8xf32> -> vector<8x8xf32>
    %866 = vector.extract_strided_slice %818 {offsets = [0, 16], sizes = [8, 8], strides = [1, 1]} : vector<8x32xf32> to vector<8x8xf32>
    %867 = vector.extract_strided_slice %824 {offsets = [0, 16], sizes = [8, 8], strides = [1, 1]} : vector<8x32xf32> to vector<8x8xf32>
    %868 = vector.extract_strided_slice %825 {offsets = [0, 16], sizes = [8, 8], strides = [1, 1]} : vector<8x32xf32> to vector<8x8xf32>
    %cst_374 = arith.constant dense<0.000000e+00> : vector<8x8xf32>
    %869 = tpu.matmul %866, %867, %cst_374 {dimension_numbers = #tpu.dot_dimension_numbers<[1], [1], [0], [0], [0, 0, 1, 0], [], []>} : vector<8x8xf32>, vector<8x8xf32>, vector<8x8xf32> -> vector<8x8xf32>
    %cst_375 = arith.constant 0.353553385 : f32
    %870 = vector.broadcast %cst_375 : f32 to vector<8x8xf32>
    %871 = arith.mulf %869, %870 : vector<8x8xf32>
    %cst_376 = arith.constant 0.000000e+00 : f32
    %872 = vector.broadcast %cst_376 : f32 to vector<8x8xf32>
    %873 = arith.cmpf ogt, %71, %872 : vector<8x8xf32>
    %cst_377 = arith.constant -1.000000e+09 : f32
    %874 = vector.broadcast %cst_377 : f32 to vector<8x8xf32>
    %875 = arith.select %873, %871, %874 : vector<8x8xi1>, vector<8x8xf32>
    %cst_378 = arith.constant dense<0xFF800000> : vector<8xf32>
    %876 = vector.multi_reduction <maximumf>, %875, %cst_378 [1] : vector<8x8xf32> to vector<8xf32>
    %877 = vector.shape_cast %876 : vector<8xf32> to vector<8x1xf32>
    %878 = vector.broadcast %877 : vector<8x1xf32> to vector<8x8xf32>
    %879 = arith.subf %875, %878 : vector<8x8xf32>
    %880 = math.exp %879 : vector<8x8xf32>
    %cst_379 = arith.constant dense<0.000000e+00> : vector<8xf32>
    %881 = vector.multi_reduction <add>, %880, %cst_379 [1] : vector<8x8xf32> to vector<8xf32>
    %882 = vector.shape_cast %881 : vector<8xf32> to vector<8x1xf32>
    %883 = vector.broadcast %882 : vector<8x1xf32> to vector<8x8xf32>
    %884 = arith.divf %880, %883 : vector<8x8xf32>
    %cst_380 = arith.constant dense<0.000000e+00> : vector<8x8xf32>
    %885 = tpu.matmul %884, %868, %cst_380 {dimension_numbers = #tpu.dot_dimension_numbers<[1], [0], [0], [1], [0, 0, 1, 1], [], []>} : vector<8x8xf32>, vector<8x8xf32>, vector<8x8xf32> -> vector<8x8xf32>
    %886 = vector.extract_strided_slice %818 {offsets = [0, 24], sizes = [8, 8], strides = [1, 1]} : vector<8x32xf32> to vector<8x8xf32>
    %887 = vector.extract_strided_slice %824 {offsets = [0, 24], sizes = [8, 8], strides = [1, 1]} : vector<8x32xf32> to vector<8x8xf32>
    %888 = vector.extract_strided_slice %825 {offsets = [0, 24], sizes = [8, 8], strides = [1, 1]} : vector<8x32xf32> to vector<8x8xf32>
    %cst_381 = arith.constant dense<0.000000e+00> : vector<8x8xf32>
    %889 = tpu.matmul %886, %887, %cst_381 {dimension_numbers = #tpu.dot_dimension_numbers<[1], [1], [0], [0], [0, 0, 1, 0], [], []>} : vector<8x8xf32>, vector<8x8xf32>, vector<8x8xf32> -> vector<8x8xf32>
    %cst_382 = arith.constant 0.353553385 : f32
    %890 = vector.broadcast %cst_382 : f32 to vector<8x8xf32>
    %891 = arith.mulf %889, %890 : vector<8x8xf32>
    %cst_383 = arith.constant 0.000000e+00 : f32
    %892 = vector.broadcast %cst_383 : f32 to vector<8x8xf32>
    %893 = arith.cmpf ogt, %71, %892 : vector<8x8xf32>
    %cst_384 = arith.constant -1.000000e+09 : f32
    %894 = vector.broadcast %cst_384 : f32 to vector<8x8xf32>
    %895 = arith.select %893, %891, %894 : vector<8x8xi1>, vector<8x8xf32>
    %cst_385 = arith.constant dense<0xFF800000> : vector<8xf32>
    %896 = vector.multi_reduction <maximumf>, %895, %cst_385 [1] : vector<8x8xf32> to vector<8xf32>
    %897 = vector.shape_cast %896 : vector<8xf32> to vector<8x1xf32>
    %898 = vector.broadcast %897 : vector<8x1xf32> to vector<8x8xf32>
    %899 = arith.subf %895, %898 : vector<8x8xf32>
    %900 = math.exp %899 : vector<8x8xf32>
    %cst_386 = arith.constant dense<0.000000e+00> : vector<8xf32>
    %901 = vector.multi_reduction <add>, %900, %cst_386 [1] : vector<8x8xf32> to vector<8xf32>
    %902 = vector.shape_cast %901 : vector<8xf32> to vector<8x1xf32>
    %903 = vector.broadcast %902 : vector<8x1xf32> to vector<8x8xf32>
    %904 = arith.divf %900, %903 : vector<8x8xf32>
    %cst_387 = arith.constant dense<0.000000e+00> : vector<8x8xf32>
    %905 = tpu.matmul %904, %888, %cst_387 {dimension_numbers = #tpu.dot_dimension_numbers<[1], [0], [0], [1], [0, 0, 1, 1], [], []>} : vector<8x8xf32>, vector<8x8xf32>, vector<8x8xf32> -> vector<8x8xf32>
    %906 = tpu.concatenate %845, %865, %885, %905 in 1 : vector<8x8xf32>, vector<8x8xf32>, vector<8x8xf32>, vector<8x8xf32> -> vector<8x32xf32>
    %907 = arith.truncf %906 : vector<8x32xf32> to vector<8x32xbf16>
    %908 = arith.truncf %40 : vector<32x32xf32> to vector<32x32xbf16>
    %cst_388 = arith.constant dense<0.000000e+00> : vector<8x32xf32>
    %909 = tpu.matmul %907, %908, %cst_388 {dimension_numbers = #tpu.dot_dimension_numbers<[1], [0], [0], [1], [0, 0, 1, 1], [], []>} : vector<8x32xbf16>, vector<32x32xbf16>, vector<8x32xf32> -> vector<8x32xf32>
    %910 = vector.broadcast %37 : vector<1x32xf32> to vector<8x32xf32>
    %911 = arith.addf %909, %910 : vector<8x32xf32>
    %912 = arith.addf %791, %911 : vector<8x32xf32>
    %cst_389 = arith.constant dense<0.000000e+00> : vector<8xf32>
    %913 = vector.multi_reduction <add>, %912, %cst_389 [1] : vector<8x32xf32> to vector<8xf32>
    %914 = vector.shape_cast %913 : vector<8xf32> to vector<8x1xf32>
    %cst_390 = arith.constant 3.200000e+01 : f32
    %915 = vector.broadcast %cst_390 : f32 to vector<8x1xf32>
    %916 = arith.divf %914, %915 : vector<8x1xf32>
    %917 = vector.broadcast %916 : vector<8x1xf32> to vector<8x32xf32>
    %918 = arith.subf %912, %917 : vector<8x32xf32>
    %919 = arith.mulf %918, %918 : vector<8x32xf32>
    %cst_391 = arith.constant dense<0.000000e+00> : vector<8xf32>
    %920 = vector.multi_reduction <add>, %919, %cst_391 [1] : vector<8x32xf32> to vector<8xf32>
    %921 = vector.shape_cast %920 : vector<8xf32> to vector<8x1xf32>
    %cst_392 = arith.constant 3.200000e+01 : f32
    %922 = vector.broadcast %cst_392 : f32 to vector<8x1xf32>
    %923 = arith.divf %921, %922 : vector<8x1xf32>
    %924 = vector.broadcast %916 : vector<8x1xf32> to vector<8x32xf32>
    %925 = arith.subf %912, %924 : vector<8x32xf32>
    %cst_393 = arith.constant 9.99999974E-6 : f32
    %926 = vector.broadcast %cst_393 : f32 to vector<8x1xf32>
    %927 = arith.addf %923, %926 : vector<8x1xf32>
    %928 = math.rsqrt %927 : vector<8x1xf32>
    %929 = vector.broadcast %928 : vector<8x1xf32> to vector<8x32xf32>
    %930 = arith.mulf %925, %929 : vector<8x32xf32>
    %931 = vector.broadcast %31 : vector<1x32xf32> to vector<8x32xf32>
    %932 = arith.mulf %930, %931 : vector<8x32xf32>
    %933 = vector.broadcast %30 : vector<1x32xf32> to vector<8x32xf32>
    %934 = arith.addf %932, %933 : vector<8x32xf32>
    %935 = arith.truncf %934 : vector<8x32xf32> to vector<8x32xbf16>
    %936 = arith.truncf %24 : vector<32x64xf32> to vector<32x64xbf16>
    %cst_394 = arith.constant dense<0.000000e+00> : vector<8x64xf32>
    %937 = tpu.matmul %935, %936, %cst_394 {dimension_numbers = #tpu.dot_dimension_numbers<[1], [0], [0], [1], [0, 0, 1, 1], [], []>} : vector<8x32xbf16>, vector<32x64xbf16>, vector<8x64xf32> -> vector<8x64xf32>
    %938 = vector.broadcast %22 : vector<1x64xf32> to vector<8x64xf32>
    %939 = arith.addf %937, %938 : vector<8x64xf32>
    %cst_395 = arith.constant 0.000000e+00 : f32
    %940 = vector.broadcast %cst_395 : f32 to vector<8x64xf32>
    %941 = arith.maximumf %939, %940 : vector<8x64xf32>
    %942 = arith.truncf %941 : vector<8x64xf32> to vector<8x64xbf16>
    %943 = arith.truncf %25 : vector<64x32xf32> to vector<64x32xbf16>
    %cst_396 = arith.constant dense<0.000000e+00> : vector<8x32xf32>
    %944 = tpu.matmul %942, %943, %cst_396 {dimension_numbers = #tpu.dot_dimension_numbers<[1], [0], [0], [1], [0, 0, 1, 1], [], []>} : vector<8x64xbf16>, vector<64x32xbf16>, vector<8x32xf32> -> vector<8x32xf32>
    %945 = vector.broadcast %23 : vector<1x32xf32> to vector<8x32xf32>
    %946 = arith.addf %944, %945 : vector<8x32xf32>
    %947 = arith.addf %912, %946 : vector<8x32xf32>
    %cst_397 = arith.constant dense<0.000000e+00> : vector<8xf32>
    %948 = vector.multi_reduction <add>, %947, %cst_397 [1] : vector<8x32xf32> to vector<8xf32>
    %949 = vector.shape_cast %948 : vector<8xf32> to vector<8x1xf32>
    %cst_398 = arith.constant 3.200000e+01 : f32
    %950 = vector.broadcast %cst_398 : f32 to vector<8x1xf32>
    %951 = arith.divf %949, %950 : vector<8x1xf32>
    %952 = vector.broadcast %951 : vector<8x1xf32> to vector<8x32xf32>
    %953 = arith.subf %947, %952 : vector<8x32xf32>
    %954 = arith.mulf %953, %953 : vector<8x32xf32>
    %cst_399 = arith.constant dense<0.000000e+00> : vector<8xf32>
    %955 = vector.multi_reduction <add>, %954, %cst_399 [1] : vector<8x32xf32> to vector<8xf32>
    %956 = vector.shape_cast %955 : vector<8xf32> to vector<8x1xf32>
    %cst_400 = arith.constant 3.200000e+01 : f32
    %957 = vector.broadcast %cst_400 : f32 to vector<8x1xf32>
    %958 = arith.divf %956, %957 : vector<8x1xf32>
    %959 = vector.broadcast %951 : vector<8x1xf32> to vector<8x32xf32>
    %960 = arith.subf %947, %959 : vector<8x32xf32>
    %cst_401 = arith.constant 9.99999974E-6 : f32
    %961 = vector.broadcast %cst_401 : f32 to vector<8x1xf32>
    %962 = arith.addf %958, %961 : vector<8x1xf32>
    %963 = math.rsqrt %962 : vector<8x1xf32>
    %964 = vector.broadcast %963 : vector<8x1xf32> to vector<8x32xf32>
    %965 = arith.mulf %960, %964 : vector<8x32xf32>
    %966 = vector.broadcast %1 : vector<1x32xf32> to vector<8x32xf32>
    %967 = arith.mulf %965, %966 : vector<8x32xf32>
    %968 = vector.broadcast %0 : vector<1x32xf32> to vector<8x32xf32>
    %969 = arith.addf %967, %968 : vector<8x32xf32>
    %970 = arith.truncf %969 : vector<8x32xf32> to vector<8x32xbf16>
    %971 = arith.truncf %69 : vector<32x128xf32> to vector<32x128xbf16>
    %cst_402 = arith.constant dense<0.000000e+00> : vector<8x128xf32>
    %972 = tpu.matmul %970, %971, %cst_402 {dimension_numbers = #tpu.dot_dimension_numbers<[1], [0], [0], [1], [0, 0, 1, 1], [], []>} : vector<8x32xbf16>, vector<32x128xbf16>, vector<8x128xf32> -> vector<8x128xf32>
    %973 = vector.broadcast %68 : vector<1x128xf32> to vector<8x128xf32>
    %974 = arith.addf %972, %973 : vector<8x128xf32>
    %cst_403 = arith.constant dense<0xFF800000> : vector<8xf32>
    %975 = vector.multi_reduction <maximumf>, %974, %cst_403 [1] : vector<8x128xf32> to vector<8xf32>
    %976 = vector.shape_cast %975 : vector<8xf32> to vector<8x1xf32>
    %977 = vector.broadcast %976 : vector<8x1xf32> to vector<8x128xf32>
    %978 = arith.subf %974, %977 : vector<8x128xf32>
    %979 = math.exp %978 : vector<8x128xf32>
    %cst_404 = arith.constant dense<0.000000e+00> : vector<8xf32>
    %980 = vector.multi_reduction <add>, %979, %cst_404 [1] : vector<8x128xf32> to vector<8xf32>
    %981 = vector.shape_cast %980 : vector<8xf32> to vector<8x1xf32>
    %982 = math.log %981 : vector<8x1xf32>
    %983 = vector.broadcast %982 : vector<8x1xf32> to vector<8x128xf32>
    %984 = arith.subf %978, %983 : vector<8x128xf32>
    %c0_405 = arith.constant 0 : index
    %c0_406 = arith.constant 0 : index
    %985 = vector.load %arg75[%c0_405, %c0_406] : memref<8x128xf32, #tpu.memory_space<vmem>>, vector<8x128xf32>
    tpu.vector_store %arg75[%c0_405, %c0_406], %984 {strides = array<i32>} : memref<8x128xf32, #tpu.memory_space<vmem>>, vector<8x128xf32>,
    return
  }
  func.func @transform_0(%arg0: i32) -> (i32, i32) {
    %c0_i32 = arith.constant 0 : i32
    %c0_i32_0 = arith.constant 0 : i32
    return %arg0, %c0_i32 : i32, i32
  }
  func.func @transform_1(%arg0: i32) -> (i32, i32) {
    %c0_i32 = arith.constant 0 : i32
    %c0_i32_0 = arith.constant 0 : i32
    return %arg0, %c0_i32 : i32, i32
  }
  func.func @transform_2(%arg0: i32) -> (i32, i32, i32) {
    %c0_i32 = arith.constant 0 : i32
    %c0_i32_0 = arith.constant 0 : i32
    %c0_i32_1 = arith.constant 0 : i32
    return %arg0, %c0_i32, %c0_i32_0 : i32, i32, i32
  }
  func.func @transform_3(%arg0: i32) -> (i32, i32, i32) {
    %c0_i32 = arith.constant 0 : i32
    %c0_i32_0 = arith.constant 0 : i32
    %c0_i32_1 = arith.constant 0 : i32
    return %arg0, %c0_i32, %c0_i32_0 : i32, i32, i32
  }
  func.func @transform_4(%arg0: i32) -> (i32, i32) {
    %c0_i32 = arith.constant 0 : i32
    %c0_i32_0 = arith.constant 0 : i32
    %c0_i32_1 = arith.constant 0 : i32
    return %c0_i32, %c0_i32_0 : i32, i32
  }
  func.func @transform_5(%arg0: i32) -> (i32, i32) {
    %c0_i32 = arith.constant 0 : i32
    %c0_i32_0 = arith.constant 0 : i32
    %c0_i32_1 = arith.constant 0 : i32
    return %c0_i32, %c0_i32_0 : i32, i32
  }
  func.func @transform_6(%arg0: i32) -> (i32, i32) {
    %c0_i32 = arith.constant 0 : i32
    %c0_i32_0 = arith.constant 0 : i32
    %c0_i32_1 = arith.constant 0 : i32
    return %c0_i32, %c0_i32_0 : i32, i32
  }
  func.func @transform_7(%arg0: i32) -> (i32, i32) {
    %c0_i32 = arith.constant 0 : i32
    %c0_i32_0 = arith.constant 0 : i32
    %c0_i32_1 = arith.constant 0 : i32
    return %c0_i32, %c0_i32_0 : i32, i32
  }
  func.func @transform_8(%arg0: i32) -> (i32, i32) {
    %c0_i32 = arith.constant 0 : i32
    %c0_i32_0 = arith.constant 0 : i32
    %c0_i32_1 = arith.constant 0 : i32
    return %c0_i32, %c0_i32_0 : i32, i32
  }
  func.func @transform_9(%arg0: i32) -> (i32, i32) {
    %c0_i32 = arith.constant 0 : i32
    %c0_i32_0 = arith.constant 0 : i32
    %c0_i32_1 = arith.constant 0 : i32
    return %c0_i32, %c0_i32_0 : i32, i32
  }
  func.func @transform_10(%arg0: i32) -> (i32, i32) {
    %c0_i32 = arith.constant 0 : i32
    %c0_i32_0 = arith.constant 0 : i32
    %c0_i32_1 = arith.constant 0 : i32
    return %c0_i32, %c0_i32_0 : i32, i32
  }
  func.func @transform_11(%arg0: i32) -> (i32, i32) {
    %c0_i32 = arith.constant 0 : i32
    %c0_i32_0 = arith.constant 0 : i32
    %c0_i32_1 = arith.constant 0 : i32
    return %c0_i32, %c0_i32_0 : i32, i32
  }
  func.func @transform_12(%arg0: i32) -> (i32, i32) {
    %c0_i32 = arith.constant 0 : i32
    %c0_i32_0 = arith.constant 0 : i32
    %c0_i32_1 = arith.constant 0 : i32
    return %c0_i32, %c0_i32_0 : i32, i32
  }
  func.func @transform_13(%arg0: i32) -> (i32, i32) {
    %c0_i32 = arith.constant 0 : i32
    %c0_i32_0 = arith.constant 0 : i32
    %c0_i32_1 = arith.constant 0 : i32
    return %c0_i32, %c0_i32_0 : i32, i32
  }
  func.func @transform_14(%arg0: i32) -> (i32, i32) {
    %c0_i32 = arith.constant 0 : i32
    %c0_i32_0 = arith.constant 0 : i32
    %c0_i32_1 = arith.constant 0 : i32
    return %c0_i32, %c0_i32_0 : i32, i32
  }
  func.func @transform_15(%arg0: i32) -> (i32, i32) {
    %c0_i32 = arith.constant 0 : i32
    %c0_i32_0 = arith.constant 0 : i32
    %c0_i32_1 = arith.constant 0 : i32
    return %c0_i32, %c0_i32_0 : i32, i32
  }
  func.func @transform_16(%arg0: i32) -> (i32, i32) {
    %c0_i32 = arith.constant 0 : i32
    %c0_i32_0 = arith.constant 0 : i32
    %c0_i32_1 = arith.constant 0 : i32
    return %c0_i32, %c0_i32_0 : i32, i32
  }
  func.func @transform_17(%arg0: i32) -> (i32, i32) {
    %c0_i32 = arith.constant 0 : i32
    %c0_i32_0 = arith.constant 0 : i32
    %c0_i32_1 = arith.constant 0 : i32
    return %c0_i32, %c0_i32_0 : i32, i32
  }
  func.func @transform_18(%arg0: i32) -> (i32, i32) {
    %c0_i32 = arith.constant 0 : i32
    %c0_i32_0 = arith.constant 0 : i32
    %c0_i32_1 = arith.constant 0 : i32
    return %c0_i32, %c0_i32_0 : i32, i32
  }
  func.func @transform_19(%arg0: i32) -> (i32, i32) {
    %c0_i32 = arith.constant 0 : i32
    %c0_i32_0 = arith.constant 0 : i32
    %c0_i32_1 = arith.constant 0 : i32
    return %c0_i32, %c0_i32_0 : i32, i32
  }
  func.func @transform_20(%arg0: i32) -> (i32, i32) {
    %c0_i32 = arith.constant 0 : i32
    %c0_i32_0 = arith.constant 0 : i32
    %c0_i32_1 = arith.constant 0 : i32
    return %c0_i32, %c0_i32_0 : i32, i32
  }
  func.func @transform_21(%arg0: i32) -> (i32, i32) {
    %c0_i32 = arith.constant 0 : i32
    %c0_i32_0 = arith.constant 0 : i32
    %c0_i32_1 = arith.constant 0 : i32
    return %c0_i32, %c0_i32_0 : i32, i32
  }
  func.func @transform_22(%arg0: i32) -> (i32, i32) {
    %c0_i32 = arith.constant 0 : i32
    %c0_i32_0 = arith.constant 0 : i32
    %c0_i32_1 = arith.constant 0 : i32
    return %c0_i32, %c0_i32_0 : i32, i32
  }
  func.func @transform_23(%arg0: i32) -> (i32, i32) {
    %c0_i32 = arith.constant 0 : i32
    %c0_i32_0 = arith.constant 0 : i32
    %c0_i32_1 = arith.constant 0 : i32
    return %c0_i32, %c0_i32_0 : i32, i32
  }
  func.func @transform_24(%arg0: i32) -> (i32, i32) {
    %c0_i32 = arith.constant 0 : i32
    %c0_i32_0 = arith.constant 0 : i32
    %c0_i32_1 = arith.constant 0 : i32
    return %c0_i32, %c0_i32_0 : i32, i32
  }
  func.func @transform_25(%arg0: i32) -> (i32, i32) {
    %c0_i32 = arith.constant 0 : i32
    %c0_i32_0 = arith.constant 0 : i32
    %c0_i32_1 = arith.constant 0 : i32
    return %c0_i32, %c0_i32_0 : i32, i32
  }
  func.func @transform_26(%arg0: i32) -> (i32, i32) {
    %c0_i32 = arith.constant 0 : i32
    %c0_i32_0 = arith.constant 0 : i32
    %c0_i32_1 = arith.constant 0 : i32
    return %c0_i32, %c0_i32_0 : i32, i32
  }
  func.func @transform_27(%arg0: i32) -> (i32, i32) {
    %c0_i32 = arith.constant 0 : i32
    %c0_i32_0 = arith.constant 0 : i32
    %c0_i32_1 = arith.constant 0 : i32
    return %c0_i32, %c0_i32_0 : i32, i32
  }
  func.func @transform_28(%arg0: i32) -> (i32, i32) {
    %c0_i32 = arith.constant 0 : i32
    %c0_i32_0 = arith.constant 0 : i32
    %c0_i32_1 = arith.constant 0 : i32
    return %c0_i32, %c0_i32_0 : i32, i32
  }
  func.func @transform_29(%arg0: i32) -> (i32, i32) {
    %c0_i32 = arith.constant 0 : i32
    %c0_i32_0 = arith.constant 0 : i32
    %c0_i32_1 = arith.constant 0 : i32
    return %c0_i32, %c0_i32_0 : i32, i32
  }
  func.func @transform_30(%arg0: i32) -> (i32, i32) {
    %c0_i32 = arith.constant 0 : i32
    %c0_i32_0 = arith.constant 0 : i32
    %c0_i32_1 = arith.constant 0 : i32
    return %c0_i32, %c0_i32_0 : i32, i32
  }
  func.func @transform_31(%arg0: i32) -> (i32, i32) {
    %c0_i32 = arith.constant 0 : i32
    %c0_i32_0 = arith.constant 0 : i32
    %c0_i32_1 = arith.constant 0 : i32
    return %c0_i32, %c0_i32_0 : i32, i32
  }
  func.func @transform_32(%arg0: i32) -> (i32, i32) {
    %c0_i32 = arith.constant 0 : i32
    %c0_i32_0 = arith.constant 0 : i32
    %c0_i32_1 = arith.constant 0 : i32
    return %c0_i32, %c0_i32_0 : i32, i32
  }
  func.func @transform_33(%arg0: i32) -> (i32, i32) {
    %c0_i32 = arith.constant 0 : i32
    %c0_i32_0 = arith.constant 0 : i32
    %c0_i32_1 = arith.constant 0 : i32
    return %c0_i32, %c0_i32_0 : i32, i32
  }
  func.func @transform_34(%arg0: i32) -> (i32, i32) {
    %c0_i32 = arith.constant 0 : i32
    %c0_i32_0 = arith.constant 0 : i32
    %c0_i32_1 = arith.constant 0 : i32
    return %c0_i32, %c0_i32_0 : i32, i32
  }
  func.func @transform_35(%arg0: i32) -> (i32, i32) {
    %c0_i32 = arith.constant 0 : i32
    %c0_i32_0 = arith.constant 0 : i32
    %c0_i32_1 = arith.constant 0 : i32
    return %c0_i32, %c0_i32_0 : i32, i32
  }
  func.func @transform_36(%arg0: i32) -> (i32, i32) {
    %c0_i32 = arith.constant 0 : i32
    %c0_i32_0 = arith.constant 0 : i32
    %c0_i32_1 = arith.constant 0 : i32
    return %c0_i32, %c0_i32_0 : i32, i32
  }
  func.func @transform_37(%arg0: i32) -> (i32, i32) {
    %c0_i32 = arith.constant 0 : i32
    %c0_i32_0 = arith.constant 0 : i32
    %c0_i32_1 = arith.constant 0 : i32
    return %c0_i32, %c0_i32_0 : i32, i32
  }
  func.func @transform_38(%arg0: i32) -> (i32, i32) {
    %c0_i32 = arith.constant 0 : i32
    %c0_i32_0 = arith.constant 0 : i32
    %c0_i32_1 = arith.constant 0 : i32
    return %c0_i32, %c0_i32_0 : i32, i32
  }
  func.func @transform_39(%arg0: i32) -> (i32, i32) {
    %c0_i32 = arith.constant 0 : i32
    %c0_i32_0 = arith.constant 0 : i32
    %c0_i32_1 = arith.constant 0 : i32
    return %c0_i32, %c0_i32_0 : i32, i32
  }
  func.func @transform_40(%arg0: i32) -> (i32, i32) {
    %c0_i32 = arith.constant 0 : i32
    %c0_i32_0 = arith.constant 0 : i32
    %c0_i32_1 = arith.constant 0 : i32
    return %c0_i32, %c0_i32_0 : i32, i32
  }
  func.func @transform_41(%arg0: i32) -> (i32, i32) {
    %c0_i32 = arith.constant 0 : i32
    %c0_i32_0 = arith.constant 0 : i32
    %c0_i32_1 = arith.constant 0 : i32
    return %c0_i32, %c0_i32_0 : i32, i32
  }
  func.func @transform_42(%arg0: i32) -> (i32, i32) {
    %c0_i32 = arith.constant 0 : i32
    %c0_i32_0 = arith.constant 0 : i32
    %c0_i32_1 = arith.constant 0 : i32
    return %c0_i32, %c0_i32_0 : i32, i32
  }
  func.func @transform_43(%arg0: i32) -> (i32, i32) {
    %c0_i32 = arith.constant 0 : i32
    %c0_i32_0 = arith.constant 0 : i32
    %c0_i32_1 = arith.constant 0 : i32
    return %c0_i32, %c0_i32_0 : i32, i32
  }
  func.func @transform_44(%arg0: i32) -> (i32, i32) {
    %c0_i32 = arith.constant 0 : i32
    %c0_i32_0 = arith.constant 0 : i32
    %c0_i32_1 = arith.constant 0 : i32
    return %c0_i32, %c0_i32_0 : i32, i32
  }
  func.func @transform_45(%arg0: i32) -> (i32, i32) {
    %c0_i32 = arith.constant 0 : i32
    %c0_i32_0 = arith.constant 0 : i32
    %c0_i32_1 = arith.constant 0 : i32
    return %c0_i32, %c0_i32_0 : i32, i32
  }
  func.func @transform_46(%arg0: i32) -> (i32, i32) {
    %c0_i32 = arith.constant 0 : i32
    %c0_i32_0 = arith.constant 0 : i32
    %c0_i32_1 = arith.constant 0 : i32
    return %c0_i32, %c0_i32_0 : i32, i32
  }
  func.func @transform_47(%arg0: i32) -> (i32, i32) {
    %c0_i32 = arith.constant 0 : i32
    %c0_i32_0 = arith.constant 0 : i32
    %c0_i32_1 = arith.constant 0 : i32
    return %c0_i32, %c0_i32_0 : i32, i32
  }
  func.func @transform_48(%arg0: i32) -> (i32, i32) {
    %c0_i32 = arith.constant 0 : i32
    %c0_i32_0 = arith.constant 0 : i32
    %c0_i32_1 = arith.constant 0 : i32
    return %c0_i32, %c0_i32_0 : i32, i32
  }
  func.func @transform_49(%arg0: i32) -> (i32, i32) {
    %c0_i32 = arith.constant 0 : i32
    %c0_i32_0 = arith.constant 0 : i32
    %c0_i32_1 = arith.constant 0 : i32
    return %c0_i32, %c0_i32_0 : i32, i32
  }
  func.func @transform_50(%arg0: i32) -> (i32, i32) {
    %c0_i32 = arith.constant 0 : i32
    %c0_i32_0 = arith.constant 0 : i32
    %c0_i32_1 = arith.constant 0 : i32
    return %c0_i32, %c0_i32_0 : i32, i32
  }
  func.func @transform_51(%arg0: i32) -> (i32, i32) {
    %c0_i32 = arith.constant 0 : i32
    %c0_i32_0 = arith.constant 0 : i32
    %c0_i32_1 = arith.constant 0 : i32
    return %c0_i32, %c0_i32_0 : i32, i32
  }
  func.func @transform_52(%arg0: i32) -> (i32, i32) {
    %c0_i32 = arith.constant 0 : i32
    %c0_i32_0 = arith.constant 0 : i32
    %c0_i32_1 = arith.constant 0 : i32
    return %c0_i32, %c0_i32_0 : i32, i32
  }
  func.func @transform_53(%arg0: i32) -> (i32, i32) {
    %c0_i32 = arith.constant 0 : i32
    %c0_i32_0 = arith.constant 0 : i32
    %c0_i32_1 = arith.constant 0 : i32
    return %c0_i32, %c0_i32_0 : i32, i32
  }
  func.func @transform_54(%arg0: i32) -> (i32, i32) {
    %c0_i32 = arith.constant 0 : i32
    %c0_i32_0 = arith.constant 0 : i32
    %c0_i32_1 = arith.constant 0 : i32
    return %c0_i32, %c0_i32_0 : i32, i32
  }
  func.func @transform_55(%arg0: i32) -> (i32, i32) {
    %c0_i32 = arith.constant 0 : i32
    %c0_i32_0 = arith.constant 0 : i32
    %c0_i32_1 = arith.constant 0 : i32
    return %c0_i32, %c0_i32_0 : i32, i32
  }
  func.func @transform_56(%arg0: i32) -> (i32, i32) {
    %c0_i32 = arith.constant 0 : i32
    %c0_i32_0 = arith.constant 0 : i32
    %c0_i32_1 = arith.constant 0 : i32
    return %c0_i32, %c0_i32_0 : i32, i32
  }
  func.func @transform_57(%arg0: i32) -> (i32, i32) {
    %c0_i32 = arith.constant 0 : i32
    %c0_i32_0 = arith.constant 0 : i32
    %c0_i32_1 = arith.constant 0 : i32
    return %c0_i32, %c0_i32_0 : i32, i32
  }
  func.func @transform_58(%arg0: i32) -> (i32, i32) {
    %c0_i32 = arith.constant 0 : i32
    %c0_i32_0 = arith.constant 0 : i32
    %c0_i32_1 = arith.constant 0 : i32
    return %c0_i32, %c0_i32_0 : i32, i32
  }
  func.func @transform_59(%arg0: i32) -> (i32, i32) {
    %c0_i32 = arith.constant 0 : i32
    %c0_i32_0 = arith.constant 0 : i32
    %c0_i32_1 = arith.constant 0 : i32
    return %c0_i32, %c0_i32_0 : i32, i32
  }
  func.func @transform_60(%arg0: i32) -> (i32, i32) {
    %c0_i32 = arith.constant 0 : i32
    %c0_i32_0 = arith.constant 0 : i32
    %c0_i32_1 = arith.constant 0 : i32
    return %c0_i32, %c0_i32_0 : i32, i32
  }
  func.func @transform_61(%arg0: i32) -> (i32, i32) {
    %c0_i32 = arith.constant 0 : i32
    %c0_i32_0 = arith.constant 0 : i32
    %c0_i32_1 = arith.constant 0 : i32
    return %c0_i32, %c0_i32_0 : i32, i32
  }
  func.func @transform_62(%arg0: i32) -> (i32, i32) {
    %c0_i32 = arith.constant 0 : i32
    %c0_i32_0 = arith.constant 0 : i32
    %c0_i32_1 = arith.constant 0 : i32
    return %c0_i32, %c0_i32_0 : i32, i32
  }
  func.func @transform_63(%arg0: i32) -> (i32, i32) {
    %c0_i32 = arith.constant 0 : i32
    %c0_i32_0 = arith.constant 0 : i32
    %c0_i32_1 = arith.constant 0 : i32
    return %c0_i32, %c0_i32_0 : i32, i32
  }
  func.func @transform_64(%arg0: i32) -> (i32, i32) {
    %c0_i32 = arith.constant 0 : i32
    %c0_i32_0 = arith.constant 0 : i32
    %c0_i32_1 = arith.constant 0 : i32
    return %c0_i32, %c0_i32_0 : i32, i32
  }
  func.func @transform_65(%arg0: i32) -> (i32, i32) {
    %c0_i32 = arith.constant 0 : i32
    %c0_i32_0 = arith.constant 0 : i32
    %c0_i32_1 = arith.constant 0 : i32
    return %c0_i32, %c0_i32_0 : i32, i32
  }
  func.func @transform_66(%arg0: i32) -> (i32, i32) {
    %c0_i32 = arith.constant 0 : i32
    %c0_i32_0 = arith.constant 0 : i32
    %c0_i32_1 = arith.constant 0 : i32
    return %c0_i32, %c0_i32_0 : i32, i32
  }
  func.func @transform_67(%arg0: i32) -> (i32, i32) {
    %c0_i32 = arith.constant 0 : i32
    %c0_i32_0 = arith.constant 0 : i32
    %c0_i32_1 = arith.constant 0 : i32
    return %c0_i32, %c0_i32_0 : i32, i32
  }
  func.func @transform_68(%arg0: i32) -> (i32, i32) {
    %c0_i32 = arith.constant 0 : i32
    %c0_i32_0 = arith.constant 0 : i32
    %c0_i32_1 = arith.constant 0 : i32
    return %c0_i32, %c0_i32_0 : i32, i32
  }
  func.func @transform_69(%arg0: i32) -> (i32, i32) {
    %c0_i32 = arith.constant 0 : i32
    %c0_i32_0 = arith.constant 0 : i32
    %c0_i32_1 = arith.constant 0 : i32
    return %c0_i32, %c0_i32_0 : i32, i32
  }
  func.func @transform_70(%arg0: i32) -> (i32, i32) {
    %c0_i32 = arith.constant 0 : i32
    %c0_i32_0 = arith.constant 0 : i32
    %c0_i32_1 = arith.constant 0 : i32
    return %c0_i32, %c0_i32_0 : i32, i32
  }
  func.func @transform_71(%arg0: i32) -> (i32, i32) {
    %c0_i32 = arith.constant 0 : i32
    %c0_i32_0 = arith.constant 0 : i32
    %c0_i32_1 = arith.constant 0 : i32
    return %c0_i32, %c0_i32_0 : i32, i32
  }
  func.func @transform_72(%arg0: i32) -> (i32, i32) {
    %c0_i32 = arith.constant 0 : i32
    %c0_i32_0 = arith.constant 0 : i32
    %c0_i32_1 = arith.constant 0 : i32
    return %c0_i32, %c0_i32_0 : i32, i32
  }
  func.func @transform_73(%arg0: i32) -> (i32, i32) {
    %c0_i32 = arith.constant 0 : i32
    %c0_i32_0 = arith.constant 0 : i32
    %c0_i32_1 = arith.constant 0 : i32
    return %c0_i32, %c0_i32_0 : i32, i32
  }
  func.func @transform_74(%arg0: i32) -> (i32, i32) {
    %c0_i32 = arith.constant 0 : i32
    %c0_i32_0 = arith.constant 0 : i32
    return %arg0, %c0_i32 : i32, i32
  }
}

</mosaic_0001>

<bundles_post_ra>
// kernel: transformer_forward.1
= control target key start
LH: loop header
LB: loop body
LE: loop exit
PB: predicated region body
PF: predicated region fallthrough
CT: control target
= control target key end

     0   :  { %s8088_s6 = smov 1   ;;  %s8089_s10 = smov 2   ;;  %s9814_s0 = inlined_call_operand.smem [shape: u32[75], index: -1, kind: input, shape index: {}] }
   0x1   :  { %s8219_s5 = sld [smem:[%s9814_s0]]   ;;  %s8090_s14 = smov 3  }
   0x2   :  { %s8224_s9 = sld [smem:[%s9814_s0 + %s8088_s6]]   ;;  %s8091_s18 = smov 4  }
   0x3   :  { %s8229_s13 = sld [smem:[%s9814_s0 + %s8089_s10]]   ;;  %s8092_s22 = smov 5  }
   0x4   :  { %s8234_s17 = sld [smem:[%s9814_s0 + %s8090_s14]]   ;;  %s8093_s26 = smov 6  }
   0x5   :  { %s8239_s21 = sld [smem:[%s9814_s0 + %s8091_s18]]   ;;  %s8094_s30 = smov 7  }
   0x6   :  { %s8244_s25 = sld [smem:[%s9814_s0 + %s8092_s22]]   ;;  %s8095_s4 = smov 8  }
   0x7   :  { %9931 = sst [smem:[#allocation75_spill]] %s8219_s5  ;;  %s8096_s10 = smov 9  }
   0x8   :  { %9932 = sst [smem:[#allocation76_spill]] %s8224_s9  ;;  %s8097_s15 = smov 10  }
   0x9   :  { %9933 = sst [smem:[#allocation77_spill]] %s8229_s13  ;;  %s8098_s20 = smov 11  }
   0xa   :  { %9934 = sst [smem:[#allocation78_spill]] %s8234_s17  ;;  %s8100_s1 = smov 13  }
   0xb   :  { %9935 = sst [smem:[#allocation79_spill]] %s8239_s21  ;;  %s8101_s7 = smov 14  }
   0xc   :  { %9936 = sst [smem:[#allocation80_spill]] %s8244_s25  ;;  %s8103_s22 = smov 16  }
   0xd   :  { %s8249_s29 = sld [smem:[%s9814_s0 + %s8093_s26]]   ;;  %s8099_s26 = smov 12  }
   0xe   :  { %s8254_s3 = sld [smem:[%s9814_s0 + %s8094_s30]]   ;;  %s8104_s28 = smov 17  }
   0xf   :  { %s8259_s8 = sld [smem:[%s9814_s0 + %s8095_s4]]  }
  0x10   :  { %s8264_s14 = sld [smem:[%s9814_s0 + %s8096_s10]]  }
  0x11   :  { %s8269_s19 = sld [smem:[%s9814_s0 + %s8097_s15]]   ;;  %s8102_s15 = smov 15  }
  0x12   :  { %s8274_s24 = sld [smem:[%s9814_s0 + %s8098_s20]]  }
  0x13   :  { %9937 = sst [smem:[#allocation81_spill]] %s8249_s29 }
  0x14   :  { %9938 = sst [smem:[#allocation82_spill]] %s8254_s3 }
  0x15   :  { %9939 = sst [smem:[#allocation83_spill]] %s8259_s8 }
  0x16   :  { %9940 = sst [smem:[#allocation84_spill]] %s8264_s14 }
  0x17   :  { %9941 = sst [smem:[#allocation85_spill]] %s8269_s19 }
  0x18   :  { %9942 = sst [smem:[#allocation86_spill]] %s8274_s24 }
  0x19   :  { %s8279_s30 = sld [smem:[%s9814_s0 + %s8099_s26]]  }
  0x1a   :  { %s8284_s6 = sld [smem:[%s9814_s0 + %s8100_s1]]  }
  0x1b   :  { %s8289_s12 = sld [smem:[%s9814_s0 + %s8101_s7]]   ;;  %s8105_s7 = smov 18  }
  0x1c   :  { %s8294_s20 = sld [smem:[%s9814_s0 + %s8102_s15]]   ;;  %s8106_s15 = smov 19  }
  0x1d   :  { %s8299_s27 = sld [smem:[%s9814_s0 + %s8103_s22]]   ;;  %s8107_s22 = smov 20  }
  0x1e   :  { %s8304_s4 = sld [smem:[%s9814_s0 + %s8104_s28]]   ;;  %s8108_s28 = smov 21  }
  0x1f   :  { %9943 = sst [smem:[#allocation87_spill]] %s8279_s30 }
  0x20   :  { %9944 = sst [smem:[#allocation88_spill]] %s8284_s6 }
  0x21   :  { %9945 = sst [smem:[#allocation89_spill]] %s8289_s12 }
  0x22   :  { %9946 = sst [smem:[#allocation90_spill]] %s8294_s20 }
  0x23   :  { %9947 = sst [smem:[#allocation91_spill]] %s8299_s27 }
  0x24   :  { %9948 = sst [smem:[#allocation92_spill]] %s8304_s4 }
  0x25   :  { %s8309_s21 = sld [smem:[%s9814_s0 + %s8105_s7]]   ;;  %s8109_s7 = smov 22  }
  0x26   :  { %s8314_s25 = sld [smem:[%s9814_s0 + %s8106_s15]]   ;;  %s8110_s15 = smov 23  }
  0x27   :  { %s8319_s3 = sld [smem:[%s9814_s0 + %s8107_s22]]   ;;  %s8111_s22 = smov 24  }
  0x28   :  { %s8324_s29 = sld [smem:[%s9814_s0 + %s8108_s28]]   ;;  %s8112_s28 = smov 25  }
  0x29   :  { %s8329_s12 = sld [smem:[%s9814_s0 + %s8109_s7]]   ;;  %s8113_s7 = smov 26  }
  0x2a   :  { %s8334_s20 = sld [smem:[%s9814_s0 + %s8110_s15]]   ;;  %s8114_s15 = smov 27  }
  0x2b   :  { %9949 = sst [smem:[#allocation93_spill]] %s8309_s21 }
  0x2c   :  { %9950 = sst [smem:[#allocation94_spill]] %s8314_s25 }
  0x2d   :  { %9951 = sst [smem:[#allocation95_spill]] %s8319_s3 }
  0x2e   :  { %9952 = sst [smem:[#allocation96_spill]] %s8324_s29 }
  0x2f   :  { %9953 = sst [smem:[#allocation97_spill]] %s8329_s12 }
  0x30   :  { %9954 = sst [smem:[#allocation98_spill]] %s8334_s20 }
  0x31   :  { %s8339_s14 = sld [smem:[%s9814_s0 + %s8111_s22]]   ;;  %s8115_s22 = smov 28  }
  0x32   :  { %s8344_s8 = sld [smem:[%s9814_s0 + %s8112_s28]]   ;;  %s8116_s28 = smov 29  }
  0x33   :  { %s8349_s30 = sld [smem:[%s9814_s0 + %s8113_s7]]   ;;  %s8117_s7 = smov 30  }
  0x34   :  { %s8354_s6 = sld [smem:[%s9814_s0 + %s8114_s15]]   ;;  %s8118_s15 = smov 31  }
  0x35   :  { %s8369_s3 = sld [smem:[%s9814_s0 + %s8117_s7]]   ;;  %s8121_s7 = smov 34  }
  0x36   :  { %s8374_s27 = sld [smem:[%s9814_s0 + %s8118_s15]]   ;;  %s8122_s15 = smov 35  }
  0x37   :  { %9955 = sst [smem:[#allocation99_spill]] %s8339_s14 }
  0x38   :  { %9956 = sst [smem:[#allocation100_spill]] %s8344_s8 }
  0x39   :  { %9957 = sst [smem:[#allocation101_spill]] %s8349_s30 }
  0x3a   :  { %9958 = sst [smem:[#allocation102_spill]] %s8354_s6 }
  0x3b   :  { %s8359_s14 = sld [smem:[%s9814_s0 + %s8115_s22]]   ;;  %s8119_s22 = smov 32  }
  0x3c   :  { %s8364_s8 = sld [smem:[%s9814_s0 + %s8116_s28]]   ;;  %s8120_s28 = smov 33  }
  0x3d   :  { %9961 = sst [smem:[#allocation105_spill]] %s8369_s3 }
  0x3e   :  { %s8389_s20 = sld [smem:[%s9814_s0 + %s8121_s7]]   ;;  %s8125_s7 = smov 38  }
  0x3f   :  { %s8394_s21 = sld [smem:[%s9814_s0 + %s8122_s15]]   ;;  %s8126_s15 = smov 39  }
  0x40   :  { %s8409_s19 = sld [smem:[%s9814_s0 + %s8125_s7]]   ;;  %s8129_s7 = smov 42  }
  0x41   :  { %9959 = sst [smem:[#allocation103_spill]] %s8359_s14 }
  0x42   :  { %9960 = sst [smem:[#allocation104_spill]] %s8364_s8 }
  0x43   :  { %s8379_s14 = sld [smem:[%s9814_s0 + %s8119_s22]]   ;;  %s8123_s22 = smov 36  }
  0x44   :  { %s8384_s8 = sld [smem:[%s9814_s0 + %s8120_s28]]   ;;  %s8124_s28 = smov 37  }
  0x45   :  { %9964 = sst [smem:[#allocation108_spill]] %s8389_s20 }
  0x46   :  { %9965 = sst [smem:[#allocation109_spill]] %s8394_s21 }
  0x47   :  { %s8399_s17 = sld [smem:[%s9814_s0 + %s8123_s22]]   ;;  %s8127_s22 = smov 40  }
  0x48   :  { %s8404_s4 = sld [smem:[%s9814_s0 + %s8124_s28]]   ;;  %s8128_s28 = smov 41  }
  0x49   :  { %9962 = sst [smem:[#allocation106_spill]] %s8379_s14 }
  0x4a   :  { %9963 = sst [smem:[#allocation107_spill]] %s8384_s8 }
  0x4b   :  { %9968 = sst [smem:[#allocation112_spill]] %s8409_s19 }
  0x4c   :  { %s8414_s24 = sld [smem:[%s9814_s0 + %s8126_s15]]   ;;  %s8130_s15 = smov 43  }
  0x4d   :  { %9966 = sst [smem:[#allocation110_spill]] %s8399_s17 }
  0x4e   :  { %9967 = sst [smem:[#allocation111_spill]] %s8404_s4 }
  0x4f   :  { %s8419_s25 = sld [smem:[%s9814_s0 + %s8127_s22]]   ;;  %s8131_s22 = smov 44  }
  0x50   :  { %s8424_s9 = sld [smem:[%s9814_s0 + %s8128_s28]]   ;;  %s8132_s28 = smov 45  }
  0x51   :  { %s8429_s19 = sld [smem:[%s9814_s0 + %s8129_s7]]   ;;  %s8133_s7 = smov 46  }
  0x52   :  { %9969 = sst [smem:[#allocation113_spill]] %s8414_s24 }
  0x53   :  { %s8434_s24 = sld [smem:[%s9814_s0 + %s8130_s15]]   ;;  %s8134_s15 = smov 47  }
  0x54   :  { %s8439_s13 = sld [smem:[%s9814_s0 + %s8131_s22]]   ;;  %s8135_s22 = smov 48  }
  0x55   :  { %9970 = sst [smem:[#allocation114_spill]] %s8419_s25 }
  0x56   :  { %9971 = sst [smem:[#allocation115_spill]] %s8424_s9 }
  0x57   :  { %9972 = sst [smem:[#allocation116_spill]] %s8429_s19 }
  0x58   :  { %s8444_s5 = sld [smem:[%s9814_s0 + %s8132_s28]]   ;;  %s8136_s28 = smov 49  }
  0x59   :  { %9973 = sst [smem:[#allocation117_spill]] %s8434_s24 }
  0x5a   :  { %9974 = sst [smem:[#allocation118_spill]] %s8439_s13 }
  0x5b   :  { %s8449_s19 = sld [smem:[%s9814_s0 + %s8133_s7]]   ;;  %s8137_s7 = smov 50  }
  0x5c   :  { %s8454_s24 = sld [smem:[%s9814_s0 + %s8134_s15]]   ;;  %s8138_s15 = smov 51  }
  0x5d   :  { %s8459_s13 = sld [smem:[%s9814_s0 + %s8135_s22]]   ;;  %s8139_s22 = smov 52  }
  0x5e   :  { %9975 = sst [smem:[#allocation119_spill]] %s8444_s5 }
  0x5f   :  { %s8464_s5 = sld [smem:[%s9814_s0 + %s8136_s28]]   ;;  %s8140_s28 = smov 53  }
  0x60   :  { %s8469_s25 = sld [smem:[%s9814_s0 + %s8137_s7]]   ;;  %s8141_s7 = smov 54  }
  0x61   :  { %9976 = sst [smem:[#allocation120_spill]] %s8449_s19 }
  0x62   :  { %9977 = sst [smem:[#allocation121_spill]] %s8454_s24 }
  0x63   :  { %9978 = sst [smem:[#allocation122_spill]] %s8459_s13 }
  0x64   :  { %s8474_s24 = sld [smem:[%s9814_s0 + %s8138_s15]]   ;;  %s8142_s15 = smov 55  }
  0x65   :  { %9979 = sst [smem:[#allocation123_spill]] %s8464_s5 }
  0x66   :  { %9980 = sst [smem:[#allocation124_spill]] %s8469_s25 }
  0x67   :  { %s8479_s17 = sld [smem:[%s9814_s0 + %s8139_s22]]   ;;  %s8143_s22 = smov 56  }
  0x68   :  { %s8484_s5 = sld [smem:[%s9814_s0 + %s8140_s28]]   ;;  %s8144_s28 = smov 57  }
  0x69   :  { %s8489_s25 = sld [smem:[%s9814_s0 + %s8141_s7]]   ;;  %s8145_s7 = smov 58  }
  0x6a   :  { %9981 = sst [smem:[#allocation125_spill]] %s8474_s24 }
  0x6b   :  { %s8494_s24 = sld [smem:[%s9814_s0 + %s8142_s15]]   ;;  %s8146_s15 = smov 59  }
  0x6c   :  { %s8499_s20 = sld [smem:[%s9814_s0 + %s8143_s22]]   ;;  %s8147_s22 = smov 60  }
  0x6d   :  { %9982 = sst [smem:[#allocation126_spill]] %s8479_s17 }
  0x6e   :  { %9983 = sst [smem:[#allocation127_spill]] %s8484_s5 }
  0x6f   :  { %s8504_s5 = sld [smem:[%s9814_s0 + %s8144_s28]]   ;;  %s8148_s28 = smov 61  }
  0x70   :  { %s8509_s14 = sld [smem:[%s9814_s0 + %s8145_s7]]   ;;  %s8149_s7 = smov 62  }
  0x71   :  { %9984 = sst [smem:[#allocation128_spill]] %s8494_s24 }
  0x72   :  { %9985 = sst [smem:[#allocation129_spill]] %s8499_s20 }
  0x73   :  { %s8514_s24 = sld [smem:[%s9814_s0 + %s8146_s15]]   ;;  %s8150_s15 = smov 63  }
  0x74   :  { %s8519_s3 = sld [smem:[%s9814_s0 + %s8147_s22]]   ;;  %s8151_s22 = smov 64  }
  0x75   :  { %9986 = sst [smem:[#allocation130_spill]] %s8504_s5 }
  0x76   :  { %9987 = sst [smem:[#allocation131_spill]] %s8509_s14 }
  0x77   :  { %s8524_s5 = sld [smem:[%s9814_s0 + %s8148_s28]]   ;;  %s8152_s28 = smov 65  }
  0x78   :  { %s8529_s14 = sld [smem:[%s9814_s0 + %s8149_s7]]   ;;  %s8153_s7 = smov 66  }
  0x79   :  { %9988 = sst [smem:[#allocation132_spill]] %s8514_s24 }
  0x7a   :  { %9989 = sst [smem:[#allocation133_spill]] %s8519_s3 }
  0x7b   :  { %s8534_s24 = sld [smem:[%s9814_s0 + %s8150_s15]]   ;;  %s8154_s15 = smov 67  }
  0x7c   :  { %s8539_s30 = sld [smem:[%s9814_s0 + %s8151_s22]]   ;;  %s8155_s22 = smov 68  }
  0x7d   :  { %9990 = sst [smem:[#allocation134_spill]] %s8524_s5 }
  0x7e   :  { %9991 = sst [smem:[#allocation135_spill]] %s8529_s14 }
  0x7f   :  { %s8544_s5 = sld [smem:[%s9814_s0 + %s8152_s28]]   ;;  %s8156_s28 = smov 69  }
  0x80   :  { %s8549_s14 = sld [smem:[%s9814_s0 + %s8153_s7]]   ;;  %s8157_s7 = smov 70  }
  0x81   :  { %9992 = sst [smem:[#allocation136_spill]] %s8534_s24 }
  0x82   :  { %s8554_s24 = sld [smem:[%s9814_s0 + %s8154_s15]]   ;;  %s8158_s15 = smov 71  }
  0x83   :  { %s8559_s29 = sld [smem:[%s9814_s0 + %s8155_s22]]   ;;  %s8159_s22 = smov 72  }
  0x85   :  { %9993 = sst [smem:[#allocation137_spill]] %s8544_s5 }
  0x86   :  { %9994 = sst [smem:[#allocation138_spill]] %s8549_s14 }
  0x87   :  { %s8564_s5 = sld [smem:[%s9814_s0 + %s8156_s28]]   ;;  %s8160_s28 = smov 73  }
  0x88   :  { %9995 = sst [smem:[#allocation139_spill]] %s8554_s24 }
  0x89   :  { %9996 = sst [smem:[#allocation140_spill]] %s8559_s29 }
  0x8a   :  { %s8569_s14 = sld [smem:[%s9814_s0 + %s8157_s7]]   ;;  %s8161_s7 = smov 74  }
  0x8b   :  { %s8574_s24 = sld [smem:[%s9814_s0 + %s8158_s15]]  }
  0x8c   :  { %s8579_s29 = sld [smem:[%s9814_s0 + %s8159_s22]]  }
  0x8d   :  { %9997 = sst [smem:[#allocation141_spill]] %s8564_s5 }
  0x8e   :  { %s8584_s5 = sld [smem:[%s9814_s0 + %s8160_s28]]  }
  0x90   :  { %9998 = sst [smem:[#allocation142_spill]] %s8569_s14 }
  0x91   :  { %s8589_s14 = sld [smem:[%s9814_s0 + %s8161_s7]]  }
  0x92   :  { %154 = vsyncpa [#allocation3], 0 }
  0x93   :  { %155 = vsyncpa [#allocation6], 0 }
  0x94   :  { %156 = vsyncpa [#allocation9], 0 }
  0x95   :  { %157 = vsyncpa [#allocation12], 0 }
  0x96   :  { %158 = vsyncpa [#allocation15], 0 }
  0x97   :  { %159 = vsyncpa [#allocation18], 0 }
  0x98   :  { %160 = vsyncpa [#allocation21], 0 }
  0x99   :  { %161 = vsyncpa [#allocation24], 0 }
  0x9a   :  { %162 = vsyncpa [#allocation27], 0 }
  0x9b   :  { %163 = vsyncpa [#allocation30], 0 }
  0x9c   :  { %164 = vsyncpa [#allocation33], 0 }
  0x9d   :  { %165 = vsyncpa [#allocation36], 0 }
  0x9e   :  { %166 = vsyncpa [#allocation39], 0 }
  0x9f   :  { %167 = vsyncpa [#allocation42], 0 }
  0xa0   :  { %168 = vsyncpa [#allocation45], 0 }
  0xa1   :  { %169 = vsyncpa [#allocation48], 0 }
  0xa2   :  { %170 = vsyncpa [#allocation51], 0 }
  0xa3   :  { %171 = vsyncpa [#allocation54], 0 }
  0xa4   :  { %172 = vsyncpa [#allocation4], 0 }
  0xa5   :  { %174 = vsyncpa [#allocation4 + $0x1], 0  ;;  %s8591_s0 = smov 0   ;;  %s8593_s15 = smov 0  }
  0xa6   :  { %s8595_s16 = smov 0   ;;  %s8597_s18 = smov 0  }
  0xa7 LB: > { %s9999_s21 = sld [smem:[#allocation109_spill]]  ;;  %s8612_s22 = sadd.s32 4294967295, %s8086_s18   ;;  %s8082_s16 = sphi %s8595_s16, %s10106_s16   ;;  %s8078_s15 = sphi %s8593_s15, %s10108_s15   ;;  %s8074_s0 = sphi %s8591_s0, %s10107_s0   ;;  %s8086_s18 = sphi %s8597_s18, %s10104_s18  }
  0xa8   : > { %s10000_s20 = sld [smem:[#allocation129_spill]]  ;;  %s6285_s23 = sadd.s32 4294967294, %s8086_s18  }
  0xa9   : > { %s10001_s19 = sld [smem:[#allocation120_spill]]  ;;  %s8616_s26 = sadd.s32 1, %s8086_s18  }
  0xaa   : > { %s10002_s17 = sld [smem:[#allocation126_spill]]  ;;  %s1761_s28 = sadd.s32 1, %s8082_s16 }
  0xab   : > { %s10003_s13 = sld [smem:[#allocation122_spill]]  ;;  %s1758_s1 = ssub.s32 %s8086_s18, %s8616_s26 }
  0xac   : > { %s10004_s12 = sld [smem:[#allocation97_spill]]  ;;  %p1771_p0 = scmp.ne.s32.totalorder %s8082_s16, %s8078_s15 }
  0xad   : > { %s10005_s9 = sld [smem:[#allocation115_spill]]  ;;  %p1759_p1 = scmp.eq.s32.totalorder %s1758_s1, 0 }
  0xae   : > { %s10006_s8 = sld [smem:[#allocation107_spill]]  ;;  %p1772_p2 = scmp.eq.s32.totalorder %s8612_s22, 1 }
  0xaf   : > { %s10007_s6 = sld [smem:[#allocation102_spill]]  ;;  %p1777_p3 = scmp.ne.s32.totalorder %s8078_s15, %s8074_s0 }
  0xb0   : > { %s10008_s4 = sld [smem:[#allocation111_spill]]  ;;  %p1778_p4 = scmp.eq.s32.totalorder %s6285_s23, 1 }
  0xb1   : > { %s10009_s3 = sld [smem:[#allocation133_spill]]  ;;  %p8629_p5 = por %p1772_p2, %p1771_p0 }
  0xb2   : > { %10010 = sst [smem:[#allocation143_spill]] %s8074_s0  ;;  %p8633_p6 = por %p1778_p4, %p1777_p3 }
  0xb3   : > { %10011 = sst [smem:[#allocation144_spill]] %s8082_s16  ;;  %p6286_p7 = scmp.ge.s32.totalorder %s8086_s18, 1 }
  0xb4   : > { %10012 = sst [smem:[#allocation145_spill]] %s8086_s18  ;;  %p1785_p8 = scmp.lt.s32.totalorder %s8086_s18, 3 }
  0xb5   : > { %10013 = sst [smem:[#allocation146_spill]] %s8616_s26 }
  0xb6   : > { %s8627_s2 = scalar_select %p1759_p1, %s8082_s16, %s1761_s28  }
  0xb7   : > { %s10015_s7 = scalar_select %p8629_p5, 1, 0 }
  0xb8   : > { %10014 = sst [smem:[#allocation147_spill]] %s8627_s2  ;;  %p8639_p9 = pnand %p6286_p7, %p1785_p8 }
  0xb9   : > { %10016 = sst [smem:[#allocation148_spill]] %s10015_s7  ;;  %p6603_p10 = scmp.eq.s32.totalorder (!%p8639_p9), %s8612_s22, 0 }
  0xba   : > { %s10017_s10 = scalar_select %p8633_p6, 1, 0 }
  0xbb   : > { %1789 = sbr.rel (%p8639_p9) target bundleno = 632 (0x278), region = 12  ;;  %s1860_s23 = sshll.u32 (!%p8639_p9), %s10004_s12, 4  ;;  %s1861_s23 = int_to_ptr.hbm [resolvable:$true] %s1860_s23 }
  0xbc   : > { %10018 = sst [smem:[#allocation149_spill]] %s10017_s10  ;;  %s8162_s28 = smov (!%p8639_p9), [#allocation5]  }
  0xbd   : > { %s1862_s1 = sshll.u32 (!%p8639_p9), %s8162_s28, 4  ;;  %s1893_s2 = sshll.u32 (!%p8639_p9), %s10007_s6, 4  ;;  %s1863_s1 = int_to_ptr.vmem [resolvable:$true] %s1862_s1  ;;  %s8648_s2 = int_to_ptr.hbm [resolvable:$true] %s1893_s2 }
  0xbe   : > { %s7000_s16 = sshra.s32 (!%p8639_p9), %s1861_s23, 4  ;;  %s7006_s10 = scalar_lea.hbm (!%p8639_p9), %s10004_s12, 1  ;;  %s7001_s16 = int_to_ptr.hbm [resolvable:$true] %s7000_s16 }
  0xbf   : > { %s7002_s26 = scalar_lea.hbm (!%p8639_p9), %s7001_s16, 1  ;;  %p7007_p0 = scmp.lt.s32.totalorder (!%p8639_p9), %s7001_s16, %s10004_s12 }
  0xc0   : > { %p7003_p11 = scmp.ne.s32.totalorder %s7001_s16, %s7002_s26  ;;  %p7008_p1 = scmp.lt.s32.totalorder %s7006_s10, %s7002_s26 }
  0xc2   : > { %p7004_p12 = pnand %p7003_p11, %p6603_p10  ;;  %p7009_p2 = por %p7008_p1, %p7007_p0 }
  0xc4   : > { %p7005_p13 = pneg %p7004_p12 }
  0xc6   : > { %p7010_p3 = pnand %p7009_p2, %p7005_p13 }
  0xc8   : > { %7013 = shalt.err (!%p7010_p3)
}
  0xc9   : > { %6464 = dma.hbm_to_vmem [thread:$0]  (%p6603_p10), %s1861_s23, 16, %s1863_s1, [#allocation6]  }
  0xca   : > { %s1923_s28 = sshll.u32 %s8374_s27, 4  ;;  %s8163_s0 = smov [#allocation8]   ;;  %s8657_s28 = int_to_ptr.hbm [resolvable:$true] %s1923_s28 }
  0xcb   : > { %s1895_s18 = sshll.u32 %s8163_s0, 4  ;;  %s7028_s7 = sshra.s32 %s8648_s2, 4  ;;  %s1896_s18 = int_to_ptr.vmem [resolvable:$true] %s1895_s18  ;;  %s7029_s7 = int_to_ptr.hbm [resolvable:$true] %s7028_s7 }
  0xcc   : > { %s7030_s16 = scalar_lea.hbm %s7029_s7, 1  ;;  %s7034_s26 = scalar_lea.hbm %s10007_s6, 1 }
  0xcd   : > { %p7031_p4 = scmp.ne.s32.totalorder %s7029_s7, %s7030_s16  ;;  %p7035_p11 = scmp.lt.s32.totalorder %s7029_s7, %s10007_s6 }
  0xce   : > { %p7036_p12 = scmp.lt.s32.totalorder %s7034_s26, %s7030_s16 }
  0xcf   : > { %p7032_p7 = pnand %p7031_p4, %p6603_p10 }
  0xd0   : > { %p7037_p13 = por %p7036_p12, %p7035_p11 }
  0xd1   : > { %p7033_p8 = pneg %p7032_p7 }
  0xd3   : > { %p7038_p0 = pnand %p7037_p13, %p7033_p8 }
  0xd5   : > { %7041 = shalt.err (!%p7038_p0)
}
  0xd6   : > { %6468 = dma.hbm_to_vmem [thread:$0]  (%p6603_p10), %s8648_s2, 16, %s1896_s18, [#allocation9]  }
  0xd7   : > { %s8164_s0 = smov [#allocation11]   ;;  %s1947_s23 = sshll.u32 %s10006_s8, 4  ;;  %s8668_s23 = int_to_ptr.hbm [resolvable:$true] %s1947_s23 }
  0xd8   : > { %s1925_s10 = sshll.u32 %s8164_s0, 4  ;;  %s7056_s7 = sshra.s32 %s8657_s28, 4  ;;  %s1926_s10 = int_to_ptr.vmem [resolvable:$true] %s1925_s10  ;;  %s7057_s7 = int_to_ptr.hbm [resolvable:$true] %s7056_s7 }
  0xd9   : > { %s7058_s1 = scalar_lea.hbm %s7057_s7, 1  ;;  %s7062_s16 = scalar_lea.hbm %s8374_s27, 1 }
  0xda   : > { %p7059_p1 = scmp.ne.s32.totalorder %s7057_s7, %s7058_s1  ;;  %p7063_p4 = scmp.lt.s32.totalorder %s7057_s7, %s8374_s27 }
  0xdb   : > { %p7064_p7 = scmp.lt.s32.totalorder %s7062_s16, %s7058_s1 }
  0xdc   : > { %p7060_p2 = pnand %p7059_p1, %p6603_p10 }
  0xdd   : > { %p7065_p8 = por %p7064_p7, %p7063_p4 }
  0xde   : > { %p7061_p3 = pneg %p7060_p2 }
  0xe0   : > { %p7066_p11 = pnand %p7065_p8, %p7061_p3 }
  0xe2   : > { %7069 = shalt.err (!%p7066_p11)
}
  0xe3   : > { %6472 = dma.hbm_to_vmem [thread:$0]  (%p6603_p10), %s8657_s28, 16, %s1926_s10, [#allocation12]  }
  0xe4   : > { %s1971_s18 = sshll.u32 %s9999_s21, 4  ;;  %s8165_s2 = smov [#allocation14]   ;;  %s8679_s18 = int_to_ptr.hbm [resolvable:$true] %s1971_s18 }
  0xe5   : > { %s1949_s26 = sshll.u32 %s8165_s2, 4  ;;  %s7084_s0 = sshra.s32 %s8668_s23, 4  ;;  %s1950_s26 = int_to_ptr.vmem [resolvable:$true] %s1949_s26  ;;  %s7085_s0 = int_to_ptr.hbm [resolvable:$true] %s7084_s0 }
  0xe6   : > { %s7086_s7 = scalar_lea.hbm %s7085_s0, 1  ;;  %s7090_s1 = scalar_lea.hbm %s10006_s8, 1 }
  0xe7   : > { %p7087_p12 = scmp.ne.s32.totalorder %s7085_s0, %s7086_s7  ;;  %p7091_p1 = scmp.lt.s32.totalorder %s7085_s0, %s10006_s8 }
  0xe8   : > { %p7092_p2 = scmp.lt.s32.totalorder %s7090_s1, %s7086_s7 }
  0xe9   : > { %p7088_p13 = pnand %p7087_p12, %p6603_p10 }
  0xea   : > { %p7093_p3 = por %p7092_p2, %p7091_p1 }
  0xeb   : > { %p7089_p0 = pneg %p7088_p13 }
  0xed   : > { %p7094_p4 = pnand %p7093_p3, %p7089_p0 }
  0xef   : > { %7097 = shalt.err (!%p7094_p4)
}
  0xf0   : > { %6476 = dma.hbm_to_vmem [thread:$0]  (%p6603_p10), %s8668_s23, 16, %s1950_s26, [#allocation15]  }
  0xf1   : > { %s8166_s28 = smov [#allocation17]   ;;  %s1995_s16 = sshll.u32 %s10008_s4, 4  ;;  %s8690_s16 = int_to_ptr.hbm [resolvable:$true] %s1995_s16 }
  0xf2   : > { %s1973_s10 = sshll.u32 %s8166_s28, 4  ;;  %s7112_s2 = sshra.s32 %s8679_s18, 4  ;;  %s1974_s10 = int_to_ptr.vmem [resolvable:$true] %s1973_s10  ;;  %s7113_s2 = int_to_ptr.hbm [resolvable:$true] %s7112_s2 }
  0xf3   : > { %s7114_s0 = scalar_lea.hbm %s7113_s2, 1  ;;  %s7118_s7 = scalar_lea.hbm %s9999_s21, 1 }
  0xf4   : > { %p7115_p7 = scmp.ne.s32.totalorder %s7113_s2, %s7114_s0  ;;  %p7119_p12 = scmp.lt.s32.totalorder %s7113_s2, %s9999_s21 }
  0xf5   : > { %p7120_p13 = scmp.lt.s32.totalorder %s7118_s7, %s7114_s0 }
  0xf6   : > { %p7116_p8 = pnand %p7115_p7, %p6603_p10 }
  0xf7   : > { %p7121_p0 = por %p7120_p13, %p7119_p12 }
  0xf8   : > { %p7117_p11 = pneg %p7116_p8 }
  0xfa   : > { %p7122_p1 = pnand %p7121_p0, %p7117_p11 }
  0xfc   : > { %7125 = shalt.err (!%p7122_p1)
}
  0xfd   : > { %6480 = dma.hbm_to_vmem [thread:$0]  (%p6603_p10), %s8679_s18, 16, %s1974_s10, [#allocation18]  }
  0xfe   : > { %s2025_s23 = sshll.u32 %s10005_s9, 4  ;;  %s8167_s26 = smov [#allocation20]   ;;  %s8701_s23 = int_to_ptr.hbm [resolvable:$true] %s2025_s23 }
  0xff   : > { %s1997_s1 = sshll.u32 %s8167_s26, 4  ;;  %s7140_s28 = sshra.s32 %s8690_s16, 4  ;;  %s1998_s1 = int_to_ptr.vmem [resolvable:$true] %s1997_s1  ;;  %s7141_s28 = int_to_ptr.hbm [resolvable:$true] %s7140_s28 }
 0x100   : > { %s7142_s2 = scalar_lea.hbm %s7141_s28, 1  ;;  %s7146_s0 = scalar_lea.hbm %s10008_s4, 1 }
 0x101   : > { %p7143_p2 = scmp.ne.s32.totalorder %s7141_s28, %s7142_s2  ;;  %p7147_p7 = scmp.lt.s32.totalorder %s7141_s28, %s10008_s4 }
 0x102   : > { %p7148_p8 = scmp.lt.s32.totalorder %s7146_s0, %s7142_s2 }
 0x103   : > { %p7144_p3 = pnand %p7143_p2, %p6603_p10 }
 0x104   : > { %p7149_p11 = por %p7148_p8, %p7147_p7 }
 0x105   : > { %p7145_p4 = pneg %p7144_p3 }
 0x107   : > { %p7150_p12 = pnand %p7149_p11, %p7145_p4 }
 0x109   : > { %7153 = shalt.err (!%p7150_p12)
}
 0x10a   : > { %6484 = dma.hbm_to_vmem [thread:$0]  (%p6603_p10), %s8690_s16, 16, %s1998_s1, [#allocation21]  }
 0x10b   : > { %s8168_s18 = smov [#allocation23]   ;;  %s2058_s7 = sshll.u32 %s10001_s19, 4  ;;  %s8712_s7 = int_to_ptr.hbm [resolvable:$true] %s2058_s7 }
 0x10c   : > { %s2027_s10 = sshll.u32 %s8168_s18, 4  ;;  %s7168_s26 = sshra.s32 %s8701_s23, 4  ;;  %s2028_s10 = int_to_ptr.vmem [resolvable:$true] %s2027_s10  ;;  %s7169_s26 = int_to_ptr.hbm [resolvable:$true] %s7168_s26 }
 0x10d   : > { %s7170_s28 = scalar_lea.hbm %s7169_s26, 1  ;;  %s7174_s2 = scalar_lea.hbm %s10005_s9, 1 }
 0x10e   : > { %p7171_p13 = scmp.ne.s32.totalorder %s7169_s26, %s7170_s28  ;;  %p7175_p2 = scmp.lt.s32.totalorder %s7169_s26, %s10005_s9 }
 0x10f   : > { %p7176_p3 = scmp.lt.s32.totalorder %s7174_s2, %s7170_s28 }
 0x110   : > { %p7172_p0 = pnand %p7171_p13, %p6603_p10 }
 0x111   : > { %p7177_p4 = por %p7176_p3, %p7175_p2 }
 0x112   : > { %p7173_p1 = pneg %p7172_p0 }
 0x114   : > { %p7178_p7 = pnand %p7177_p4, %p7173_p1 }
 0x116   : > { %7181 = shalt.err (!%p7178_p7)
}
 0x117   : > { %6488 = dma.hbm_to_vmem [thread:$0]  (%p6603_p10), %s8701_s23, 16, %s2028_s10, [#allocation24]  }
 0x118   : > { %s2082_s16 = sshll.u32 %s10003_s13, 4  ;;  %s8169_s1 = smov [#allocation26]   ;;  %s8723_s16 = int_to_ptr.hbm [resolvable:$true] %s2082_s16 }
 0x119   : > { %s2060_s0 = sshll.u32 %s8169_s1, 4  ;;  %s7196_s18 = sshra.s32 %s8712_s7, 4  ;;  %s2061_s0 = int_to_ptr.vmem [resolvable:$true] %s2060_s0  ;;  %s7197_s18 = int_to_ptr.hbm [resolvable:$true] %s7196_s18 }
 0x11a   : > { %s7198_s26 = scalar_lea.hbm %s7197_s18, 1  ;;  %s7202_s28 = scalar_lea.hbm %s10001_s19, 1 }
 0x11b   : > { %p7199_p8 = scmp.ne.s32.totalorder %s7197_s18, %s7198_s26  ;;  %p7203_p13 = scmp.lt.s32.totalorder %s7197_s18, %s10001_s19 }
 0x11c   : > { %p7204_p0 = scmp.lt.s32.totalorder %s7202_s28, %s7198_s26 }
 0x11d   : > { %p7200_p11 = pnand %p7199_p8, %p6603_p10 }
 0x11e   : > { %p7205_p1 = por %p7204_p0, %p7203_p13 }
 0x11f   : > { %p7201_p12 = pneg %p7200_p11 }
 0x121   : > { %p7206_p2 = pnand %p7205_p1, %p7201_p12 }
 0x123   : > { %7209 = shalt.err (!%p7206_p2)
}
 0x124   : > { %6492 = dma.hbm_to_vmem [thread:$0]  (%p6603_p10), %s8712_s7, 16, %s2061_s0, [#allocation27]  }
 0x125   : > { %s8170_s23 = smov [#allocation29]   ;;  %s2112_s2 = sshll.u32 %s10002_s17, 4  ;;  %s8734_s2 = int_to_ptr.hbm [resolvable:$true] %s2112_s2 }
 0x126   : > { %s2084_s10 = sshll.u32 %s8170_s23, 4  ;;  %s7224_s1 = sshra.s32 %s8723_s16, 4  ;;  %s2085_s10 = int_to_ptr.vmem [resolvable:$true] %s2084_s10  ;;  %s7225_s1 = int_to_ptr.hbm [resolvable:$true] %s7224_s1 }
 0x127   : > { %s7226_s18 = scalar_lea.hbm %s7225_s1, 1  ;;  %s7230_s26 = scalar_lea.hbm %s10003_s13, 1 }
 0x128   : > { %p7227_p3 = scmp.ne.s32.totalorder %s7225_s1, %s7226_s18  ;;  %p7231_p8 = scmp.lt.s32.totalorder %s7225_s1, %s10003_s13 }
 0x129   : > { %p7232_p11 = scmp.lt.s32.totalorder %s7230_s26, %s7226_s18 }
 0x12a   : > { %p7228_p4 = pnand %p7227_p3, %p6603_p10 }
 0x12b   : > { %p7233_p12 = por %p7232_p11, %p7231_p8 }
 0x12c   : > { %p7229_p7 = pneg %p7228_p4 }
 0x12e   : > { %p7234_p13 = pnand %p7233_p12, %p7229_p7 }
 0x130   : > { %7237 = shalt.err (!%p7234_p13)
}
 0x131   : > { %6496 = dma.hbm_to_vmem [thread:$0]  (%p6603_p10), %s8723_s16, 16, %s2085_s10, [#allocation30]  }
 0x132   : > { %s2136_s7 = sshll.u32 %s8489_s25, 4  ;;  %s8171_s0 = smov [#allocation32]   ;;  %s8745_s7 = int_to_ptr.hbm [resolvable:$true] %s2136_s7 }
 0x133   : > { %s2114_s28 = sshll.u32 %s8171_s0, 4  ;;  %s7252_s23 = sshra.s32 %s8734_s2, 4  ;;  %s2115_s28 = int_to_ptr.vmem [resolvable:$true] %s2114_s28  ;;  %s7253_s23 = int_to_ptr.hbm [resolvable:$true] %s7252_s23 }
 0x134   : > { %s7254_s1 = scalar_lea.hbm %s7253_s23, 1  ;;  %s7258_s18 = scalar_lea.hbm %s10002_s17, 1 }
 0x135   : > { %p7255_p0 = scmp.ne.s32.totalorder %s7253_s23, %s7254_s1  ;;  %p7259_p3 = scmp.lt.s32.totalorder %s7253_s23, %s10002_s17 }
 0x136   : > { %p7260_p4 = scmp.lt.s32.totalorder %s7258_s18, %s7254_s1 }
 0x137   : > { %p7256_p1 = pnand %p7255_p0, %p6603_p10 }
 0x138   : > { %p7261_p7 = por %p7260_p4, %p7259_p3 }
 0x139   : > { %p7257_p2 = pneg %p7256_p1 }
 0x13b   : > { %p7262_p8 = pnand %p7261_p7, %p7257_p2 }
 0x13d   : > { %7265 = shalt.err (!%p7262_p8)
}
 0x13e   : > { %6500 = dma.hbm_to_vmem [thread:$0]  (%p6603_p10), %s8734_s2, 16, %s2115_s28, [#allocation33]  }
 0x13f   : > { %s8172_s16 = smov [#allocation35]   ;;  %s2160_s26 = sshll.u32 %s10000_s20, 4  ;;  %s8756_s26 = int_to_ptr.hbm [resolvable:$true] %s2160_s26 }
 0x140   : > { %s2138_s10 = sshll.u32 %s8172_s16, 4  ;;  %s7280_s0 = sshra.s32 %s8745_s7, 4  ;;  %s2139_s10 = int_to_ptr.vmem [resolvable:$true] %s2138_s10  ;;  %s7281_s0 = int_to_ptr.hbm [resolvable:$true] %s7280_s0 }
 0x141   : > { %s7282_s23 = scalar_lea.hbm %s7281_s0, 1  ;;  %s7286_s1 = scalar_lea.hbm %s8489_s25, 1 }
 0x142   : > { %p7283_p11 = scmp.ne.s32.totalorder %s7281_s0, %s7282_s23  ;;  %p7287_p0 = scmp.lt.s32.totalorder %s7281_s0, %s8489_s25 }
 0x143   : > { %p7288_p1 = scmp.lt.s32.totalorder %s7286_s1, %s7282_s23 }
 0x144   : > { %p7284_p12 = pnand %p7283_p11, %p6603_p10 }
 0x145   : > { %p7289_p2 = por %p7288_p1, %p7287_p0 }
 0x146   : > { %p7285_p13 = pneg %p7284_p12 }
 0x148   : > { %p7290_p3 = pnand %p7289_p2, %p7285_p13 }
 0x14a   : > { %7293 = shalt.err (!%p7290_p3)
}
 0x14b   : > { %6504 = dma.hbm_to_vmem [thread:$0]  (%p6603_p10), %s8745_s7, 16, %s2139_s10, [#allocation36]  }
 0x14c   : > { %s2190_s2 = sshll.u32 %s10009_s3, 4  ;;  %s8173_s28 = smov [#allocation38]   ;;  %s8767_s2 = int_to_ptr.hbm [resolvable:$true] %s2190_s2 }
 0x14d   : > { %s2162_s18 = sshll.u32 %s8173_s28, 4  ;;  %s7308_s16 = sshra.s32 %s8756_s26, 4  ;;  %s2163_s18 = int_to_ptr.vmem [resolvable:$true] %s2162_s18  ;;  %s7309_s16 = int_to_ptr.hbm [resolvable:$true] %s7308_s16 }
 0x14e   : > { %s7310_s0 = scalar_lea.hbm %s7309_s16, 1  ;;  %s7314_s23 = scalar_lea.hbm %s10000_s20, 1 }
 0x14f   : > { %p7311_p4 = scmp.ne.s32.totalorder %s7309_s16, %s7310_s0  ;;  %p7315_p11 = scmp.lt.s32.totalorder %s7309_s16, %s10000_s20 }
 0x150   : > { %p7316_p12 = scmp.lt.s32.totalorder %s7314_s23, %s7310_s0 }
 0x151   : > { %p7312_p7 = pnand %p7311_p4, %p6603_p10 }
 0x152   : > { %p7317_p13 = por %p7316_p12, %p7315_p11 }
 0x153   : > { %p7313_p8 = pneg %p7312_p7 }
 0x155   : > { %p7318_p0 = pnand %p7317_p13, %p7313_p8 }
 0x157   : > { %7321 = shalt.err (!%p7318_p0)
}
 0x158   : > { %6508 = dma.hbm_to_vmem [thread:$0]  (%p6603_p10), %s8756_s26, 16, %s2163_s18, [#allocation39]  }
 0x159   : > { %s8174_s7 = smov [#allocation41]   ;;  %s2220_s1 = sshll.u32 %s8539_s30, 4  ;;  %s8778_s1 = int_to_ptr.hbm [resolvable:$true] %s2220_s1 }
 0x15a   : > { %s2192_s10 = sshll.u32 %s8174_s7, 4  ;;  %s7336_s28 = sshra.s32 %s8767_s2, 4  ;;  %s2193_s10 = int_to_ptr.vmem [resolvable:$true] %s2192_s10  ;;  %s7337_s28 = int_to_ptr.hbm [resolvable:$true] %s7336_s28 }
 0x15b   : > { %s7338_s16 = scalar_lea.hbm %s7337_s28, 1  ;;  %s7342_s0 = scalar_lea.hbm %s10009_s3, 1 }
 0x15c   : > { %p7339_p1 = scmp.ne.s32.totalorder %s7337_s28, %s7338_s16  ;;  %p7343_p4 = scmp.lt.s32.totalorder %s7337_s28, %s10009_s3 }
 0x15d   : > { %p7344_p7 = scmp.lt.s32.totalorder %s7342_s0, %s7338_s16 }
 0x15e   : > { %p7340_p2 = pnand %p7339_p1, %p6603_p10 }
 0x15f   : > { %p7345_p8 = por %p7344_p7, %p7343_p4 }
 0x160   : > { %p7341_p3 = pneg %p7340_p2 }
 0x162   : > { %p7346_p11 = pnand %p7345_p8, %p7341_p3 }
 0x164   : > { %7349 = shalt.err (!%p7346_p11)
}
 0x165   : > { %s10020_s26 = sld [smem:[#allocation138_spill]]  ;;  %s8175_s23 = smov [#allocation44]  }
 0x166   : > { %6512 = dma.hbm_to_vmem [thread:$0]  (%p6603_p10), %s8767_s2, 16, %s2193_s10, [#allocation42]  }
 0x167   : > { %s2222_s7 = sshll.u32 %s8175_s23, 4  ;;  %s7364_s28 = sshra.s32 %s8778_s1, 4  ;;  %s2223_s7 = int_to_ptr.vmem [resolvable:$true] %s2222_s7  ;;  %s7365_s28 = int_to_ptr.hbm [resolvable:$true] %s7364_s28 }
 0x168   : > { %s7366_s16 = scalar_lea.hbm %s7365_s28, 1  ;;  %s7370_s0 = scalar_lea.hbm %s8539_s30, 1 }
 0x169   : > { %p7367_p12 = scmp.ne.s32.totalorder %s7365_s28, %s7366_s16  ;;  %p7371_p1 = scmp.lt.s32.totalorder %s7365_s28, %s8539_s30 }
 0x16a   : > { %p7372_p2 = scmp.lt.s32.totalorder %s7370_s0, %s7366_s16 }
 0x16b   : > { %s2244_s18 = sshll.u32 %s10020_s26, 4  ;;  %p7368_p13 = pnand %p7367_p12, %p6603_p10  ;;  %s8789_s18 = int_to_ptr.hbm [resolvable:$true] %s2244_s18 }
 0x16c   : > { %p7373_p3 = por %p7372_p2, %p7371_p1 }
 0x16d   : > { %p7369_p0 = pneg %p7368_p13 }
 0x16f   : > { %p7374_p4 = pnand %p7373_p3, %p7369_p0 }
 0x171   : > { %7377 = shalt.err (!%p7374_p4)
}
 0x172   : > { %s10021_s2 = sld [smem:[#allocation140_spill]]  ;;  %s8176_s10 = smov [#allocation47]  }
 0x173   : > { %6516 = dma.hbm_to_vmem [thread:$0]  (%p6603_p10), %s8778_s1, 16, %s2223_s7, [#allocation45]  }
 0x174   : > { %s2246_s23 = sshll.u32 %s8176_s10, 4  ;;  %s7392_s28 = sshra.s32 %s8789_s18, 4  ;;  %s2247_s23 = int_to_ptr.vmem [resolvable:$true] %s2246_s23  ;;  %s7393_s28 = int_to_ptr.hbm [resolvable:$true] %s7392_s28 }
 0x175   : > { %s7394_s16 = scalar_lea.hbm %s7393_s28, 1  ;;  %s7398_s0 = scalar_lea.hbm %s10020_s26, 1 }
 0x176   : > { %p7395_p7 = scmp.ne.s32.totalorder %s7393_s28, %s7394_s16  ;;  %p7399_p12 = scmp.lt.s32.totalorder %s7393_s28, %s10020_s26 }
 0x177   : > { %p7400_p13 = scmp.lt.s32.totalorder %s7398_s0, %s7394_s16 }
 0x178   : > { %s2268_s3 = sshll.u32 %s10021_s2, 4  ;;  %p7396_p8 = pnand %p7395_p7, %p6603_p10  ;;  %s8800_s3 = int_to_ptr.hbm [resolvable:$true] %s2268_s3 }
 0x179   : > { %p7401_p0 = por %p7400_p13, %p7399_p12 }
 0x17a   : > { %p7397_p11 = pneg %p7396_p8 }
 0x17c   : > { %p7402_p1 = pnand %p7401_p0, %p7397_p11 }
 0x17e   : > { %7405 = shalt.err (!%p7402_p1)
}
 0x17f   : > { %s10022_s1 = sld [smem:[#allocation96_spill]]  ;;  %s8177_s7 = smov [#allocation50]  }
 0x180   : > { %6520 = dma.hbm_to_vmem [thread:$0]  (%p6603_p10), %s8789_s18, 16, %s2247_s23, [#allocation48]  }
 0x181   : > { %s2270_s10 = sshll.u32 %s8177_s7, 4  ;;  %s7420_s28 = sshra.s32 %s8800_s3, 4  ;;  %s2271_s10 = int_to_ptr.vmem [resolvable:$true] %s2270_s10  ;;  %s7421_s28 = int_to_ptr.hbm [resolvable:$true] %s7420_s28 }
 0x182   : > { %s7422_s16 = scalar_lea.hbm %s7421_s28, 1  ;;  %s7426_s0 = scalar_lea.hbm %s10021_s2, 1 }
 0x183   : > { %p7423_p2 = scmp.ne.s32.totalorder %s7421_s28, %s7422_s16  ;;  %p7427_p7 = scmp.lt.s32.totalorder %s7421_s28, %s10021_s2 }
 0x184   : > { %p7428_p8 = scmp.lt.s32.totalorder %s7426_s0, %s7422_s16 }
 0x185   : > { %s1848_s4 = sshll.u32 %s10022_s1, 4  ;;  %p7424_p3 = pnand %p7423_p2, %p6603_p10  ;;  %s8811_s4 = int_to_ptr.hbm [resolvable:$true] %s1848_s4 }
 0x186   : > { %p7429_p11 = por %p7428_p8, %p7427_p7 }
 0x187   : > { %p7425_p4 = pneg %p7424_p3 }
 0x189   : > { %p7430_p12 = pnand %p7429_p11, %p7425_p4 }
 0x18b   : > { %7433 = shalt.err (!%p7430_p12)
}
 0x18c   : > { %s10023_s18 = sld [smem:[#allocation101_spill]]  ;;  %s8178_s6 = smov [#allocation2]  }
 0x18d   : > { %6524 = dma.hbm_to_vmem [thread:$0]  (%p6603_p10), %s8800_s3, 16, %s2271_s10, [#allocation51]  }
 0x18e   : > { %s1850_s8 = sshll.u32 %s8178_s6, 4  ;;  %s7448_s28 = sshra.s32 %s8811_s4, 4  ;;  %s1851_s8 = int_to_ptr.vmem [resolvable:$true] %s1850_s8  ;;  %s7449_s28 = int_to_ptr.hbm [resolvable:$true] %s7448_s28 }
 0x18f   : > { %s7450_s16 = scalar_lea.hbm %s7449_s28, 1  ;;  %s7454_s0 = scalar_lea.hbm %s10022_s1, 1 }
 0x190   : > { %p7451_p13 = scmp.ne.s32.totalorder %s7449_s28, %s7450_s16  ;;  %p7455_p2 = scmp.lt.s32.totalorder %s7449_s28, %s10022_s1 }
 0x191   : > { %p7456_p3 = scmp.lt.s32.totalorder %s7454_s0, %s7450_s16 }
 0x192   : > { %s10024_s23 = smov %s10023_s18  ;;  %s1881_s7 = sshll.u32 %s10023_s18, 4  ;;  %s8822_s7 = int_to_ptr.hbm [resolvable:$true] %s1881_s7 }
 0x193   : > { %p7452_p0 = pnand %p7451_p13, %p6603_p10  ;;  %p7457_p4 = por %p7456_p3, %p7455_p2 }
 0x195   : > { %p7453_p1 = pneg %p7452_p0 }
 0x197   : > { %p7458_p7 = pnand %p7457_p4, %p7453_p1 }
 0x199   : > { %7461 = shalt.err (!%p7458_p7)
}
 0x19a   : > { %s10025_s3 = sld [smem:[#allocation105_spill]]  ;;  %s8179_s6 = smov [#allocation7]  }
 0x19b   : > { %6462 = dma.hbm_to_vmem [thread:$0]  (%p6603_p10), %s8811_s4, 16, %s1851_s8, [#allocation3]  }
 0x19c   : > { %s1883_s10 = sshll.u32 %s8179_s6, 4  ;;  %s7476_s28 = sshra.s32 %s8822_s7, 4  ;;  %s1884_s10 = int_to_ptr.vmem [resolvable:$true] %s1883_s10  ;;  %s7477_s28 = int_to_ptr.hbm [resolvable:$true] %s7476_s28 }
 0x19d   : > { %s7478_s16 = scalar_lea.hbm %s7477_s28, 1  ;;  %s7482_s0 = scalar_lea.hbm %s10024_s23, 1 }
 0x19e   : > { %p7479_p8 = scmp.ne.s32.totalorder %s7477_s28, %s7478_s16  ;;  %p7483_p13 = scmp.lt.s32.totalorder %s7477_s28, %s10024_s23 }
 0x19f   : > { %p7484_p0 = scmp.lt.s32.totalorder %s7482_s0, %s7478_s16 }
 0x1a0   : > { %s1911_s18 = sshll.u32 %s10025_s3, 4  ;;  %p7480_p11 = pnand %p7479_p8, %p6603_p10  ;;  %s8833_s18 = int_to_ptr.hbm [resolvable:$true] %s1911_s18 }
 0x1a1   : > { %p7485_p1 = por %p7484_p0, %p7483_p13 }
 0x1a2   : > { %p7481_p12 = pneg %p7480_p11 }
 0x1a4   : > { %p7486_p2 = pnand %p7485_p1, %p7481_p12 }
 0x1a6   : > { %7489 = shalt.err (!%p7486_p2)
}
 0x1a7   : > { %s10026_s8 = sld [smem:[#allocation106_spill]]  ;;  %s8180_s6 = smov [#allocation10]  }
 0x1a8   : > { %6466 = dma.hbm_to_vmem [thread:$0]  (%p6603_p10), %s8822_s7, 16, %s1884_s10, [#allocation6]  }
 0x1a9   : > { %s1913_s1 = sshll.u32 %s8180_s6, 4  ;;  %s7504_s28 = sshra.s32 %s8833_s18, 4  ;;  %s1914_s1 = int_to_ptr.vmem [resolvable:$true] %s1913_s1  ;;  %s7505_s28 = int_to_ptr.hbm [resolvable:$true] %s7504_s28 }
 0x1aa   : > { %s7506_s16 = scalar_lea.hbm %s7505_s28, 1  ;;  %s7510_s0 = scalar_lea.hbm %s10025_s3, 1 }
 0x1ab   : > { %p7507_p3 = scmp.ne.s32.totalorder %s7505_s28, %s7506_s16  ;;  %p7511_p8 = scmp.lt.s32.totalorder %s7505_s28, %s10025_s3 }
 0x1ac   : > { %p7512_p11 = scmp.lt.s32.totalorder %s7510_s0, %s7506_s16 }
 0x1ad   : > { %s1935_s4 = sshll.u32 %s10026_s8, 4  ;;  %p7508_p4 = pnand %p7507_p3, %p6603_p10  ;;  %s8844_s4 = int_to_ptr.hbm [resolvable:$true] %s1935_s4 }
 0x1ae   : > { %p7513_p12 = por %p7512_p11, %p7511_p8 }
 0x1af   : > { %p7509_p7 = pneg %p7508_p4 }
 0x1b1   : > { %p7514_p13 = pnand %p7513_p12, %p7509_p7 }
 0x1b3   : > { %7517 = shalt.err (!%p7514_p13)
}
 0x1b4   : > { %s10027_s7 = sld [smem:[#allocation108_spill]]  ;;  %s8181_s10 = smov [#allocation13]  }
 0x1b5   : > { %6470 = dma.hbm_to_vmem [thread:$0]  (%p6603_p10), %s8833_s18, 16, %s1914_s1, [#allocation9]  }
 0x1b6   : > { %s1937_s6 = sshll.u32 %s8181_s10, 4  ;;  %s7532_s28 = sshra.s32 %s8844_s4, 4  ;;  %s1938_s6 = int_to_ptr.vmem [resolvable:$true] %s1937_s6  ;;  %s7533_s28 = int_to_ptr.hbm [resolvable:$true] %s7532_s28 }
 0x1b7   : > { %s7534_s16 = scalar_lea.hbm %s7533_s28, 1  ;;  %s7538_s0 = scalar_lea.hbm %s10026_s8, 1 }
 0x1b8   : > { %p7535_p0 = scmp.ne.s32.totalorder %s7533_s28, %s7534_s16  ;;  %p7539_p3 = scmp.lt.s32.totalorder %s7533_s28, %s10026_s8 }
 0x1b9   : > { %p7540_p4 = scmp.lt.s32.totalorder %s7538_s0, %s7534_s16 }
 0x1ba   : > { %s1959_s2 = sshll.u32 %s10027_s7, 4  ;;  %p7536_p1 = pnand %p7535_p0, %p6603_p10  ;;  %s8855_s2 = int_to_ptr.hbm [resolvable:$true] %s1959_s2 }
 0x1bb   : > { %p7541_p7 = por %p7540_p4, %p7539_p3 }
 0x1bc   : > { %p7537_p2 = pneg %p7536_p1 }
 0x1be   : > { %p7542_p8 = pnand %p7541_p7, %p7537_p2 }
 0x1c0   : > { %7545 = shalt.err (!%p7542_p8)
}
 0x1c1   : > { %s10028_s1 = sld [smem:[#allocation110_spill]]  ;;  %s8182_s10 = smov [#allocation16]  }
 0x1c2   : > { %6474 = dma.hbm_to_vmem [thread:$0]  (%p6603_p10), %s8844_s4, 16, %s1938_s6, [#allocation12]  }
 0x1c3   : > { %s1961_s3 = sshll.u32 %s8182_s10, 4  ;;  %s7560_s28 = sshra.s32 %s8855_s2, 4  ;;  %s1962_s3 = int_to_ptr.vmem [resolvable:$true] %s1961_s3  ;;  %s7561_s28 = int_to_ptr.hbm [resolvable:$true] %s7560_s28 }
 0x1c4   : > { %s7562_s16 = scalar_lea.hbm %s7561_s28, 1  ;;  %s7566_s0 = scalar_lea.hbm %s10027_s7, 1 }
 0x1c5   : > { %p7563_p11 = scmp.ne.s32.totalorder %s7561_s28, %s7562_s16  ;;  %p7567_p0 = scmp.lt.s32.totalorder %s7561_s28, %s10027_s7 }
 0x1c6   : > { %p7568_p1 = scmp.lt.s32.totalorder %s7566_s0, %s7562_s16 }
 0x1c7   : > { %s1983_s18 = sshll.u32 %s10028_s1, 4  ;;  %p7564_p12 = pnand %p7563_p11, %p6603_p10  ;;  %s8866_s18 = int_to_ptr.hbm [resolvable:$true] %s1983_s18 }
 0x1c8   : > { %p7569_p2 = por %p7568_p1, %p7567_p0 }
 0x1c9   : > { %p7565_p13 = pneg %p7564_p12 }
 0x1cb   : > { %p7570_p3 = pnand %p7569_p2, %p7565_p13 }
 0x1cd   : > { %7573 = shalt.err (!%p7570_p3)
}
 0x1ce   : > { %s10029_s4 = sld [smem:[#allocation114_spill]]  ;;  %s8183_s6 = smov [#allocation19]  }
 0x1cf   : > { %6478 = dma.hbm_to_vmem [thread:$0]  (%p6603_p10), %s8855_s2, 16, %s1962_s3, [#allocation15]  }
 0x1d0   : > { %s1985_s10 = sshll.u32 %s8183_s6, 4  ;;  %s7588_s28 = sshra.s32 %s8866_s18, 4  ;;  %s1986_s10 = int_to_ptr.vmem [resolvable:$true] %s1985_s10  ;;  %s7589_s28 = int_to_ptr.hbm [resolvable:$true] %s7588_s28 }
 0x1d1   : > { %s7590_s16 = scalar_lea.hbm %s7589_s28, 1  ;;  %s7594_s0 = scalar_lea.hbm %s10028_s1, 1 }
 0x1d2   : > { %p7591_p4 = scmp.ne.s32.totalorder %s7589_s28, %s7590_s16  ;;  %p7595_p11 = scmp.lt.s32.totalorder %s7589_s28, %s10028_s1 }
 0x1d3   : > { %p7596_p12 = scmp.lt.s32.totalorder %s7594_s0, %s7590_s16 }
 0x1d4   : > { %s2013_s8 = sshll.u32 %s10029_s4, 4  ;;  %p7592_p7 = pnand %p7591_p4, %p6603_p10  ;;  %s8877_s8 = int_to_ptr.hbm [resolvable:$true] %s2013_s8 }
 0x1d5   : > { %p7597_p13 = por %p7596_p12, %p7595_p11 }
 0x1d6   : > { %p7593_p8 = pneg %p7592_p7 }
 0x1d8   : > { %p7598_p0 = pnand %p7597_p13, %p7593_p8 }
 0x1da   : > { %7601 = shalt.err (!%p7598_p0)
}
 0x1db   : > { %s10030_s2 = sld [smem:[#allocation116_spill]]  ;;  %s8184_s6 = smov [#allocation22]  }
 0x1dc   : > { %6482 = dma.hbm_to_vmem [thread:$0]  (%p6603_p10), %s8866_s18, 16, %s1986_s10, [#allocation18]  }
 0x1dd   : > { %s2015_s7 = sshll.u32 %s8184_s6, 4  ;;  %s7616_s28 = sshra.s32 %s8877_s8, 4  ;;  %s2016_s7 = int_to_ptr.vmem [resolvable:$true] %s2015_s7  ;;  %s7617_s28 = int_to_ptr.hbm [resolvable:$true] %s7616_s28 }
 0x1de   : > { %s7618_s16 = scalar_lea.hbm %s7617_s28, 1  ;;  %s7622_s0 = scalar_lea.hbm %s10029_s4, 1 }
 0x1df   : > { %p7619_p1 = scmp.ne.s32.totalorder %s7617_s28, %s7618_s16  ;;  %p7623_p4 = scmp.lt.s32.totalorder %s7617_s28, %s10029_s4 }
 0x1e0   : > { %p7624_p7 = scmp.lt.s32.totalorder %s7622_s0, %s7618_s16 }
 0x1e1   : > { %s2037_s3 = sshll.u32 %s10030_s2, 4  ;;  %p7620_p2 = pnand %p7619_p1, %p6603_p10  ;;  %s8888_s3 = int_to_ptr.hbm [resolvable:$true] %s2037_s3 }
 0x1e2   : > { %p7625_p8 = por %p7624_p7, %p7623_p4 }
 0x1e3   : > { %p7621_p3 = pneg %p7620_p2 }
 0x1e5   : > { %p7626_p11 = pnand %p7625_p8, %p7621_p3 }
 0x1e7   : > { %7629 = shalt.err (!%p7626_p11)
}
 0x1e8   : > { %s10031_s18 = sld [smem:[#allocation121_spill]]  ;;  %s8185_s6 = smov [#allocation25]  }
 0x1e9   : > { %6486 = dma.hbm_to_vmem [thread:$0]  (%p6603_p10), %s8877_s8, 16, %s2016_s7, [#allocation21]  }
 0x1ea   : > { %s2039_s1 = sshll.u32 %s8185_s6, 4  ;;  %s7644_s28 = sshra.s32 %s8888_s3, 4  ;;  %s2040_s1 = int_to_ptr.vmem [resolvable:$true] %s2039_s1  ;;  %s7645_s28 = int_to_ptr.hbm [resolvable:$true] %s7644_s28 }
 0x1eb   : > { %s7646_s16 = scalar_lea.hbm %s7645_s28, 1  ;;  %s7650_s0 = scalar_lea.hbm %s10030_s2, 1 }
 0x1ec   : > { %p7647_p12 = scmp.ne.s32.totalorder %s7645_s28, %s7646_s16  ;;  %p7651_p1 = scmp.lt.s32.totalorder %s7645_s28, %s10030_s2 }
 0x1ed   : > { %p7652_p2 = scmp.lt.s32.totalorder %s7650_s0, %s7646_s16 }
 0x1ee   : > { %s10032_s10 = smov %s10031_s18  ;;  %s2070_s9 = sshll.u32 %s10031_s18, 4  ;;  %s8899_s9 = int_to_ptr.hbm [resolvable:$true] %s2070_s9 }
 0x1ef   : > { %p7648_p13 = pnand %p7647_p12, %p6603_p10  ;;  %p7653_p3 = por %p7652_p2, %p7651_p1 }
 0x1f1   : > { %p7649_p0 = pneg %p7648_p13 }
 0x1f3   : > { %p7654_p4 = pnand %p7653_p3, %p7649_p0 }
 0x1f5   : > { %7657 = shalt.err (!%p7654_p4)
}
 0x1f6   : > { %s10033_s8 = sld [smem:[#allocation123_spill]]  ;;  %s8186_s18 = smov [#allocation28]  }
 0x1f7   : > { %6490 = dma.hbm_to_vmem [thread:$0]  (%p6603_p10), %s8888_s3, 16, %s2040_s1, [#allocation24]  }
 0x1f8   : > { %s2072_s6 = sshll.u32 %s8186_s18, 4  ;;  %s7672_s28 = sshra.s32 %s8899_s9, 4  ;;  %s2073_s6 = int_to_ptr.vmem [resolvable:$true] %s2072_s6  ;;  %s7673_s28 = int_to_ptr.hbm [resolvable:$true] %s7672_s28 }
 0x1f9   : > { %s7674_s16 = scalar_lea.hbm %s7673_s28, 1  ;;  %s7678_s0 = scalar_lea.hbm %s10032_s10, 1 }
 0x1fa   : > { %p7675_p7 = scmp.ne.s32.totalorder %s7673_s28, %s7674_s16  ;;  %p7679_p12 = scmp.lt.s32.totalorder %s7673_s28, %s10032_s10 }
 0x1fb   : > { %p7680_p13 = scmp.lt.s32.totalorder %s7678_s0, %s7674_s16 }
 0x1fc   : > { %s2094_s7 = sshll.u32 %s10033_s8, 4  ;;  %p7676_p8 = pnand %p7675_p7, %p6603_p10  ;;  %s8910_s7 = int_to_ptr.hbm [resolvable:$true] %s2094_s7 }
 0x1fd   : > { %p7681_p0 = por %p7680_p13, %p7679_p12 }
 0x1fe   : > { %p7677_p11 = pneg %p7676_p8 }
 0x200   : > { %p7682_p1 = pnand %p7681_p0, %p7677_p11 }
 0x202   : > { %7685 = shalt.err (!%p7682_p1)
}
 0x203   : > { %s10034_s1 = sld [smem:[#allocation127_spill]]  ;;  %s8187_s3 = smov [#allocation31]  }
 0x204   : > { %6494 = dma.hbm_to_vmem [thread:$0]  (%p6603_p10), %s8899_s9, 16, %s2073_s6, [#allocation27]  }
 0x205   : > { %s2096_s18 = sshll.u32 %s8187_s3, 4  ;;  %s7700_s28 = sshra.s32 %s8910_s7, 4  ;;  %s2097_s18 = int_to_ptr.vmem [resolvable:$true] %s2096_s18  ;;  %s7701_s28 = int_to_ptr.hbm [resolvable:$true] %s7700_s28 }
 0x206   : > { %s7702_s16 = scalar_lea.hbm %s7701_s28, 1  ;;  %s7706_s0 = scalar_lea.hbm %s10033_s8, 1 }
 0x207   : > { %p7703_p2 = scmp.ne.s32.totalorder %s7701_s28, %s7702_s16  ;;  %p7707_p7 = scmp.lt.s32.totalorder %s7701_s28, %s10033_s8 }
 0x208   : > { %p7708_p8 = scmp.lt.s32.totalorder %s7706_s0, %s7702_s16 }
 0x209   : > { %s2124_s2 = sshll.u32 %s10034_s1, 4  ;;  %p7704_p3 = pnand %p7703_p2, %p6603_p10  ;;  %s8921_s2 = int_to_ptr.hbm [resolvable:$true] %s2124_s2 }
 0x20a   : > { %p7709_p11 = por %p7708_p8, %p7707_p7 }
 0x20b   : > { %p7705_p4 = pneg %p7704_p3 }
 0x20d   : > { %p7710_p12 = pnand %p7709_p11, %p7705_p4 }
 0x20f   : > { %7713 = shalt.err (!%p7710_p12)
}
 0x210   : > { %s10035_s9 = sld [smem:[#allocation128_spill]]  ;;  %s8188_s3 = smov [#allocation34]  }
 0x211   : > { %6498 = dma.hbm_to_vmem [thread:$0]  (%p6603_p10), %s8910_s7, 16, %s2097_s18, [#allocation30]  }
 0x212   : > { %s2126_s4 = sshll.u32 %s8188_s3, 4  ;;  %s7728_s28 = sshra.s32 %s8921_s2, 4  ;;  %s2127_s4 = int_to_ptr.vmem [resolvable:$true] %s2126_s4  ;;  %s7729_s28 = int_to_ptr.hbm [resolvable:$true] %s7728_s28 }
 0x213   : > { %s7730_s16 = scalar_lea.hbm %s7729_s28, 1  ;;  %s7734_s0 = scalar_lea.hbm %s10034_s1, 1 }
 0x214   : > { %p7731_p13 = scmp.ne.s32.totalorder %s7729_s28, %s7730_s16  ;;  %p7735_p2 = scmp.lt.s32.totalorder %s7729_s28, %s10034_s1 }
 0x215   : > { %p7736_p3 = scmp.lt.s32.totalorder %s7734_s0, %s7730_s16 }
 0x216   : > { %s2148_s6 = sshll.u32 %s10035_s9, 4  ;;  %p7732_p0 = pnand %p7731_p13, %p6603_p10  ;;  %s8932_s6 = int_to_ptr.hbm [resolvable:$true] %s2148_s6 }
 0x217   : > { %p7737_p4 = por %p7736_p3, %p7735_p2 }
 0x218   : > { %p7733_p1 = pneg %p7732_p0 }
 0x21a   : > { %p7738_p7 = pnand %p7737_p4, %p7733_p1 }
 0x21c   : > { %7741 = shalt.err (!%p7738_p7)
}
 0x21d   : > { %s10036_s7 = sld [smem:[#allocation130_spill]]  ;;  %s8189_s18 = smov [#allocation37]  }
 0x21e   : > { %6502 = dma.hbm_to_vmem [thread:$0]  (%p6603_p10), %s8921_s2, 16, %s2127_s4, [#allocation33]  }
 0x21f   : > { %s2150_s3 = sshll.u32 %s8189_s18, 4  ;;  %s7756_s28 = sshra.s32 %s8932_s6, 4  ;;  %s2151_s3 = int_to_ptr.vmem [resolvable:$true] %s2150_s3  ;;  %s7757_s28 = int_to_ptr.hbm [resolvable:$true] %s7756_s28 }
 0x220   : > { %s7758_s16 = scalar_lea.hbm %s7757_s28, 1  ;;  %s7762_s0 = scalar_lea.hbm %s10035_s9, 1 }
 0x221   : > { %p7759_p8 = scmp.ne.s32.totalorder %s7757_s28, %s7758_s16  ;;  %p7763_p13 = scmp.lt.s32.totalorder %s7757_s28, %s10035_s9 }
 0x222   : > { %p7764_p0 = scmp.lt.s32.totalorder %s7762_s0, %s7758_s16 }
 0x223   : > { %s2172_s8 = sshll.u32 %s10036_s7, 4  ;;  %p7760_p11 = pnand %p7759_p8, %p6603_p10  ;;  %s8943_s8 = int_to_ptr.hbm [resolvable:$true] %s2172_s8 }
 0x224   : > { %p7765_p1 = por %p7764_p0, %p7763_p13 }
 0x225   : > { %p7761_p12 = pneg %p7760_p11 }
 0x227   : > { %p7766_p2 = pnand %p7765_p1, %p7761_p12 }
 0x229   : > { %7769 = shalt.err (!%p7766_p2)
}
 0x22a   : > { %s10037_s4 = sld [smem:[#allocation134_spill]]  ;;  %s8190_s18 = smov [#allocation40]  }
 0x22b   : > { %6506 = dma.hbm_to_vmem [thread:$0]  (%p6603_p10), %s8932_s6, 16, %s2151_s3, [#allocation36]  }
 0x22c   : > { %s2174_s1 = sshll.u32 %s8190_s18, 4  ;;  %s7784_s28 = sshra.s32 %s8943_s8, 4  ;;  %s2175_s1 = int_to_ptr.vmem [resolvable:$true] %s2174_s1  ;;  %s7785_s28 = int_to_ptr.hbm [resolvable:$true] %s7784_s28 }
 0x22d   : > { %s7786_s16 = scalar_lea.hbm %s7785_s28, 1  ;;  %s7790_s0 = scalar_lea.hbm %s10036_s7, 1 }
 0x22e   : > { %p7787_p3 = scmp.ne.s32.totalorder %s7785_s28, %s7786_s16  ;;  %p7791_p8 = scmp.lt.s32.totalorder %s7785_s28, %s10036_s7 }
 0x22f   : > { %p7792_p11 = scmp.lt.s32.totalorder %s7790_s0, %s7786_s16 }
 0x230   : > { %s2202_s2 = sshll.u32 %s10037_s4, 4  ;;  %p7788_p4 = pnand %p7787_p3, %p6603_p10  ;;  %s8954_s2 = int_to_ptr.hbm [resolvable:$true] %s2202_s2 }
 0x231   : > { %p7793_p12 = por %p7792_p11, %p7791_p8 }
 0x232   : > { %p7789_p7 = pneg %p7788_p4 }
 0x234   : > { %p7794_p13 = pnand %p7793_p12, %p7789_p7 }
 0x236   : > { %7797 = shalt.err (!%p7794_p13)
}
 0x237   : > { %s10038_s6 = sld [smem:[#allocation137_spill]]  ;;  %s8191_s3 = smov [#allocation43]  }
 0x238   : > { %6510 = dma.hbm_to_vmem [thread:$0]  (%p6603_p10), %s8943_s8, 16, %s2175_s1, [#allocation39]  }
 0x239   : > { %s2204_s18 = sshll.u32 %s8191_s3, 4  ;;  %s7812_s28 = sshra.s32 %s8954_s2, 4  ;;  %s2205_s18 = int_to_ptr.vmem [resolvable:$true] %s2204_s18  ;;  %s7813_s28 = int_to_ptr.hbm [resolvable:$true] %s7812_s28 }
 0x23a   : > { %s7814_s16 = scalar_lea.hbm %s7813_s28, 1  ;;  %s7818_s0 = scalar_lea.hbm %s10037_s4, 1 }
 0x23b   : > { %p7815_p0 = scmp.ne.s32.totalorder %s7813_s28, %s7814_s16  ;;  %p7819_p3 = scmp.lt.s32.totalorder %s7813_s28, %s10037_s4 }
 0x23c   : > { %p7820_p4 = scmp.lt.s32.totalorder %s7818_s0, %s7814_s16 }
 0x23d   : > { %s2232_s9 = sshll.u32 %s10038_s6, 4  ;;  %p7816_p1 = pnand %p7815_p0, %p6603_p10  ;;  %s8965_s9 = int_to_ptr.hbm [resolvable:$true] %s2232_s9 }
 0x23e   : > { %p7821_p7 = por %p7820_p4, %p7819_p3 }
 0x23f   : > { %p7817_p2 = pneg %p7816_p1 }
 0x241   : > { %p7822_p8 = pnand %p7821_p7, %p7817_p2 }
 0x243   : > { %7825 = shalt.err (!%p7822_p8)
}
 0x244   : > { %s10039_s8 = sld [smem:[#allocation139_spill]]  ;;  %s8192_s3 = smov [#allocation46]  }
 0x245   : > { %6514 = dma.hbm_to_vmem [thread:$0]  (%p6603_p10), %s8954_s2, 16, %s2205_s18, [#allocation42]  }
 0x246   : > { %s2234_s7 = sshll.u32 %s8192_s3, 4  ;;  %s7840_s28 = sshra.s32 %s8965_s9, 4  ;;  %s2235_s7 = int_to_ptr.vmem [resolvable:$true] %s2234_s7  ;;  %s7841_s28 = int_to_ptr.hbm [resolvable:$true] %s7840_s28 }
 0x247   : > { %s7842_s16 = scalar_lea.hbm %s7841_s28, 1  ;;  %s7846_s0 = scalar_lea.hbm %s10038_s6, 1 }
 0x248   : > { %p7843_p11 = scmp.ne.s32.totalorder %s7841_s28, %s7842_s16  ;;  %p7847_p0 = scmp.lt.s32.totalorder %s7841_s28, %s10038_s6 }
 0x249   : > { %p7848_p1 = scmp.lt.s32.totalorder %s7846_s0, %s7842_s16 }
 0x24a   : > { %s2256_s1 = sshll.u32 %s10039_s8, 4  ;;  %p7844_p12 = pnand %p7843_p11, %p6603_p10  ;;  %s8976_s1 = int_to_ptr.hbm [resolvable:$true] %s2256_s1 }
 0x24b   : > { %p7849_p2 = por %p7848_p1, %p7847_p0 }
 0x24c   : > { %p7845_p13 = pneg %p7844_p12 }
 0x24e   : > { %p7850_p3 = pnand %p7849_p2, %p7845_p13 }
 0x250   : > { %7853 = shalt.err (!%p7850_p3)
}
 0x251   : > { %s10040_s2 = sld [smem:[#allocation141_spill]]  ;;  %s8193_s18 = smov [#allocation49]  }
 0x252   : > { %6518 = dma.hbm_to_vmem [thread:$0]  (%p6603_p10), %s8965_s9, 16, %s2235_s7, [#allocation45]  }
 0x253   : > { %s2258_s3 = sshll.u32 %s8193_s18, 4  ;;  %s7868_s28 = sshra.s32 %s8976_s1, 4  ;;  %s2259_s3 = int_to_ptr.vmem [resolvable:$true] %s2258_s3  ;;  %s7869_s28 = int_to_ptr.hbm [resolvable:$true] %s7868_s28 }
 0x254   : > { %s7870_s16 = scalar_lea.hbm %s7869_s28, 1  ;;  %s7874_s0 = scalar_lea.hbm %s10039_s8, 1 }
 0x255   : > { %p7871_p4 = scmp.ne.s32.totalorder %s7869_s28, %s7870_s16  ;;  %p7875_p11 = scmp.lt.s32.totalorder %s7869_s28, %s10039_s8 }
 0x256   : > { %p7876_p12 = scmp.lt.s32.totalorder %s7874_s0, %s7870_s16 }
 0x257   : > { %s2280_s4 = sshll.u32 %s10040_s2, 4  ;;  %p7872_p7 = pnand %p7871_p4, %p6603_p10  ;;  %s8987_s4 = int_to_ptr.hbm [resolvable:$true] %s2280_s4 }
 0x258   : > { %p7877_p13 = por %p7876_p12, %p7875_p11 }
 0x259   : > { %p7873_p8 = pneg %p7872_p7 }
 0x25b   : > { %p7878_p0 = pnand %p7877_p13, %p7873_p8 }
 0x25d   : > { %7881 = shalt.err (!%p7878_p0)
}
 0x25e   : > { %6522 = dma.hbm_to_vmem [thread:$0]  (%p6603_p10), %s8976_s1, 16, %s2259_s3, [#allocation48]  }
 0x25f   : > { %s2298_s9 = sshll.u32 %s8579_s29, 4  ;;  %s8194_s7 = smov [#allocation52]   ;;  %s8998_s9 = int_to_ptr.hbm [resolvable:$true] %s2298_s9 }
 0x260   : > { %s2282_s18 = sshll.u32 %s8194_s7, 4  ;;  %s7896_s28 = sshra.s32 %s8987_s4, 4  ;;  %s2283_s18 = int_to_ptr.vmem [resolvable:$true] %s2282_s18  ;;  %s7897_s28 = int_to_ptr.hbm [resolvable:$true] %s7896_s28 }
 0x261   : > { %s7898_s16 = scalar_lea.hbm %s7897_s28, 1  ;;  %s7902_s0 = scalar_lea.hbm %s10040_s2, 1 }
 0x262   : > { %p7899_p1 = scmp.ne.s32.totalorder %s7897_s28, %s7898_s16  ;;  %p7903_p4 = scmp.lt.s32.totalorder %s7897_s28, %s10040_s2 }
 0x263   : > { %p7904_p7 = scmp.lt.s32.totalorder %s7902_s0, %s7898_s16 }
 0x264   : > { %p7900_p2 = pnand %p7899_p1, %p6603_p10 }
 0x265   : > { %p7905_p8 = por %p7904_p7, %p7903_p4 }
 0x266   : > { %p7901_p3 = pneg %p7900_p2 }
 0x268   : > { %p7906_p11 = pnand %p7905_p8, %p7901_p3 }
 0x26a   : > { %7909 = shalt.err (!%p7906_p11)
}
 0x26b   : > { %6526 = dma.hbm_to_vmem [thread:$0]  (%p6603_p10), %s8987_s4, 16, %s2283_s18, [#allocation51]  }
 0x26c   : > { %s8195_s1 = smov [#allocation53]   ;;  %s7924_s7 = sshra.s32 %s8998_s9, 4  ;;  %s7925_s7 = int_to_ptr.hbm [resolvable:$true] %s7924_s7 }
 0x26d   : > { %s2300_s3 = sshll.u32 %s8195_s1, 4  ;;  %s7926_s6 = scalar_lea.hbm %s7925_s7, 1  ;;  %s2301_s3 = int_to_ptr.vmem [resolvable:$true] %s2300_s3 }
 0x26e   : > { %p7927_p12 = scmp.ne.s32.totalorder %s7925_s7, %s7926_s6  ;;  %s7930_s28 = scalar_lea.hbm %s8579_s29, 1 }
 0x26f   : > { %p7931_p1 = scmp.lt.s32.totalorder %s7925_s7, %s8579_s29  ;;  %p7932_p2 = scmp.lt.s32.totalorder %s7930_s28, %s7926_s6 }
 0x270   : > { %p7928_p13 = pnand %p7927_p12, %p6603_p10 }
 0x271   : > { %p7933_p3 = por %p7932_p2, %p7931_p1 }
 0x272   : > { %p7929_p0 = pneg %p7928_p13 }
 0x274   : > { %p7934_p4 = pnand %p7933_p3, %p7929_p0 }
 0x276   : > { %7937 = shalt.err (!%p7934_p4)
}
 0x277   : > { %6528 = dma.hbm_to_vmem [thread:$0]  (%p6603_p10), %s8998_s9, 16, %s2301_s3, [#allocation54]  }
 0x278 PF: > { %2344 = sbr.rel (%p8639_p9) target bundleno = 11732 (0x2dd4), region = 316  ;;  %p6637_p7 = scmp.eq.s32.totalorder (!%p8639_p9), %s8612_s22, 0 }
 0x27d   : > { %7997 = dma.done.wait (%p6637_p7), [#allocation3], 16  }
 0x27e   : > { %7999 = vsyncadd (%p6637_p7), [#allocation3], 4294967280 }
 0x27f   : > { %8001 = dma.done.wait (%p6637_p7), [#allocation6], 32  }
 0x280   : > { %8003 = vsyncadd (%p6637_p7), [#allocation6], 4294967264 }
 0x281   : > { %8005 = dma.done.wait (%p6637_p7), [#allocation9], 32  }
 0x282   : > { %8007 = vsyncadd (%p6637_p7), [#allocation9], 4294967264 }
 0x283   : > { %8009 = dma.done.wait (%p6637_p7), [#allocation12], 32  }
 0x284   : > { %8011 = vsyncadd (%p6637_p7), [#allocation12], 4294967264 }
 0x285   : > { %8013 = dma.done.wait (%p6637_p7), [#allocation15], 32  }
 0x286   : > { %8015 = vsyncadd (%p6637_p7), [#allocation15], 4294967264 }
 0x287   : > { %8017 = dma.done.wait (%p6637_p7), [#allocation18], 32  }
 0x288   : > { %8019 = vsyncadd (%p6637_p7), [#allocation18], 4294967264 }
 0x289   : > { %8021 = dma.done.wait (%p6637_p7), [#allocation21], 32  }
 0x28a   : > { %8023 = vsyncadd (%p6637_p7), [#allocation21], 4294967264 }
 0x28b   : > { %8025 = dma.done.wait (%p6637_p7), [#allocation24], 32  }
 0x28c   : > { %8027 = vsyncadd (%p6637_p7), [#allocation24], 4294967264 }
 0x28d   : > { %8029 = dma.done.wait (%p6637_p7), [#allocation27], 32  }
 0x28e   : > { %8031 = vsyncadd (%p6637_p7), [#allocation27], 4294967264 }
 0x28f   : > { %8033 = dma.done.wait (%p6637_p7), [#allocation30], 32  }
 0x290   : > { %8035 = vsyncadd (%p6637_p7), [#allocation30], 4294967264 }
 0x291   : > { %8037 = dma.done.wait (%p6637_p7), [#allocation33], 32  }
 0x292   : > { %8039 = vsyncadd (%p6637_p7), [#allocation33], 4294967264 }
 0x293   : > { %8041 = dma.done.wait (%p6637_p7), [#allocation36], 32  }
 0x294   : > { %8043 = vsyncadd (%p6637_p7), [#allocation36], 4294967264 }
 0x295   : > { %8045 = dma.done.wait (%p6637_p7), [#allocation39], 32  }
 0x296   : > { %8047 = vsyncadd (%p6637_p7), [#allocation39], 4294967264 }
 0x297   : > { %8049 = dma.done.wait (%p6637_p7), [#allocation42], 32  }
 0x298   : > { %8051 = vsyncadd (%p6637_p7), [#allocation42], 4294967264 }
 0x299   : > { %8053 = dma.done.wait (%p6637_p7), [#allocation45], 32  }
 0x29a   : > { %8055 = vsyncadd (%p6637_p7), [#allocation45], 4294967264 }
 0x29b   : > { %8057 = dma.done.wait (%p6637_p7), [#allocation48], 32  }
 0x29c   : > { %8059 = vsyncadd (%p6637_p7), [#allocation48], 4294967264 }
 0x29d   : > { %8061 = dma.done.wait (%p6637_p7), [#allocation51], 32  }
 0x29e   : > { %8063 = vsyncadd (%p6637_p7), [#allocation51], 4294967264 }
 0x29f   : > { %8065 = dma.done.wait (%p6637_p7), [#allocation54], 16  }
 0x2a0   : > { %8067 = vsyncadd (%p6637_p7), [#allocation54], 4294967280  ;;  %s10041_s11 = sld [smem:[#allocation75_spill]]  ;;  %p2687_p9 = scmp.lt.s32.totalorder %s8612_s22, 1  ;;  %vm2862_vm0 = vcmask 261120   ;;  %v8196_v2 = vmov 32.0  }
 0x2a1   : > { %s10042_s18 = sld [smem:[#allocation132_spill]]  ;;  %6874 = vrcp.f32 %v8196_v2  ;;  %v6827_v29 = vld [vmem:[#allocation34] ss:$0 sm:$0xff]  ;;  %v6828_v32 = vld [vmem:[#allocation32] ss:$0 sm:$0xff]  ;;  %s9904_s16 = smov 64  }
 0x2a2   : > { %s2688_s4 = scalar_select %p2687_p9, %s8612_s22, 1  ;;  %v6829_v36 = vld [vmem:[#allocation40] ss:$0 sm:$0xff]  ;;  %vm2925_vm5 = vcmask 64512  }
 0x2a3   : > { %s9902_s0 = smov 120   ;;  %s9908_s3 = smov 96  }
 0x2a4   : > { %s9093_s6 = sshll.u32 %s2688_s4, 3  ;;  %s9900_s7 = smov 80  }
 0x2a5   : > { %s10044_s28 = sld [smem:[#allocation77_spill]]  ;;  %s10067_s10 = smov 24  }
 0x2a6   : > { %s2690_s9 = scalar_lea.vmem %s10041_s11, %s9093_s6  ;;  %s9906_s11 = smov 88  }
 0x2a7   : > { %v9097_v0 = vld [vmem:[%s2690_s9] sm:$0xff]  ;;  %s10043_s1 = smov %s10042_s18  ;;  %v6875_v3 = vpop.eup %6874  ;;  %v2824_v14 = vld [vmem:[%s10042_s18 + $0x10] sm:$0xff]  ;;  %s9882_s9 = smov 56  }
 0x2a8   : > { %v2863_v1 = vsel %vm2862_vm0, %v9097_v0, 0.0  ;;  %v2867_v4 = vmul.f32 32.0, %v6875_v3  ;;  %vm2871_vm1 = vweird.f32 %v6875_v3  ;;  %v2825_v15 = vld [vmem:[%s10043_s1 + $0x18] sm:$0xff]  ;;  %v2822_v16 = vld [vmem:[%s10043_s1] sm:$0xff]  ;;  %v2823_v18 = vld [vmem:[%s10043_s1 + $0x8] sm:$0xff]  ;;  %s9892_s18 = smov 112  }
 0x2a9   : > { %2864 = vadd.xlane.f32.xlu0 %v2863_v1  ;;  %v2902_v17 = vpack.c.bf16 %v2825_v15, %v2824_v14  ;;  %v2901_v19 = vpack.c.bf16 %v2823_v18, %v2822_v16  ;;  %s10056_s1 = sld [smem:[#allocation94_spill]]  ;;  %s10070_s12 = smov 88  }
 0x2aa   : > { %v2868_v5 = vsub.f32 1.0, %v2867_v4  ;;  %s10061_s2 = sld [smem:[#allocation86_spill]]  ;;  %s10071_s13 = smov 120  }
 0x2ab   : > { %2915 = vmatpush.bf16.msra.mxu0 %v2902_v17  ;;  %s2698_s4 = scalar_lea.vmem %s10044_s28, %s9093_s6  ;;  %s9898_s28 = smov 72  }
 0x2ac   : > { %v2869_v6 = vmul.f32 %v6875_v3, %v2868_v5  ;;  %v9132_v45 = vld [vmem:[%s2698_s4] sm:$0xff]  ;;  %s9884_s4 = smov 104   ;;  %s10064_s8 = sld [smem:[#allocation142_spill]] }
 0x2ad   : > { %vm2951_vm6 = vcmp.gt.f32.partialorder %v9132_v45, 0.0  ;;  %s10075_s17 = sld [smem:[#allocation136_spill]] }
 0x2ae   : > { %v2870_v7 = vadd.f32 %v6875_v3, %v2869_v6  ;;  %s10079_s19 = sld [smem:[#allocation95_spill]] }
 0x2af   : > { %2916 = vmatpush.bf16.msra.mxu0 %v2901_v19  ;;  %s10087_s20 = sld [smem:[#allocation89_spill]] }
 0x2b0   : > { %v9101_v8 = vsel %vm2871_vm1, %v6875_v3, %v2870_v7  ;;  %s10089_s21 = sld [smem:[#allocation82_spill]] }
 0x31c   : > { %v2865_v9 = vpop.xlane.xlu0 %2864 }
 0x31d   : > { %v2873_v10 = vmul.f32 %v9101_v8, %v2865_v9 }
 0x31f   : > { %v2874_v11 = vsub.f32 %v9097_v0, %v2873_v10 }
 0x321   : > { %v2875_v12 = vmul.f32 %v2874_v11, %v2874_v11 }
 0x323   : > { %v2876_v13 = vsel %vm2862_vm0, %v2875_v12, 0.0 }
 0x324   : > { %2877 = vadd.xlane.f32.xlu0 %v2876_v13 }
 0x397   : > { %v2878_v20 = vpop.xlane.xlu0 %2877 }
 0x398   : > { %v2879_v21 = vmul.f32 %v2878_v20, %v9101_v8 }
 0x39a   : > { %v2880_v22 = vadd.f32 1e-05, %v2879_v21 }
 0x39c   : > { %6876 = vrsqrt.f32 %v2880_v22  ;;  %vm2887_vm3 = vweird.f32 %v2880_v22 }
 0x3a2   : > { %v6877_v23 = vpop.eup %6876 }
 0x3a3   : > { %v2882_v24 = vmul.f32 %v6877_v23, %v2880_v22  ;;  %vm2888_vm2 = vweird.f32 %v6877_v23 }
 0x3a4   : > { %vm2889_vm4 = vmor %vm2887_vm3, %vm2888_vm2 }
 0x3a5   : > { %v2883_v25 = vmul.f32 %v6877_v23, %v2882_v24 }
 0x3a7   : > { %v2884_v26 = vmul.f32 0.5, %v2883_v25 }
 0x3a9   : > { %v2885_v27 = vsub.f32 1.5, %v2884_v26 }
 0x3ab   : > { %v2886_v28 = vmul.f32 %v6877_v23, %v2885_v27 }
 0x3ad   : > { %v2890_v30 = vsel %vm2889_vm4, %v6877_v23, %v2886_v28 }
 0x3ae   : > { %v2891_v31 = vmul.f32 %v2890_v30, %v2874_v11 }
 0x3b0   : > { %v2895_v33 = vmul.f32 %v6827_v29, %v2891_v31 }
 0x3b2   : > { %v2899_v34 = vadd.f32 %v6828_v32, %v2895_v33 }
 0x3b4   : > { %v2900_v35 = vpack.c.bf16 %v2899_v34, %v2899_v34 }
 0x3b6   : > { %6362 = vmatmul.msk.bf16.vlgmr.msra.gmra.mxu0 %vm2862_vm0, %v2900_v35 }
 0x433   : > { %v2918_v37 = vpop.f32.mrf.mxu0 }
 0x434   : > { %v9112_v38 = vadd.f32 %v6829_v36, %v2918_v37 }
 0x436   : > { %2977 = vrot.lane.b32.xlu0 %v9112_v38, %s9904_s16  ;;  %3003 = vrot.lane.b32.xlu2 %v9112_v38, %s9902_s0 }
 0x437   : > { %2923 = vrot.lane.b32.xlu1 %v9112_v38, %s9908_s3 }
 0x43b   : > { %v2920_v39 = vpop.f32.mrf.mxu0 }
 0x43e   : > { %3085 = vrot.lane.b32.xlu0 %v9112_v38, %s9900_s7 }
 0x43f   : > { %3005 = vrot.lane.b32.xlu1 %v9112_v38, %s9906_s11 }
 0x490   : > { %v3004_v44 = vpop.permute.xlu2 %3003 }
 0x4a8   : > { %v2978_v40 = vpop.permute.xlu0 %2977 }
 0x4a9   : > { %v2924_v41 = vpop.permute.xlu1 %2923  ;;  %2998 = vmatpush.msra.mxu2 %v2978_v40 }
 0x4aa   : > { %6363 = vmatpush.xpose.msk.msra.mxu1 %vm2925_vm5, %v2924_v41 }
 0x4ad   : > { %6364 = vmatmul.msk.f32.vlgmr.msra.gmra.mxu1 %vm2925_vm5, %v9112_v38 }
 0x4b0   : > { %v3086_v42 = vpop.permute.xlu0 %3085 }
 0x4b1   : > { %v3006_v43 = vpop.permute.xlu1 %3005  ;;  %6369 = vmatpush.xpose.msk.msrb.mxu1 %vm2925_vm5, %v3086_v42 }
 0x4b2   : > { %6366 = vmatpush.xpose.msk.msra.mxu3 %vm2925_vm5, %v3006_v43 }
 0x4b5   : > { %6367 = vmatmul.msk.f32.vlgmr.msra.gmra.mxu3 %vm2925_vm5, %v3004_v44 }
 0x52a   : > { %v2947_v46 = vpop.f32.mrf.mxu1 }
 0x52b   : > { %v2950_v47 = vmul.f32 0.35355338, %v2947_v46 }
 0x52d   : > { %v2952_v48 = vsel %vm2951_vm6, %v2950_v47, -1e+09 }
 0x52e   : > { %v2953_v49 = vsel %vm2925_vm5, %v2952_v48, -inf }
 0x52f   : > { %2954 = vmax.xlane.f32.xlu2 %v2953_v49 }
 0x538   : > { %v3028_v50 = vpop.f32.mrf.mxu3 }
 0x539   : > { %v3031_v51 = vmul.f32 0.35355338, %v3028_v50 }
 0x53b   : > { %v3032_v52 = vsel %vm2951_vm6, %v3031_v51, -1e+09 }
 0x53c   : > { %v3033_v53 = vsel %vm2925_vm5, %v3032_v52, -inf }
 0x53d   : > { %3034 = vmax.xlane.f32.xlu0 %v3033_v53 }
 0x547   : > { %3057 = vrot.lane.b32.xlu2 %v9112_v38, %s9882_s9  ;;  %s9886_s9 = smov 8  }
 0x551   : > { %3083 = vrot.lane.b32.xlu0 %v9112_v38, %s9892_s18  ;;  %s9896_s18 = smov 24  }
 0x5a2   : > { %v2955_v54 = vpop.xlane.xlu2 %2954 }
 0x5a3   : > { %v2956_v55 = vsub.f32 %v2952_v48, %v2955_v54 }
 0x5a5   : > { %v2957_v56 = vmul.f32 1.442695, %v2956_v55 }
 0x5a7   : > { %6878 = vpow2.f32 %v2957_v56 }
 0x5aa   : > { %v3058_v57 = vpop.permute.xlu2 %3057 }
 0x5ab   : > { %3078 = vmatpush.msrb.mxu2 %v3058_v57 }
 0x5ad   : > { %v6879_v58 = vpop.eup %6878 }
 0x5ae   : > { %v2959_v59 = vsel %vm2925_vm5, %v6879_v58, 0.0 }
 0x5af   : > { %2960 = vadd.xlane.f32.xlu1 %v2959_v59 }
 0x5b0   : > { %v3035_v60 = vpop.xlane.xlu0 %3034 }
 0x5b1   : > { %v3036_v61 = vsub.f32 %v3032_v52, %v3035_v60 }
 0x5b3   : > { %v3037_v62 = vmul.f32 1.442695, %v3036_v61 }
 0x5b5   : > { %6880 = vpow2.f32 %v3037_v62 }
 0x5bb   : > { %v6881_v63 = vpop.eup %6880 }
 0x5bc   : > { %v3039_v1 = vsel %vm2925_vm5, %v6881_v63, 0.0 }
 0x5bd   : > { %3040 = vadd.xlane.f32.xlu0 %v3039_v1 }
 0x5c3   : > { %v3084_v2 = vpop.permute.xlu0 %3083 }
 0x5c4   : > { %6370 = vmatmul.msk.f32.vlgmr.msrb.gmra.mxu1 %vm2925_vm5, %v3084_v2 }
 0x5c8   : > { %3165 = vrot.lane.b32.xlu1 %v9112_v38, %s9898_s28 }
 0x5d1   : > { %3163 = vrot.lane.b32.xlu0 %v9112_v38, %s9884_s4  ;;  %s9888_s4 = smov 48  }
 0x622   : > { %v2961_v3 = vpop.xlane.xlu1 %2960 }
 0x623   : > { %6882 = vrcp.f32 %v2961_v3  ;;  %v2973_v7 = vand.u32 2147483648, %v2961_v3  ;;  %v2971_v10 = vand.u32 2147483647, %v2961_v3  ;;  %vm2967_vm8 = vweird.f32 %v2961_v3 }
 0x625   : > { %v2974_v13 = vor.u32 1.1754944e-38, %v2973_v7  ;;  %vm2972_vm10 = vcmp.eq.f32.partialorder %v2971_v10, 8.507059e+37 }
 0x629   : > { %v6883_v4 = vpop.eup %6882 }
 0x62a   : > { %v2963_v5 = vmul.f32 %v6883_v4, %v2961_v3  ;;  %vm2968_vm7 = vweird.f32 %v6883_v4 }
 0x62b   : > { %vm2969_vm9 = vmor %vm2967_vm8, %vm2968_vm7 }
 0x62c   : > { %v2964_v6 = vsub.f32 1.0, %v2963_v5 }
 0x62e   : > { %v2965_v9 = vmul.f32 %v6883_v4, %v2964_v6 }
 0x630   : > { %v3041_v11 = vpop.xlane.xlu0 %3040  ;;  %v2966_v12 = vadd.f32 %v6883_v4, %v2965_v9 }
 0x631   : > { %6884 = vrcp.f32 %v3041_v11  ;;  %v3053_v21 = vand.u32 2147483648, %v3041_v11  ;;  %v3051_v23 = vand.u32 2147483647, %v3041_v11  ;;  %vm3047_vm12 = vweird.f32 %v3041_v11 }
 0x632   : > { %v2970_v14 = vsel %vm2969_vm9, %v6883_v4, %v2966_v12 }
 0x633   : > { %v2975_v15 = vsel %vm2972_vm10, %v2974_v13, %v2970_v14  ;;  %v3054_v25 = vor.u32 1.1754944e-38, %v3053_v21  ;;  %vm3052_vm14 = vcmp.eq.f32.partialorder %v3051_v23, 8.507059e+37  ;;  %vm3256_vm10 = vcmask 130048  }
 0x634   : > { %v2976_v16 = vmul.f32 %v6879_v58, %v2975_v15 }
 0x636   : > { %6365 = vmatmul.msk.f32.vlgmr.msra.gmra.mxu2 %vm2925_vm5, %v2976_v16 }
 0x637   : > { %v6885_v17 = vpop.eup %6884 }
 0x638   : > { %v3043_v18 = vmul.f32 %v6885_v17, %v3041_v11  ;;  %vm3048_vm11 = vweird.f32 %v6885_v17 }
 0x639   : > { %vm3049_vm13 = vmor %vm3047_vm12, %vm3048_vm11  ;;  %vm3258_vm11 = vcmask 195584  }
 0x63a   : > { %v3044_v19 = vsub.f32 1.0, %v3043_v18  ;;  %v3166_v20 = vpop.permute.xlu1 %3165 }
 0x63b   : > { %6372 = vmatpush.xpose.msk.msra.mxu2 %vm2925_vm5, %v3166_v20 }
 0x63c   : > { %v3045_v22 = vmul.f32 %v6885_v17, %v3044_v19 }
 0x63e   : > { %v3046_v24 = vadd.f32 %v6885_v17, %v3045_v22 }
 0x640   : > { %v3050_v26 = vsel %vm3049_vm13, %v6885_v17, %v3046_v24 }
 0x641   : > { %v3108_v27 = vpop.f32.mrf.mxu1  ;;  %v3055_v28 = vsel %vm3052_vm14, %v3054_v25, %v3050_v26 }
 0x642   : > { %v3111_v29 = vmul.f32 0.35355338, %v3108_v27  ;;  %v3056_v30 = vmul.f32 %v6881_v63, %v3055_v28 }
 0x643   : > { %v3164_v33 = vpop.permute.xlu0 %3163 }
 0x644   : > { %6368 = vmatmul.msk.f32.vlgmr.msrb.gmra.mxu2 %vm2925_vm5, %v3056_v30  ;;  %v3112_v31 = vsel %vm2951_vm6, %v3111_v29, -1e+09  ;;  %v6830_v30 = vld [vmem:[#allocation38] ss:$0 sm:$0xff] }
 0x645   : > { %v3113_v32 = vsel %vm2925_vm5, %v3112_v31, -inf }
 0x646   : > { %3114 = vmax.xlane.f32.xlu2 %v3113_v32 }
 0x64c   : > { %6373 = vmatmul.msk.f32.vlgmr.msra.gmra.mxu2 %vm2925_vm5, %v3164_v33 }
 0x6b9   : > { %v3115_v34 = vpop.xlane.xlu2 %3114  ;;  %v9159_v37 = vpop.f32.mrf.mxu2 }
 0x6ba   : > { %v3116_v35 = vsub.f32 %v3112_v31, %v3115_v34 }
 0x6bc   : > { %v3117_v36 = vmul.f32 1.442695, %v3116_v35 }
 0x6be   : > { %6886 = vpow2.f32 %v3117_v36 }
 0x6c4   : > { %v6887_v39 = vpop.eup %6886 }
 0x6c5   : > { %v3119_v40 = vsel %vm2925_vm5, %v6887_v39, 0.0 }
 0x6c6   : > { %3120 = vadd.xlane.f32.xlu1 %v3119_v40 }
 0x6c7   : > { %v3080_v41 = vpop.f32.mrf.mxu2 }
 0x6cf   : > { %v3188_v42 = vpop.f32.mrf.mxu2 }
 0x6d0   : > { %v3191_v43 = vmul.f32 0.35355338, %v3188_v42 }
 0x6d2   : > { %v3192_v44 = vsel %vm2951_vm6, %v3191_v43, -1e+09 }
 0x6d3   : > { %v3193_v46 = vsel %vm2925_vm5, %v3192_v44, -inf }
 0x6d4   : > { %3194 = vmax.xlane.f32.xlu0 %v3193_v46 }
 0x6df   : > { %3244 = vrot.lane.b32.xlu1 %v3080_v41, %s9886_s9  ;;  %s9890_s9 = smov 40  }
 0x6e8   : > { %3137 = vrot.lane.b32.xlu0 %v9112_v38, %s9888_s4  ;;  %s10045_s4 = sld [smem:[#allocation131_spill]] }
 0x6ee   : > { %v2820_v16 = vld [vmem:[%s10045_s4 + $0x10] sm:$0xff]  ;;  %v2821_v17 = vld [vmem:[%s10045_s4 + $0x18] sm:$0xff]  ;;  %v2818_v20 = vld [vmem:[%s10045_s4] sm:$0xff] }
 0x6ef   : > { %v3262_v18 = vpack.c.bf16 %v2821_v17, %v2820_v16  ;;  %v2819_v21 = vld [vmem:[%s10045_s4 + $0x8] sm:$0xff]  ;;  %s10062_s4 = sld [smem:[#allocation85_spill]] }
 0x6f0   : > { %v3261_v22 = vpack.c.bf16 %v2819_v21, %v2818_v20 }
 0x739   : > { %v3121_v47 = vpop.xlane.xlu1 %3120 }
 0x73a   : > { %6888 = vrcp.f32 %v3121_v47  ;;  %v3133_v56 = vand.u32 2147483648, %v3121_v47  ;;  %vm3127_vm1 = vweird.f32 %v3121_v47  ;;  %v3131_v58 = vand.u32 2147483647, %v3121_v47 }
 0x73c   : > { %v3134_v61 = vor.u32 1.1754944e-38, %v3133_v56  ;;  %vm3132_vm3 = vcmp.eq.f32.partialorder %v3131_v58, 8.507059e+37 }
 0x740   : > { %v6889_v48 = vpop.eup %6888 }
 0x741   : > { %v3123_v49 = vmul.f32 %v6889_v48, %v3121_v47  ;;  %vm3128_vm15 = vweird.f32 %v6889_v48 }
 0x742   : > { %vm3129_vm2 = vmor %vm3127_vm1, %vm3128_vm15  ;;  %vm3344_vm15 = vcmask 523264  }
 0x743   : > { %v3124_v51 = vsub.f32 1.0, %v3123_v49 }
 0x745   : > { %v3125_v54 = vmul.f32 %v6889_v48, %v3124_v51 }
 0x747   : > { %v3195_v50 = vpop.xlane.xlu0 %3194  ;;  %v3126_v55 = vadd.f32 %v6889_v48, %v3125_v54 }
 0x748   : > { %v3196_v52 = vsub.f32 %v3192_v44, %v3195_v50 }
 0x749   : > { %v3130_v60 = vsel %vm3129_vm2, %v6889_v48, %v3126_v55 }
 0x74a   : > { %v3197_v53 = vmul.f32 1.442695, %v3196_v52  ;;  %v3135_v62 = vsel %vm3132_vm3, %v3134_v61, %v3130_v60 }
 0x74b   : > { %v3136_v1 = vmul.f32 %v6887_v39, %v3135_v62 }
 0x74c   : > { %6890 = vpow2.f32 %v3197_v53 }
 0x751   : > { %v3245_v24 = vpop.permute.xlu1 %3244 }
 0x752   : > { %v6891_v57 = vpop.eup %6890  ;;  %v3255_v25 = vsel %vm2925_vm5, %v9159_v37, %v3245_v24 }
 0x753   : > { %v3199_v59 = vsel %vm2925_vm5, %v6891_v57, 0.0 }
 0x754   : > { %3200 = vadd.xlane.f32.xlu2 %v3199_v59 }
 0x75a   : > { %v3138_v63 = vpop.permute.xlu0 %3137 }
 0x75b   : > { %3158 = vmatpush.msrb.mxu3 %v3138_v63  ;;  %v6831_v63 = vld [vmem:[#allocation37] ss:$0 sm:$0xff] }
 0x75c   : > { %6371 = vmatmul.msk.f32.vlgmr.msrb.gmra.mxu3 %vm2925_vm5, %v3136_v1 }
 0x75d   : > { %3275 = vmatpush.bf16.msra.mxu3 %v3262_v18 }
 0x761   : > { %3276 = vmatpush.bf16.msra.mxu3 %v3261_v22 }
 0x76c   : > { %3217 = vrot.lane.b32.xlu2 %v9112_v38, %s9890_s9  ;;  %s9894_s9 = smov 16  }
 0x7c7   : > { %v3201_v2 = vpop.xlane.xlu2 %3200 }
 0x7c8   : > { %6892 = vrcp.f32 %v3201_v2  ;;  %v3213_v7 = vand.u32 2147483648, %v3201_v2  ;;  %v3211_v10 = vand.u32 2147483647, %v3201_v2  ;;  %vm3207_vm7 = vweird.f32 %v3201_v2 }
 0x7ca   : > { %v3214_v12 = vor.u32 1.1754944e-38, %v3213_v7  ;;  %vm3212_vm9 = vcmp.eq.f32.partialorder %v3211_v10, 8.507059e+37 }
 0x7ce   : > { %v6893_v3 = vpop.eup %6892 }
 0x7cf   : > { %v3203_v4 = vmul.f32 %v6893_v3, %v3201_v2  ;;  %v3218_v5 = vpop.permute.xlu2 %3217  ;;  %vm3208_vm4 = vweird.f32 %v6893_v3 }
 0x7d0   : > { %3238 = vmatpush.msra.mxu1 %v3218_v5  ;;  %vm3209_vm8 = vmor %vm3207_vm7, %vm3208_vm4 }
 0x7d1   : > { %v3204_v6 = vsub.f32 1.0, %v3203_v4 }
 0x7d3   : > { %v3205_v9 = vmul.f32 %v6893_v3, %v3204_v6 }
 0x7d5   : > { %v3206_v11 = vadd.f32 %v6893_v3, %v3205_v9 }
 0x7d7   : > { %v3210_v13 = vsel %vm3209_vm8, %v6893_v3, %v3206_v11  ;;  %v6832_v3 = vld [vmem:[#allocation35] ss:$0 sm:$0xff] }
 0x7d8   : > { %v3215_v38 = vsel %vm3212_vm9, %v3214_v12, %v3210_v13 }
 0x7d9   : > { %v3216_v14 = vmul.f32 %v6891_v57, %v3215_v38  ;;  %v6833_v38 = vld [vmem:[#allocation29] ss:$0 sm:$0xff] }
 0x7db   : > { %6374 = vmatmul.msk.f32.vlgmr.msra.gmra.mxu1 %vm2925_vm5, %v3216_v14 }
 0x7df   : > { %v3160_v15 = vpop.f32.mrf.mxu3 }
 0x7e0   : > { %3248 = vrot.lane.b32.xlu0 %v3160_v15, %s9894_s9  ;;  %s10046_s9 = sld [smem:[#allocation124_spill]] }
 0x7e6   : > { %v2803_v42 = vld [vmem:[%s10046_s9 + $0x18] sm:$0xff]  ;;  %v2800_v44 = vld [vmem:[%s10046_s9] sm:$0xff]  ;;  %v2801_v46 = vld [vmem:[%s10046_s9 + $0x8] sm:$0xff] }
 0x7e7   : > { %v3314_v47 = vpack.c.bf16 %v2801_v46, %v2800_v44  ;;  %v6835_v46 = vld [vmem:[#allocation46] ss:$0 sm:$0xff] }
 0x852   : > { %v3249_v23 = vpop.permute.xlu0 %3248 }
 0x853   : > { %v3257_v26 = vsel %vm3256_vm10, %v3255_v25, %v3249_v23 }
 0x858   : > { %v3240_v19 = vpop.f32.mrf.mxu1 }
 0x859   : > { %3252 = vrot.lane.b32.xlu0 %v3240_v19, %s9896_s18  ;;  %s10047_s18 = sld [smem:[#allocation125_spill]]  ;;  %v6834_v19 = vld [vmem:[#allocation31] ss:$0 sm:$0xff] }
 0x85f   : > { %s10048_s28 = smov %s10047_s18  ;;  %v2810_v48 = vld [vmem:[%s10047_s18 + $0x30] sm:$0xff]  ;;  %s10049_s18 = smov 72  }
 0x860   : > { %v2811_v49 = vld [vmem:[%s10048_s28 + $0x38] sm:$0xff]  ;;  %v2808_v50 = vld [vmem:[%s10048_s28 + $0x20] sm:$0xff]  ;;  %v2809_v53 = vld [vmem:[%s10048_s28 + $0x28] sm:$0xff] }
 0x861   : > { %v3340_v52 = vpack.c.bf16 %v2811_v49, %v2810_v48  ;;  %v3339_v55 = vpack.c.bf16 %v2809_v53, %v2808_v50  ;;  %v2806_v7 = vld [vmem:[%s10048_s28 + $0x10] sm:$0xff]  ;;  %v2807_v9 = vld [vmem:[%s10048_s28 + $0x18] sm:$0xff]  ;;  %v2804_v11 = vld [vmem:[%s10048_s28] sm:$0xff] }
 0x862   : > { %v3338_v10 = vpack.c.bf16 %v2807_v9, %v2806_v7  ;;  %v2805_v12 = vld [vmem:[%s10048_s28 + $0x8] sm:$0xff]  ;;  %v6836_v49 = vld [vmem:[#allocation44] ss:$0 sm:$0xff]  ;;  %v6837_v53 = vld [vmem:[#allocation52] ss:$0 sm:$0xff] }
 0x863   : > { %3352 = vmatpush.bf16.msrb.mxu2 %v3340_v52  ;;  %v3337_v13 = vpack.c.bf16 %v2805_v12, %v2804_v11 }
 0x867   : > { %3353 = vmatpush.bf16.msrb.mxu2 %v3339_v55 }
 0x86b   : > { %3354 = vmatpush.bf16.msrb.mxu2 %v3338_v10 }
 0x86f   : > { %3355 = vmatpush.bf16.msrb.mxu2 %v3337_v13 }
 0x8cb   : > { %v3253_v27 = vpop.permute.xlu0 %3252 }
 0x8cc   : > { %v3259_v28 = vsel %vm3258_vm11, %v3257_v26, %v3253_v27 }
 0x8cd   : > { %v3260_v29 = vpack.c.bf16 %v3259_v28, %v3259_v28 }
 0x8cf   : > { %6375 = vmatmul.msk.bf16.vlgmr.msra.gmra.mxu3 %vm2862_vm0, %v3260_v29 }
 0x952   : > { %v3278_v31 = vpop.f32.mrf.mxu3 }
 0x953   : > { %v3279_v32 = vadd.f32 %v6830_v30, %v3278_v31  ;;  %v2852_v30 = vld [vmem:[%s8574_s24 + $0x10] sm:$0xff]  ;;  %v2853_v31 = vld [vmem:[%s8574_s24 + $0x18] sm:$0xff] }
 0x955   : > { %v9185_v33 = vadd.f32 %v3279_v32, %v9097_v0  ;;  %v2802_v0 = vld [vmem:[%s10046_s9 + $0x10] sm:$0xff]  ;;  %v3394_v32 = vpack.c.bf16 %v2853_v31, %v2852_v30  ;;  %s10066_s9 = smov 16  }
 0x956   : > { %v3315_v43 = vpack.c.bf16 %v2803_v42, %v2802_v0 }
 0x957   : > { %v3283_v34 = vsel %vm2862_vm0, %v9185_v33, 0.0  ;;  %3407 = vmatpush.bf16.msrb.mxu1 %v3394_v32 }
 0x958   : > { %3284 = vadd.xlane.f32.xlu2 %v3283_v34  ;;  %3328 = vmatpush.bf16.msrb.mxu0 %v3315_v43  ;;  %v2851_v34 = vld [vmem:[%s8574_s24 + $0x8] sm:$0xff] }
 0x95a   : > { %v3280_v35 = vpop.f32.mrf.mxu3 }
 0x95c   : > { %3329 = vmatpush.bf16.msrb.mxu0 %v3314_v47 }
 0x9cb   : > { %v3285_v36 = vpop.xlane.xlu2 %3284 }
 0x9cc   : > { %v3286_v37 = vmul.f32 %v3285_v36, %v9101_v8 }
 0x9ce   : > { %v3287_v39 = vsub.f32 %v9185_v33, %v3286_v37 }
 0x9d0   : > { %v3288_v40 = vmul.f32 %v3287_v39, %v3287_v39 }
 0x9d2   : > { %v3289_v41 = vsel %vm2862_vm0, %v3288_v40, 0.0 }
 0x9d3   : > { %3290 = vadd.xlane.f32.xlu1 %v3289_v41 }
 0xa46   : > { %v3291_v51 = vpop.xlane.xlu1 %3290 }
 0xa47   : > { %v3292_v54 = vmul.f32 %v3291_v51, %v9101_v8 }
 0xa49   : > { %v3293_v56 = vadd.f32 1e-05, %v3292_v54 }
 0xa4b   : > { %6894 = vrsqrt.f32 %v3293_v56  ;;  %vm3300_vm13 = vweird.f32 %v3293_v56 }
 0xa51   : > { %v6895_v57 = vpop.eup %6894 }
 0xa52   : > { %v3295_v58 = vmul.f32 %v6895_v57, %v3293_v56  ;;  %vm3301_vm12 = vweird.f32 %v6895_v57 }
 0xa53   : > { %vm3302_vm14 = vmor %vm3300_vm13, %vm3301_vm12 }
 0xa54   : > { %v3296_v59 = vmul.f32 %v6895_v57, %v3295_v58 }
 0xa56   : > { %v3297_v60 = vmul.f32 0.5, %v3296_v59 }
 0xa58   : > { %v3298_v61 = vsub.f32 1.5, %v3297_v60 }
 0xa5a   : > { %v3299_v62 = vmul.f32 %v6895_v57, %v3298_v61 }
 0xa5c   : > { %v3303_v1 = vsel %vm3302_vm14, %v6895_v57, %v3299_v62 }
 0xa5d   : > { %v3304_v2 = vmul.f32 %v3303_v1, %v3287_v39 }
 0xa5f   : > { %v3308_v4 = vmul.f32 %v6831_v63, %v3304_v2 }
 0xa61   : > { %v3312_v5 = vadd.f32 %v6832_v3, %v3308_v4 }
 0xa63   : > { %v3313_v6 = vpack.c.bf16 %v3312_v5, %v3312_v5 }
 0xa65   : > { %6376 = vmatmul.msk.bf16.vlgmr.msrb.gmra.mxu0 %vm2862_vm0, %v3313_v6 }
 0xae2   : > { %v3331_v14 = vpop.f32.mrf.mxu0 }
 0xae3   : > { %v3332_v15 = vadd.f32 %v6833_v38, %v3331_v14 }
 0xae5   : > { %v3335_v16 = vmax.f32 %v3332_v15, 0.0 }
 0xae7   : > { %v3336_v17 = vpack.c.bf16 %v3335_v16, %v3335_v16 }
 0xae9   : > { %6377 = vmatmul.msk.bf16.vlgmr.msrb.gmra.mxu2 %vm3344_vm15, %v3336_v17 }
 0xaea   : > { %v3333_v18 = vpop.f32.mrf.mxu0 }
 0xb6c   : > { %v3357_v20 = vpop.f32.mrf.mxu2 }
 0xb6d   : > { %v3358_v21 = vadd.f32 %v6834_v19, %v3357_v20 }
 0xb6f   : > { %v9208_v22 = vadd.f32 %v3358_v21, %v9185_v33  ;;  %v2850_v33 = vld [vmem:[%s8574_s24] sm:$0xff] }
 0xb70   : > { %v3393_v35 = vpack.c.bf16 %v2851_v34, %v2850_v33 }
 0xb71   : > { %v3362_v23 = vsel %vm2862_vm0, %v9208_v22, 0.0 }
 0xb72   : > { %3363 = vadd.xlane.f32.xlu0 %v3362_v23  ;;  %3408 = vmatpush.bf16.msrb.mxu1 %v3393_v35 }
 0xb74   : > { %v3359_v24 = vpop.f32.mrf.mxu2 }
 0xbe5   : > { %v3364_v25 = vpop.xlane.xlu0 %3363 }
 0xbe6   : > { %v3365_v26 = vmul.f32 %v3364_v25, %v9101_v8 }
 0xbe8   : > { %v3366_v27 = vsub.f32 %v9208_v22, %v3365_v26 }
 0xbea   : > { %v3367_v28 = vmul.f32 %v3366_v27, %v3366_v27 }
 0xbec   : > { %v3368_v29 = vsel %vm2862_vm0, %v3367_v28, 0.0 }
 0xbed   : > { %3369 = vadd.xlane.f32.xlu2 %v3368_v29 }
 0xc60   : > { %v3370_v36 = vpop.xlane.xlu2 %3369 }
 0xc61   : > { %v3371_v37 = vmul.f32 %v3370_v36, %v9101_v8 }
 0xc63   : > { %v3372_v39 = vadd.f32 1e-05, %v3371_v37 }
 0xc65   : > { %6896 = vrsqrt.f32 %v3372_v39  ;;  %vm3379_vm2 = vweird.f32 %v3372_v39 }
 0xc6b   : > { %v6897_v40 = vpop.eup %6896 }
 0xc6c   : > { %v3374_v41 = vmul.f32 %v6897_v40, %v3372_v39  ;;  %vm3380_vm1 = vweird.f32 %v6897_v40 }
 0xc6d   : > { %vm3381_vm3 = vmor %vm3379_vm2, %vm3380_vm1 }
 0xc6e   : > { %v3375_v0 = vmul.f32 %v6897_v40, %v3374_v41 }
 0xc70   : > { %v3376_v42 = vmul.f32 0.5, %v3375_v0 }
 0xc72   : > { %v3377_v43 = vsub.f32 1.5, %v3376_v42 }
 0xc74   : > { %v3378_v44 = vmul.f32 %v6897_v40, %v3377_v43 }
 0xc76   : > { %v3382_v47 = vsel %vm3381_vm3, %v6897_v40, %v3378_v44 }
 0xc77   : > { %v3383_v48 = vmul.f32 %v3382_v47, %v3366_v27 }
 0xc79   : > { %v3387_v50 = vmul.f32 %v6835_v46, %v3383_v48 }
 0xc7b   : > { %v3391_v51 = vadd.f32 %v6836_v49, %v3387_v50 }
 0xc7d   : > { %v3392_v52 = vpack.c.bf16 %v3391_v51, %v3391_v51 }
 0xc7f   : > { %6378 = vmatmul.msk.bf16.vlgmr.msrb.gmra.mxu1 %vm2862_vm0, %v3392_v52 }
 0xcfc   : > { %v3410_v54 = vpop.f32.mrf.mxu1 }
 0xcfd   : > { %v9221_v55 = vadd.f32 %v6837_v53, %v3410_v54 }
 0xcff   : > { %3495 = vrot.lane.b32.xlu0 %v9221_v55, %s9906_s11  ;;  %3415 = vrot.lane.b32.xlu1 %v9221_v55, %s9908_s3  ;;  %s10055_s3 = smov 40  }
 0xd04   : > { %v3412_v56 = vpop.f32.mrf.mxu1 }
 0xd07   : > { %3575 = vrot.lane.b32.xlu0 %v9221_v55, %s9900_s7  ;;  %3493 = vrot.lane.b32.xlu1 %v9221_v55, %s9902_s0  ;;  %s10050_s7 = smov 112   ;;  %s10051_s0 = smov 104  }
 0xd0f   : > { %3655 = vrot.lane.b32.xlu1 %v9221_v55, %s10049_s18 }
 0xd71   : > { %v3496_v57 = vpop.permute.xlu0 %3495  ;;  %v3416_v58 = vpop.permute.xlu1 %3415 }
 0xd72   : > { %6379 = vmatpush.xpose.msk.msrb.mxu3 %vm2925_vm5, %v3416_v58 }
 0xd75   : > { %6380 = vmatmul.msk.f32.vlgmr.msrb.gmra.mxu3 %vm2925_vm5, %v9221_v55 }
 0xd79   : > { %v3576_v59 = vpop.permute.xlu0 %3575  ;;  %v3494_v12 = vpop.permute.xlu1 %3493 }
 0xd7a   : > { %6385 = vmatpush.xpose.msk.msra.mxu0 %vm2925_vm5, %v3576_v59 }
 0xd81   : > { %v3656_v26 = vpop.permute.xlu1 %3655 }
 0xdf8   : > { %v3438_v60 = vpop.f32.mrf.mxu3 }
 0xdf9   : > { %v3441_v61 = vmul.f32 0.35355338, %v3438_v60 }
 0xdfb   : > { %v3442_v62 = vsel %vm2951_vm6, %v3441_v61, -1e+09 }
 0xdfc   : > { %v3443_v63 = vsel %vm2925_vm5, %v3442_v62, -inf }
 0xdfd   : > { %3444 = vmax.xlane.f32.xlu2 %v3443_v63 }
 0xe15   : > { %3467 = vrot.lane.b32.xlu2 %v9221_v55, %s9904_s16  ;;  %s10052_s16 = sld [smem:[#allocation76_spill]] }
 0xe1b   : > { %s2694_s11 = scalar_lea.vmem %s10052_s16, %s9093_s6  ;;  %s10053_s16 = smov 56  }
 0xe1c   : > { %v9263_v36 = vld [vmem:[%s2694_s11] sm:$0xff]  ;;  %s10054_s11 = smov 48  }
 0xe1d   : > { %3573 = vrot.lane.b32.xlu2 %v9221_v55, %s10050_s7  ;;  %v3880_v40 = vsel %vm2862_vm0, %v9263_v36, 0.0 }
 0xe70   : > { %v3445_v1 = vpop.xlane.xlu2 %3444 }
 0xe71   : > { %v3446_v2 = vsub.f32 %v3442_v62, %v3445_v1 }
 0xe73   : > { %v3447_v3 = vmul.f32 1.442695, %v3446_v2 }
 0xe75   : > { %6898 = vpow2.f32 %v3447_v3 }
 0xe78   : > { %v3468_v4 = vpop.permute.xlu2 %3467 }
 0xe79   : > { %3488 = vmatpush.msra.mxu1 %v3468_v4 }
 0xe7b   : > { %6382 = vmatpush.xpose.msk.msrb.mxu1 %vm2925_vm5, %v3496_v57  ;;  %v6899_v5 = vpop.eup %6898 }
 0xe7c   : > { %v3449_v6 = vsel %vm2925_vm5, %v6899_v5, 0.0 }
 0xe7d   : > { %3450 = vadd.xlane.f32.xlu0 %v3449_v6 }
 0xe80   : > { %v3574_v7 = vpop.permute.xlu2 %3573 }
 0xe81   : > { %6386 = vmatmul.msk.f32.vlgmr.msra.gmra.mxu0 %vm2925_vm5, %v3574_v7 }
 0xe91   : > { %3653 = vrot.lane.b32.xlu0 %v9221_v55, %s10051_s0 }
 0xef0   : > { %v3451_v9 = vpop.xlane.xlu0 %3450 }
 0xef1   : > { %6900 = vrcp.f32 %v3451_v9  ;;  %v3463_v38 = vand.u32 2147483648, %v3451_v9  ;;  %v3461_v15 = vand.u32 2147483647, %v3451_v9  ;;  %vm3457_vm7 = vweird.f32 %v3451_v9 }
 0xef3   : > { %v3464_v18 = vor.u32 1.1754944e-38, %v3463_v38  ;;  %vm3462_vm9 = vcmp.eq.f32.partialorder %v3461_v15, 8.507059e+37 }
 0xef7   : > { %v6901_v10 = vpop.eup %6900 }
 0xef8   : > { %v3453_v11 = vmul.f32 %v6901_v10, %v3451_v9  ;;  %vm3458_vm4 = vweird.f32 %v6901_v10 }
 0xef9   : > { %vm3459_vm8 = vmor %vm3457_vm7, %vm3458_vm4 }
 0xefa   : > { %v3454_v13 = vsub.f32 1.0, %v3453_v11 }
 0xefc   : > { %v3455_v14 = vmul.f32 %v6901_v10, %v3454_v13 }
 0xefe   : > { %v3456_v16 = vadd.f32 %v6901_v10, %v3455_v14  ;;  %v3598_v17 = vpop.f32.mrf.mxu0 }
 0xeff   : > { %v3601_v19 = vmul.f32 0.35355338, %v3598_v17 }
 0xf00   : > { %v3460_v20 = vsel %vm3459_vm8, %v6901_v10, %v3456_v16 }
 0xf01   : > { %v3465_v21 = vsel %vm3462_vm9, %v3464_v18, %v3460_v20  ;;  %v3602_v23 = vsel %vm2951_vm6, %v3601_v19, -1e+09 }
 0xf02   : > { %v3603_v24 = vsel %vm2925_vm5, %v3602_v23, -inf  ;;  %v3466_v25 = vmul.f32 %v6899_v5, %v3465_v21 }
 0xf03   : > { %3604 = vmax.xlane.f32.xlu2 %v3603_v24  ;;  %v3654_v27 = vpop.permute.xlu0 %3653 }
 0xf04   : > { %6381 = vmatmul.msk.f32.vlgmr.msra.gmra.mxu1 %vm2925_vm5, %v3466_v25 }
 0xf05   : > { %6388 = vmatpush.xpose.msk.msra.mxu1 %vm2925_vm5, %v3656_v26 }
 0xf0c   : > { %6383 = vmatmul.msk.f32.vlgmr.msrb.gmra.mxu1 %vm2925_vm5, %v3494_v12 }
 0xf14   : > { %6389 = vmatmul.msk.f32.vlgmr.msra.gmra.mxu1 %vm2925_vm5, %v3654_v27 }
 0xf76   : > { %v3605_v29 = vpop.xlane.xlu2 %3604 }
 0xf77   : > { %v3606_v32 = vsub.f32 %v3602_v23, %v3605_v29 }
 0xf79   : > { %v3607_v35 = vmul.f32 1.442695, %v3606_v32 }
 0xf7b   : > { %6902 = vpow2.f32 %v3607_v35 }
 0xf81   : > { %v9256_v28 = vpop.f32.mrf.mxu1  ;;  %v9270_v42 = vpop.eup %6902 }
 0xf82   : > { %v3609_v43 = vsel %vm2925_vm5, %v9270_v42, 0.0 }
 0xf89   : > { %v3518_v30 = vpop.f32.mrf.mxu1 }
 0xf8a   : > { %v3521_v31 = vmul.f32 0.35355338, %v3518_v30 }
 0xf8c   : > { %v3522_v33 = vsel %vm2951_vm6, %v3521_v31, -1e+09 }
 0xf8d   : > { %v3523_v34 = vsel %vm2925_vm5, %v3522_v33, -inf }
 0xf8e   : > { %3524 = vmax.xlane.f32.xlu1 %v3523_v34  ;;  %v2735_v34 = vld [vmem:[%s10056_s1 + $0x18] sm:$0xff] }
 0xf91   : > { %v3678_v37 = vpop.f32.mrf.mxu1 }
 0xf92   : > { %v3681_v39 = vmul.f32 0.35355338, %v3678_v37 }
 0xf94   : > { %v3682_v41 = vsel %vm2951_vm6, %v3681_v39, -1e+09 }
 0xf95   : > { %v3683_v0 = vsel %vm2925_vm5, %v3682_v41, -inf }
 0xf96   : > { %3881 = vadd.xlane.f32.xlu1 %v3880_v40  ;;  %3684 = vmax.xlane.f32.xlu0 %v3683_v0 }
 0xf9e   : > { %3610 = vadd.xlane.f32.xlu0 %v3609_v43 }
 0xfb2   : > { %3547 = vrot.lane.b32.xlu0 %v9221_v55, %s10053_s16 }
0x1001   : > { %v3525_v44 = vpop.xlane.xlu1 %3524 }
0x1002   : > { %v3526_v46 = vsub.f32 %v3522_v33, %v3525_v44  ;;  %v2734_v33 = vld [vmem:[%s10056_s1 + $0x10] sm:$0xff] }
0x1003   : > { %v3912_v44 = vpack.c.bf16 %v2735_v34, %v2734_v33 }
0x1004   : > { %v3527_v51 = vmul.f32 1.442695, %v3526_v46 }
0x1009   : > { %v3685_v47 = vpop.xlane.xlu0 %3684  ;;  %v3882_v48 = vpop.xlane.xlu1 %3881 }
0x100a   : > { %v3686_v49 = vsub.f32 %v3682_v41, %v3685_v47  ;;  %v3883_v50 = vmul.f32 %v3882_v48, %v9101_v8 }
0x100c   : > { %v3687_v52 = vmul.f32 1.442695, %v3686_v49  ;;  %v9278_v53 = vsub.f32 %v9263_v36, %v3883_v50  ;;  %v2732_v49 = vld [vmem:[%s10056_s1] sm:$0xff]  ;;  %v2733_v50 = vld [vmem:[%s10056_s1 + $0x8] sm:$0xff]  ;;  %s10063_s1 = sld [smem:[#allocation92_spill]] }
0x100e   : > { %6904 = vpow2.f32 %v3687_v52  ;;  %v3885_v54 = vmul.f32 %v9278_v53, %v9278_v53 }
0x100f   : > { %6906 = vpow2.f32 %v3527_v51 }
0x1010   : > { %v3886_v56 = vsel %vm2862_vm0, %v3885_v54, 0.0 }
0x1011   : > { %3887 = vadd.xlane.f32.xlu2 %v3886_v56  ;;  %v3611_v61 = vpop.xlane.xlu0 %3610 }
0x1012   : > { %6908 = vrcp.f32 %v3611_v61  ;;  %v3621_v18 = vand.u32 2147483647, %v3611_v61  ;;  %v3623_v19 = vand.u32 2147483648, %v3611_v61  ;;  %vm3617_vm14 = vweird.f32 %v3611_v61 }
0x1014   : > { %v9283_v57 = vpop.eup %6904  ;;  %vm9308_vm2 = vcmp.eq.f32.partialorder %v3621_v18, 8.507059e+37  ;;  %v3624_v31 = vor.u32 1.1754944e-38, %v3623_v19 }
0x1015   : > { %v9285_v58 = vpop.eup %6906  ;;  %v3689_v59 = vsel %vm2925_vm5, %v9283_v57, 0.0 }
0x1016   : > { %3690 = vadd.xlane.f32.xlu1 %v3689_v59  ;;  %v3529_v60 = vsel %vm2925_vm5, %v9285_v58, 0.0 }
0x1018   : > { %v6909_v3 = vpop.eup %6908 }
0x1019   : > { %3530 = vadd.xlane.f32.xlu2 %v3529_v60  ;;  %v3613_v5 = vmul.f32 %v6909_v3, %v3611_v61  ;;  %vm3618_vm12 = vweird.f32 %v6909_v3  ;;  %v3911_v60 = vpack.c.bf16 %v2733_v50, %v2732_v49 }
0x101a   : > { %vm9304_vm1 = vmor %vm3617_vm14, %vm3618_vm12 }
0x101b   : > { %v3614_v9 = vsub.f32 1.0, %v3613_v5 }
0x101d   : > { %v3615_v38 = vmul.f32 %v6909_v3, %v3614_v9 }
0x101f   : > { %v3616_v21 = vadd.f32 %v6909_v3, %v3615_v38 }
0x1021   : > { %v3620_v35 = vsel %vm9304_vm1, %v6909_v3, %v3616_v21 }
0x1022   : > { %v3625_v46 = vsel %vm9308_vm2, %v3624_v31, %v3620_v35 }
0x1023   : > { %v3626_v59 = vmul.f32 %v9270_v42, %v3625_v46 }
0x1024   : > { %v3548_v62 = vpop.permute.xlu0 %3547 }
0x1025   : > { %3568 = vmatpush.msra.mxu3 %v3548_v62 }
0x102f   : > { %3627 = vrot.lane.b32.xlu1 %v9221_v55, %s10054_s11 }
0x1031   : > { %3707 = vrot.lane.b32.xlu2 %v9221_v55, %s10055_s3 }
0x1084   : > { %v3888_v63 = vpop.xlane.xlu2 %3887 }
0x1085   : > { %v3889_v1 = vmul.f32 %v3888_v63, %v9101_v8 }
0x1087   : > { %v3890_v2 = vadd.f32 1e-05, %v3889_v1 }
0x1089   : > { %6910 = vrsqrt.f32 %v3890_v2  ;;  %v9296_v4 = vpop.xlane.xlu1 %3690  ;;  %vm3897_vm12 = vweird.f32 %v3890_v2 }
0x108a   : > { %6912 = vrcp.f32 %v9296_v4  ;;  %v3703_v0 = vand.u32 2147483648, %v9296_v4  ;;  %v3701_v47 = vand.u32 2147483647, %v9296_v4 }
0x108c   : > { %v3531_v6 = vpop.xlane.xlu2 %3530  ;;  %v3704_v54 = vor.u32 1.1754944e-38, %v3703_v0  ;;  %vm3702_vm2 = vcmp.eq.f32.partialorder %v3701_v47, 8.507059e+37 }
0x108d   : > { %6914 = vrcp.f32 %v3531_v6  ;;  %v3543_v24 = vand.u32 2147483648, %v3531_v6  ;;  %v3541_v27 = vand.u32 2147483647, %v3531_v6  ;;  %vm3537_vm3 = vweird.f32 %v3531_v6 }
0x108f   : > { %v6911_v7 = vpop.eup %6910  ;;  %v3544_v39 = vor.u32 1.1754944e-38, %v3543_v24  ;;  %vm3542_vm9 = vcmp.eq.f32.partialorder %v3541_v27, 8.507059e+37 }
0x1090   : > { %v9299_v10 = vpop.eup %6912  ;;  %v3892_v11 = vmul.f32 %v6911_v7, %v3890_v2  ;;  %vm3898_vm4 = vweird.f32 %v6911_v7  ;;  %v6839_v2 = vld [vmem:[%s10062_s4] ss:$0 sm:$0xff]  ;;  %s10068_s4 = smov 96  }
0x1091   : > { %v3693_v55 = vmul.f32 %v9299_v10, %v9296_v4  ;;  %vm3698_vm8 = vweird.f32 %v9299_v10  ;;  %vm3899_vm14 = vmor %vm3897_vm12, %vm3898_vm4 }
0x1092   : > { %v3893_v12 = vmul.f32 %v6911_v7, %v3892_v11  ;;  %v2849_v11 = vld [vmem:[%s10064_s8 + $0x18] sm:$0xff] }
0x1093   : > { %v6915_v13 = vpop.eup %6914  ;;  %v3694_v15 = vsub.f32 1.0, %v3693_v55 }
0x1094   : > { %v3894_v14 = vmul.f32 0.5, %v3893_v12  ;;  %v3533_v16 = vmul.f32 %v6915_v13, %v3531_v6  ;;  %v3708_v17 = vpop.permute.xlu2 %3707  ;;  %vm3538_vm13 = vweird.f32 %v6915_v13  ;;  %v2846_v12 = vld [vmem:[%s10064_s8] sm:$0xff] }
0x1095   : > { %3728 = vmatpush.msrb.mxu3 %v3708_v17  ;;  %v3695_v25 = vmul.f32 %v9299_v10, %v3694_v15  ;;  %vm3539_vm7 = vmor %vm3537_vm3, %vm3538_vm13  ;;  %vm3697_vm13 = vweird.f32 %v9296_v4 }
0x1096   : > { %v3534_v20 = vsub.f32 1.0, %v3533_v16  ;;  %v3895_v23 = vsub.f32 1.5, %v3894_v14  ;;  %vm3699_vm1 = vmor %vm3697_vm13, %vm3698_vm8 }
0x1097   : > { %v3696_v40 = vadd.f32 %v9299_v10, %v3695_v25 }
0x1098   : > { %v3535_v26 = vmul.f32 %v6915_v13, %v3534_v20  ;;  %v3896_v37 = vmul.f32 %v6911_v7, %v3895_v23  ;;  %v6841_v23 = vld [vmem:[#allocation50] ss:$0 sm:$0xff] }
0x1099   : > { %v3700_v52 = vsel %vm3699_vm1, %v9299_v10, %v3696_v40  ;;  %v2848_v10 = vld [vmem:[%s10064_s8 + $0x10] sm:$0xff] }
0x109a   : > { %v3536_v32 = vadd.f32 %v6915_v13, %v3535_v26  ;;  %v3900_v51 = vsel %vm3899_vm14, %v6911_v7, %v3896_v37  ;;  %v3705_v62 = vsel %vm3702_vm2, %v3704_v54, %v3700_v52  ;;  %v3750_v55 = vpack.c.bf16 %v2849_v11, %v2848_v10  ;;  %v2839_v10 = vld [vmem:[%s10075_s17 + $0x38] sm:$0xff] }
0x109b   : > { %v3901_v61 = vmul.f32 %v3900_v51, %v9278_v53  ;;  %v3706_v1 = vmul.f32 %v9283_v57, %v3705_v62  ;;  %v6840_v57 = vld [vmem:[%s10063_s1] ss:$0 sm:$0xff]  ;;  %s10069_s1 = sld [smem:[#allocation78_spill]] }
0x109c   : > { %v3540_v41 = vsel %vm3539_vm7, %v6915_v13, %v3536_v32  ;;  %3763 = vmatpush.bf16.msrb.mxu0 %v3750_v55  ;;  %v2847_v13 = vld [vmem:[%s10064_s8 + $0x8] sm:$0xff] }
0x109d   : > { %v3545_v43 = vsel %vm3542_vm9, %v3544_v39, %v3540_v41  ;;  %v3749_v38 = vpack.c.bf16 %v2847_v13, %v2846_v12 }
0x109e   : > { %v3546_v48 = vmul.f32 %v9285_v58, %v3545_v43  ;;  %v6838_v58 = vld [vmem:[%s10061_s2] ss:$0 sm:$0xff]  ;;  %s10065_s2 = smov 8  }
0x109f   : > { %v3905_v63 = vmul.f32 %v6838_v58, %v3901_v61 }
0x10a0   : > { %6384 = vmatmul.msk.f32.vlgmr.msra.gmra.mxu3 %vm2925_vm5, %v3546_v48  ;;  %3764 = vmatpush.bf16.msrb.mxu0 %v3749_v38 }
0x10a1   : > { %v3628_v56 = vpop.permute.xlu1 %3627  ;;  %3925 = vmatpush.bf16.msra.mxu3 %v3912_v44  ;;  %v3909_v42 = vadd.f32 %v6839_v2, %v3905_v63  ;;  %s2702_s8 = scalar_lea.vmem %s10069_s1, %s9093_s6  ;;  %s10073_s6 = smov 64  }
0x10a2   : > { %3648 = vmatpush.msra.mxu2 %v3628_v56  ;;  %v9365_v29 = vld [vmem:[%s2702_s8] sm:$0xff]  ;;  %s10072_s8 = sld [smem:[#allocation135_spill]]  ;;  %s10074_s1 = smov 80  }
0x10a3   : > { %6387 = vmatmul.msk.f32.vlgmr.msra.gmra.mxu2 %vm2925_vm5, %v3626_v59  ;;  %v3910_v3 = vpack.c.bf16 %v3909_v42, %v3909_v42  ;;  %vm3960_vm3 = vcmp.gt.f32.partialorder %v9365_v29, 0.0 }
0x10a5   : > { %3926 = vmatpush.bf16.msra.mxu3 %v3911_v60 }
0x10a8   : > { %6390 = vmatmul.msk.f32.vlgmr.msrb.gmra.mxu3 %vm2925_vm5, %v3706_v1  ;;  %v2830_v49 = vld [vmem:[%s10072_s8 + $0x10] sm:$0xff]  ;;  %v2831_v50 = vld [vmem:[%s10072_s8 + $0x18] sm:$0xff]  ;;  %v2828_v52 = vld [vmem:[%s10072_s8] sm:$0xff] }
0x10a9   : > { %v3803_v51 = vpack.c.bf16 %v2831_v50, %v2830_v49  ;;  %v2829_v54 = vld [vmem:[%s10072_s8 + $0x8] sm:$0xff]  ;;  %s10076_s8 = sld [smem:[#allocation93_spill]] }
0x10aa   : > { %v3802_v56 = vpack.c.bf16 %v2829_v54, %v2828_v52 }
0x10ab   : > { %3816 = vmatpush.bf16.msrb.mxu2 %v3803_v51 }
0x10af   : > { %3817 = vmatpush.bf16.msrb.mxu2 %v3802_v56 }
0x10b0   : > { %6394 = vmatmul.msk.bf16.vlgmr.msra.gmra.mxu3 %vm2862_vm0, %v3910_v3 }
0x1123   : > { %v3570_v53 = vpop.f32.mrf.mxu3 }
0x1124   : > { %3734 = vrot.lane.b32.xlu0 %v3570_v53, %s10065_s2 }
0x1126   : > { %v3650_v4 = vpop.f32.mrf.mxu2 }
0x1127   : > { %3738 = vrot.lane.b32.xlu1 %v3650_v4, %s10066_s9  ;;  %v6842_v4 = vld [vmem:[#allocation49] ss:$0 sm:$0xff] }
0x112b   : > { %v3730_v5 = vpop.f32.mrf.mxu3 }
0x112c   : > { %3742 = vrot.lane.b32.xlu2 %v3730_v5, %s10067_s10 }
0x1133   : > { %v3928_v6 = vpop.f32.mrf.mxu3 }
0x1134   : > { %v9342_v7 = vadd.f32 %v6840_v57, %v3928_v6  ;;  %v6843_v6 = vld [vmem:[#allocation47] ss:$0 sm:$0xff] }
0x1136   : > { %3933 = vrot.lane.b32.xlu0 %v9342_v7, %s10068_s4 }
0x113b   : > { %v3930_v9 = vpop.f32.mrf.mxu3 }
0x113c   : > { %v2838_v9 = vld [vmem:[%s10075_s17 + $0x30] sm:$0xff] }
0x113d   : > { %v3828_v11 = vpack.c.bf16 %v2839_v10, %v2838_v9 }
0x113f   : > { %3839 = vmatpush.bf16.msrb.mxu1 %v3828_v11 }
0x1186   : > { %v3743_v17 = vpop.permute.xlu2 %3742 }
0x1196   : > { %v3735_v14 = vpop.permute.xlu0 %3734 }
0x1197   : > { %v3745_v15 = vsel %vm2925_vm5, %v9256_v28, %v3735_v14 }
0x1199   : > { %v3739_v16 = vpop.permute.xlu1 %3738 }
0x119a   : > { %v3746_v18 = vsel %vm3256_vm10, %v3745_v15, %v3739_v16 }
0x119b   : > { %v3747_v19 = vsel %vm3258_vm11, %v3746_v18, %v3743_v17 }
0x119c   : > { %v3748_v20 = vpack.c.bf16 %v3747_v19, %v3747_v19 }
0x119e   : > { %6391 = vmatmul.msk.bf16.vlgmr.msrb.gmra.mxu0 %vm2862_vm0, %v3748_v20 }
0x11a8   : > { %v3934_v21 = vpop.permute.xlu0 %3933 }
0x11a9   : > { %6395 = vmatpush.xpose.msk.msra.mxu0 %vm2925_vm5, %v3934_v21 }
0x11ae   : > { %6396 = vmatmul.msk.f32.vlgmr.msra.gmra.mxu0 %vm2925_vm5, %v9342_v7 }
0x121b   : > { %v3766_v24 = vpop.f32.mrf.mxu0 }
0x121c   : > { %v3767_v28 = vadd.f32 %v6841_v23, %v3766_v24 }
0x121e   : > { %v9359_v25 = vadd.f32 %v3767_v28, %v9208_v22 }
0x1220   : > { %v3771_v26 = vsel %vm2862_vm0, %v9359_v25, 0.0 }
0x1221   : > { %3772 = vadd.xlane.f32.xlu1 %v3771_v26 }
0x1223   : > { %v3768_v27 = vpop.f32.mrf.mxu0 }
0x122b   : > { %v3956_v30 = vpop.f32.mrf.mxu0 }
0x122c   : > { %v3959_v31 = vmul.f32 0.35355338, %v3956_v30 }
0x122e   : > { %v3961_v32 = vsel %vm3960_vm3, %v3959_v31, -1e+09 }
0x122f   : > { %v3962_v33 = vsel %vm2925_vm5, %v3961_v32, -inf }
0x1230   : > { %3963 = vmax.xlane.f32.xlu2 %v3962_v33 }
0x123a   : > { %4014 = vrot.lane.b32.xlu1 %v9342_v7, %s10070_s12 }
0x1242   : > { %4174 = vrot.lane.b32.xlu1 %v9342_v7, %s10049_s18 }
0x1248   : > { %4012 = vrot.lane.b32.xlu2 %v9342_v7, %s10071_s13 }
0x1294   : > { %v3773_v22 = vpop.xlane.xlu1 %3772 }
0x1295   : > { %v3774_v34 = vmul.f32 %v3773_v22, %v9101_v8  ;;  %v2836_v22 = vld [vmem:[%s10075_s17 + $0x20] sm:$0xff] }
0x1297   : > { %v3775_v35 = vsub.f32 %v9359_v25, %v3774_v34  ;;  %v2837_v34 = vld [vmem:[%s10075_s17 + $0x28] sm:$0xff] }
0x1299   : > { %v3776_v37 = vmul.f32 %v3775_v35, %v3775_v35 }
0x129b   : > { %v3777_v39 = vsel %vm2862_vm0, %v3776_v37, 0.0  ;;  %v2834_v37 = vld [vmem:[%s10075_s17 + $0x10] sm:$0xff] }
0x129c   : > { %3778 = vadd.xlane.f32.xlu0 %v3777_v39  ;;  %v2835_v39 = vld [vmem:[%s10075_s17 + $0x18] sm:$0xff] }
0x12a3   : > { %v3964_v40 = vpop.xlane.xlu2 %3963 }
0x12a4   : > { %v3965_v41 = vsub.f32 %v3961_v32, %v3964_v40  ;;  %v3826_v40 = vpack.c.bf16 %v2835_v39, %v2834_v37 }
0x12a6   : > { %v3966_v0 = vmul.f32 1.442695, %v3965_v41  ;;  %v2832_v41 = vld [vmem:[%s10075_s17] sm:$0xff] }
0x12a8   : > { %6916 = vpow2.f32 %v3966_v0  ;;  %v2833_v0 = vld [vmem:[%s10075_s17 + $0x8] sm:$0xff]  ;;  %s10077_s17 = sld [smem:[#allocation98_spill]] }
0x12ab   : > { %v4013_v47 = vpop.permute.xlu2 %4012 }
0x12ac   : > { %v4015_v43 = vpop.permute.xlu1 %4014 }
0x12ad   : > { %6398 = vmatpush.xpose.msk.msrb.mxu3 %vm2925_vm5, %v4015_v43  ;;  %v3825_v43 = vpack.c.bf16 %v2833_v0, %v2832_v41 }
0x12ae   : > { %v9381_v44 = vpop.eup %6916 }
0x12af   : > { %v3968_v46 = vsel %vm2925_vm5, %v9381_v44, 0.0 }
0x12b0   : > { %3986 = vrot.lane.b32.xlu0 %v9342_v7, %s10073_s6  ;;  %3969 = vadd.xlane.f32.xlu2 %v3968_v46 }
0x12b1   : > { %6399 = vmatmul.msk.f32.vlgmr.msrb.gmra.mxu3 %vm2925_vm5, %v4013_v47 }
0x12b4   : > { %v4175_v48 = vpop.permute.xlu1 %4174 }
0x12b5   : > { %6404 = vmatpush.xpose.msk.msra.mxu3 %vm2925_vm5, %v4175_v48 }
0x12b8   : > { %4094 = vrot.lane.b32.xlu0 %v9342_v7, %s10074_s1 }
0x12c0   : > { %4092 = vrot.lane.b32.xlu0 %v9342_v7, %s10050_s7 }
0x12c8   : > { %4172 = vrot.lane.b32.xlu2 %v9342_v7, %s10051_s0 }
0x130f   : > { %v3779_v59 = vpop.xlane.xlu0 %3778 }
0x1310   : > { %v3780_v60 = vmul.f32 %v3779_v59, %v9101_v8 }
0x1312   : > { %v3781_v61 = vadd.f32 1e-05, %v3780_v60 }
0x1314   : > { %6918 = vrsqrt.f32 %v3781_v61  ;;  %vm3788_vm7 = vweird.f32 %v3781_v61 }
0x131a   : > { %v6919_v58 = vpop.eup %6918 }
0x131b   : > { %v3783_v62 = vmul.f32 %v6919_v58, %v3781_v61  ;;  %vm3789_vm4 = vweird.f32 %v6919_v58 }
0x131c   : > { %vm3790_vm8 = vmor %vm3788_vm7, %vm3789_vm4 }
0x131d   : > { %v3784_v63 = vmul.f32 %v6919_v58, %v3783_v62 }
0x131f   : > { %v3785_v1 = vmul.f32 0.5, %v3784_v63 }
0x1321   : > { %v3786_v2 = vsub.f32 1.5, %v3785_v1 }
0x1322   : > { %v3987_v42 = vpop.permute.xlu0 %3986 }
0x1323   : > { %v3787_v3 = vmul.f32 %v6919_v58, %v3786_v2  ;;  %v3970_v53 = vpop.xlane.xlu2 %3969  ;;  %4007 = vmatpush.msra.mxu2 %v3987_v42 }
0x1324   : > { %6920 = vrcp.f32 %v3970_v53  ;;  %v3982_v20 = vand.u32 2147483648, %v3970_v53  ;;  %vm3976_vm12 = vweird.f32 %v3970_v53  ;;  %v3980_v21 = vand.u32 2147483647, %v3970_v53 }
0x1325   : > { %v3791_v5 = vsel %vm3790_vm8, %v6919_v58, %v3787_v3 }
0x1326   : > { %v3792_v57 = vmul.f32 %v3791_v5, %v3775_v35  ;;  %v3983_v26 = vor.u32 1.1754944e-38, %v3982_v20  ;;  %vm3981_vm13 = vcmp.eq.f32.partialorder %v3980_v21, 8.507059e+37  ;;  %v3827_v35 = vpack.c.bf16 %v2837_v34, %v2836_v22 }
0x1328   : > { %v3796_v55 = vmul.f32 %v6842_v4, %v3792_v57  ;;  %3840 = vmatpush.bf16.msrb.mxu1 %v3827_v35 }
0x132a   : > { %v6921_v12 = vpop.eup %6920  ;;  %v3800_v13 = vadd.f32 %v6843_v6, %v3796_v55  ;;  %v4095_v17 = vpop.permute.xlu0 %4094 }
0x132b   : > { %v3972_v38 = vmul.f32 %v6921_v12, %v3970_v53  ;;  %v4173_v14 = vpop.permute.xlu2 %4172  ;;  %vm3977_vm9 = vweird.f32 %v6921_v12 }
0x132c   : > { %6405 = vmatmul.msk.f32.vlgmr.msra.gmra.mxu3 %vm2925_vm5, %v4173_v14  ;;  %v3801_v15 = vpack.c.bf16 %v3800_v13, %v3800_v13  ;;  %vm3978_vm14 = vmor %vm3976_vm12, %vm3977_vm9  ;;  %3841 = vmatpush.bf16.msrb.mxu1 %v3826_v40 }
0x132d   : > { %v3973_v16 = vsub.f32 1.0, %v3972_v38 }
0x132e   : > { %6392 = vmatmul.msk.bf16.vlgmr.msrb.gmra.mxu2 %vm2862_vm0, %v3801_v15 }
0x132f   : > { %v3974_v18 = vmul.f32 %v6921_v12, %v3973_v16  ;;  %6401 = vmatpush.xpose.msk.msrb.mxu2 %vm2925_vm5, %v4095_v17 }
0x1330   : > { %3842 = vmatpush.bf16.msrb.mxu1 %v3825_v43 }
0x1331   : > { %v3975_v19 = vadd.f32 %v6921_v12, %v3974_v18 }
0x1332   : > { %v4093_v33 = vpop.permute.xlu0 %4092 }
0x1333   : > { %v3979_v28 = vsel %vm3978_vm14, %v6921_v12, %v3975_v19 }
0x1334   : > { %v4037_v23 = vpop.f32.mrf.mxu3  ;;  %v3984_v31 = vsel %vm3981_vm13, %v3983_v26, %v3979_v28 }
0x1335   : > { %v4040_v24 = vmul.f32 0.35355338, %v4037_v23  ;;  %v3985_v32 = vmul.f32 %v9381_v44, %v3984_v31  ;;  %v6844_v44 = vld [vmem:[#allocation41] ss:$0 sm:$0xff] }
0x1337   : > { %v4041_v27 = vsel %vm3960_vm3, %v4040_v24, -1e+09 }
0x1338   : > { %v4042_v30 = vsel %vm2925_vm5, %v4041_v27, -inf }
0x1339   : > { %4043 = vmax.xlane.f32.xlu1 %v4042_v30 }
0x133e   : > { %6397 = vmatmul.msk.f32.vlgmr.msra.gmra.mxu2 %vm2925_vm5, %v3985_v32 }
0x1346   : > { %6402 = vmatmul.msk.f32.vlgmr.msrb.gmra.mxu2 %vm2925_vm5, %v4093_v33 }
0x13ac   : > { %v4044_v46 = vpop.xlane.xlu1 %4043 }
0x13ad   : > { %v4045_v47 = vsub.f32 %v4041_v27, %v4044_v46 }
0x13af   : > { %v4046_v48 = vmul.f32 1.442695, %v4045_v47  ;;  %v4197_v49 = vpop.f32.mrf.mxu3 }
0x13b0   : > { %v4200_v50 = vmul.f32 0.35355338, %v4197_v49 }
0x13b1   : > { %6922 = vpow2.f32 %v4046_v48  ;;  %v3819_v51 = vpop.f32.mrf.mxu2 }
0x13b2   : > { %v3820_v52 = vadd.f32 %v6844_v44, %v3819_v51  ;;  %v4201_v54 = vsel %vm3960_vm3, %v4200_v50, -1e+09 }
0x13b3   : > { %v4202_v56 = vsel %vm2925_vm5, %v4201_v54, -inf }
0x13b4   : > { %v3823_v59 = vmax.f32 %v3820_v52, 0.0  ;;  %4203 = vmax.xlane.f32.xlu2 %v4202_v56 }
0x13b6   : > { %v3824_v60 = vpack.c.bf16 %v3823_v59, %v3823_v59 }
0x13b7   : > { %v6923_v61 = vpop.eup %6922 }
0x13b8   : > { %v4048_v58 = vsel %vm2925_vm5, %v6923_v61, 0.0  ;;  %6393 = vmatmul.msk.bf16.vlgmr.msrb.gmra.mxu1 %vm3344_vm15, %v3824_v60 }
0x13b9   : > { %4049 = vadd.xlane.f32.xlu1 %v4048_v58  ;;  %v3821_v62 = vpop.f32.mrf.mxu2  ;;  %v6845_v58 = vld [vmem:[#allocation43] ss:$0 sm:$0xff] }
0x13c1   : > { %v9422_v63 = vpop.f32.mrf.mxu2 }
0x13c9   : > { %v4117_v1 = vpop.f32.mrf.mxu2 }
0x13ca   : > { %v4120_v2 = vmul.f32 0.35355338, %v4117_v1 }
0x13cc   : > { %v4121_v42 = vsel %vm3960_vm3, %v4120_v2, -1e+09 }
0x13cd   : > { %v4122_v3 = vsel %vm2925_vm5, %v4121_v42, -inf }
0x13ce   : > { %4123 = vmax.xlane.f32.xlu0 %v4122_v3 }
0x13d2   : > { %4066 = vrot.lane.b32.xlu1 %v9342_v7, %s10053_s16 }
0x1427   : > { %v4204_v53 = vpop.xlane.xlu2 %4203 }
0x1428   : > { %v4205_v4 = vsub.f32 %v4201_v54, %v4204_v53 }
0x142a   : > { %v4206_v5 = vmul.f32 1.442695, %v4205_v4 }
0x142c   : > { %6924 = vpow2.f32 %v4206_v5  ;;  %v4050_v57 = vpop.xlane.xlu1 %4049 }
0x142d   : > { %6926 = vrcp.f32 %v4050_v57  ;;  %v4062_v14 = vand.u32 2147483648, %v4050_v57  ;;  %vm4056_vm2 = vweird.f32 %v4050_v57  ;;  %v4060_v15 = vand.u32 2147483647, %v4050_v57 }
0x142f   : > { %v4063_v18 = vor.u32 1.1754944e-38, %v4062_v14  ;;  %vm4061_vm7 = vcmp.eq.f32.partialorder %v4060_v15, 8.507059e+37 }
0x1432   : > { %v6925_v6 = vpop.eup %6924 }
0x1433   : > { %v6927_v9 = vpop.eup %6926  ;;  %v4208_v10 = vsel %vm2925_vm5, %v6925_v6, 0.0 }
0x1434   : > { %v4052_v11 = vmul.f32 %v6927_v9, %v4050_v57  ;;  %4209 = vadd.xlane.f32.xlu2 %v4208_v10  ;;  %vm4057_vm1 = vweird.f32 %v6927_v9  ;;  %v2731_v10 = vld [vmem:[%s10076_s8 + $0x18] sm:$0xff] }
0x1435   : > { %v9430_v55 = vpop.f32.mrf.mxu1  ;;  %vm4058_vm4 = vmor %vm4056_vm2, %vm4057_vm1 }
0x1436   : > { %v4053_v12 = vsub.f32 1.0, %v4052_v11  ;;  %v3845_v62 = vadd.f32 %v6845_v58, %v9430_v55  ;;  %v2728_v55 = vld [vmem:[%s10076_s8] sm:$0xff] }
0x1438   : > { %v4054_v13 = vmul.f32 %v6927_v9, %v4053_v12  ;;  %v3848_v1 = vadd.f32 %v3845_v62, %v9359_v25  ;;  %v2730_v25 = vld [vmem:[%s10076_s8 + $0x10] sm:$0xff]  ;;  %v2729_v12 = vld [vmem:[%s10076_s8 + $0x8] sm:$0xff]  ;;  %s10078_s8 = sld [smem:[#allocation91_spill]] }
0x1439   : > { %v4269_v11 = vpack.c.bf16 %v2731_v10, %v2730_v25 }
0x143a   : > { %v4055_v38 = vadd.f32 %v6927_v9, %v4054_v13  ;;  %v3849_v2 = vsel %vm2862_vm0, %v3848_v1, 0.0  ;;  %v4268_v13 = vpack.c.bf16 %v2729_v12, %v2728_v55 }
0x143b   : > { %4282 = vmatpush.bf16.msra.mxu2 %v4269_v11 }
0x143c   : > { %v4059_v17 = vsel %vm4058_vm4, %v6927_v9, %v4055_v38 }
0x143d   : > { %v3846_v16 = vpop.f32.mrf.mxu1  ;;  %v4064_v19 = vsel %vm4061_vm7, %v4063_v18, %v4059_v17 }
0x143e   : > { %v4065_v28 = vmul.f32 %v6923_v61, %v4064_v19  ;;  %v2741_v19 = vld [vmem:[%s10077_s17 + $0x10] sm:$0xff] }
0x143f   : > { %4283 = vmatpush.bf16.msra.mxu2 %v4268_v13 }
0x1441   : > { %v4124_v20 = vpop.xlane.xlu0 %4123 }
0x1442   : > { %v4125_v21 = vsub.f32 %v4121_v42, %v4124_v20  ;;  %v2742_v20 = vld [vmem:[%s10077_s17 + $0x18] sm:$0xff] }
0x1444   : > { %v4126_v23 = vmul.f32 1.442695, %v4125_v21  ;;  %v4067_v24 = vpop.permute.xlu1 %4066  ;;  %v4344_v21 = vpack.c.bf16 %v2742_v20, %v2741_v19  ;;  %v6852_v20 = vld [vmem:[#allocation5] ss:$0 sm:$0xff] }
0x1445   : > { %4087 = vmatpush.msrb.mxu0 %v4067_v24  ;;  %v2740_v24 = vld [vmem:[%s10077_s17 + $0x8] sm:$0xff] }
0x1446   : > { %6928 = vpow2.f32 %v4126_v23  ;;  %6400 = vmatmul.msk.f32.vlgmr.msrb.gmra.mxu0 %vm2925_vm5, %v4065_v28  ;;  %4357 = vmatpush.bf16.msrb.mxu3 %v4344_v21  ;;  %v2739_v23 = vld [vmem:[%s10077_s17] sm:$0xff]  ;;  %s10080_s17 = sld [smem:[#allocation100_spill]] }
0x1447   : > { %v4343_v28 = vpack.c.bf16 %v2740_v24, %v2739_v23 }
0x144a   : > { %4358 = vmatpush.bf16.msrb.mxu3 %v4343_v28 }
0x144c   : > { %v6929_v26 = vpop.eup %6928  ;;  %4226 = vrot.lane.b32.xlu2 %v9342_v7, %s10055_s3 }
0x144d   : > { %v4128_v27 = vsel %vm2925_vm5, %v6929_v26, 0.0 }
0x144e   : > { %4129 = vadd.xlane.f32.xlu0 %v4128_v27 }
0x1462   : > { %4146 = vrot.lane.b32.xlu0 %v9342_v7, %s10054_s11 }
0x14a7   : > { %v4210_v30 = vpop.xlane.xlu2 %4209 }
0x14a8   : > { %6930 = vrcp.f32 %v4210_v30  ;;  %v4222_v34 = vand.u32 2147483648, %v4210_v30  ;;  %v4220_v37 = vand.u32 2147483647, %v4210_v30  ;;  %vm4216_vm9 = vweird.f32 %v4210_v30 }
0x14aa   : > { %v4223_v40 = vor.u32 1.1754944e-38, %v4222_v34  ;;  %vm4221_vm14 = vcmp.eq.f32.partialorder %v4220_v37, 8.507059e+37 }
0x14ae   : > { %v6931_v31 = vpop.eup %6930 }
0x14af   : > { %v4212_v32 = vmul.f32 %v6931_v31, %v4210_v30  ;;  %v4227_v33 = vpop.permute.xlu2 %4226  ;;  %vm4217_vm8 = vweird.f32 %v6931_v31 }
0x14b0   : > { %4247 = vmatpush.msra.mxu0 %v4227_v33  ;;  %vm4218_vm12 = vmor %vm4216_vm9, %vm4217_vm8 }
0x14b1   : > { %v4213_v22 = vsub.f32 1.0, %v4212_v32 }
0x14b3   : > { %v4214_v35 = vmul.f32 %v6931_v31, %v4213_v22 }
0x14b5   : > { %v4215_v39 = vadd.f32 %v6931_v31, %v4214_v35  ;;  %v6846_v35 = vld [vmem:[#allocation28] ss:$0 sm:$0xff] }
0x14b7   : > { %v4219_v41 = vsel %vm4218_vm12, %v6931_v31, %v4215_v39 }
0x14b8   : > { %v4224_v0 = vsel %vm4221_vm14, %v4223_v40, %v4219_v41  ;;  %v6847_v40 = vld [vmem:[#allocation26] ss:$0 sm:$0xff] }
0x14b9   : > { %v4225_v43 = vmul.f32 %v6925_v6, %v4224_v0 }
0x14bb   : > { %6406 = vmatmul.msk.f32.vlgmr.msra.gmra.mxu0 %vm2925_vm5, %v4225_v43 }
0x14c1   : > { %v4130_v7 = vpop.xlane.xlu0 %4129 }
0x14c2   : > { %6932 = vrcp.f32 %v4130_v7  ;;  %v4142_v49 = vand.u32 2147483648, %v4130_v7  ;;  %v4140_v51 = vand.u32 2147483647, %v4130_v7  ;;  %vm4136_vm1 = vweird.f32 %v4130_v7 }
0x14c3   : > { %v4089_v46 = vpop.f32.mrf.mxu0 }
0x14c4   : > { %4253 = vrot.lane.b32.xlu0 %v4089_v46, %s10065_s2  ;;  %v4143_v54 = vor.u32 1.1754944e-38, %v4142_v49  ;;  %vm4141_vm4 = vcmp.eq.f32.partialorder %v4140_v51, 8.507059e+37 }
0x14c8   : > { %v6933_v47 = vpop.eup %6932 }
0x14c9   : > { %v4132_v44 = vmul.f32 %v6933_v47, %v4130_v7  ;;  %vm4137_vm13 = vweird.f32 %v6933_v47  ;;  %v6848_v7 = vld [vmem:[%s10078_s8] ss:$0 sm:$0xff]  ;;  %s10082_s8 = sld [smem:[#allocation87_spill]] }
0x14ca   : > { %vm4138_vm2 = vmor %vm4136_vm1, %vm4137_vm13 }
0x14cb   : > { %v4133_v48 = vsub.f32 1.0, %v4132_v44 }
0x14cd   : > { %v4134_v50 = vmul.f32 %v6933_v47, %v4133_v48 }
0x14cf   : > { %v4135_v52 = vadd.f32 %v6933_v47, %v4134_v50  ;;  %v6849_v50 = vld [vmem:[%s10079_s19] ss:$0 sm:$0xff]  ;;  %s10081_s19 = sld [smem:[#allocation88_spill]] }
0x14d1   : > { %v4139_v56 = vsel %vm4138_vm2, %v6933_v47, %v4135_v52 }
0x14d2   : > { %v4144_v59 = vsel %vm4141_vm4, %v4143_v54, %v4139_v56 }
0x14d3   : > { %v4145_v60 = vmul.f32 %v6929_v26, %v4144_v59 }
0x14d4   : > { %v4147_v61 = vpop.permute.xlu0 %4146 }
0x14d5   : > { %4167 = vmatpush.msra.mxu1 %v4147_v61 }
0x14d6   : > { %6403 = vmatmul.msk.f32.vlgmr.msra.gmra.mxu1 %vm2925_vm5, %v4145_v60 }
0x14ee   : > { %3850 = vadd.xlane.f32.xlu0 %v3849_v2  ;;  %v2750_v2 = vld [vmem:[%s10080_s17 + $0x18] sm:$0xff] }
0x1536   : > { %v4254_v53 = vpop.permute.xlu0 %4253 }
0x1537   : > { %v4264_v38 = vsel %vm2925_vm5, %v9422_v63, %v4254_v53  ;;  %v2748_v53 = vld [vmem:[%s10080_s17 + $0x8] sm:$0xff] }
0x1538   : > { %v4249_v42 = vpop.f32.mrf.mxu0 }
0x1539   : > { %4261 = vrot.lane.b32.xlu2 %v4249_v42, %s10067_s10 }
0x1553   : > { %v4169_v3 = vpop.f32.mrf.mxu1 }
0x1554   : > { %4257 = vrot.lane.b32.xlu1 %v4169_v3, %s10066_s9  ;;  %v2747_v3 = vld [vmem:[%s10080_s17] sm:$0xff] }
0x1561   : > { %v3851_v4 = vpop.xlane.xlu0 %3850 }
0x1562   : > { %v3852_v5 = vmul.f32 %v3851_v4, %v9101_v8  ;;  %v4321_v4 = vpack.c.bf16 %v2748_v53, %v2747_v3 }
0x1564   : > { %v3853_v57 = vsub.f32 %v3848_v1, %v3852_v5  ;;  %v2749_v1 = vld [vmem:[%s10080_s17 + $0x10] sm:$0xff]  ;;  %s10085_s17 = sld [smem:[#allocation84_spill]] }
0x1565   : > { %v4322_v42 = vpack.c.bf16 %v2750_v2, %v2749_v1 }
0x1566   : > { %v3854_v6 = vmul.f32 %v3853_v57, %v3853_v57 }
0x1567   : > { %4335 = vmatpush.bf16.msrb.mxu1 %v4322_v42 }
0x1568   : > { %v3855_v9 = vsel %vm2862_vm0, %v3854_v6, 0.0 }
0x1569   : > { %3856 = vadd.xlane.f32.xlu2 %v3855_v9 }
0x156b   : > { %4336 = vmatpush.bf16.msrb.mxu1 %v4321_v4 }
0x1593   : > { %v4262_v15 = vpop.permute.xlu2 %4261 }
0x15c6   : > { %v4258_v14 = vpop.permute.xlu1 %4257 }
0x15c7   : > { %v4265_v16 = vsel %vm3256_vm10, %v4264_v38, %v4258_v14  ;;  %v6850_v38 = vld [vmem:[%s10081_s19] ss:$0 sm:$0xff]  ;;  %s10083_s19 = sld [smem:[#allocation99_spill]] }
0x15c8   : > { %v4266_v17 = vsel %vm3258_vm11, %v4265_v16, %v4262_v15  ;;  %v6851_v16 = vld [vmem:[%s10082_s8] ss:$0 sm:$0xff]  ;;  %s10084_s8 = sld [smem:[#allocation83_spill]] }
0x15c9   : > { %v4267_v18 = vpack.c.bf16 %v4266_v17, %v4266_v17 }
0x15cb   : > { %6407 = vmatmul.msk.bf16.vlgmr.msra.gmra.mxu2 %vm2862_vm0, %v4267_v18 }
0x15dc   : > { %v3857_v26 = vpop.xlane.xlu2 %3856 }
0x15dd   : > { %v3858_v63 = vmul.f32 %v3857_v26, %v9101_v8 }
0x15df   : > { %v3859_v27 = vadd.f32 1e-05, %v3858_v63 }
0x15e1   : > { %6934 = vrsqrt.f32 %v3859_v27  ;;  %vm3866_vm8 = vweird.f32 %v3859_v27 }
0x15e7   : > { %v6935_v30 = vpop.eup %6934 }
0x15e8   : > { %v3861_v31 = vmul.f32 %v6935_v30, %v3859_v27  ;;  %vm3867_vm7 = vweird.f32 %v6935_v30 }
0x15e9   : > { %vm3868_vm9 = vmor %vm3866_vm8, %vm3867_vm7 }
0x15ea   : > { %v3862_v32 = vmul.f32 %v6935_v30, %v3861_v31 }
0x15ec   : > { %v3863_v33 = vmul.f32 0.5, %v3862_v32 }
0x15ee   : > { %v3864_v22 = vsub.f32 1.5, %v3863_v33 }
0x15f0   : > { %v3865_v34 = vmul.f32 %v6935_v30, %v3864_v22 }
0x15f2   : > { %v3869_v37 = vsel %vm3868_vm9, %v6935_v30, %v3865_v34 }
0x15f3   : > { %v3870_v39 = vmul.f32 %v3869_v37, %v3853_v57 }
0x15f5   : > { %v3874_v41 = vmul.f32 %v6846_v35, %v3870_v39 }
0x15f7   : > { %v3878_v0 = vadd.f32 %v6847_v40, %v3874_v41 }
0x15f9   : > { %v9462_v43 = vpack.c.bf16 %v3878_v0, %v3878_v0 }
0x15fb   : > { %6409 = vmatmul.msk.bf16.vlgmr.msrb.gmra.mxu3 %vm2862_vm0, %v9462_v43 }
0x164e   : > { %v4285_v46 = vpop.f32.mrf.mxu2 }
0x164f   : > { %v4286_v47 = vadd.f32 %v6848_v7, %v4285_v46 }
0x1651   : > { %v9468_v44 = vadd.f32 %v4286_v47, %v9263_v36 }
0x1653   : > { %v4290_v48 = vsel %vm2862_vm0, %v9468_v44, 0.0 }
0x1654   : > { %4291 = vadd.xlane.f32.xlu1 %v4290_v48 }
0x1656   : > { %v4287_v49 = vpop.f32.mrf.mxu2 }
0x167e   : > { %v4360_v51 = vpop.f32.mrf.mxu3 }
0x167f   : > { %v9473_v52 = vadd.f32 %v6849_v50, %v4360_v51 }
0x1681   : > { %4444 = vrot.lane.b32.xlu1 %v9473_v52, %s10071_s13  ;;  %6410 = vmatpush.xpose.msk.msrb.mxu0 %vm2925_vm5, %v9473_v52 }
0x1686   : > { %v4362_v54 = vpop.f32.mrf.mxu3 }
0x1689   : > { %4604 = vrot.lane.b32.xlu1 %v9473_v52, %s10051_s0 }
0x16c7   : > { %v4292_v36 = vpop.xlane.xlu1 %4291 }
0x16c8   : > { %v4293_v56 = vmul.f32 %v4292_v36, %v9101_v8 }
0x16ca   : > { %v4294_v59 = vsub.f32 %v9468_v44, %v4293_v56 }
0x16cc   : > { %v4295_v60 = vmul.f32 %v4294_v59, %v4294_v59 }
0x16ce   : > { %v4296_v61 = vsel %vm2862_vm0, %v4295_v60, 0.0 }
0x16cf   : > { %4297 = vadd.xlane.f32.xlu0 %v4296_v61 }
0x16e3   : > { %4524 = vrot.lane.b32.xlu0 %v9473_v52, %s10050_s7 }
0x16f3   : > { %v4445_v58 = vpop.permute.xlu1 %4444 }
0x16f4   : > { %6413 = vmatpush.xpose.msk.msrb.mxu2 %vm2925_vm5, %v4445_v58 }
0x16fb   : > { %v4605_v62 = vpop.permute.xlu1 %4604 }
0x16fc   : > { %6419 = vmatpush.xpose.msk.msra.mxu2 %vm2925_vm5, %v4605_v62 }
0x1742   : > { %v4298_v5 = vpop.xlane.xlu0 %4297 }
0x1743   : > { %v4299_v57 = vmul.f32 %v4298_v5, %v9101_v8 }
0x1745   : > { %v4300_v6 = vadd.f32 1e-05, %v4299_v57 }
0x1747   : > { %6936 = vrsqrt.f32 %v4300_v6  ;;  %vm4307_vm14 = vweird.f32 %v4300_v6 }
0x174d   : > { %v6937_v9 = vpop.eup %6936 }
0x174e   : > { %v4302_v25 = vmul.f32 %v6937_v9, %v4300_v6  ;;  %vm4308_vm12 = vweird.f32 %v6937_v9 }
0x174f   : > { %vm4309_vm13 = vmor %vm4307_vm14, %vm4308_vm12 }
0x1750   : > { %v4303_v10 = vmul.f32 %v6937_v9, %v4302_v25 }
0x1752   : > { %v4304_v11 = vmul.f32 0.5, %v4303_v10 }
0x1754   : > { %v4305_v55 = vsub.f32 1.5, %v4304_v11 }
0x1755   : > { %v4525_v12 = vpop.permute.xlu0 %4524 }
0x1756   : > { %v4306_v13 = vmul.f32 %v6937_v9, %v4305_v55  ;;  %6416 = vmatpush.xpose.msk.msra.mxu3 %vm2925_vm5, %v4525_v12 }
0x1758   : > { %v4310_v14 = vsel %vm4309_vm13, %v6937_v9, %v4306_v13 }
0x1759   : > { %v4311_v15 = vmul.f32 %v4310_v14, %v4294_v59 }
0x175b   : > { %v4315_v17 = vmul.f32 %v6850_v38, %v4311_v15 }
0x175d   : > { %v4319_v18 = vadd.f32 %v6851_v16, %v4315_v17 }
0x175f   : > { %v4320_v19 = vpack.c.bf16 %v4319_v18, %v4319_v18 }
0x1761   : > { %6408 = vmatmul.msk.bf16.vlgmr.msrb.gmra.mxu1 %vm2862_vm0, %v4320_v19 }
0x17de   : > { %v4338_v21 = vpop.f32.mrf.mxu1 }
0x17df   : > { %v4339_v23 = vadd.f32 %v6852_v20, %v4338_v21 }
0x17e1   : > { %4602 = vrot.lane.b32.xlu0 %v4339_v23, %s10051_s0  ;;  %4442 = vrot.lane.b32.xlu2 %v4339_v23, %s10071_s13 }
0x17e2   : > { %6411 = vmatmul.msk.f32.vlgmr.msrb.gmra.mxu0 %vm2925_vm5, %v4339_v23 }
0x17e6   : > { %v4340_v24 = vpop.f32.mrf.mxu1 }
0x17e9   : > { %4522 = vrot.lane.b32.xlu2 %v4339_v23, %s10050_s7 }
0x183b   : > { %v4443_v28 = vpop.permute.xlu2 %4442 }
0x183c   : > { %6414 = vmatmul.msk.f32.vlgmr.msrb.gmra.mxu2 %vm2925_vm5, %v4443_v28 }
0x1843   : > { %v4523_v26 = vpop.permute.xlu2 %4522 }
0x1844   : > { %6417 = vmatmul.msk.f32.vlgmr.msra.gmra.mxu3 %vm2925_vm5, %v4523_v26 }
0x1853   : > { %v4603_v63 = vpop.permute.xlu0 %4602 }
0x1854   : > { %6420 = vmatmul.msk.f32.vlgmr.msra.gmra.mxu2 %vm2925_vm5, %v4603_v63 }
0x185f   : > { %v4387_v27 = vpop.f32.mrf.mxu0 }
0x1860   : > { %v4390_v30 = vmul.f32 0.35355338, %v4387_v27 }
0x1862   : > { %v4391_v31 = vsel %vm2951_vm6, %v4390_v30, -1e+09 }
0x1863   : > { %v4392_v32 = vsel %vm2925_vm5, %v4391_v31, -inf }
0x1864   : > { %4393 = vmax.xlane.f32.xlu1 %v4392_v32 }
0x18bf   : > { %v4467_v33 = vpop.f32.mrf.mxu2 }
0x18c0   : > { %v4470_v22 = vmul.f32 0.35355338, %v4467_v33 }
0x18c2   : > { %v4471_v34 = vsel %vm2951_vm6, %v4470_v22, -1e+09 }
0x18c3   : > { %v4472_v35 = vsel %vm2925_vm5, %v4471_v34, -inf }
0x18c4   : > { %4473 = vmax.xlane.f32.xlu2 %v4472_v35 }
0x18c7   : > { %v4547_v37 = vpop.f32.mrf.mxu3 }
0x18c8   : > { %v4550_v39 = vmul.f32 0.35355338, %v4547_v37 }
0x18ca   : > { %v4551_v40 = vsel %vm2951_vm6, %v4550_v39, -1e+09 }
0x18cb   : > { %v4552_v41 = vsel %vm2925_vm5, %v4551_v40, -inf }
0x18cc   : > { %4553 = vmax.xlane.f32.xlu0 %v4552_v41 }
0x18d7   : > { %v4394_v0 = vpop.xlane.xlu1 %4393  ;;  %v4627_v7 = vpop.f32.mrf.mxu2 }
0x18d8   : > { %v4395_v46 = vsub.f32 %v4391_v31, %v4394_v0  ;;  %v4630_v47 = vmul.f32 0.35355338, %v4627_v7 }
0x18da   : > { %v4396_v48 = vmul.f32 1.442695, %v4395_v46  ;;  %v4631_v49 = vsel %vm2951_vm6, %v4630_v47, -1e+09 }
0x18db   : > { %v4632_v50 = vsel %vm2925_vm5, %v4631_v49, -inf }
0x18dc   : > { %6938 = vpow2.f32 %v4396_v48  ;;  %4633 = vmax.xlane.f32.xlu1 %v4632_v50 }
0x18e0   : > { %4416 = vrot.lane.b32.xlu0 %v9473_v52, %s10068_s4 }
0x18e2   : > { %v6939_v51 = vpop.eup %6938 }
0x18e3   : > { %v4398_v54 = vsel %vm2925_vm5, %v6939_v51, 0.0 }
0x18e4   : > { %4399 = vadd.xlane.f32.xlu2 %v4398_v54 }
0x1937   : > { %v4474_v36 = vpop.xlane.xlu2 %4473 }
0x1938   : > { %v4475_v56 = vsub.f32 %v4471_v34, %v4474_v36 }
0x193a   : > { %v4476_v59 = vmul.f32 1.442695, %v4475_v56 }
0x193c   : > { %6940 = vpow2.f32 %v4476_v59 }
0x193f   : > { %v4554_v60 = vpop.xlane.xlu0 %4553 }
0x1940   : > { %v4555_v61 = vsub.f32 %v4551_v40, %v4554_v60 }
0x1942   : > { %v9519_v58 = vpop.eup %6940  ;;  %v4556_v62 = vmul.f32 1.442695, %v4555_v61 }
0x1943   : > { %v4478_v1 = vsel %vm2925_vm5, %v9519_v58, 0.0 }
0x1944   : > { %6942 = vpow2.f32 %v4556_v62  ;;  %4479 = vadd.xlane.f32.xlu0 %v4478_v1 }
0x194a   : > { %v9523_v2 = vpop.eup %6942 }
0x194b   : > { %v4558_v42 = vsel %vm2925_vm5, %v9523_v2, 0.0 }
0x194c   : > { %4559 = vadd.xlane.f32.xlu1 %v4558_v42 }
0x194f   : > { %v4634_v3 = vpop.xlane.xlu1 %4633 }
0x1950   : > { %v4635_v53 = vsub.f32 %v4631_v49, %v4634_v3 }
0x1952   : > { %v4636_v4 = vmul.f32 1.442695, %v4635_v53  ;;  %v4417_v5 = vpop.permute.xlu0 %4416 }
0x1953   : > { %4437 = vmatpush.msra.mxu0 %v4417_v5  ;;  %v2746_v5 = vld [vmem:[%s10083_s19 + $0x18] sm:$0xff] }
0x1954   : > { %6944 = vpow2.f32 %v4636_v4  ;;  %v2745_v4 = vld [vmem:[%s10083_s19 + $0x10] sm:$0xff] }
0x1957   : > { %v4400_v57 = vpop.xlane.xlu2 %4399 }
0x1958   : > { %6946 = vrcp.f32 %v4400_v57  ;;  %4656 = vrot.lane.b32.xlu0 %v9473_v52, %s10049_s18  ;;  %v4412_v55 = vand.u32 2147483648, %v4400_v57  ;;  %v4410_v13 = vand.u32 2147483647, %v4400_v57  ;;  %vm4406_vm2 = vweird.f32 %v4400_v57 }
0x195a   : > { %v9529_v6 = vpop.eup %6944  ;;  %v4413_v14 = vor.u32 1.1754944e-38, %v4412_v55  ;;  %vm4411_vm7 = vcmp.eq.f32.partialorder %v4410_v13, 8.507059e+37 }
0x195b   : > { %v4638_v9 = vsel %vm2925_vm5, %v9529_v6, 0.0 }
0x195c   : > { %4639 = vadd.xlane.f32.xlu2 %v4638_v9  ;;  %v2743_v9 = vld [vmem:[%s10083_s19] sm:$0xff] }
0x195e   : > { %v6947_v25 = vpop.eup %6946 }
0x195f   : > { %v4402_v10 = vmul.f32 %v6947_v25, %v4400_v57  ;;  %vm4407_vm1 = vweird.f32 %v6947_v25  ;;  %v4699_v57 = vpack.c.bf16 %v2746_v5, %v2745_v4 }
0x1960   : > { %vm4408_vm4 = vmor %vm4406_vm2, %vm4407_vm1 }
0x1961   : > { %v4403_v11 = vsub.f32 1.0, %v4402_v10  ;;  %4712 = vmatpush.bf16.msrb.mxu3 %v4699_v57 }
0x1963   : > { %v4404_v12 = vmul.f32 %v6947_v25, %v4403_v11 }
0x1965   : > { %v4405_v38 = vadd.f32 %v6947_v25, %v4404_v12  ;;  %4496 = vrot.lane.b32.xlu1 %v9473_v52, %s10070_s12 }
0x1967   : > { %v4409_v15 = vsel %vm4408_vm4, %v6947_v25, %v4405_v38  ;;  %v2744_v25 = vld [vmem:[%s10083_s19 + $0x8] sm:$0xff]  ;;  %s10086_s19 = sld [smem:[#allocation90_spill]] }
0x1968   : > { %v4414_v16 = vsel %vm4411_vm7, %v4413_v14, %v4409_v15  ;;  %v4698_v10 = vpack.c.bf16 %v2744_v25, %v2743_v9  ;;  %v6853_v15 = vld [vmem:[#allocation2] ss:$0 sm:$0xff] }
0x1969   : > { %v4415_v17 = vmul.f32 %v6939_v51, %v4414_v16  ;;  %v6857_v25 = vld [vmem:[%s10089_s21] ss:$0 sm:$0xff]  ;;  %s10091_s21 = sld [smem:[#allocation117_spill]] }
0x196a   : > { %4713 = vmatpush.bf16.msrb.mxu3 %v4698_v10 }
0x196b   : > { %6412 = vmatmul.msk.f32.vlgmr.msra.gmra.mxu0 %vm2925_vm5, %v4415_v17 }
0x1974   : > { %4576 = vrot.lane.b32.xlu2 %v9473_v52, %s10074_s1 }
0x19b7   : > { %v4480_v18 = vpop.xlane.xlu0 %4479 }
0x19b8   : > { %6948 = vrcp.f32 %v4480_v18  ;;  %vm4486_vm12 = vweird.f32 %v4480_v18  ;;  %v4492_v32 = vand.u32 2147483648, %v4480_v18  ;;  %v4490_v52 = vand.u32 2147483647, %v4480_v18 }
0x19ba   : > { %v4493_v39 = vor.u32 1.1754944e-38, %v4492_v32  ;;  %vm4491_vm2 = vcmp.eq.f32.partialorder %v4490_v52, 8.507059e+37  ;;  %v2719_v52 = vld [vmem:[%s10085_s17 + $0x38] sm:$0xff] }
0x19be   : > { %v6949_v19 = vpop.eup %6948 }
0x19bf   : > { %v4560_v20 = vpop.xlane.xlu1 %4559  ;;  %v4482_v21 = vmul.f32 %v6949_v19, %v4480_v18  ;;  %vm4487_vm8 = vweird.f32 %v6949_v19 }
0x19c0   : > { %6950 = vrcp.f32 %v4560_v20  ;;  %v4572_v33 = vand.u32 2147483648, %v4560_v20  ;;  %vm4488_vm14 = vmor %vm4486_vm12, %vm4487_vm8  ;;  %vm4566_vm13 = vweird.f32 %v4560_v20  ;;  %v4570_v22 = vand.u32 2147483647, %v4560_v20 }
0x19c1   : > { %v4483_v23 = vsub.f32 1.0, %v4482_v21 }
0x19c2   : > { %v4573_v40 = vor.u32 1.1754944e-38, %v4572_v33  ;;  %vm4571_vm4 = vcmp.eq.f32.partialorder %v4570_v22, 8.507059e+37  ;;  %v2718_v33 = vld [vmem:[%s10085_s17 + $0x30] sm:$0xff]  ;;  %v2716_v22 = vld [vmem:[%s10085_s17 + $0x20] sm:$0xff] }
0x19c3   : > { %v4484_v26 = vmul.f32 %v6949_v19, %v4483_v23 }
0x19c5   : > { %v4485_v30 = vadd.f32 %v6949_v19, %v4484_v26 }
0x19c6   : > { %v6951_v24 = vpop.eup %6950 }
0x19c7   : > { %v4562_v28 = vmul.f32 %v6951_v24, %v4560_v20  ;;  %vm4567_vm9 = vweird.f32 %v6951_v24  ;;  %v4489_v35 = vsel %vm4488_vm14, %v6949_v19, %v4485_v30  ;;  %v2708_v30 = vld [vmem:[%s10084_s8] sm:$0xff] }
0x19c8   : > { %vm4568_vm1 = vmor %vm4566_vm13, %vm4567_vm9  ;;  %v4494_v41 = vsel %vm4491_vm2, %v4493_v39, %v4489_v35  ;;  %v4777_v35 = vpack.c.bf16 %v2719_v52, %v2718_v33  ;;  %v6858_v33 = vld [vmem:[#allocation11] ss:$0 sm:$0xff] }
0x19c9   : > { %v4563_v63 = vsub.f32 1.0, %v4562_v28  ;;  %v4495_v49 = vmul.f32 %v9519_v58, %v4494_v41 }
0x19ca   : > { %v4657_v51 = vpop.permute.xlu0 %4656  ;;  %4788 = vmatpush.bf16.msrb.mxu2 %v4777_v35 }
0x19cb   : > { %v4564_v27 = vmul.f32 %v6951_v24, %v4563_v63  ;;  %v2711_v63 = vld [vmem:[%s10084_s8 + $0x18] sm:$0xff] }
0x19cd   : > { %v4565_v31 = vadd.f32 %v6951_v24, %v4564_v27 }
0x19cf   : > { %v4640_v34 = vpop.xlane.xlu2 %4639  ;;  %v4569_v37 = vsel %vm4568_vm1, %v6951_v24, %v4565_v31  ;;  %v2709_v31 = vld [vmem:[%s10084_s8 + $0x8] sm:$0xff] }
0x19d0   : > { %6952 = vrcp.f32 %v4640_v34  ;;  %v4574_v0 = vsel %vm4571_vm4, %v4573_v40, %v4569_v37  ;;  %v4652_v36 = vand.u32 2147483648, %v4640_v34  ;;  %v4650_v59 = vand.u32 2147483647, %v4640_v34  ;;  %v2717_v37 = vld [vmem:[%s10085_s17 + $0x28] sm:$0xff] }
0x19d1   : > { %v4575_v50 = vmul.f32 %v9523_v2, %v4574_v0  ;;  %vm4646_vm8 = vweird.f32 %v4640_v34  ;;  %v4751_v32 = vpack.c.bf16 %v2709_v31, %v2708_v30  ;;  %v4776_v40 = vpack.c.bf16 %v2717_v37, %v2716_v22 }
0x19d2   : > { %v4653_v61 = vor.u32 1.1754944e-38, %v4652_v36  ;;  %vm4651_vm12 = vcmp.eq.f32.partialorder %v4650_v59, 8.507059e+37  ;;  %v6855_v36 = vld [vmem:[%s10087_s20] ss:$0 sm:$0xff]  ;;  %s10090_s20 = sld [smem:[#allocation113_spill]] }
0x19d3   : > { %4789 = vmatpush.bf16.msrb.mxu2 %v4776_v40  ;;  %v6860_v40 = vld [vmem:[#allocation20] ss:$0 sm:$0xff] }
0x19d6   : > { %v6953_v7 = vpop.eup %6952 }
0x19d7   : > { %v4642_v46 = vmul.f32 %v6953_v7, %v4640_v34  ;;  %v4577_v47 = vpop.permute.xlu2 %4576  ;;  %v4497_v48 = vpop.permute.xlu1 %4496  ;;  %vm4647_vm7 = vweird.f32 %v6953_v7 }
0x19d8   : > { %4517 = vmatpush.msra.mxu1 %v4497_v48  ;;  %4597 = vmatpush.msrb.mxu0 %v4577_v47  ;;  %vm4648_vm9 = vmor %vm4646_vm8, %vm4647_vm7 }
0x19d9   : > { %v4643_v54 = vsub.f32 1.0, %v4642_v46  ;;  %6415 = vmatmul.msk.f32.vlgmr.msra.gmra.mxu1 %vm2925_vm5, %v4495_v49  ;;  %6418 = vmatmul.msk.f32.vlgmr.msrb.gmra.mxu0 %vm2925_vm5, %v4575_v50  ;;  %v6854_v50 = vld [vmem:[%s10086_s19] ss:$0 sm:$0xff] }
0x19da   : > { %4677 = vmatpush.msrb.mxu1 %v4657_v51 }
0x19db   : > { %v4644_v56 = vmul.f32 %v6953_v7, %v4643_v54 }
0x19dd   : > { %v4645_v60 = vadd.f32 %v6953_v7, %v4644_v56 }
0x19df   : > { %v4649_v58 = vsel %vm4648_vm9, %v6953_v7, %v4645_v60 }
0x19e0   : > { %v4654_v62 = vsel %vm4651_vm12, %v4653_v61, %v4649_v58  ;;  %v2714_v61 = vld [vmem:[%s10085_s17 + $0x10] sm:$0xff]  ;;  %v2715_v58 = vld [vmem:[%s10085_s17 + $0x18] sm:$0xff] }
0x19e1   : > { %v4655_v1 = vmul.f32 %v9529_v6, %v4654_v62  ;;  %v4775_v62 = vpack.c.bf16 %v2715_v58, %v2714_v61 }
0x19e3   : > { %6421 = vmatmul.msk.f32.vlgmr.msrb.gmra.mxu1 %vm2925_vm5, %v4655_v1  ;;  %4790 = vmatpush.bf16.msrb.mxu2 %v4775_v62  ;;  %v2712_v1 = vld [vmem:[%s10085_s17] sm:$0xff] }
0x19e8   : > { %v4439_v2 = vpop.f32.mrf.mxu0 }
0x1a56   : > { %v4519_v42 = vpop.f32.mrf.mxu1  ;;  %v4599_v3 = vpop.f32.mrf.mxu0 }
0x1a57   : > { %4687 = vrot.lane.b32.xlu1 %v4599_v3, %s10066_s9  ;;  %4683 = vrot.lane.b32.xlu0 %v4519_v42, %s10065_s2 }
0x1a60   : > { %v4679_v53 = vpop.f32.mrf.mxu1 }
0x1a61   : > { %4691 = vrot.lane.b32.xlu2 %v4679_v53, %s10067_s10 }
0x1abb   : > { %v4692_v12 = vpop.permute.xlu2 %4691 }
0x1ac9   : > { %v4688_v6 = vpop.permute.xlu1 %4687  ;;  %v4684_v11 = vpop.permute.xlu0 %4683 }
0x1aca   : > { %v4694_v55 = vsel %vm2925_vm5, %v4439_v2, %v4684_v11  ;;  %v2713_v2 = vld [vmem:[%s10085_s17 + $0x8] sm:$0xff] }
0x1acb   : > { %v4695_v13 = vsel %vm3256_vm10, %v4694_v55, %v4688_v6  ;;  %v4774_v42 = vpack.c.bf16 %v2713_v2, %v2712_v1  ;;  %v2786_v1 = vld [vmem:[%s10091_s21 + $0x10] sm:$0xff]  ;;  %v2787_v2 = vld [vmem:[%s10091_s21 + $0x18] sm:$0xff] }
0x1acc   : > { %v4696_v38 = vsel %vm3258_vm11, %v4695_v13, %v4692_v12 }
0x1acd   : > { %v4697_v14 = vpack.c.bf16 %v4696_v38, %v4696_v38  ;;  %4791 = vmatpush.bf16.msrb.mxu2 %v4774_v42  ;;  %v5260_v42 = vpack.c.bf16 %v2787_v2, %v2786_v1 }
0x1acf   : > { %6422 = vmatmul.msk.bf16.vlgmr.msrb.gmra.mxu3 %vm2862_vm0, %v4697_v14 }
0x1b52   : > { %v4715_v16 = vpop.f32.mrf.mxu3 }
0x1b53   : > { %v4716_v17 = vadd.f32 %v6853_v15, %v4715_v16 }
0x1b55   : > { %v9556_v18 = vadd.f32 %v4716_v17, %v9468_v44  ;;  %v2710_v44 = vld [vmem:[%s10084_s8 + $0x10] sm:$0xff]  ;;  %s10088_s8 = sld [smem:[#allocation81_spill]] }
0x1b56   : > { %v4752_v27 = vpack.c.bf16 %v2711_v63, %v2710_v44  ;;  %v2779_v17 = vld [vmem:[%s10090_s20 + $0x10] sm:$0xff] }
0x1b57   : > { %v4720_v19 = vsel %vm2862_vm0, %v9556_v18, 0.0 }
0x1b58   : > { %4721 = vadd.xlane.f32.xlu0 %v4720_v19  ;;  %4765 = vmatpush.bf16.msra.mxu0 %v4752_v27  ;;  %v2780_v19 = vld [vmem:[%s10090_s20 + $0x18] sm:$0xff] }
0x1b5a   : > { %v4717_v20 = vpop.f32.mrf.mxu3 }
0x1b5b   : > { %v6856_v3 = vld [vmem:[%s10088_s8] ss:$0 sm:$0xff]  ;;  %v4830_v20 = vpack.c.bf16 %v2780_v19, %v2779_v17 }
0x1b5c   : > { %4766 = vmatpush.bf16.msra.mxu0 %v4751_v32 }
0x1b5d   : > { %4843 = vmatpush.bf16.msra.mxu1 %v4830_v20 }
0x1bcb   : > { %v4722_v21 = vpop.xlane.xlu0 %4721 }
0x1bcc   : > { %v4723_v23 = vmul.f32 %v4722_v21, %v9101_v8  ;;  %v2778_v21 = vld [vmem:[%s10090_s20 + $0x8] sm:$0xff] }
0x1bce   : > { %v4724_v24 = vsub.f32 %v9556_v18, %v4723_v23 }
0x1bd0   : > { %v4725_v28 = vmul.f32 %v4724_v24, %v4724_v24 }
0x1bd2   : > { %v4726_v26 = vsel %vm2862_vm0, %v4725_v28, 0.0 }
0x1bd3   : > { %4727 = vadd.xlane.f32.xlu1 %v4726_v26 }
0x1c46   : > { %v4728_v34 = vpop.xlane.xlu1 %4727 }
0x1c47   : > { %v4729_v39 = vmul.f32 %v4728_v34, %v9101_v8  ;;  %v6859_v34 = vld [vmem:[#allocation10] ss:$0 sm:$0xff] }
0x1c49   : > { %v4730_v41 = vadd.f32 1e-05, %v4729_v39 }
0x1c4b   : > { %6954 = vrsqrt.f32 %v4730_v41  ;;  %vm4737_vm13 = vweird.f32 %v4730_v41 }
0x1c51   : > { %v6955_v0 = vpop.eup %6954 }
0x1c52   : > { %v4732_v7 = vmul.f32 %v6955_v0, %v4730_v41  ;;  %vm4738_vm14 = vweird.f32 %v6955_v0 }
0x1c53   : > { %vm4739_vm1 = vmor %vm4737_vm13, %vm4738_vm14 }
0x1c54   : > { %v4733_v46 = vmul.f32 %v6955_v0, %v4732_v7 }
0x1c56   : > { %v4734_v47 = vmul.f32 0.5, %v4733_v46 }
0x1c58   : > { %v4735_v48 = vsub.f32 1.5, %v4734_v47 }
0x1c5a   : > { %v4736_v49 = vmul.f32 %v6955_v0, %v4735_v48 }
0x1c5c   : > { %v4740_v51 = vsel %vm4739_vm1, %v6955_v0, %v4736_v49 }
0x1c5d   : > { %v4741_v54 = vmul.f32 %v4740_v51, %v4724_v24 }
0x1c5f   : > { %v4745_v56 = vmul.f32 %v6854_v50, %v4741_v54 }
0x1c61   : > { %v4749_v59 = vadd.f32 %v6855_v36, %v4745_v56 }
0x1c63   : > { %v4750_v60 = vpack.c.bf16 %v4749_v59, %v4749_v59 }
0x1c65   : > { %6423 = vmatmul.msk.bf16.vlgmr.msra.gmra.mxu0 %vm2862_vm0, %v4750_v60 }
0x1ce2   : > { %v4768_v53 = vpop.f32.mrf.mxu0 }
0x1ce3   : > { %v4769_v4 = vadd.f32 %v6856_v3, %v4768_v53  ;;  %v2784_v3 = vld [vmem:[%s10091_s21] sm:$0xff]  ;;  %v2785_v53 = vld [vmem:[%s10091_s21 + $0x8] sm:$0xff] }
0x1ce5   : > { %v4772_v5 = vmax.f32 %v4769_v4, 0.0 }
0x1ce7   : > { %v4773_v57 = vpack.c.bf16 %v4772_v5, %v4772_v5  ;;  %v5259_v5 = vpack.c.bf16 %v2785_v53, %v2784_v3 }
0x1ce9   : > { %6424 = vmatmul.msk.bf16.vlgmr.msrb.gmra.mxu2 %vm3344_vm15, %v4773_v57 }
0x1cea   : > { %v4770_v9 = vpop.f32.mrf.mxu0 }
0x1d6c   : > { %v4793_v10 = vpop.f32.mrf.mxu2 }
0x1d6d   : > { %v4794_v6 = vadd.f32 %v6857_v25, %v4793_v10 }
0x1d6f   : > { %v9583_v11 = vadd.f32 %v4794_v6, %v9556_v18  ;;  %v2777_v18 = vld [vmem:[%s10090_s20] sm:$0xff] }
0x1d70   : > { %v4829_v23 = vpack.c.bf16 %v2778_v21, %v2777_v18 }
0x1d71   : > { %v4798_v55 = vsel %vm2862_vm0, %v9583_v11, 0.0 }
0x1d72   : > { %4799 = vadd.xlane.f32.xlu2 %v4798_v55  ;;  %4844 = vmatpush.bf16.msra.mxu1 %v4829_v23 }
0x1d74   : > { %v4795_v12 = vpop.f32.mrf.mxu2 }
0x1de5   : > { %v4800_v13 = vpop.xlane.xlu2 %4799 }
0x1de6   : > { %v4801_v38 = vmul.f32 %v4800_v13, %v9101_v8 }
0x1de8   : > { %v4802_v14 = vsub.f32 %v9583_v11, %v4801_v38 }
0x1dea   : > { %v4803_v15 = vmul.f32 %v4802_v14, %v4802_v14 }
0x1dec   : > { %v4804_v16 = vsel %vm2862_vm0, %v4803_v15, 0.0 }
0x1ded   : > { %4805 = vadd.xlane.f32.xlu0 %v4804_v16 }
0x1e60   : > { %v4806_v24 = vpop.xlane.xlu0 %4805 }
0x1e61   : > { %v4807_v28 = vmul.f32 %v4806_v24, %v9101_v8 }
0x1e63   : > { %v4808_v26 = vadd.f32 1e-05, %v4807_v28 }
0x1e65   : > { %6956 = vrsqrt.f32 %v4808_v26  ;;  %vm4815_vm4 = vweird.f32 %v4808_v26 }
0x1e6b   : > { %v6957_v44 = vpop.eup %6956 }
0x1e6c   : > { %v4810_v63 = vmul.f32 %v6957_v44, %v4808_v26  ;;  %vm4816_vm2 = vweird.f32 %v6957_v44 }
0x1e6d   : > { %vm4817_vm7 = vmor %vm4815_vm4, %vm4816_vm2 }
0x1e6e   : > { %v4811_v27 = vmul.f32 %v6957_v44, %v4810_v63 }
0x1e70   : > { %v4812_v30 = vmul.f32 0.5, %v4811_v27 }
0x1e72   : > { %v4813_v31 = vsub.f32 1.5, %v4812_v30 }
0x1e74   : > { %v4814_v32 = vmul.f32 %v6957_v44, %v4813_v31 }
0x1e76   : > { %v4818_v52 = vsel %vm4817_vm7, %v6957_v44, %v4814_v32 }
0x1e77   : > { %v4819_v22 = vmul.f32 %v4818_v52, %v4802_v14 }
0x1e79   : > { %v4823_v35 = vmul.f32 %v6858_v33, %v4819_v22 }
0x1e7b   : > { %v4827_v37 = vadd.f32 %v6859_v34, %v4823_v35 }
0x1e7d   : > { %v4828_v39 = vpack.c.bf16 %v4827_v37, %v4827_v37 }
0x1e7f   : > { %6425 = vmatmul.msk.bf16.vlgmr.msra.gmra.mxu1 %vm2862_vm0, %v4828_v39 }
0x1efc   : > { %v4846_v41 = vpop.f32.mrf.mxu1 }
0x1efd   : > { %v9596_v0 = vadd.f32 %v6860_v40, %v4846_v41 }
0x1eff   : > { %4903 = vrot.lane.b32.xlu0 %v9596_v0, %s10073_s6  ;;  %4851 = vrot.lane.b32.xlu2 %v9596_v0, %s10068_s4 }
0x1f04   : > { %v4848_v7 = vpop.f32.mrf.mxu1 }
0x1f07   : > { %4929 = vrot.lane.b32.xlu2 %v9596_v0, %s10071_s13 }
0x1f0f   : > { %5011 = vrot.lane.b32.xlu2 %v9596_v0, %s10074_s1 }
0x1f17   : > { %5089 = vrot.lane.b32.xlu2 %v9596_v0, %s10051_s0 }
0x1f59   : > { %v4852_v46 = vpop.permute.xlu2 %4851 }
0x1f5a   : > { %6426 = vmatpush.xpose.msk.msra.mxu3 %vm2925_vm5, %v4852_v46 }
0x1f5d   : > { %6427 = vmatmul.msk.f32.vlgmr.msra.gmra.mxu3 %vm2925_vm5, %v9596_v0 }
0x1f61   : > { %v4930_v47 = vpop.permute.xlu2 %4929 }
0x1f69   : > { %v5012_v49 = vpop.permute.xlu2 %5011 }
0x1f71   : > { %v4904_v48 = vpop.permute.xlu0 %4903  ;;  %v5090_v57 = vpop.permute.xlu2 %5089 }
0x1f72   : > { %4924 = vmatpush.msrb.mxu0 %v4904_v48 }
0x1f74   : > { %6432 = vmatpush.xpose.msk.msra.mxu0 %vm2925_vm5, %v5012_v49 }
0x1fe0   : > { %v4874_v50 = vpop.f32.mrf.mxu3 }
0x1fe1   : > { %v4877_v51 = vmul.f32 0.35355338, %v4874_v50 }
0x1fe3   : > { %v4878_v54 = vsel %vm3960_vm3, %v4877_v51, -1e+09 }
0x1fe4   : > { %v4879_v36 = vsel %vm2925_vm5, %v4878_v54, -inf }
0x1fe5   : > { %4880 = vmax.xlane.f32.xlu1 %v4879_v36 }
0x1ffe   : > { %4931 = vrot.lane.b32.xlu1 %v9596_v0, %s10070_s12 }
0x2006   : > { %5091 = vrot.lane.b32.xlu1 %v9596_v0, %s10049_s18 }
0x2058   : > { %v4881_v56 = vpop.xlane.xlu1 %4880 }
0x2059   : > { %v4882_v59 = vsub.f32 %v4878_v54, %v4881_v56 }
0x205b   : > { %v4883_v60 = vmul.f32 1.442695, %v4882_v59 }
0x205d   : > { %6958 = vpow2.f32 %v4883_v60 }
0x2063   : > { %v6959_v61 = vpop.eup %6958 }
0x2064   : > { %v4885_v58 = vsel %vm2925_vm5, %v6959_v61, 0.0 }
0x2065   : > { %4886 = vadd.xlane.f32.xlu0 %v4885_v58 }
0x2070   : > { %v4932_v62 = vpop.permute.xlu1 %4931 }
0x2071   : > { %6429 = vmatpush.xpose.msk.msrb.mxu1 %vm2925_vm5, %v4932_v62 }
0x2074   : > { %6430 = vmatmul.msk.f32.vlgmr.msrb.gmra.mxu1 %vm2925_vm5, %v4930_v47 }
0x2078   : > { %v5092_v4 = vpop.permute.xlu1 %5091 }
0x2079   : > { %5009 = vrot.lane.b32.xlu0 %v9596_v0, %s10050_s7  ;;  %6435 = vmatpush.xpose.msk.msra.mxu1 %vm2925_vm5, %v5092_v4 }
0x207c   : > { %6436 = vmatmul.msk.f32.vlgmr.msra.gmra.mxu1 %vm2925_vm5, %v5090_v57  ;;  %v6861_v57 = vld [vmem:[#allocation22] ss:$0 sm:$0xff] }
0x207d   : > { %5270 = vmatpush.bf16.msrb.mxu1 %v5260_v42 }
0x2081   : > { %5271 = vmatpush.bf16.msrb.mxu1 %v5259_v5 }
0x2084   : > { %6440 = vmatmul.msk.bf16.vlgmr.msrb.gmra.mxu1 %vm2862_vm0, %v9462_v43 }
0x20d8   : > { %v4887_v9 = vpop.xlane.xlu0 %4886 }
0x20d9   : > { %6960 = vrcp.f32 %v4887_v9  ;;  %v4899_v55 = vand.u32 2147483648, %v4887_v9  ;;  %v4897_v13 = vand.u32 2147483647, %v4887_v9  ;;  %vm4893_vm9 = vweird.f32 %v4887_v9 }
0x20db   : > { %v4900_v14 = vor.u32 1.1754944e-38, %v4899_v55  ;;  %vm4898_vm14 = vcmp.eq.f32.partialorder %v4897_v13, 8.507059e+37 }
0x20df   : > { %v6961_v25 = vpop.eup %6960 }
0x20e0   : > { %v4889_v10 = vmul.f32 %v6961_v25, %v4887_v9  ;;  %vm4894_vm8 = vweird.f32 %v6961_v25 }
0x20e1   : > { %vm4895_vm12 = vmor %vm4893_vm9, %vm4894_vm8 }
0x20e2   : > { %v4890_v6 = vsub.f32 1.0, %v4889_v10 }
0x20e4   : > { %v4891_v12 = vmul.f32 %v6961_v25, %v4890_v6 }
0x20e6   : > { %v4892_v38 = vadd.f32 %v6961_v25, %v4891_v12 }
0x20e8   : > { %v4896_v15 = vsel %vm4895_vm12, %v6961_v25, %v4892_v38 }
0x20e9   : > { %v4901_v16 = vsel %vm4898_vm14, %v4900_v14, %v4896_v15 }
0x20ea   : > { %v4902_v17 = vmul.f32 %v6959_v61, %v4901_v16 }
0x20eb   : > { %v5010_v20 = vpop.permute.xlu0 %5009 }
0x20ec   : > { %6428 = vmatmul.msk.f32.vlgmr.msrb.gmra.mxu0 %vm2925_vm5, %v4902_v17 }
0x20f1   : > { %v4954_v43 = vpop.f32.mrf.mxu1 }
0x20f2   : > { %v4957_v19 = vmul.f32 0.35355338, %v4954_v43 }
0x20f4   : > { %6433 = vmatmul.msk.f32.vlgmr.msra.gmra.mxu0 %vm2925_vm5, %v5010_v20  ;;  %v4958_v18 = vsel %vm3960_vm3, %v4957_v19, -1e+09 }
0x20f5   : > { %v4959_v21 = vsel %vm2925_vm5, %v4958_v18, -inf }
0x20f6   : > { %4960 = vmax.xlane.f32.xlu1 %v4959_v21 }
0x20f9   : > { %v5114_v23 = vpop.f32.mrf.mxu1 }
0x20fa   : > { %v5117_v24 = vmul.f32 0.35355338, %v5114_v23 }
0x20fc   : > { %v5118_v28 = vsel %vm3960_vm3, %v5117_v24, -1e+09 }
0x20fd   : > { %v5119_v26 = vsel %vm2925_vm5, %v5118_v28, -inf }
0x20fe   : > { %5120 = vmax.xlane.f32.xlu2 %v5119_v26 }
0x2101   : > { %v9640_v44 = vpop.f32.mrf.mxu1 }
0x2102   : > { %v9655_v12 = vadd.f32 %v6861_v57, %v9640_v44 }
0x2109   : > { %v5275_v63 = vpop.f32.mrf.mxu1 }
0x2169   : > { %v9642_v27 = vpop.f32.mrf.mxu0  ;;  %v4961_v30 = vpop.xlane.xlu1 %4960 }
0x216a   : > { %v4962_v31 = vsub.f32 %v4958_v18, %v4961_v30 }
0x216c   : > { %v4963_v32 = vmul.f32 1.442695, %v4962_v31 }
0x216e   : > { %6962 = vpow2.f32 %v4963_v32 }
0x2171   : > { %v5034_v33 = vpop.f32.mrf.mxu0  ;;  %v5121_v52 = vpop.xlane.xlu2 %5120 }
0x2172   : > { %v5037_v22 = vmul.f32 0.35355338, %v5034_v33  ;;  %v5122_v34 = vsub.f32 %v5118_v28, %v5121_v52 }
0x2174   : > { %v6963_v35 = vpop.eup %6962  ;;  %v5123_v37 = vmul.f32 1.442695, %v5122_v34  ;;  %v5038_v39 = vsel %vm3960_vm3, %v5037_v22, -1e+09 }
0x2175   : > { %v4965_v40 = vsel %vm2925_vm5, %v6963_v35, 0.0  ;;  %v5039_v41 = vsel %vm2925_vm5, %v5038_v39, -inf }
0x2176   : > { %6964 = vpow2.f32 %v5123_v37  ;;  %4966 = vadd.xlane.f32.xlu1 %v4965_v40  ;;  %5040 = vmax.xlane.f32.xlu0 %v5039_v41 }
0x217c   : > { %v6965_v7 = vpop.eup %6964 }
0x217d   : > { %v5125_v46 = vsel %vm2925_vm5, %v6965_v7, 0.0 }
0x217e   : > { %5126 = vadd.xlane.f32.xlu2 %v5125_v46 }
0x218f   : > { %4983 = vrot.lane.b32.xlu1 %v9596_v0, %s10053_s16  ;;  %s10093_s16 = sld [smem:[#allocation119_spill]] }
0x2196   : > { %5143 = vrot.lane.b32.xlu2 %v9596_v0, %s10055_s3  ;;  %s10092_s3 = sld [smem:[#allocation112_spill]] }
0x219c   : > { %v2775_v32 = vld [vmem:[%s10092_s3 + $0x10] sm:$0xff]  ;;  %v2776_v33 = vld [vmem:[%s10092_s3 + $0x18] sm:$0xff]  ;;  %v2773_v52 = vld [vmem:[%s10092_s3] sm:$0xff] }
0x219d   : > { %v5186_v22 = vpack.c.bf16 %v2776_v33, %v2775_v32  ;;  %v2774_v34 = vld [vmem:[%s10092_s3 + $0x8] sm:$0xff] }
0x219f   : > { %5199 = vmatpush.bf16.msrb.mxu0 %v5186_v22 }
0x21e9   : > { %v4967_v47 = vpop.xlane.xlu1 %4966  ;;  %v5041_v29 = vpop.xlane.xlu0 %5040 }
0x21ea   : > { %6966 = vrcp.f32 %v4967_v47  ;;  %v5042_v48 = vsub.f32 %v5038_v39, %v5041_v29  ;;  %v4979_v62 = vand.u32 2147483648, %v4967_v47  ;;  %vm4973_vm13 = vweird.f32 %v4967_v47 }
0x21eb   : > { %v4977_v1 = vand.u32 2147483647, %v4967_v47 }
0x21ec   : > { %v5043_v49 = vmul.f32 1.442695, %v5042_v48  ;;  %v4980_v53 = vor.u32 1.1754944e-38, %v4979_v62 }
0x21ed   : > { %vm4978_vm2 = vcmp.eq.f32.partialorder %v4977_v1, 8.507059e+37 }
0x21ee   : > { %6968 = vpow2.f32 %v5043_v49 }
0x21f0   : > { %v6967_v50 = vpop.eup %6966 }
0x21f1   : > { %v4969_v51 = vmul.f32 %v6967_v50, %v4967_v47  ;;  %v5127_v54 = vpop.xlane.xlu2 %5126  ;;  %vm4974_vm3 = vweird.f32 %v6967_v50 }
0x21f2   : > { %6970 = vrcp.f32 %v5127_v54  ;;  %vm4975_vm1 = vmor %vm4973_vm13, %vm4974_vm3  ;;  %v5139_v25 = vand.u32 2147483648, %v5127_v54  ;;  %vm5133_vm7 = vweird.f32 %v5127_v54  ;;  %v5137_v10 = vand.u32 2147483647, %v5127_v54 }
0x21f3   : > { %v4970_v36 = vsub.f32 1.0, %v4969_v51  ;;  %v6862_v51 = vld [vmem:[#allocation19] ss:$0 sm:$0xff] }
0x21f4   : > { %v6969_v56 = vpop.eup %6968  ;;  %v5140_v14 = vor.u32 1.1754944e-38, %v5139_v25  ;;  %vm5138_vm9 = vcmp.eq.f32.partialorder %v5137_v10, 8.507059e+37 }
0x21f5   : > { %v4971_v59 = vmul.f32 %v6967_v50, %v4970_v36  ;;  %v5045_v60 = vsel %vm2925_vm5, %v6969_v56, 0.0 }
0x21f6   : > { %5046 = vadd.xlane.f32.xlu0 %v5045_v60 }
0x21f7   : > { %v4972_v61 = vadd.f32 %v6967_v50, %v4971_v59 }
0x21f8   : > { %v6971_v58 = vpop.eup %6970 }
0x21f9   : > { %v5129_v2 = vmul.f32 %v6971_v58, %v5127_v54  ;;  %v4976_v42 = vsel %vm4975_vm1, %v6967_v50, %v4972_v61  ;;  %vm5134_vm4 = vweird.f32 %v6971_v58  ;;  %v5144_v38 = vpop.permute.xlu2 %5143 }
0x21fa   : > { %v4981_v5 = vsel %vm4978_vm2, %v4980_v53, %v4976_v42  ;;  %vm5135_vm8 = vmor %vm5133_vm7, %vm5134_vm4 }
0x21fb   : > { %v5130_v3 = vsub.f32 1.0, %v5129_v2  ;;  %v4982_v55 = vmul.f32 %v6963_v35, %v4981_v5  ;;  %v5185_v35 = vpack.c.bf16 %v2774_v34, %v2773_v52  ;;  %v2794_v2 = vld [vmem:[%s10093_s16 + $0x10] sm:$0xff] }
0x21fd   : > { %v5131_v4 = vmul.f32 %v6971_v58, %v5130_v3  ;;  %5200 = vmatpush.bf16.msrb.mxu0 %v5185_v35 }
0x21ff   : > { %v5132_v9 = vadd.f32 %v6971_v58, %v5131_v4 }
0x2201   : > { %v4984_v6 = vpop.permute.xlu1 %4983  ;;  %v5136_v13 = vsel %vm5135_vm8, %v6971_v58, %v5132_v9 }
0x2202   : > { %5004 = vmatpush.msrb.mxu3 %v4984_v6  ;;  %v5141_v15 = vsel %vm5138_vm9, %v5140_v14, %v5136_v13  ;;  %v6863_v14 = vld [vmem:[#allocation14] ss:$0 sm:$0xff] }
0x2203   : > { %6431 = vmatmul.msk.f32.vlgmr.msrb.gmra.mxu3 %vm2925_vm5, %v4982_v55  ;;  %v5142_v16 = vmul.f32 %v6965_v7, %v5141_v15 }
0x2204   : > { %5164 = vmatpush.msra.mxu3 %v5144_v38 }
0x2206   : > { %6441 = vmatpush.xpose.msk.msrb.mxu3 %vm2925_vm5, %v9655_v12 }
0x220a   : > { %5063 = vrot.lane.b32.xlu0 %v9596_v0, %s10054_s11  ;;  %s10094_s11 = smov %s10093_s16 }
0x220b   : > { %6437 = vmatmul.msk.f32.vlgmr.msra.gmra.mxu3 %vm2925_vm5, %v5142_v16  ;;  %v2795_v42 = vld [vmem:[%s10094_s11 + $0x18] sm:$0xff]  ;;  %v2793_v53 = vld [vmem:[%s10094_s11 + $0x8] sm:$0xff] }
0x220c   : > { %v5239_v3 = vpack.c.bf16 %v2795_v42, %v2794_v2 }
0x2269   : > { %v5047_v17 = vpop.xlane.xlu0 %5046 }
0x226a   : > { %6972 = vrcp.f32 %v5047_v17  ;;  %v5059_v18 = vand.u32 2147483648, %v5047_v17  ;;  %v5057_v23 = vand.u32 2147483647, %v5047_v17  ;;  %vm5053_vm14 = vweird.f32 %v5047_v17 }
0x226c   : > { %v5060_v28 = vor.u32 1.1754944e-38, %v5059_v18  ;;  %vm5058_vm13 = vcmp.eq.f32.partialorder %v5057_v23, 8.507059e+37  ;;  %v6865_v18 = vld [vmem:[#allocation25] ss:$0 sm:$0xff] }
0x2270   : > { %v6973_v43 = vpop.eup %6972 }
0x2271   : > { %v5049_v19 = vmul.f32 %v6973_v43, %v5047_v17  ;;  %vm5054_vm12 = vweird.f32 %v6973_v43  ;;  %v6864_v17 = vld [vmem:[#allocation13] ss:$0 sm:$0xff] }
0x2272   : > { %vm5055_vm3 = vmor %vm5053_vm14, %vm5054_vm12 }
0x2273   : > { %v5050_v20 = vsub.f32 1.0, %v5049_v19 }
0x2275   : > { %v5051_v21 = vmul.f32 %v6973_v43, %v5050_v20 }
0x2277   : > { %v5052_v24 = vadd.f32 %v6973_v43, %v5051_v21 }
0x2279   : > { %v5056_v26 = vsel %vm5055_vm3, %v6973_v43, %v5052_v24 }
0x227a   : > { %v5061_v0 = vsel %vm5058_vm13, %v5060_v28, %v5056_v26 }
0x227b   : > { %v5062_v44 = vmul.f32 %v6969_v56, %v5061_v0 }
0x227c   : > { %v5064_v63 = vpop.permute.xlu0 %5063 }
0x227d   : > { %5084 = vmatpush.msra.mxu2 %v5064_v63 }
0x227e   : > { %6434 = vmatmul.msk.f32.vlgmr.msra.gmra.mxu2 %vm2925_vm5, %v5062_v44 }
0x227f   : > { %5252 = vmatpush.bf16.msrb.mxu2 %v5239_v3 }
0x2286   : > { %v5006_v30 = vpop.f32.mrf.mxu3 }
0x2287   : > { %5170 = vrot.lane.b32.xlu0 %v5006_v30, %s10065_s2 }
0x228e   : > { %v5166_v31 = vpop.f32.mrf.mxu3 }
0x228f   : > { %5178 = vrot.lane.b32.xlu0 %v5166_v31, %s10067_s10 }
0x2297   : > { %5357 = vrot.lane.b32.xlu0 %v9655_v12, %s10071_s13 }
0x229f   : > { %5437 = vrot.lane.b32.xlu0 %v9655_v12, %s10050_s7 }
0x22a7   : > { %5517 = vrot.lane.b32.xlu0 %v9655_v12, %s10051_s0 }
0x22f9   : > { %v5171_v37 = vpop.permute.xlu0 %5170 }
0x22fa   : > { %v5181_v46 = vsel %vm2925_vm5, %v9642_v27, %v5171_v37 }
0x2301   : > { %v5179_v39 = vpop.permute.xlu0 %5178  ;;  %v5086_v40 = vpop.f32.mrf.mxu2 }
0x2302   : > { %5174 = vrot.lane.b32.xlu1 %v5086_v40, %s10066_s9 }
0x2309   : > { %v5358_v41 = vpop.permute.xlu0 %5357 }
0x230a   : > { %6444 = vmatpush.xpose.msk.msra.mxu0 %vm2925_vm5, %v5358_v41 }
0x2311   : > { %v5438_v7 = vpop.permute.xlu0 %5437 }
0x2312   : > { %6447 = vmatpush.xpose.msk.msra.mxu1 %vm2925_vm5, %v5438_v7 }
0x2319   : > { %v5518_v50 = vpop.permute.xlu0 %5517 }
0x2374   : > { %v5175_v47 = vpop.permute.xlu1 %5174 }
0x2375   : > { %v5182_v29 = vsel %vm3256_vm10, %v5181_v46, %v5175_v47 }
0x2376   : > { %v5183_v48 = vsel %vm3258_vm11, %v5182_v29, %v5179_v39 }
0x2377   : > { %v5184_v49 = vpack.c.bf16 %v5183_v48, %v5183_v48 }
0x2379   : > { %6438 = vmatmul.msk.bf16.vlgmr.msrb.gmra.mxu0 %vm2862_vm0, %v5184_v49 }
0x237a   : > { %6450 = vmatpush.xpose.msk.msrb.mxu0 %vm2925_vm5, %v5518_v50 }
0x23f6   : > { %v5202_v54 = vpop.f32.mrf.mxu0 }
0x23f7   : > { %v5203_v36 = vadd.f32 %v6862_v51, %v5202_v54 }
0x23f9   : > { %v9686_v27 = vadd.f32 %v5203_v36, %v9583_v11  ;;  %v2792_v11 = vld [vmem:[%s10094_s11] sm:$0xff] }
0x23fa   : > { %v5238_v4 = vpack.c.bf16 %v2793_v53, %v2792_v11 }
0x23fb   : > { %v5207_v56 = vsel %vm2862_vm0, %v9686_v27, 0.0 }
0x23fc   : > { %5208 = vadd.xlane.f32.xlu2 %v5207_v56  ;;  %5253 = vmatpush.bf16.msrb.mxu2 %v5238_v4 }
0x23fe   : > { %v5204_v59 = vpop.f32.mrf.mxu0 }
0x246f   : > { %v5209_v60 = vpop.xlane.xlu2 %5208 }
0x2470   : > { %v5210_v61 = vmul.f32 %v5209_v60, %v9101_v8 }
0x2472   : > { %v5211_v58 = vsub.f32 %v9686_v27, %v5210_v61 }
0x2474   : > { %v5212_v62 = vmul.f32 %v5211_v58, %v5211_v58 }
0x2476   : > { %v5213_v1 = vsel %vm2862_vm0, %v5212_v62, 0.0 }
0x2477   : > { %5214 = vadd.xlane.f32.xlu1 %v5213_v1 }
0x24ea   : > { %v5215_v5 = vpop.xlane.xlu1 %5214 }
0x24eb   : > { %v5216_v57 = vmul.f32 %v5215_v5, %v9101_v8 }
0x24ed   : > { %v5217_v9 = vadd.f32 1e-05, %v5216_v57 }
0x24ef   : > { %6974 = vrsqrt.f32 %v5217_v9  ;;  %vm5224_vm2 = vweird.f32 %v5217_v9 }
0x24f5   : > { %v6975_v25 = vpop.eup %6974 }
0x24f6   : > { %v5219_v10 = vmul.f32 %v6975_v25, %v5217_v9  ;;  %vm5225_vm1 = vweird.f32 %v6975_v25 }
0x24f7   : > { %vm5226_vm4 = vmor %vm5224_vm2, %vm5225_vm1 }
0x24f8   : > { %v5220_v6 = vmul.f32 %v6975_v25, %v5219_v10 }
0x24fa   : > { %v5221_v55 = vmul.f32 0.5, %v5220_v6 }
0x24fc   : > { %v5222_v13 = vsub.f32 1.5, %v5221_v55 }
0x24fe   : > { %v5223_v38 = vmul.f32 %v6975_v25, %v5222_v13 }
0x2500   : > { %v5227_v15 = vsel %vm5226_vm4, %v6975_v25, %v5223_v38 }
0x2501   : > { %v5228_v16 = vmul.f32 %v5227_v15, %v5211_v58 }
0x2503   : > { %v5232_v43 = vmul.f32 %v6863_v14, %v5228_v16 }
0x2505   : > { %v5236_v19 = vadd.f32 %v6864_v17, %v5232_v43 }
0x2507   : > { %v5237_v20 = vpack.c.bf16 %v5236_v19, %v5236_v19 }
0x2509   : > { %6439 = vmatmul.msk.bf16.vlgmr.msrb.gmra.mxu2 %vm2862_vm0, %v5237_v20 }
0x258c   : > { %v5255_v21 = vpop.f32.mrf.mxu2 }
0x258d   : > { %v5256_v23 = vadd.f32 %v6865_v18, %v5255_v21 }
0x258f   : > { %5515 = vrot.lane.b32.xlu2 %v5256_v23, %s10051_s0  ;;  %5355 = vrot.lane.b32.xlu0 %v5256_v23, %s10071_s13  ;;  %s10095_s13 = sld [smem:[#allocation118_spill]] }
0x2590   : > { %6442 = vmatmul.msk.f32.vlgmr.msrb.gmra.mxu3 %vm2925_vm5, %v5256_v23  ;;  %s10098_s0 = sld [smem:[#allocation80_spill]] }
0x2594   : > { %v5257_v24 = vpop.f32.mrf.mxu2 }
0x2597   : > { %5435 = vrot.lane.b32.xlu0 %v5256_v23, %s10050_s7  ;;  %s10099_s7 = sld [smem:[#allocation79_spill]] }
0x25e9   : > { %v5516_v26 = vpop.permute.xlu2 %5515 }
0x2601   : > { %v5356_v28 = vpop.permute.xlu0 %5355 }
0x2602   : > { %6445 = vmatmul.msk.f32.vlgmr.msra.gmra.mxu0 %vm2925_vm5, %v5356_v28 }
0x2609   : > { %v5436_v0 = vpop.permute.xlu0 %5435 }
0x260a   : > { %6448 = vmatmul.msk.f32.vlgmr.msra.gmra.mxu1 %vm2925_vm5, %v5436_v0  ;;  %6451 = vmatmul.msk.f32.vlgmr.msrb.gmra.mxu0 %vm2925_vm5, %v5516_v26 }
0x2613   : > { %v5300_v44 = vpop.f32.mrf.mxu3 }
0x2614   : > { %v5303_v63 = vmul.f32 0.35355338, %v5300_v44 }
0x2616   : > { %v5304_v30 = vsel %vm2951_vm6, %v5303_v63, -1e+09 }
0x2617   : > { %v5305_v31 = vsel %vm2925_vm5, %v5304_v30, -inf }
0x2618   : > { %5306 = vmax.xlane.f32.xlu1 %v5305_v31 }
0x267f   : > { %v5380_v32 = vpop.f32.mrf.mxu0 }
0x2680   : > { %v5383_v33 = vmul.f32 0.35355338, %v5380_v32 }
0x2682   : > { %v5384_v52 = vsel %vm2951_vm6, %v5383_v33, -1e+09 }
0x2683   : > { %v5385_v22 = vsel %vm2925_vm5, %v5384_v52, -inf }
0x2684   : > { %5386 = vmax.xlane.f32.xlu0 %v5385_v22 }
0x2687   : > { %v5460_v34 = vpop.f32.mrf.mxu1  ;;  %v5540_v37 = vpop.f32.mrf.mxu0 }
0x2688   : > { %v5463_v35 = vmul.f32 0.35355338, %v5460_v34  ;;  %v5543_v7 = vmul.f32 0.35355338, %v5540_v37 }
0x268a   : > { %v5464_v39 = vsel %vm2951_vm6, %v5463_v35, -1e+09  ;;  %v5544_v29 = vsel %vm2951_vm6, %v5543_v7, -1e+09 }
0x268b   : > { %v5307_v40 = vpop.xlane.xlu1 %5306  ;;  %v5465_v41 = vsel %vm2925_vm5, %v5464_v39, -inf  ;;  %v5545_v48 = vsel %vm2925_vm5, %v5544_v29, -inf }
0x268c   : > { %v5308_v46 = vsub.f32 %v5304_v30, %v5307_v40  ;;  %5466 = vmax.xlane.f32.xlu1 %v5465_v41 }
0x268e   : > { %v5309_v47 = vmul.f32 1.442695, %v5308_v46 }
0x2690   : > { %6976 = vpow2.f32 %v5309_v47 }
0x2694   : > { %5546 = vmax.xlane.f32.xlu1 %v5545_v48 }
0x2696   : > { %v6977_v49 = vpop.eup %6976 }
0x2697   : > { %v5311_v50 = vsel %vm2925_vm5, %v6977_v49, 0.0 }
0x2698   : > { %5312 = vadd.xlane.f32.xlu2 %v5311_v50  ;;  %5329 = vrot.lane.b32.xlu0 %v9655_v12, %s10068_s4 }
0x26a0   : > { %5569 = vrot.lane.b32.xlu0 %v9655_v12, %s10049_s18 }
0x26b0   : > { %5489 = vrot.lane.b32.xlu2 %v9655_v12, %s10074_s1 }
0x26f7   : > { %v5387_v51 = vpop.xlane.xlu0 %5386 }
0x26f8   : > { %v5388_v54 = vsub.f32 %v5384_v52, %v5387_v51 }
0x26fa   : > { %v5389_v45 = vmul.f32 1.442695, %v5388_v54 }
0x26fc   : > { %6978 = vpow2.f32 %v5389_v45 }
0x26ff   : > { %v5467_v36 = vpop.xlane.xlu1 %5466 }
0x2700   : > { %v5468_v56 = vsub.f32 %v5464_v39, %v5467_v36 }
0x2702   : > { %v9725_v59 = vpop.eup %6978  ;;  %v5469_v60 = vmul.f32 1.442695, %v5468_v56 }
0x2703   : > { %v5391_v61 = vsel %vm2925_vm5, %v9725_v59, 0.0 }
0x2704   : > { %6980 = vpow2.f32 %v5469_v60  ;;  %5392 = vadd.xlane.f32.xlu1 %v5391_v61 }
0x2707   : > { %v5547_v58 = vpop.xlane.xlu1 %5546 }
0x2708   : > { %v5548_v62 = vsub.f32 %v5544_v29, %v5547_v58 }
0x270a   : > { %v6981_v1 = vpop.eup %6980  ;;  %v5549_v2 = vmul.f32 1.442695, %v5548_v62  ;;  %v5330_v42 = vpop.permute.xlu0 %5329  ;;  %v2790_v62 = vld [vmem:[%s10095_s13 + $0x10] sm:$0xff] }
0x270b   : > { %v5313_v3 = vpop.xlane.xlu2 %5312  ;;  %5350 = vmatpush.msra.mxu3 %v5330_v42  ;;  %v5471_v11 = vsel %vm2925_vm5, %v6981_v1, 0.0  ;;  %v2788_v42 = vld [vmem:[%s10095_s13] sm:$0xff] }
0x270c   : > { %6982 = vpow2.f32 %v5549_v2  ;;  %5472 = vadd.xlane.f32.xlu1 %v5471_v11  ;;  %v5325_v10 = vand.u32 2147483648, %v5313_v3  ;;  %v5323_v55 = vand.u32 2147483647, %v5313_v3  ;;  %vm5319_vm7 = vweird.f32 %v5313_v3 }
0x270d   : > { %6984 = vrcp.f32 %v5313_v3 }
0x270e   : > { %v5326_v38 = vor.u32 1.1754944e-38, %v5325_v10  ;;  %vm5324_vm9 = vcmp.eq.f32.partialorder %v5323_v55, 8.507059e+37 }
0x2712   : > { %v9730_v53 = vpop.eup %6982  ;;  %v5570_v51 = vpop.permute.xlu0 %5569 }
0x2713   : > { %v6985_v4 = vpop.eup %6984  ;;  %v5490_v5 = vpop.permute.xlu2 %5489  ;;  %v5551_v57 = vsel %vm2925_vm5, %v9730_v53, 0.0 }
0x2714   : > { %v5315_v9 = vmul.f32 %v6985_v4, %v5313_v3  ;;  %5510 = vmatpush.msrb.mxu3 %v5490_v5  ;;  %5552 = vadd.xlane.f32.xlu1 %v5551_v57  ;;  %vm5320_vm6 = vweird.f32 %v6985_v4  ;;  %v2789_v3 = vld [vmem:[%s10095_s13 + $0x8] sm:$0xff] }
0x2715   : > { %vm5321_vm8 = vmor %vm5319_vm7, %vm5320_vm6  ;;  %v5611_v11 = vpack.c.bf16 %v2789_v3, %v2788_v42 }
0x2716   : > { %v5316_v25 = vsub.f32 1.0, %v5315_v9 }
0x2718   : > { %v5317_v6 = vmul.f32 %v6985_v4, %v5316_v25 }
0x271a   : > { %v5318_v13 = vadd.f32 %v6985_v4, %v5317_v6  ;;  %v6866_v6 = vld [vmem:[#allocation23] ss:$0 sm:$0xff] }
0x271c   : > { %v5322_v14 = vsel %vm5321_vm8, %v6985_v4, %v5318_v13 }
0x271d   : > { %v5327_v15 = vsel %vm5324_vm9, %v5326_v38, %v5322_v14 }
0x271e   : > { %v5328_v16 = vmul.f32 %v6977_v49, %v5327_v15 }
0x2720   : > { %6443 = vmatmul.msk.f32.vlgmr.msra.gmra.mxu3 %vm2925_vm5, %v5328_v16 }
0x272d   : > { %5409 = vrot.lane.b32.xlu1 %v9655_v12, %s10070_s12  ;;  %s10096_s12 = sld [smem:[#allocation103_spill]] }
0x2777   : > { %v5393_v17 = vpop.xlane.xlu1 %5392 }
0x2778   : > { %6986 = vrcp.f32 %v5393_v17  ;;  %v5405_v37 = vand.u32 2147483648, %v5393_v17  ;;  %vm5399_vm2 = vweird.f32 %v5393_v17  ;;  %v5403_v39 = vand.u32 2147483647, %v5393_v17 }
0x277a   : > { %v5406_v7 = vor.u32 1.1754944e-38, %v5405_v37  ;;  %vm5404_vm6 = vcmp.eq.f32.partialorder %v5403_v39, 8.507059e+37 }
0x277e   : > { %v6987_v19 = vpop.eup %6986 }
0x277f   : > { %v5473_v43 = vpop.xlane.xlu1 %5472  ;;  %v5395_v23 = vmul.f32 %v6987_v19, %v5393_v17  ;;  %vm5400_vm1 = vweird.f32 %v6987_v19 }
0x2780   : > { %6988 = vrcp.f32 %v5473_v43  ;;  %v5485_v28 = vand.u32 2147483648, %v5473_v43  ;;  %v5483_v0 = vand.u32 2147483647, %v5473_v43  ;;  %vm5479_vm14 = vweird.f32 %v5473_v43  ;;  %vm5401_vm4 = vmor %vm5399_vm2, %vm5400_vm1 }
0x2781   : > { %v5396_v44 = vsub.f32 1.0, %v5395_v23  ;;  %v2753_v23 = vld [vmem:[%s10096_s12] sm:$0xff] }
0x2782   : > { %v5486_v12 = vor.u32 1.1754944e-38, %v5485_v28  ;;  %vm5484_vm13 = vcmp.eq.f32.partialorder %v5483_v0, 8.507059e+37 }
0x2783   : > { %v5397_v33 = vmul.f32 %v6987_v19, %v5396_v44 }
0x2785   : > { %v5398_v34 = vadd.f32 %v6987_v19, %v5397_v33 }
0x2786   : > { %v6989_v20 = vpop.eup %6988 }
0x2787   : > { %v5475_v18 = vmul.f32 %v6989_v20, %v5473_v43  ;;  %v5553_v21 = vpop.xlane.xlu1 %5552  ;;  %vm5480_vm12 = vweird.f32 %v6989_v20  ;;  %v5402_v40 = vsel %vm5401_vm4, %v6987_v19, %v5398_v34 }
0x2788   : > { %6990 = vrcp.f32 %v5553_v21  ;;  %vm5481_vm3 = vmor %vm5479_vm14, %vm5480_vm12  ;;  %v5407_v46 = vsel %vm5404_vm6, %v5406_v7, %v5402_v40  ;;  %v5565_v29 = vand.u32 2147483648, %v5553_v21  ;;  %vm5559_vm8 = vweird.f32 %v5553_v21  ;;  %v6867_v40 = vld [vmem:[#allocation17] ss:$0 sm:$0xff] }
0x2789   : > { %v5476_v24 = vsub.f32 1.0, %v5475_v18  ;;  %v5563_v48 = vand.u32 2147483647, %v5553_v21  ;;  %v5408_v50 = vmul.f32 %v9725_v59, %v5407_v46  ;;  %v2756_v18 = vld [vmem:[%s10096_s12 + $0x18] sm:$0xff]  ;;  %v6868_v46 = vld [vmem:[#allocation16] ss:$0 sm:$0xff] }
0x278a   : > { %v5566_v45 = vor.u32 1.1754944e-38, %v5565_v29 }
0x278b   : > { %v5477_v26 = vmul.f32 %v6989_v20, %v5476_v24  ;;  %vm5564_vm12 = vcmp.eq.f32.partialorder %v5563_v48, 8.507059e+37  ;;  %v2754_v24 = vld [vmem:[%s10096_s12 + $0x8] sm:$0xff] }
0x278c   : > { %v5664_v28 = vpack.c.bf16 %v2754_v24, %v2753_v23  ;;  %v6871_v23 = vld [vmem:[%s10098_s0] ss:$0 sm:$0xff] }
0x278d   : > { %v5478_v63 = vadd.f32 %v6989_v20, %v5477_v26 }
0x278e   : > { %v6991_v30 = vpop.eup %6990 }
0x278f   : > { %v5482_v31 = vsel %vm5481_vm3, %v6989_v20, %v5478_v63  ;;  %v5555_v52 = vmul.f32 %v6991_v30, %v5553_v21  ;;  %vm5560_vm7 = vweird.f32 %v6991_v30 }
0x2790   : > { %v5487_v32 = vsel %vm5484_vm13, %v5486_v12, %v5482_v31  ;;  %vm5561_vm9 = vmor %vm5559_vm8, %vm5560_vm7 }
0x2791   : > { %v5488_v22 = vmul.f32 %v6981_v1, %v5487_v32  ;;  %v5556_v35 = vsub.f32 1.0, %v5555_v52  ;;  %v2791_v1 = vld [vmem:[%s10095_s13 + $0x18] sm:$0xff] }
0x2792   : > { %v5612_v2 = vpack.c.bf16 %v2791_v1, %v2790_v62  ;;  %v6870_v1 = vld [vmem:[#allocation8] ss:$0 sm:$0xff] }
0x2793   : > { %6449 = vmatmul.msk.f32.vlgmr.msrb.gmra.mxu3 %vm2925_vm5, %v5488_v22  ;;  %v5557_v41 = vmul.f32 %v6991_v30, %v5556_v35 }
0x2794   : > { %5625 = vmatpush.bf16.msrb.mxu1 %v5612_v2 }
0x2795   : > { %v5558_v47 = vadd.f32 %v6991_v30, %v5557_v41 }
0x2797   : > { %v5562_v54 = vsel %vm5561_vm9, %v6991_v30, %v5558_v47 }
0x2798   : > { %v5567_v36 = vsel %vm5564_vm12, %v5566_v45, %v5562_v54  ;;  %5626 = vmatpush.bf16.msrb.mxu1 %v5611_v11 }
0x2799   : > { %v5568_v56 = vmul.f32 %v9730_v53, %v5567_v36 }
0x279f   : > { %v5410_v49 = vpop.permute.xlu1 %5409 }
0x27a0   : > { %5430 = vmatpush.msra.mxu2 %v5410_v49 }
0x27a1   : > { %6446 = vmatmul.msk.f32.vlgmr.msra.gmra.mxu2 %vm2925_vm5, %v5408_v50 }
0x27a2   : > { %5590 = vmatpush.msrb.mxu2 %v5570_v51 }
0x27a3   : > { %v5352_v60 = vpop.f32.mrf.mxu3 }
0x27a9   : > { %6452 = vmatmul.msk.f32.vlgmr.msrb.gmra.mxu2 %vm2925_vm5, %v5568_v56  ;;  %v6869_v56 = vld [vmem:[#allocation7] ss:$0 sm:$0xff] }
0x2816   : > { %v5512_v59 = vpop.f32.mrf.mxu3 }
0x2817   : > { %5600 = vrot.lane.b32.xlu1 %v5512_v59, %s10066_s9  ;;  %s2684_s9 = sand.u32 1, %s8078_s15  }
0x2818   : > { %s6357_s18 = sshll.u32 %s2684_s9, 3  ;;  %s5775_s16 = scalar_lea.sflag [#allocation4], %s2684_s9 }
0x2819   : > { %s2686_s1 = scalar_lea.vmem [#allocation55], %s6357_s18 }
0x281a   : > { %s5787_s19 = sshll.u32 %s2686_s1, 4  ;;  %s5788_s19 = int_to_ptr.vmem [resolvable:$true] %s5787_s19 }
0x2824   : > { %v5432_v61 = vpop.f32.mrf.mxu2 }
0x2825   : > { %5596 = vrot.lane.b32.xlu0 %v5432_v61, %s10065_s2  ;;  %s6458_s2 = sshll.u32 %s8612_s22, 3  ;;  %s7972_s22 = scalar_lea.hbm %s8589_s14, 16 }
0x2826   : > { %s5785_s6 = scalar_lea.hbm %s8589_s14, %s6458_s2 }
0x2827   : > { %s5789_s8 = sshll.u32 %s5785_s6, 4  ;;  %s5790_s8 = int_to_ptr.hbm [resolvable:$true] %s5789_s8 }
0x2828   : > { %s7966_s0 = sshra.s32 %s5790_s8, 4  ;;  %s7967_s0 = int_to_ptr.hbm [resolvable:$true] %s7966_s0 }
0x2829   : > { %p7973_p12 = scmp.lt.s32.totalorder %s7967_s0, %s8589_s14 }
0x282c   : > { %v5592_v58 = vpop.f32.mrf.mxu2 }
0x282d   : > { %5604 = vrot.lane.b32.xlu0 %v5592_v58, %s10067_s10  ;;  %s10097_s10 = sld [smem:[#allocation104_spill]] }
0x2833   : > { %v2763_v26 = vld [vmem:[%s10097_s10 + $0x30] sm:$0xff]  ;;  %v2764_v0 = vld [vmem:[%s10097_s10 + $0x38] sm:$0xff]  ;;  %v2761_v44 = vld [vmem:[%s10097_s10 + $0x20] sm:$0xff] }
0x2834   : > { %v5690_v30 = vpack.c.bf16 %v2764_v0, %v2763_v26  ;;  %v2762_v12 = vld [vmem:[%s10097_s10 + $0x28] sm:$0xff]  ;;  %v2759_v49 = vld [vmem:[%s10097_s10 + $0x10] sm:$0xff]  ;;  %v2760_v50 = vld [vmem:[%s10097_s10 + $0x18] sm:$0xff] }
0x2835   : > { %v5689_v32 = vpack.c.bf16 %v2762_v12, %v2761_v44  ;;  %v5688_v51 = vpack.c.bf16 %v2760_v50, %v2759_v49  ;;  %v2757_v54 = vld [vmem:[%s10097_s10] sm:$0xff]  ;;  %v2758_v45 = vld [vmem:[%s10097_s10 + $0x8] sm:$0xff] }
0x2836   : > { %5701 = vmatpush.bf16.msra.mxu0 %v5690_v30  ;;  %v5687_v36 = vpack.c.bf16 %v2758_v45, %v2757_v54  ;;  %v6872_v26 = vld [vmem:[%s10099_s7] ss:$0 sm:$0xff]  ;;  %s7968_s7 = scalar_lea.hbm %s7967_s0, 8 }
0x2837   : > { %p7969_p10 = scmp.ne.s32.totalorder %s7967_s0, %s7968_s7  ;;  %p7974_p13 = scmp.lt.s32.totalorder %s7972_s22, %s7968_s7 }
0x2839   : > { %p7970_p8 = pnand %p7969_p10, %p8629_p5  ;;  %p7975_p0 = por %p7974_p13, %p7973_p12 }
0x283a   : > { %5702 = vmatpush.bf16.msra.mxu0 %v5689_v32 }
0x283b   : > { %p7971_p11 = pneg %p7970_p8 }
0x283d   : > { %p7976_p1 = pnand %p7975_p0, %p7971_p11 }
0x283e   : > { %5703 = vmatpush.bf16.msra.mxu0 %v5688_v51 }
0x2842   : > { %5704 = vmatpush.bf16.msra.mxu0 %v5687_v36 }
0x2889   : > { %v5601_v5 = vpop.permute.xlu1 %5600 }
0x2897   : > { %v5597_v53 = vpop.permute.xlu0 %5596 }
0x2898   : > { %v5607_v4 = vsel %vm2925_vm5, %v5352_v60, %v5597_v53 }
0x2899   : > { %v5608_v57 = vsel %vm3256_vm10, %v5607_v4, %v5601_v5 }
0x289f   : > { %v5605_v9 = vpop.permute.xlu0 %5604 }
0x28a0   : > { %v5609_v25 = vsel %vm3258_vm11, %v5608_v57, %v5605_v9 }
0x28a1   : > { %v5610_v10 = vpack.c.bf16 %v5609_v25, %v5609_v25 }
0x28a3   : > { %6453 = vmatmul.msk.bf16.vlgmr.msrb.gmra.mxu1 %vm2862_vm0, %v5610_v10  ;;  %v2857_v10 = vld [vmem:[%s8584_s5 + $0x10] sm:$0xff] }
0x2920   : > { %v5628_v55 = vpop.f32.mrf.mxu1 }
0x2921   : > { %v5629_v13 = vadd.f32 %v6866_v6, %v5628_v55  ;;  %v2858_v6 = vld [vmem:[%s8584_s5 + $0x18] sm:$0xff] }
0x2922   : > { %v5743_v55 = vpack.c.bf16 %v2858_v6, %v2857_v10 }
0x2923   : > { %v9754_v38 = vadd.f32 %v5629_v13, %v9686_v27  ;;  %v2755_v27 = vld [vmem:[%s10096_s12 + $0x10] sm:$0xff]  ;;  %v2855_v13 = vld [vmem:[%s8584_s5] sm:$0xff] }
0x2924   : > { %v5665_v21 = vpack.c.bf16 %v2756_v18, %v2755_v27  ;;  %5756 = vmatpush.bf16.msra.mxu2 %v5743_v55 }
0x2925   : > { %v5633_v14 = vsel %vm2862_vm0, %v9754_v38, 0.0 }
0x2926   : > { %5634 = vadd.xlane.f32.xlu1 %v5633_v14  ;;  %5678 = vmatpush.bf16.msra.mxu3 %v5665_v21  ;;  %v2856_v14 = vld [vmem:[%s8584_s5 + $0x8] sm:$0xff] }
0x2928   : > { %v5630_v15 = vpop.f32.mrf.mxu1 }
0x292a   : > { %5679 = vmatpush.bf16.msra.mxu3 %v5664_v28 }
0x2999   : > { %v5635_v16 = vpop.xlane.xlu1 %5634 }
0x299a   : > { %v5636_v17 = vmul.f32 %v5635_v16, %v9101_v8 }
0x299c   : > { %v5637_v43 = vsub.f32 %v9754_v38, %v5636_v17 }
0x299e   : > { %v5638_v19 = vmul.f32 %v5637_v43, %v5637_v43 }
0x29a0   : > { %v5639_v20 = vsel %vm2862_vm0, %v5638_v19, 0.0 }
0x29a1   : > { %5640 = vadd.xlane.f32.xlu2 %v5639_v20 }
0x2a14   : > { %v5641_v63 = vpop.xlane.xlu2 %5640 }
0x2a15   : > { %v5642_v31 = vmul.f32 %v5641_v63, %v9101_v8 }
0x2a17   : > { %v5643_v33 = vadd.f32 1e-05, %v5642_v31 }
0x2a19   : > { %6992 = vrsqrt.f32 %v5643_v33  ;;  %vm5650_vm10 = vweird.f32 %v5643_v33 }
0x2a1f   : > { %v6993_v52 = vpop.eup %6992 }
0x2a20   : > { %v5645_v22 = vmul.f32 %v6993_v52, %v5643_v33  ;;  %vm5651_vm5 = vweird.f32 %v6993_v52 }
0x2a21   : > { %vm5652_vm11 = vmor %vm5650_vm10, %vm5651_vm5 }
0x2a22   : > { %v5646_v34 = vmul.f32 %v6993_v52, %v5645_v22 }
0x2a24   : > { %v5647_v35 = vmul.f32 0.5, %v5646_v34 }
0x2a26   : > { %v5648_v37 = vsub.f32 1.5, %v5647_v35 }
0x2a28   : > { %v5649_v39 = vmul.f32 %v6993_v52, %v5648_v37 }
0x2a2a   : > { %v5653_v41 = vsel %vm5652_vm11, %v6993_v52, %v5649_v39 }
0x2a2b   : > { %v5654_v7 = vmul.f32 %v5653_v41, %v5637_v43 }
0x2a2d   : > { %v5658_v47 = vmul.f32 %v6867_v40, %v5654_v7 }
0x2a2f   : > { %v5662_v29 = vadd.f32 %v6868_v46, %v5658_v47 }
0x2a31   : > { %v5663_v48 = vpack.c.bf16 %v5662_v29, %v5662_v29 }
0x2a33   : > { %6454 = vmatmul.msk.bf16.vlgmr.msra.gmra.mxu3 %vm2862_vm0, %v5663_v48 }
0x2ab6   : > { %v5681_v60 = vpop.f32.mrf.mxu3 }
0x2ab7   : > { %v5682_v59 = vadd.f32 %v6869_v56, %v5681_v60 }
0x2ab9   : > { %v5685_v61 = vmax.f32 %v5682_v59, 0.0 }
0x2abb   : > { %v5686_v58 = vpack.c.bf16 %v5685_v61, %v5685_v61 }
0x2abd   : > { %6455 = vmatmul.msk.bf16.vlgmr.msra.gmra.mxu0 %vm3344_vm15, %v5686_v58 }
0x2abe   : > { %v5683_v62 = vpop.f32.mrf.mxu3 }
0x2b3a   : > { %v5706_v2 = vpop.f32.mrf.mxu0 }
0x2b3b   : > { %v5707_v42 = vadd.f32 %v6870_v1, %v5706_v2 }
0x2b3d   : > { %v5710_v3 = vadd.f32 %v5707_v42, %v9754_v38  ;;  %v5742_v38 = vpack.c.bf16 %v2856_v14, %v2855_v13 }
0x2b3f   : > { %v5711_v11 = vsel %vm2862_vm0, %v5710_v3, 0.0  ;;  %5757 = vmatpush.bf16.msra.mxu2 %v5742_v38 }
0x2b40   : > { %5712 = vadd.xlane.f32.xlu0 %v5711_v11 }
0x2b42   : > { %v5708_v53 = vpop.f32.mrf.mxu0 }
0x2bb3   : > { %v5713_v4 = vpop.xlane.xlu0 %5712 }
0x2bb4   : > { %v5714_v5 = vmul.f32 %v5713_v4, %v9101_v8 }
0x2bb6   : > { %v5715_v57 = vsub.f32 %v5710_v3, %v5714_v5 }
0x2bb8   : > { %v5716_v9 = vmul.f32 %v5715_v57, %v5715_v57 }
0x2bba   : > { %v5717_v25 = vsel %vm2862_vm0, %v5716_v9, 0.0 }
0x2bbb   : > { %5718 = vadd.xlane.f32.xlu1 %v5717_v25 }
0x2c2e   : > { %v5719_v15 = vpop.xlane.xlu1 %5718 }
0x2c2f   : > { %v5720_v16 = vmul.f32 %v5719_v15, %v9101_v8  ;;  %v6873_v8 = vld [vmem:[#allocation53] ss:$0 sm:$0xff] }
0x2c31   : > { %v5721_v17 = vadd.f32 1e-05, %v5720_v16 }
0x2c33   : > { %6994 = vrsqrt.f32 %v5721_v17  ;;  %vm5728_vm14 = vweird.f32 %v5721_v17 }
0x2c39   : > { %v6995_v43 = vpop.eup %6994 }
0x2c3a   : > { %v5723_v19 = vmul.f32 %v6995_v43, %v5721_v17  ;;  %vm5729_vm15 = vweird.f32 %v6995_v43 }
0x2c3b   : > { %vm5730_vm3 = vmor %vm5728_vm14, %vm5729_vm15 }
0x2c3c   : > { %v5724_v20 = vmul.f32 %v6995_v43, %v5723_v19 }
0x2c3e   : > { %v5725_v27 = vmul.f32 0.5, %v5724_v20 }
0x2c40   : > { %v5726_v18 = vsub.f32 1.5, %v5725_v27 }
0x2c42   : > { %v5727_v21 = vmul.f32 %v6995_v43, %v5726_v18 }
0x2c44   : > { %v5731_v24 = vsel %vm5730_vm3, %v6995_v43, %v5727_v21 }
0x2c45   : > { %v5732_v28 = vmul.f32 %v5731_v24, %v5715_v57 }
0x2c47   : > { %v5736_v0 = vmul.f32 %v6871_v23, %v5732_v28 }
0x2c49   : > { %v5740_v44 = vadd.f32 %v6872_v26, %v5736_v0 }
0x2c4b   : > { %v5741_v63 = vpack.c.bf16 %v5740_v44, %v5740_v44 }
0x2c4d   : > { %6456 = vmatmul.msk.bf16.vlgmr.msra.gmra.mxu2 %vm2862_vm0, %v5741_v63 }
0x2cd0   : > { %v5759_v30 = vpop.f32.mrf.mxu2 }
0x2cd1   : > { %v5760_v12 = vadd.f32 %v6873_v8, %v5759_v30 }
0x2cd3   : > { %5763 = vmax.xlane.f32.xlu2 %v5760_v12 }
0x2cd8   : > { %v5761_v31 = vpop.f32.mrf.mxu2 }
0x2d46   : > { %v5764_v32 = vpop.xlane.xlu2 %5763 }
0x2d47   : > { %v5765_v33 = vsub.f32 %v5760_v12, %v5764_v32 }
0x2d49   : > { %v5766_v52 = vmul.f32 1.442695, %v5765_v33 }
0x2d4b   : > { %6996 = vpow2.f32 %v5766_v52 }
0x2d51   : > { %v6997_v22 = vpop.eup %6996 }
0x2d52   : > { %5768 = vadd.xlane.f32.xlu0 %v6997_v22 }
0x2dc5   : > { %v5769_v34 = vpop.xlane.xlu0 %5768 }
0x2dc6   : > { %6998 = vlog2.f32 %v5769_v34 }
0x2dcc   : > { %v6999_v35 = vpop.eup %6998 }
0x2dcd   : > { %v5771_v37 = vmul.f32 0.6931472, %v6999_v35 }
0x2dcf   : > { %v5772_v39 = vsub.f32 %v5765_v33, %v5771_v37 }
0x2dd1   : > { %5773 = vst [vmem:[%s2686_s1] sm:$0xff] %v5772_v39 }
0x2dd2   : > { %7979 = shalt.err (!%p7976_p1)
}
0x2dd3   : > { %6597 = dma.vmem_to_hbm [thread:$0]  (%p8629_p5), %s5788_s19, 128, %s5790_s8, %s5775_s16  }
0x2dd4 PF: > { %s10101_s18 = sld [smem:[#allocation145_spill]] }
0x2dd5   : > { %s10102_s2 = sld [smem:[#allocation143_spill]] }
0x2dda   : > { %p6671_p2 = scmp.ge.s32.totalorder %s10101_s18, 2 }
0x2ddb   : > { %s5801_s6 = sand.u32 1, %s10102_s2  }
0x2ddc   : > { %p6600_p3 = pnand %p6671_p2, %p8633_p6  ;;  %s5802_s1 = scalar_lea.sflag [#allocation4], %s5801_s6 }
0x2dde   : > { %p6601_p4 = pneg %p6600_p3 }
0x2de0   : > { %8069 = dma.done.wait (%p6601_p4), %s5802_s1, 128  }
0x2de1   : > { %8071 = vsyncadd (%p6601_p4), %s5802_s1, 4294967168  ;;  %s10104_s18 = sld [smem:[#allocation146_spill]]  ;;  %s10107_s0 = smov %s8078_s15 }
0x2de2   : > { %s10105_s7 = sld [smem:[#allocation144_spill]] }
0x2de3   : > { %s10106_s16 = sld [smem:[#allocation147_spill]] }
0x2de7   : > { %p177_p7 = scmp.ge.s32.totalorder %s10104_s18, 4  }
0x2de8   : > { %s10108_s15 = smov %s10105_s7 }
0x2de9   :  { %179 = sbr.rel (!%p177_p7) target bundleno = 167 (0xa7), region = 571 }
0x2dee   :  { %5808 = vsyncpa [#allocation3], 1 }
0x2def   :  { %5810 = vsyncpa [#allocation3 + $0x1], 1 }
0x2df0   :  { %5811 = vsyncpa [#allocation6], 1 }
0x2df1   :  { %5812 = vsyncpa [#allocation9], 1 }
0x2df2   :  { %5813 = vsyncpa [#allocation12], 1 }
0x2df3   :  { %5814 = vsyncpa [#allocation15], 1 }
0x2df4   :  { %5815 = vsyncpa [#allocation18], 1 }
0x2df5   :  { %5816 = vsyncpa [#allocation21], 1 }
0x2df6   :  { %5817 = vsyncpa [#allocation24], 1 }
0x2df7   :  { %5818 = vsyncpa [#allocation27], 1 }
0x2df8   :  { %5819 = vsyncpa [#allocation30], 1 }
0x2df9   :  { %5820 = vsyncpa [#allocation33], 1 }
0x2dfa   :  { %5821 = vsyncpa [#allocation36], 1 }
0x2dfb   :  { %5822 = vsyncpa [#allocation39], 1 }
0x2dfc   :  { %5823 = vsyncpa [#allocation42], 1 }
0x2dfd   :  { %5824 = vsyncpa [#allocation45], 1 }
0x2dfe   :  { %5825 = vsyncpa [#allocation48], 1 }
0x2dff   :  { %5826 = vsyncpa [#allocation51], 1 }
0x2e00   :  { %5827 = vsyncpa [#allocation54], 1 }
0x2e01   :  { %5828 = vsyncpa [#allocation4], 1 }
0x2e02   :  { %5830 = vsyncpa [#allocation4 + $0x1], 1 }

</bundles_post_ra>
